<compile_context>
chip_gen: v5e
topology: v5e:2x2
jax: 0.10.0
libtpu: 0.0.40
codegen_flags: <defaults>
</compile_context>

<pallas_src>
import functools
import math

import jax
import jax.numpy as jnp
import numpy as np
from jax.experimental import pallas as pl
from jax.experimental.pallas import tpu as pltpu


def _pos_embed_kernel(nm_ref, tri_rows_ref, triw_ref, inv_ref, phase_ref,
                      out_ref, y_row_scr, x_row_scr, *,
                      normalize, eps, num_pos_feats, block_h):
    # nm_ref:       (1, H, W)         f32  not_mask (1.0 valid, 0.0 masked), full image
    # tri_rows_ref: (block_h, H)      f32  rows [t*th, (t+1)*th) of lower-tri ones
    # triw_ref:     (W, W)            f32  upper-tri ones: triw[k, w] = 1 if k <= w
    # inv_ref:      (F, 1)            f32  scale_fold / dim_t[c]
    # phase_ref:    (F, 1)            f32  0 for even c, pi/2 for odd c (cos == sin(x+pi/2))
    # out_ref:      (1, 2F, th*W)     NCHW output, spatial flattened h-major
    # y_row_scr / x_row_scr: (1, th*W) f32 VMEM scratch rows
    F = num_pos_feats
    th = block_h

    nm = nm_ref[0]                                  # (H, W)
    H, W = nm.shape

    if th == H:
        nm_t = nm                                   # this tile covers all rows
    else:
        t = pl.program_id(1)
        start = pl.multiple_of(t * th, 8)
        nm_t = nm_ref[0, pl.ds(start, th), :]       # (th, W) rows of this tile

    # Cumulative sums on the MXU (0/1 operands, f32 accumulation -> exact counts).
    #   y_embed[r, w] = sum_{h' <= global_row(r)} nm[h', w]
    #   x_embed[r, w] = sum_{w' <= w} nm_t[r, w']
    y_embed = jnp.dot(tri_rows_ref[...], nm, preferred_element_type=jnp.float32)
    x_embed = jnp.dot(nm_t, triw_ref[...], preferred_element_type=jnp.float32)

    if normalize:
        # Reciprocal of the small normalizer vectors, then multiply (no hot-path divide).
        inv_y = 1.0 / (jnp.sum(nm, axis=0, keepdims=True) + eps)      # (1, W)
        inv_x = 1.0 / (jnp.sum(nm_t, axis=1, keepdims=True) + eps)    # (th, 1)
        y_embed = y_embed * inv_y                    # `scale` is folded into inv_ref
        x_embed = x_embed * inv_x

    # Tiny relayout: (th, W) sublane/lane -> (1, th*W) all-lanes, h-major order.
    # th masked row stores per array; everything downstream is fully lane-dense.
    for h in range(th):
        y_row_scr[0:1, pl.ds(h * W, W)] = y_embed[h:h + 1, :]
        x_row_scr[0:1, pl.ds(h * W, W)] = x_embed[h:h + 1, :]

    y_row = y_row_scr[...]                           # (1, th*W)
    x_row = x_row_scr[...]                           # (1, th*W)

    inv_c = inv_ref[...]                             # (F, 1)
    ph_c = phase_ref[...]                            # (F, 1)

    # args[c, p] = e[p] * (scale/dim_t[c]) + phase[c]; one sin per output element.
    # Channels [0, F) are pos_y, [F, 2F) are pos_x.  Both stores are dense
    # (F sublanes x th*W lanes), no masked vst on the hot path.
    out_ref[0, 0:F, :] = jnp.sin(y_row * inv_c + ph_c).astype(out_ref.dtype)
    out_ref[0, F:2 * F, :] = jnp.sin(x_row * inv_c + ph_c).astype(out_ref.dtype)


def _pick_block_h(H, W, F2, B, itemsize=4, target_bytes=6 << 20, max_rows=128):
    """Pick block_h (th): divides H, keeps the (2F, th*W) output block tileable
    ((th*W) % 128 == 0 unless th == H), stays under ~target_bytes, and leaves
    >= 2 parallel grid units when possible (v7x has 2 TensorCores)."""
    row_bytes = F2 * W * itemsize

    def valid(th):
        return H % th == 0 and (th == H or (th % 8 == 0 and (th * W) % 128 == 0))

    cands = sorted({th for th in list(range(8, H, 8)) + [H] if valid(th)})
    good = [th for th in cands if th * row_bytes <= target_bytes and th <= max_rows]
    th = max(good) if good else min(cands)
    if B * (H // th) < 2:                      # make sure both TensorCores get work
        smaller = [c for c in cands if c < th]
        if smaller:
            th = max(smaller)
    return th


def position_embedding_sine(mask, num_pos_feats=64, temperature=10000,
                            normalize=False, scale=None, block_h=None,
                            out_dtype=jnp.float32):
    """mask: (B, H, W) bool (True = padded). Returns (B, 2*num_pos_feats, H, W)."""
    if scale is not None and normalize is False:
        raise ValueError("normalize should be True if scale is passed")
    if scale is None:
        scale = 2 * math.pi
    assert num_pos_feats % 2 == 0, "kernel assumes even num_pos_feats"

    B, H, W = mask.shape
    F = num_pos_feats
    F2 = 2 * F

    not_mask = (~mask).astype(jnp.float32)

    # Static per-feature constants: dim_t[c] = temperature ** (2*(c//2)/F);
    # fold the `normalize` scale into the reciprocal; phase turns cos into sin.
    idx = np.arange(F, dtype=np.float64)
    dim_t = float(temperature) ** (2.0 * np.floor(idx / 2.0) / float(F))
    scale_fold = float(scale) if normalize else 1.0
    inv_col = jnp.asarray((scale_fold / dim_t).astype(np.float32).reshape(F, 1))
    phase_col = jnp.asarray(
        np.where((np.arange(F) % 2) == 0, 0.0, np.pi / 2.0).astype(np.float32).reshape(F, 1))

    # Triangular 0/1 matrices for cumsum-as-MXU-matmul (hoisted out of the kernel).
    tri_h = jnp.asarray(np.tril(np.ones((H, H), np.float32)))   # tri_h[i, k] = k <= i
    tri_w = jnp.asarray(np.triu(np.ones((W, W), np.float32)))   # tri_w[k, w] = k <= w

    th = block_h if block_h is not None else _pick_block_h(H, W, F2, B)
    assert H % th == 0, "block_h must divide H"
    if th != H:
        assert th % 8 == 0 and (th * W) % 128 == 0, \
            "tiled block_h needs th % 8 == 0 and (th * W) % 128 == 0"
    n_h = H // th

    out_block_bytes = F2 * th * W * 4
    vmem_est = (2 * out_block_bytes            # double-buffered output block
                + 2 * H * W * 4                # not_mask block
                + 2 * th * H * 4               # tri_h block
                + 2 * W * W * 4                # tri_w
                + 2 * 8 * th * W * 4           # row scratches (sublane padded)
                + 4 * F * th * W * 4)          # live f32 intermediates
    vmem_limit = int(min(48 << 20, max(32 << 20, 2 * vmem_est)))

    cost = pl.CostEstimate(
        flops=int(B * (2 * H * H * W + 2 * H * W * W + 4 * F2 * H * W)),
        transcendentals=int(B * F2 * H * W),
        bytes_accessed=int(4 * (B * F2 * H * W + B * H * W + H * H + W * W + 2 * F)),
    )

    kernel = functools.partial(
        _pos_embed_kernel, normalize=normalize, eps=1e-6,
        num_pos_feats=F, block_h=th)

    out_flat = pl.pallas_call(
        kernel,
        out_shape=jax.ShapeDtypeStruct((B, F2, H * W), out_dtype),
        grid=(B, n_h),
        in_specs=[
            pl.BlockSpec((1, H, W), lambda b, t: (b, 0, 0)),    # full not_mask per batch
            pl.BlockSpec((th, H), lambda b, t: (t, 0)),         # rows of lower-tri ones
            pl.BlockSpec((W, W), lambda b, t: (0, 0)),          # upper-tri ones (resident)
            pl.BlockSpec((F, 1), lambda b, t: (0, 0)),          # scale/dim_t column (resident)
            pl.BlockSpec((F, 1), lambda b, t: (0, 0)),          # phase column (resident)
        ],
        out_specs=pl.BlockSpec((1, F2, th * W), lambda b, t: (b, 0, t)),
        scratch_shapes=[pltpu.VMEM((1, th * W), jnp.float32),
                        pltpu.VMEM((1, th * W), jnp.float32)],
        compiler_params=pltpu.CompilerParams(
            dimension_semantics=("parallel", "parallel"),
            vmem_limit_bytes=vmem_limit),
        cost_estimate=cost,
    )(not_mask, tri_h, tri_w, inv_col, phase_col)

    # Free metadata-only reshape back to NCHW.
    return out_flat.reshape(B, F2, H, W)


def _reference(mask, num_pos_feats=64, temperature=10000, normalize=False, scale=None):
    """Pure-JAX port of the PyTorch forward, for correctness checking."""
    if scale is None:
        scale = 2 * math.pi
    not_mask = (~mask).astype(jnp.float32)
    y_embed = jnp.cumsum(not_mask, axis=1)
    x_embed = jnp.cumsum(not_mask, axis=2)
    if normalize:
        eps = 1e-6
        y_embed = y_embed / (y_embed[:, -1:, :] + eps) * scale
        x_embed = x_embed / (x_embed[:, :, -1:] + eps) * scale
    dim_t = jnp.arange(num_pos_feats, dtype=jnp.float32)
    dim_t = temperature ** (2 * jnp.floor(dim_t / 2) / num_pos_feats)
    pos_x = x_embed[:, :, :, None] / dim_t
    pos_y = y_embed[:, :, :, None] / dim_t
    B, H, W, _ = pos_x.shape
    pos_x = jnp.stack((jnp.sin(pos_x[..., 0::2]), jnp.cos(pos_x[..., 1::2])),
                      axis=4).reshape(B, H, W, -1)
    pos_y = jnp.stack((jnp.sin(pos_y[..., 0::2]), jnp.cos(pos_y[..., 1::2])),
                      axis=4).reshape(B, H, W, -1)
    pos = jnp.concatenate((pos_y, pos_x), axis=3).transpose(0, 3, 1, 2)
    return pos


if __name__ == "__main__":
    key = jax.random.PRNGKey(0)
    B, C, H, W = 2, 4, 16, 16

    # x is only carried for shape/device in the PyTorch module; the mask drives everything.
    kx, kh, kw = jax.random.split(key, 3)
    x = jax.random.normal(kx, (B, C, H, W), dtype=jnp.float32)

    # Deterministic padding-style mask: True = padded.
    h_valid = jax.random.randint(kh, (B,), 8, H + 1)
    w_valid = jax.random.randint(kw, (B,), 8, W + 1)
    hh = jnp.arange(H)[None, :, None]
    ww = jnp.arange(W)[None, None, :]
    mask = (hh >= h_valid[:, None, None]) | (ww >= w_valid[:, None, None])  # (B, H, W) bool

    # normalize=False (module default)
    pos = jax.block_until_ready(position_embedding_sine(mask, num_pos_feats=64))
    ref = _reference(mask, num_pos_feats=64)
    np.testing.assert_allclose(np.asarray(pos), np.asarray(ref), atol=1e-5, rtol=1e-5)

    # normalize=True path
    pos_n = jax.block_until_ready(
        position_embedding_sine(mask, num_pos_feats=64, normalize=True))
    ref_n = _reference(mask, num_pos_feats=64, normalize=True)
    np.testing.assert_allclose(np.asarray(pos_n), np.asarray(ref_n), atol=1e-5, rtol=1e-5)

    # Exercise the H-tiled path (grid = (B, 2), block_h = 8, out block lanes = 128).
    pos_t = jax.block_until_ready(
        position_embedding_sine(mask, num_pos_feats=64, normalize=True, block_h=8))
    np.testing.assert_allclose(np.asarray(pos_t), np.asarray(ref_n), atol=1e-5, rtol=1e-5)

    assert pos.shape == (B, 128, H, W) and pos.dtype == jnp.float32
    print("KERNEL_OK")
</pallas_src>

<mosaic_0001>
module attributes {stable_mosaic.version = 11 : i64} {
  func.func @_pos_embed_kernel(%arg0: i32, %arg1: i32, %arg2: memref<1x16x16xf32, #tpu.memory_space<vmem>>, %arg3: memref<16x16xf32, #tpu.memory_space<vmem>>, %arg4: memref<16x16xf32, #tpu.memory_space<vmem>>, %arg5: memref<64x1xf32, #tpu.memory_space<vmem>>, %arg6: memref<64x1xf32, #tpu.memory_space<vmem>>, %arg7: memref<1x128x256xf32, #tpu.memory_space<vmem>>, %arg8: memref<1x256xf32, #tpu.memory_space<vmem>>, %arg9: memref<1x256xf32, #tpu.memory_space<vmem>>) attributes {dimension_semantics = [#tpu.dimension_semantics<parallel>, #tpu.dimension_semantics<parallel>], iteration_bounds = array<i64: 2, 1>, scalar_prefetch = 0 : i64, scratch_operands = 2 : i64, tpu.core_type = #tpu.core_type<tc>, window_params = [{transform_indices = @transform_0, window_bounds = array<i64: 1, 16, 16>}, {transform_indices = @transform_1, window_bounds = array<i64: 16, 16>}, {pipeline_mode = #tpu.pipeline_mode<synchronous>, transform_indices = @transform_2, window_bounds = array<i64: 16, 16>}, {pipeline_mode = #tpu.pipeline_mode<synchronous>, transform_indices = @transform_3, window_bounds = array<i64: 64, 1>}, {pipeline_mode = #tpu.pipeline_mode<synchronous>, transform_indices = @transform_4, window_bounds = array<i64: 64, 1>}, {transform_indices = @transform_5, window_bounds = array<i64: 1, 128, 256>}]} {
    %c0 = arith.constant 0 : index
    %c0_0 = arith.constant 0 : index
    %c0_1 = arith.constant 0 : index
    %0 = vector.load %arg2[%c0, %c0_0, %c0_1] : memref<1x16x16xf32, #tpu.memory_space<vmem>>, vector<1x16x16xf32>
    %1 = vector.shape_cast %0 : vector<1x16x16xf32> to vector<16x16xf32>
    %c0_2 = arith.constant 0 : index
    %c0_3 = arith.constant 0 : index
    %2 = vector.load %arg3[%c0_2, %c0_3] : memref<16x16xf32, #tpu.memory_space<vmem>>, vector<16x16xf32>
    %cst = arith.constant dense<0.000000e+00> : vector<16x16xf32>
    %3 = tpu.matmul %2, %1, %cst {dimension_numbers = #tpu.dot_dimension_numbers<[1], [0], [0], [1], [0, 0, 1, 1], [], []>} : vector<16x16xf32>, vector<16x16xf32>, vector<16x16xf32> -> vector<16x16xf32>
    %c0_4 = arith.constant 0 : index
    %c0_5 = arith.constant 0 : index
    %4 = vector.load %arg4[%c0_4, %c0_5] : memref<16x16xf32, #tpu.memory_space<vmem>>, vector<16x16xf32>
    %cst_6 = arith.constant dense<0.000000e+00> : vector<16x16xf32>
    %5 = tpu.matmul %1, %4, %cst_6 {dimension_numbers = #tpu.dot_dimension_numbers<[1], [0], [0], [1], [0, 0, 1, 1], [], []>} : vector<16x16xf32>, vector<16x16xf32>, vector<16x16xf32> -> vector<16x16xf32>
    %6 = vector.extract_strided_slice %3 {offsets = [0, 0], sizes = [1, 16], strides = [1, 1]} : vector<16x16xf32> to vector<1x16xf32>
    %c0_7 = arith.constant 0 : index
    %c0_8 = arith.constant 0 : index
    %7 = vector.load %arg8[%c0_7, %c0_8] : memref<1x256xf32, #tpu.memory_space<vmem>>, vector<1x16xf32>
    tpu.vector_store %arg8[%c0_7, %c0_8], %6 {strides = array<i32>} : memref<1x256xf32, #tpu.memory_space<vmem>>, vector<1x16xf32>,
    %8 = vector.extract_strided_slice %5 {offsets = [0, 0], sizes = [1, 16], strides = [1, 1]} : vector<16x16xf32> to vector<1x16xf32>
    %c0_9 = arith.constant 0 : index
    %c0_10 = arith.constant 0 : index
    %9 = vector.load %arg9[%c0_9, %c0_10] : memref<1x256xf32, #tpu.memory_space<vmem>>, vector<1x16xf32>
    tpu.vector_store %arg9[%c0_9, %c0_10], %8 {strides = array<i32>} : memref<1x256xf32, #tpu.memory_space<vmem>>, vector<1x16xf32>,
    %10 = vector.extract_strided_slice %3 {offsets = [1, 0], sizes = [1, 16], strides = [1, 1]} : vector<16x16xf32> to vector<1x16xf32>
    %c0_11 = arith.constant 0 : index
    %c16 = arith.constant 16 : index
    %11 = vector.load %arg8[%c0_11, %c16] : memref<1x256xf32, #tpu.memory_space<vmem>>, vector<1x16xf32>
    tpu.vector_store %arg8[%c0_11, %c16], %10 {strides = array<i32>} : memref<1x256xf32, #tpu.memory_space<vmem>>, vector<1x16xf32>,
    %12 = vector.extract_strided_slice %5 {offsets = [1, 0], sizes = [1, 16], strides = [1, 1]} : vector<16x16xf32> to vector<1x16xf32>
    %c0_12 = arith.constant 0 : index
    %c16_13 = arith.constant 16 : index
    %13 = vector.load %arg9[%c0_12, %c16_13] : memref<1x256xf32, #tpu.memory_space<vmem>>, vector<1x16xf32>
    tpu.vector_store %arg9[%c0_12, %c16_13], %12 {strides = array<i32>} : memref<1x256xf32, #tpu.memory_space<vmem>>, vector<1x16xf32>,
    %14 = vector.extract_strided_slice %3 {offsets = [2, 0], sizes = [1, 16], strides = [1, 1]} : vector<16x16xf32> to vector<1x16xf32>
    %c0_14 = arith.constant 0 : index
    %c32 = arith.constant 32 : index
    %15 = vector.load %arg8[%c0_14, %c32] : memref<1x256xf32, #tpu.memory_space<vmem>>, vector<1x16xf32>
    tpu.vector_store %arg8[%c0_14, %c32], %14 {strides = array<i32>} : memref<1x256xf32, #tpu.memory_space<vmem>>, vector<1x16xf32>,
    %16 = vector.extract_strided_slice %5 {offsets = [2, 0], sizes = [1, 16], strides = [1, 1]} : vector<16x16xf32> to vector<1x16xf32>
    %c0_15 = arith.constant 0 : index
    %c32_16 = arith.constant 32 : index
    %17 = vector.load %arg9[%c0_15, %c32_16] : memref<1x256xf32, #tpu.memory_space<vmem>>, vector<1x16xf32>
    tpu.vector_store %arg9[%c0_15, %c32_16], %16 {strides = array<i32>} : memref<1x256xf32, #tpu.memory_space<vmem>>, vector<1x16xf32>,
    %18 = vector.extract_strided_slice %3 {offsets = [3, 0], sizes = [1, 16], strides = [1, 1]} : vector<16x16xf32> to vector<1x16xf32>
    %c0_17 = arith.constant 0 : index
    %c48 = arith.constant 48 : index
    %19 = vector.load %arg8[%c0_17, %c48] : memref<1x256xf32, #tpu.memory_space<vmem>>, vector<1x16xf32>
    tpu.vector_store %arg8[%c0_17, %c48], %18 {strides = array<i32>} : memref<1x256xf32, #tpu.memory_space<vmem>>, vector<1x16xf32>,
    %20 = vector.extract_strided_slice %5 {offsets = [3, 0], sizes = [1, 16], strides = [1, 1]} : vector<16x16xf32> to vector<1x16xf32>
    %c0_18 = arith.constant 0 : index
    %c48_19 = arith.constant 48 : index
    %21 = vector.load %arg9[%c0_18, %c48_19] : memref<1x256xf32, #tpu.memory_space<vmem>>, vector<1x16xf32>
    tpu.vector_store %arg9[%c0_18, %c48_19], %20 {strides = array<i32>} : memref<1x256xf32, #tpu.memory_space<vmem>>, vector<1x16xf32>,
    %22 = vector.extract_strided_slice %3 {offsets = [4, 0], sizes = [1, 16], strides = [1, 1]} : vector<16x16xf32> to vector<1x16xf32>
    %c0_20 = arith.constant 0 : index
    %c64 = arith.constant 64 : index
    %23 = vector.load %arg8[%c0_20, %c64] : memref<1x256xf32, #tpu.memory_space<vmem>>, vector<1x16xf32>
    tpu.vector_store %arg8[%c0_20, %c64], %22 {strides = array<i32>} : memref<1x256xf32, #tpu.memory_space<vmem>>, vector<1x16xf32>,
    %24 = vector.extract_strided_slice %5 {offsets = [4, 0], sizes = [1, 16], strides = [1, 1]} : vector<16x16xf32> to vector<1x16xf32>
    %c0_21 = arith.constant 0 : index
    %c64_22 = arith.constant 64 : index
    %25 = vector.load %arg9[%c0_21, %c64_22] : memref<1x256xf32, #tpu.memory_space<vmem>>, vector<1x16xf32>
    tpu.vector_store %arg9[%c0_21, %c64_22], %24 {strides = array<i32>} : memref<1x256xf32, #tpu.memory_space<vmem>>, vector<1x16xf32>,
    %26 = vector.extract_strided_slice %3 {offsets = [5, 0], sizes = [1, 16], strides = [1, 1]} : vector<16x16xf32> to vector<1x16xf32>
    %c0_23 = arith.constant 0 : index
    %c80 = arith.constant 80 : index
    %27 = vector.load %arg8[%c0_23, %c80] : memref<1x256xf32, #tpu.memory_space<vmem>>, vector<1x16xf32>
    tpu.vector_store %arg8[%c0_23, %c80], %26 {strides = array<i32>} : memref<1x256xf32, #tpu.memory_space<vmem>>, vector<1x16xf32>,
    %28 = vector.extract_strided_slice %5 {offsets = [5, 0], sizes = [1, 16], strides = [1, 1]} : vector<16x16xf32> to vector<1x16xf32>
    %c0_24 = arith.constant 0 : index
    %c80_25 = arith.constant 80 : index
    %29 = vector.load %arg9[%c0_24, %c80_25] : memref<1x256xf32, #tpu.memory_space<vmem>>, vector<1x16xf32>
    tpu.vector_store %arg9[%c0_24, %c80_25], %28 {strides = array<i32>} : memref<1x256xf32, #tpu.memory_space<vmem>>, vector<1x16xf32>,
    %30 = vector.extract_strided_slice %3 {offsets = [6, 0], sizes = [1, 16], strides = [1, 1]} : vector<16x16xf32> to vector<1x16xf32>
    %c0_26 = arith.constant 0 : index
    %c96 = arith.constant 96 : index
    %31 = vector.load %arg8[%c0_26, %c96] : memref<1x256xf32, #tpu.memory_space<vmem>>, vector<1x16xf32>
    tpu.vector_store %arg8[%c0_26, %c96], %30 {strides = array<i32>} : memref<1x256xf32, #tpu.memory_space<vmem>>, vector<1x16xf32>,
    %32 = vector.extract_strided_slice %5 {offsets = [6, 0], sizes = [1, 16], strides = [1, 1]} : vector<16x16xf32> to vector<1x16xf32>
    %c0_27 = arith.constant 0 : index
    %c96_28 = arith.constant 96 : index
    %33 = vector.load %arg9[%c0_27, %c96_28] : memref<1x256xf32, #tpu.memory_space<vmem>>, vector<1x16xf32>
    tpu.vector_store %arg9[%c0_27, %c96_28], %32 {strides = array<i32>} : memref<1x256xf32, #tpu.memory_space<vmem>>, vector<1x16xf32>,
    %34 = vector.extract_strided_slice %3 {offsets = [7, 0], sizes = [1, 16], strides = [1, 1]} : vector<16x16xf32> to vector<1x16xf32>
    %c0_29 = arith.constant 0 : index
    %c112 = arith.constant 112 : index
    %35 = vector.load %arg8[%c0_29, %c112] : memref<1x256xf32, #tpu.memory_space<vmem>>, vector<1x16xf32>
    tpu.vector_store %arg8[%c0_29, %c112], %34 {strides = array<i32>} : memref<1x256xf32, #tpu.memory_space<vmem>>, vector<1x16xf32>,
    %36 = vector.extract_strided_slice %5 {offsets = [7, 0], sizes = [1, 16], strides = [1, 1]} : vector<16x16xf32> to vector<1x16xf32>
    %c0_30 = arith.constant 0 : index
    %c112_31 = arith.constant 112 : index
    %37 = vector.load %arg9[%c0_30, %c112_31] : memref<1x256xf32, #tpu.memory_space<vmem>>, vector<1x16xf32>
    tpu.vector_store %arg9[%c0_30, %c112_31], %36 {strides = array<i32>} : memref<1x256xf32, #tpu.memory_space<vmem>>, vector<1x16xf32>,
    %38 = vector.extract_strided_slice %3 {offsets = [8, 0], sizes = [1, 16], strides = [1, 1]} : vector<16x16xf32> to vector<1x16xf32>
    %c0_32 = arith.constant 0 : index
    %c128 = arith.constant 128 : index
    %39 = vector.load %arg8[%c0_32, %c128] : memref<1x256xf32, #tpu.memory_space<vmem>>, vector<1x16xf32>
    tpu.vector_store %arg8[%c0_32, %c128], %38 {strides = array<i32>} : memref<1x256xf32, #tpu.memory_space<vmem>>, vector<1x16xf32>,
    %40 = vector.extract_strided_slice %5 {offsets = [8, 0], sizes = [1, 16], strides = [1, 1]} : vector<16x16xf32> to vector<1x16xf32>
    %c0_33 = arith.constant 0 : index
    %c128_34 = arith.constant 128 : index
    %41 = vector.load %arg9[%c0_33, %c128_34] : memref<1x256xf32, #tpu.memory_space<vmem>>, vector<1x16xf32>
    tpu.vector_store %arg9[%c0_33, %c128_34], %40 {strides = array<i32>} : memref<1x256xf32, #tpu.memory_space<vmem>>, vector<1x16xf32>,
    %42 = vector.extract_strided_slice %3 {offsets = [9, 0], sizes = [1, 16], strides = [1, 1]} : vector<16x16xf32> to vector<1x16xf32>
    %c0_35 = arith.constant 0 : index
    %c144 = arith.constant 144 : index
    %43 = vector.load %arg8[%c0_35, %c144] : memref<1x256xf32, #tpu.memory_space<vmem>>, vector<1x16xf32>
    tpu.vector_store %arg8[%c0_35, %c144], %42 {strides = array<i32>} : memref<1x256xf32, #tpu.memory_space<vmem>>, vector<1x16xf32>,
    %44 = vector.extract_strided_slice %5 {offsets = [9, 0], sizes = [1, 16], strides = [1, 1]} : vector<16x16xf32> to vector<1x16xf32>
    %c0_36 = arith.constant 0 : index
    %c144_37 = arith.constant 144 : index
    %45 = vector.load %arg9[%c0_36, %c144_37] : memref<1x256xf32, #tpu.memory_space<vmem>>, vector<1x16xf32>
    tpu.vector_store %arg9[%c0_36, %c144_37], %44 {strides = array<i32>} : memref<1x256xf32, #tpu.memory_space<vmem>>, vector<1x16xf32>,
    %46 = vector.extract_strided_slice %3 {offsets = [10, 0], sizes = [1, 16], strides = [1, 1]} : vector<16x16xf32> to vector<1x16xf32>
    %c0_38 = arith.constant 0 : index
    %c160 = arith.constant 160 : index
    %47 = vector.load %arg8[%c0_38, %c160] : memref<1x256xf32, #tpu.memory_space<vmem>>, vector<1x16xf32>
    tpu.vector_store %arg8[%c0_38, %c160], %46 {strides = array<i32>} : memref<1x256xf32, #tpu.memory_space<vmem>>, vector<1x16xf32>,
    %48 = vector.extract_strided_slice %5 {offsets = [10, 0], sizes = [1, 16], strides = [1, 1]} : vector<16x16xf32> to vector<1x16xf32>
    %c0_39 = arith.constant 0 : index
    %c160_40 = arith.constant 160 : index
    %49 = vector.load %arg9[%c0_39, %c160_40] : memref<1x256xf32, #tpu.memory_space<vmem>>, vector<1x16xf32>
    tpu.vector_store %arg9[%c0_39, %c160_40], %48 {strides = array<i32>} : memref<1x256xf32, #tpu.memory_space<vmem>>, vector<1x16xf32>,
    %50 = vector.extract_strided_slice %3 {offsets = [11, 0], sizes = [1, 16], strides = [1, 1]} : vector<16x16xf32> to vector<1x16xf32>
    %c0_41 = arith.constant 0 : index
    %c176 = arith.constant 176 : index
    %51 = vector.load %arg8[%c0_41, %c176] : memref<1x256xf32, #tpu.memory_space<vmem>>, vector<1x16xf32>
    tpu.vector_store %arg8[%c0_41, %c176], %50 {strides = array<i32>} : memref<1x256xf32, #tpu.memory_space<vmem>>, vector<1x16xf32>,
    %52 = vector.extract_strided_slice %5 {offsets = [11, 0], sizes = [1, 16], strides = [1, 1]} : vector<16x16xf32> to vector<1x16xf32>
    %c0_42 = arith.constant 0 : index
    %c176_43 = arith.constant 176 : index
    %53 = vector.load %arg9[%c0_42, %c176_43] : memref<1x256xf32, #tpu.memory_space<vmem>>, vector<1x16xf32>
    tpu.vector_store %arg9[%c0_42, %c176_43], %52 {strides = array<i32>} : memref<1x256xf32, #tpu.memory_space<vmem>>, vector<1x16xf32>,
    %54 = vector.extract_strided_slice %3 {offsets = [12, 0], sizes = [1, 16], strides = [1, 1]} : vector<16x16xf32> to vector<1x16xf32>
    %c0_44 = arith.constant 0 : index
    %c192 = arith.constant 192 : index
    %55 = vector.load %arg8[%c0_44, %c192] : memref<1x256xf32, #tpu.memory_space<vmem>>, vector<1x16xf32>
    tpu.vector_store %arg8[%c0_44, %c192], %54 {strides = array<i32>} : memref<1x256xf32, #tpu.memory_space<vmem>>, vector<1x16xf32>,
    %56 = vector.extract_strided_slice %5 {offsets = [12, 0], sizes = [1, 16], strides = [1, 1]} : vector<16x16xf32> to vector<1x16xf32>
    %c0_45 = arith.constant 0 : index
    %c192_46 = arith.constant 192 : index
    %57 = vector.load %arg9[%c0_45, %c192_46] : memref<1x256xf32, #tpu.memory_space<vmem>>, vector<1x16xf32>
    tpu.vector_store %arg9[%c0_45, %c192_46], %56 {strides = array<i32>} : memref<1x256xf32, #tpu.memory_space<vmem>>, vector<1x16xf32>,
    %58 = vector.extract_strided_slice %3 {offsets = [13, 0], sizes = [1, 16], strides = [1, 1]} : vector<16x16xf32> to vector<1x16xf32>
    %c0_47 = arith.constant 0 : index
    %c208 = arith.constant 208 : index
    %59 = vector.load %arg8[%c0_47, %c208] : memref<1x256xf32, #tpu.memory_space<vmem>>, vector<1x16xf32>
    tpu.vector_store %arg8[%c0_47, %c208], %58 {strides = array<i32>} : memref<1x256xf32, #tpu.memory_space<vmem>>, vector<1x16xf32>,
    %60 = vector.extract_strided_slice %5 {offsets = [13, 0], sizes = [1, 16], strides = [1, 1]} : vector<16x16xf32> to vector<1x16xf32>
    %c0_48 = arith.constant 0 : index
    %c208_49 = arith.constant 208 : index
    %61 = vector.load %arg9[%c0_48, %c208_49] : memref<1x256xf32, #tpu.memory_space<vmem>>, vector<1x16xf32>
    tpu.vector_store %arg9[%c0_48, %c208_49], %60 {strides = array<i32>} : memref<1x256xf32, #tpu.memory_space<vmem>>, vector<1x16xf32>,
    %62 = vector.extract_strided_slice %3 {offsets = [14, 0], sizes = [1, 16], strides = [1, 1]} : vector<16x16xf32> to vector<1x16xf32>
    %c0_50 = arith.constant 0 : index
    %c224 = arith.constant 224 : index
    %63 = vector.load %arg8[%c0_50, %c224] : memref<1x256xf32, #tpu.memory_space<vmem>>, vector<1x16xf32>
    tpu.vector_store %arg8[%c0_50, %c224], %62 {strides = array<i32>} : memref<1x256xf32, #tpu.memory_space<vmem>>, vector<1x16xf32>,
    %64 = vector.extract_strided_slice %5 {offsets = [14, 0], sizes = [1, 16], strides = [1, 1]} : vector<16x16xf32> to vector<1x16xf32>
    %c0_51 = arith.constant 0 : index
    %c224_52 = arith.constant 224 : index
    %65 = vector.load %arg9[%c0_51, %c224_52] : memref<1x256xf32, #tpu.memory_space<vmem>>, vector<1x16xf32>
    tpu.vector_store %arg9[%c0_51, %c224_52], %64 {strides = array<i32>} : memref<1x256xf32, #tpu.memory_space<vmem>>, vector<1x16xf32>,
    %66 = vector.extract_strided_slice %3 {offsets = [15, 0], sizes = [1, 16], strides = [1, 1]} : vector<16x16xf32> to vector<1x16xf32>
    %c0_53 = arith.constant 0 : index
    %c240 = arith.constant 240 : index
    %67 = vector.load %arg8[%c0_53, %c240] : memref<1x256xf32, #tpu.memory_space<vmem>>, vector<1x16xf32>
    tpu.vector_store %arg8[%c0_53, %c240], %66 {strides = array<i32>} : memref<1x256xf32, #tpu.memory_space<vmem>>, vector<1x16xf32>,
    %68 = vector.extract_strided_slice %5 {offsets = [15, 0], sizes = [1, 16], strides = [1, 1]} : vector<16x16xf32> to vector<1x16xf32>
    %c0_54 = arith.constant 0 : index
    %c240_55 = arith.constant 240 : index
    %69 = vector.load %arg9[%c0_54, %c240_55] : memref<1x256xf32, #tpu.memory_space<vmem>>, vector<1x16xf32>
    tpu.vector_store %arg9[%c0_54, %c240_55], %68 {strides = array<i32>} : memref<1x256xf32, #tpu.memory_space<vmem>>, vector<1x16xf32>,
    %c0_56 = arith.constant 0 : index
    %c0_57 = arith.constant 0 : index
    %70 = vector.load %arg8[%c0_56, %c0_57] : memref<1x256xf32, #tpu.memory_space<vmem>>, vector<1x256xf32>
    %c0_58 = arith.constant 0 : index
    %c0_59 = arith.constant 0 : index
    %71 = vector.load %arg9[%c0_58, %c0_59] : memref<1x256xf32, #tpu.memory_space<vmem>>, vector<1x256xf32>
    %c0_60 = arith.constant 0 : index
    %c0_61 = arith.constant 0 : index
    %72 = vector.load %arg5[%c0_60, %c0_61] : memref<64x1xf32, #tpu.memory_space<vmem>>, vector<64x1xf32>
    %c0_62 = arith.constant 0 : index
    %c0_63 = arith.constant 0 : index
    %73 = vector.load %arg6[%c0_62, %c0_63] : memref<64x1xf32, #tpu.memory_space<vmem>>, vector<64x1xf32>
    %74 = vector.broadcast %70 : vector<1x256xf32> to vector<64x256xf32>
    %75 = vector.broadcast %72 : vector<64x1xf32> to vector<64x256xf32>
    %76 = arith.mulf %74, %75 : vector<64x256xf32>
    %77 = vector.broadcast %73 : vector<64x1xf32> to vector<64x256xf32>
    %78 = arith.addf %76, %77 : vector<64x256xf32>
    %79 = math.sin %78 : vector<64x256xf32>
    %c0_64 = arith.constant 0 : index
    %c0_65 = arith.constant 0 : index
    %c0_66 = arith.constant 0 : index
    %80 = vector.load %arg7[%c0_64, %c0_65, %c0_66] : memref<1x128x256xf32, #tpu.memory_space<vmem>>, vector<1x64x256xf32>
    %81 = vector.shape_cast %80 : vector<1x64x256xf32> to vector<64x256xf32>
    %82 = vector.shape_cast %79 : vector<64x256xf32> to vector<1x64x256xf32>
    tpu.vector_store %arg7[%c0_64, %c0_65, %c0_66], %82 {strides = array<i32>} : memref<1x128x256xf32, #tpu.memory_space<vmem>>, vector<1x64x256xf32>,
    %83 = vector.broadcast %71 : vector<1x256xf32> to vector<64x256xf32>
    %84 = vector.broadcast %72 : vector<64x1xf32> to vector<64x256xf32>
    %85 = arith.mulf %83, %84 : vector<64x256xf32>
    %86 = vector.broadcast %73 : vector<64x1xf32> to vector<64x256xf32>
    %87 = arith.addf %85, %86 : vector<64x256xf32>
    %88 = math.sin %87 : vector<64x256xf32>
    %c0_67 = arith.constant 0 : index
    %c64_68 = arith.constant 64 : index
    %c0_69 = arith.constant 0 : index
    %89 = vector.load %arg7[%c0_67, %c64_68, %c0_69] : memref<1x128x256xf32, #tpu.memory_space<vmem>>, vector<1x64x256xf32>
    %90 = vector.shape_cast %89 : vector<1x64x256xf32> to vector<64x256xf32>
    %91 = vector.shape_cast %88 : vector<64x256xf32> to vector<1x64x256xf32>
    tpu.vector_store %arg7[%c0_67, %c64_68, %c0_69], %91 {strides = array<i32>} : memref<1x128x256xf32, #tpu.memory_space<vmem>>, vector<1x64x256xf32>,
    return
  }
  func.func @transform_0(%arg0: i32, %arg1: i32) -> (i32, i32, i32) {
    %c0_i32 = arith.constant 0 : i32
    %c0_i32_0 = arith.constant 0 : i32
    %c0_i32_1 = arith.constant 0 : i32
    return %arg0, %c0_i32, %c0_i32_0 : i32, i32, i32
  }
  func.func @transform_1(%arg0: i32, %arg1: i32) -> (i32, i32) {
    %c0_i32 = arith.constant 0 : i32
    %c0_i32_0 = arith.constant 0 : i32
    return %arg1, %c0_i32 : i32, i32
  }
  func.func @transform_2(%arg0: i32, %arg1: i32) -> (i32, i32) {
    %c0_i32 = arith.constant 0 : i32
    %c0_i32_0 = arith.constant 0 : i32
    %c0_i32_1 = arith.constant 0 : i32
    return %c0_i32, %c0_i32_0 : i32, i32
  }
  func.func @transform_3(%arg0: i32, %arg1: i32) -> (i32, i32) {
    %c0_i32 = arith.constant 0 : i32
    %c0_i32_0 = arith.constant 0 : i32
    %c0_i32_1 = arith.constant 0 : i32
    return %c0_i32, %c0_i32_0 : i32, i32
  }
  func.func @transform_4(%arg0: i32, %arg1: i32) -> (i32, i32) {
    %c0_i32 = arith.constant 0 : i32
    %c0_i32_0 = arith.constant 0 : i32
    %c0_i32_1 = arith.constant 0 : i32
    return %c0_i32, %c0_i32_0 : i32, i32
  }
  func.func @transform_5(%arg0: i32, %arg1: i32) -> (i32, i32, i32) {
    %c0_i32 = arith.constant 0 : i32
    %c0_i32_0 = arith.constant 0 : i32
    return %arg0, %c0_i32, %arg1 : i32, i32, i32
  }
}

</mosaic_0001>

<bundles_post_ra>
// kernel: tpu_custom_call.1
= control target key start
LH: loop header
LB: loop body
LE: loop exit
PB: predicated region body
PF: predicated region fallthrough
CT: control target
= control target key end

     0   :  { %10 = vsyncpa [#allocation5], 0  ;;  %s10140_s0 = inlined_call_operand.vmem [shape: f32[2,16,16], index: 0, kind: input, shape index: {}]   ;;  %s10141_s1 = inlined_call_operand.vmem [shape: f32[16,16], index: 1, kind: input, shape index: {}]   ;;  %s10142_s2 = inlined_call_operand.vmem [shape: f32[16,16], index: 2, kind: input, shape index: {}]   ;;  %s10143_s3 = inlined_call_operand.vmem [shape: f32[64,1], index: 3, kind: input, shape index: {}]   ;;  %s10144_s4 = inlined_call_operand.vmem [shape: f32[64,1], index: 4, kind: input, shape index: {}]   ;;  %s10145_s5 = inlined_call_operand.hbm [shape: f32[2,128,256], index: 5, kind: output, shape index: {}]  }
   0x1   :  { %12 = vsyncpa [#allocation5 + $0x1], 0  ;;  %s6142_s18 = smov 0   ;;  %s6144_s19 = smov 0  }
   0x2   :  { %s6146_s20 = smov 0   ;;  %s6148_s21 = smov 0  }
   0x3   :  { %s6150_s22 = smov 0   ;;  %s6152_s23 = smov 0  }
   0x4 LB: > { %s5824_s24 = sadd.s32 4294967295, %s6095_s23   ;;  %s5825_s25 = sadd.s32 4294967294, %s6095_s23   ;;  %s6095_s23 = sphi %s6152_s23, %s18_s23   ;;  %s6091_s22 = sphi %s6150_s22, %s10252_s22   ;;  %s6087_s21 = sphi %s6148_s21, %s10251_s21   ;;  %s6083_s20 = sphi %s6146_s20, %s10250_s20   ;;  %s6079_s19 = sphi %s6144_s19, %s10249_s19   ;;  %s6075_s18 = sphi %s6142_s18, %s10248_s18  }
   0x5   : > { %s30_s26 = sadd.s32 1, %s6091_s22  ;;  %s154_s27 = sadd.s32 1, %s6083_s20 }
   0x6   : > { %p32_p0 = scmp.ge.s32.totalorder %s30_s26, 2  ;;  %p164_p1 = scmp.ne.s32.totalorder %s6083_s20, %s6079_s19 }
   0x7   : > { %p165_p2 = scmp.eq.s32.totalorder %s5824_s24, 1  ;;  %p170_p3 = scmp.ne.s32.totalorder %s6079_s19, %s6075_s18 }
   0x8   : > { %s10254_s26 = smov (%p32_p0, %s30_s26), 0  ;;  %p171_p5 = scmp.eq.s32.totalorder %s5825_s25, 1 }
   0x9   : > { %p6182_p4 = por %p165_p2, %p164_p1  ;;  %s149_s29 = ssub.s32 %s6091_s22, %s10254_s26 }
   0xa   : > { %p5829_p6 = scmp.ge.s32.totalorder %s6095_s23, 1  ;;  %p152_p7 = scmp.eq.s32.totalorder %s149_s29, 0 }
   0xb   : > { %p6189_p8 = por %p171_p5, %p170_p3  ;;  %p215_p9 = scmp.lt.s32.totalorder %s6095_s23, 3 }
   0xc   : > { %s6195_s6 = scalar_select %p152_p7, %s6083_s20, %s154_s27  }
   0xd   : > { %p216_p10 = pnand %p5829_p6, %p215_p9 }
   0xf   : > { %219 = sbr.rel (%p216_p10) target bundleno = 1735 (0x6c7), region = 40 }
  0x14   : > { %p248_p11 = scmp.lt.s32.totalorder %s6087_s21, 1  ;;  %v295_v0 = vld [vmem:[%s10142_s2 + $0x8] sm:$0xff]  ;;  %v294_v1 = vld [vmem:[%s10142_s2] sm:$0xff]  ;;  %v558_v2 = vld [vmem:[%s10143_s3 + $0x10] sm:$0xff]  ;;  %v10163_v4 = vmov 0   ;;  %vm264_vm0 = vcmask 130048   ;;  %v325_v16 = vlaneseq }
  0x15   : > { %316 = vmatpush.msra.mxu1 %v295_v0  ;;  %5942 = vmatpush.msra.mxu3 %v295_v0  ;;  %v556_v3 = vld [vmem:[%s10143_s3] sm:$0xff]  ;;  %v263_v8 = vld [vmem:[%s10141_s1 + $0x8] sm:$0xff]  ;;  %v563_v9 = vld [vmem:[%s10143_s3 + $0x38] sm:$0xff]  ;;  %s6098_s10 = smov 16   ;;  %s6099_s11 = smov 32  }
  0x16   : > { %s249_s15 = scalar_select %p248_p11, %s6087_s21, 1  ;;  %6016 = vset.pattern.permute.xlu0 %v10163_v4  ;;  %6014 = vset.pattern.permute.xlu1 %v10163_v4  ;;  %v262_v7 = vld [vmem:[%s10141_s1] sm:$0xff]  ;;  %v559_v10 = vld [vmem:[%s10143_s3 + $0x18] sm:$0xff]  ;;  %v557_v11 = vld [vmem:[%s10143_s3 + $0x8] sm:$0xff]  ;;  %vm6245_vm1 = vcmp.lt.s32.totalorder %v325_v16, 16  ;;  %vm338_vm2 = vcmp.ge.s32.totalorder %v325_v16, 16 }
  0x17   : > { %317 = vmatpush.msra.mxu1 %v294_v1  ;;  %5943 = vmatpush.msra.mxu3 %v294_v1  ;;  %v561_v12 = vld [vmem:[%s10143_s3 + $0x28] sm:$0xff]  ;;  %v560_v13 = vld [vmem:[%s10143_s3 + $0x20] sm:$0xff]  ;;  %v562_v15 = vld [vmem:[%s10143_s3 + $0x30] sm:$0xff]  ;;  %s6100_s12 = smov 48   ;;  %s6101_s13 = smov 64   ;;  %vm339_vm3 = vcmp.lt.s32.totalorder %v325_v16, 32 }
  0x18   : > { %s5938_s16 = sshll.u32 %s249_s15, 4  ;;  %589 = vperm.xlu0 %6016, %v558_v2   ;;  %579 = vperm.xlu1 %6014, %v556_v3   ;;  %v564_v14 = vld [vmem:[%s10144_s4] sm:$0xff]  ;;  %v565_v20 = vld [vmem:[%s10144_s4 + $0x8] sm:$0xff]  ;;  %s6102_s14 = smov 80   ;;  %vm6301_vm4 = vmand %vm338_vm2, %vm339_vm3  ;;  %vm356_vm5 = vcmp.ge.s32.totalorder %v325_v16, 32  ;;  %vm357_vm6 = vcmp.lt.s32.totalorder %v325_v16, 48 }
  0x19   : > { %s252_s25 = scalar_lea.vmem %s10140_s0, %s5938_s16  ;;  %6015 = vset.pattern.permute.xlu2 %v10163_v4  ;;  %s6103_s15 = smov 96   ;;  %vm373_vm7 = vcmp.ge.s32.totalorder %v325_v16, 48  ;;  %vm374_vm8 = vcmp.lt.s32.totalorder %v325_v16, 64  ;;  %vm6321_vm9 = vmand %vm356_vm5, %vm357_vm6  ;;  %vm390_vm11 = vcmp.ge.s32.totalorder %v325_v16, 64  ;;  %vm391_vm12 = vcmp.lt.s32.totalorder %v325_v16, 80 }
  0x1a   : > { %v261_v5 = vld [vmem:[%s252_s25 + $0x8] sm:$0xff]  ;;  %v260_v6 = vld [vmem:[%s252_s25] sm:$0xff]  ;;  %584 = vperm.xlu2 %6015, %v557_v11   ;;  %s6104_s16 = smov 112   ;;  %vm6325_vm10 = vmand %vm373_vm7, %vm374_vm8  ;;  %vm407_vm14 = vcmp.ge.s32.totalorder %v325_v16, 80  ;;  %vm408_vm15 = vcmp.lt.s32.totalorder %v325_v16, 96  ;;  %vm425_vm2 = vcmp.lt.s32.totalorder %v325_v16, 112 }
  0x1b   : > { %285 = vmatpush.msra.mxu0 %v261_v5  ;;  %5835 = vmatmul.msk.f32.vlgmr.msra.gmra.mxu1 %vm264_vm0, %v260_v6  ;;  %vm6347_vm13 = vmand %vm390_vm11, %vm391_vm12  ;;  %vm441_vm5 = vcmp.ge.s32.totalorder %v325_v16, 112  ;;  %vm442_vm6 = vcmp.lt.s32.totalorder %v325_v16, 128  ;;  %s5939_s24 = sshll.u32 %s6087_s21, 8 }
  0x1c   : > { %5940 = vmatpush.msra.mxu2 %v261_v5  ;;  %5836 = vmatmul.msk.f32.vlgmr.msra.gmra.mxu3 %vm264_vm0, %v261_v5  ;;  %vm6397_vm7 = vmand %vm441_vm5, %vm442_vm6  ;;  %s5732_s29 = scalar_lea.hbm %s10145_s5, %s5939_s24 }
  0x1d   : > { %286 = vmatpush.msra.mxu0 %v260_v6  ;;  %s5735_s8 = sshll.u32 %s5732_s29, 4  ;;  %s5736_s8 = int_to_ptr.hbm [resolvable:$true] %s5735_s8 }
  0x1e   : > { %5833 = vmatmul.msk.f32.vlgmr.msra.gmra.mxu0 %vm264_vm0, %v262_v7  ;;  %5941 = vmatpush.msra.mxu2 %v260_v6  ;;  %s6031_s9 = sshra.s32 %s5736_s8, 4  ;;  %s6032_s9 = int_to_ptr.hbm [resolvable:$true] %s6031_s9 }
  0x1f   : > { %5834 = vmatmul.msk.f32.vlgmr.msra.gmra.mxu2 %vm264_vm0, %v263_v8  ;;  %vm6357_vm0 = vmand %vm407_vm14, %vm408_vm15  ;;  %p6038_p1 = scmp.lt.s32.totalorder %s6032_s9, %s10145_s5 }
  0x20   : > { %614 = vperm.xlu0 %6016, %v563_v9   ;;  %594 = vperm.xlu1 %6014, %v559_v10  }
  0x22   : > { %599 = vperm.xlu2 %6015, %v560_v13  }
  0x28   : > { %604 = vperm.xlu1 %6014, %v561_v12   ;;  %v567_v12 = vld [vmem:[%s10144_s4 + $0x18] sm:$0xff] }
  0x2a   : > { %609 = vperm.xlu2 %6015, %v562_v15  }
  0x30   : > { %635 = vperm.xlu1 %6014, %v564_v14  }
  0x32   : > { %640 = vperm.xlu2 %6015, %v565_v20  }
  0x74   : > { %v6278_v35 = vpop.permute.xlu2 %584 }
  0x7c   : > { %v6285_v39 = vpop.permute.xlu2 %599 }
  0x84   : > { %v6293_v43 = vpop.permute.xlu2 %609 }
  0x8a   : > { %v6280_v36 = vpop.permute.xlu1 %579  ;;  %v6282_v37 = vpop.permute.xlu0 %589 }
  0x8c   : > { %v6307_v48 = vpop.permute.xlu2 %640 }
  0x92   : > { %v6287_v40 = vpop.permute.xlu1 %594  ;;  %v6291_v42 = vpop.permute.xlu0 %614 }
  0x98   : > { %v319_v17 = vpop.f32.mrf.mxu1 }
  0x99   : > { %330 = vst.msk [vmem:[#allocation3] sm:$0x1] %vm6245_vm1, %v319_v17 }
  0x9a   : > { %v6297_v44 = vpop.permute.xlu1 %604 }
  0x9b   : > { %v288_v19 = vpop.f32.mrf.mxu0  ;;  %10170 = vst [vmem:[#allocation7_spill] sm:$0xff] %v6297_v44 }
  0x9c   : > { %332 = vst [vmem:[#allocation1] sm:$0xff] %v288_v19 }
  0x9d   : > { %329 = vst.msk [vmem:[#allocation2] sm:$0x1] %vm6245_vm1, %v288_v19 }
  0x9f   : > { %v6271_v32 = vpop.f32.mrf.mxu3 }
  0xa0   : > { %453 = vst.msk [vmem:[#allocation3 + $0x1] sm:$0x1] %vm6245_vm1, %v6271_v32 }
  0xa2   : > { %v6265_v30 = vpop.f32.mrf.mxu2  ;;  %v6311_v50 = vpop.permute.xlu1 %635 }
  0xa3   : > { %v334_v21 = vld [vmem:[#allocation1 + $0x1] ss:$9 sm:$0xff]  ;;  %452 = vst.msk [vmem:[#allocation2 + $0x1] sm:$0x1] %vm6245_vm1, %v6265_v30  ;;  %vm424_vm1 = vcmp.ge.s32.totalorder %v325_v16, 96 }
  0xa4   : > { %343 = vst [vmem:[#allocation1] sm:$0xff] %v319_v17  ;;  %335 = vrot.lane.b32.xlu0 %v334_v21, %s6098_s10  ;;  %vm6369_vm3 = vmand %vm424_vm1, %vm425_vm2  ;;  %v568_v21 = vld [vmem:[%s10144_s4 + $0x20] sm:$0xff] }
  0xab   : > { %v345_v22 = vld [vmem:[#allocation1 + $0x1] ss:$9 sm:$0xff] }
  0xac   : > { %350 = vst [vmem:[#allocation1] sm:$0xff] %v288_v19  ;;  %346 = vrot.lane.b32.xlu0 %v345_v22, %s6098_s10 }
  0xb3   : > { %v352_v23 = vld [vmem:[#allocation1 + $0x2] ss:$9 sm:$0xff] }
  0xb4   : > { %360 = vst [vmem:[#allocation1] sm:$0xff] %v319_v17  ;;  %353 = vrot.lane.b32.xlu1 %v352_v23, %s6099_s11  ;;  %v571_v23 = vld [vmem:[%s10144_s4 + $0x38] sm:$0xff] }
  0xbb   : > { %v362_v24 = vld [vmem:[#allocation1 + $0x2] ss:$9 sm:$0xff] }
  0xbc   : > { %367 = vst [vmem:[#allocation1] sm:$0xff] %v288_v19  ;;  %363 = vrot.lane.b32.xlu1 %v362_v24, %s6099_s11  ;;  %v566_v24 = vld [vmem:[%s10144_s4 + $0x10] sm:$0xff] }
  0xc3   : > { %v369_v25 = vld [vmem:[#allocation1 + $0x3] ss:$9 sm:$0xff] }
  0xc4   : > { %377 = vst [vmem:[#allocation1] sm:$0xff] %v319_v17  ;;  %370 = vrot.lane.b32.xlu2 %v369_v25, %s6100_s12  ;;  %v569_v25 = vld [vmem:[%s10144_s4 + $0x28] sm:$0xff] }
  0xcb   : > { %v379_v26 = vld [vmem:[#allocation1 + $0x3] ss:$9 sm:$0xff] }
  0xcc   : > { %384 = vst [vmem:[#allocation1] sm:$0xff] %v288_v19  ;;  %380 = vrot.lane.b32.xlu2 %v379_v26, %s6100_s12 }
  0xd3   : > { %v386_v27 = vld [vmem:[#allocation1 + $0x4] ss:$9 sm:$0xff] }
  0xd4   : > { %394 = vst [vmem:[#allocation1] sm:$0xff] %v319_v17  ;;  %387 = vrot.lane.b32.xlu0 %v386_v27, %s6101_s13 }
  0xdb   : > { %v396_v28 = vld [vmem:[#allocation1 + $0x4] ss:$9 sm:$0xff] }
  0xdc   : > { %401 = vst [vmem:[#allocation1] sm:$0xff] %v288_v19  ;;  %397 = vrot.lane.b32.xlu1 %v396_v28, %s6101_s13 }
  0xe3   : > { %v403_v29 = vld [vmem:[#allocation1 + $0x5] ss:$9 sm:$0xff] }
  0xe4   : > { %411 = vst [vmem:[#allocation1] sm:$0xff] %v319_v17  ;;  %404 = vrot.lane.b32.xlu1 %v403_v29, %s6102_s14 }
  0xeb   : > { %v413_v31 = vld [vmem:[#allocation1 + $0x5] ss:$9 sm:$0xff] }
  0xec   : > { %418 = vst [vmem:[#allocation1] sm:$0xff] %v288_v19  ;;  %414 = vrot.lane.b32.xlu2 %v413_v31, %s6102_s14 }
  0xf3   : > { %v420_v33 = vld [vmem:[#allocation1 + $0x6] ss:$9 sm:$0xff] }
  0xf4   : > { %428 = vst [vmem:[#allocation1] sm:$0xff] %v319_v17  ;;  %421 = vrot.lane.b32.xlu2 %v420_v33, %s6103_s15 }
  0xfb   : > { %v430_v34 = vld [vmem:[#allocation1 + $0x6] ss:$9 sm:$0xff] }
  0xfc   : > { %435 = vst [vmem:[#allocation1] sm:$0xff] %v288_v19  ;;  %431 = vrot.lane.b32.xlu0 %v430_v34, %s6103_s15 }
 0x103   : > { %v437_v38 = vld [vmem:[#allocation1 + $0x7] ss:$9 sm:$0xff] }
 0x104   : > { %445 = vst [vmem:[#allocation1] sm:$0xff] %v319_v17  ;;  %438 = vrot.lane.b32.xlu0 %v437_v38, %s6104_s16  ;;  %v570_v17 = vld [vmem:[%s10144_s4 + $0x30] sm:$0xff] }
 0x10b   : > { %v447_v41 = vld [vmem:[#allocation1 + $0x7] ss:$9 sm:$0xff] }
 0x10c   : > { %448 = vrot.lane.b32.xlu1 %v447_v41, %s6104_s16  ;;  %455 = vst [vmem:[#allocation1] sm:$0xff] %v6265_v30 }
 0x113   : > { %v457_v45 = vld [vmem:[#allocation1 + $0x1] ss:$9 sm:$0xff] }
 0x114   : > { %458 = vrot.lane.b32.xlu2 %v457_v45, %s6098_s10  ;;  %463 = vst [vmem:[#allocation1] sm:$0xff] %v6271_v32 }
 0x116   : > { %v336_v47 = vpop.permute.xlu0 %335 }
 0x117   : > { %341 = vst.msk [vmem:[#allocation2] sm:$0x1] %vm6301_vm4, %v336_v47 }
 0x11b   : > { %v465_v49 = vld [vmem:[#allocation1 + $0x1] ss:$9 sm:$0xff] }
 0x11c   : > { %466 = vrot.lane.b32.xlu0 %v465_v49, %s6098_s10  ;;  %470 = vst [vmem:[#allocation1] sm:$0xff] %v6265_v30 }
 0x11e   : > { %v347_v51 = vpop.permute.xlu0 %346  ;;  %v371_v54 = vpop.permute.xlu2 %370 }
 0x11f   : > { %349 = vst.msk [vmem:[#allocation3] sm:$0x1] %vm6301_vm4, %v347_v51 }
 0x123   : > { %v472_v52 = vld [vmem:[#allocation1 + $0x2] ss:$9 sm:$0xff] }
 0x124   : > { %473 = vrot.lane.b32.xlu1 %v472_v52, %s6099_s11  ;;  %477 = vst [vmem:[#allocation1] sm:$0xff] %v6271_v32 }
 0x126   : > { %v354_v56 = vpop.permute.xlu1 %353  ;;  %v381_v59 = vpop.permute.xlu2 %380 }
 0x127   : > { %359 = vst.msk [vmem:[#allocation2] sm:$0x1] %vm6321_vm9, %v354_v56 }
 0x128   : > { %376 = vst.msk [vmem:[#allocation2] sm:$0x1] %vm6325_vm10, %v371_v54 }
 0x12b   : > { %v479_v57 = vld [vmem:[#allocation1 + $0x2] ss:$9 sm:$0xff] }
 0x12c   : > { %480 = vrot.lane.b32.xlu2 %v479_v57, %s6099_s11  ;;  %484 = vst [vmem:[#allocation1] sm:$0xff] %v6265_v30  ;;  %s6033_s11 = scalar_lea.hbm %s6032_s9, 256 }
 0x12d   : > { %p6034_p12 = scmp.ne.s32.totalorder %s6032_s9, %s6033_s11 }
 0x12e   : > { %v364_v58 = vpop.permute.xlu1 %363 }
 0x12f   : > { %366 = vst.msk [vmem:[#allocation3] sm:$0x1] %vm6321_vm9, %v364_v58  ;;  %p6035_p13 = pnand %p6034_p12, %p6182_p4 }
 0x130   : > { %383 = vst.msk [vmem:[#allocation3] sm:$0x1] %vm6325_vm10, %v381_v59 }
 0x131   : > { %p6036_p0 = pneg %p6035_p13 }
 0x133   : > { %v486_v60 = vld [vmem:[#allocation1 + $0x3] ss:$9 sm:$0xff] }
 0x134   : > { %487 = vrot.lane.b32.xlu0 %v486_v60, %s6100_s12  ;;  %491 = vst [vmem:[#allocation1] sm:$0xff] %v6271_v32 }
 0x13b   : > { %v493_v61 = vld [vmem:[#allocation1 + $0x3] ss:$9 sm:$0xff] }
 0x13c   : > { %494 = vrot.lane.b32.xlu1 %v493_v61, %s6100_s12  ;;  %498 = vst [vmem:[#allocation1] sm:$0xff] %v6265_v30 }
 0x143   : > { %v500_v62 = vld [vmem:[#allocation1 + $0x4] ss:$9 sm:$0xff] }
 0x144   : > { %501 = vrot.lane.b32.xlu2 %v500_v62, %s6101_s13  ;;  %505 = vst [vmem:[#allocation1] sm:$0xff] %v6271_v32 }
 0x146   : > { %v388_v0 = vpop.permute.xlu0 %387  ;;  %v415_v2 = vpop.permute.xlu2 %414 }
 0x147   : > { %393 = vst.msk [vmem:[#allocation2] sm:$0x1] %vm6347_vm13, %v388_v0 }
 0x14b   : > { %v507_v1 = vld [vmem:[#allocation1 + $0x4] ss:$9 sm:$0xff] }
 0x14c   : > { %508 = vrot.lane.b32.xlu0 %v507_v1, %s6101_s13  ;;  %512 = vst [vmem:[#allocation1] sm:$0xff] %v6265_v30 }
 0x14e   : > { %v398_v5 = vpop.permute.xlu1 %397  ;;  %v422_v9 = vpop.permute.xlu2 %421 }
 0x14f   : > { %400 = vst.msk [vmem:[#allocation3] sm:$0x1] %vm6347_vm13, %v398_v5 }
 0x150   : > { %417 = vst.msk [vmem:[#allocation3] sm:$0x1] %vm6357_vm0, %v415_v2 }
 0x153   : > { %v514_v6 = vld [vmem:[#allocation1 + $0x5] ss:$9 sm:$0xff] }
 0x154   : > { %515 = vrot.lane.b32.xlu0 %v514_v6, %s6102_s14  ;;  %519 = vst [vmem:[#allocation1] sm:$0xff] %v6271_v32 }
 0x156   : > { %v405_v8 = vpop.permute.xlu1 %404 }
 0x157   : > { %410 = vst.msk [vmem:[#allocation2] sm:$0x1] %vm6357_vm0, %v405_v8 }
 0x158   : > { %427 = vst.msk [vmem:[#allocation2] sm:$0x1] %vm6369_vm3, %v422_v9 }
 0x15b   : > { %v521_v10 = vld [vmem:[#allocation1 + $0x5] ss:$9 sm:$0xff] }
 0x15c   : > { %522 = vrot.lane.b32.xlu1 %v521_v10, %s6102_s14  ;;  %526 = vst [vmem:[#allocation1] sm:$0xff] %v6265_v30  ;;  %s6037_s14 = scalar_lea.hbm %s10145_s5, 512 }
 0x15d   : > { %p6039_p2 = scmp.lt.s32.totalorder %s6037_s14, %s6033_s11 }
 0x15f   : > { %p6040_p3 = por %p6039_p2, %p6038_p1 }
 0x161   : > { %p6041_p5 = pnand %p6040_p3, %p6036_p0 }
 0x163   : > { %v528_v11 = vld [vmem:[#allocation1 + $0x6] ss:$9 sm:$0xff] }
 0x164   : > { %529 = vrot.lane.b32.xlu1 %v528_v11, %s6103_s15  ;;  %533 = vst [vmem:[#allocation1] sm:$0xff] %v6271_v32 }
 0x16b   : > { %v535_v13 = vld [vmem:[#allocation1 + $0x6] ss:$9 sm:$0xff] }
 0x16c   : > { %650 = vperm.xlu1 %6014, %v567_v12   ;;  %536 = vrot.lane.b32.xlu2 %v535_v13, %s6103_s15  ;;  %540 = vst [vmem:[#allocation1] sm:$0xff] %v6265_v30  ;;  %s245_s15 = sand.u32 1, %s6079_s19  }
 0x16d   : > { %s5719_s21 = scalar_lea.sflag [#allocation5], %s245_s15 }
 0x16e   : > { %v432_v14 = vpop.permute.xlu0 %431  ;;  %v459_v15 = vpop.permute.xlu2 %458 }
 0x16f   : > { %434 = vst.msk [vmem:[#allocation3] sm:$0x1] %vm6369_vm3, %v432_v14 }
 0x170   : > { %461 = vst.msk [vmem:[#allocation2 + $0x1] sm:$0x1] %vm6301_vm4, %v459_v15 }
 0x173   : > { %v542_v18 = vld [vmem:[#allocation1 + $0x7] ss:$9 sm:$0xff] }
 0x174   : > { %665 = vperm.xlu1 %6014, %v570_v17   ;;  %543 = vrot.lane.b32.xlu2 %v542_v18, %s6104_s16  ;;  %547 = vst [vmem:[#allocation1] sm:$0xff] %v6271_v32 }
 0x176   : > { %v439_v20 = vpop.permute.xlu0 %438 }
 0x177   : > { %444 = vst.msk [vmem:[#allocation2] sm:$0x1] %vm6397_vm7, %v439_v20 }
 0x17b   : > { %v549_v22 = vld [vmem:[#allocation1 + $0x7] ss:$9 sm:$0xff] }
 0x17c   : > { %655 = vperm.xlu2 %6015, %v568_v21   ;;  %550 = vrot.lane.b32.xlu0 %v549_v22, %s6104_s16  ;;  %s5830_s16 = sshll.u32 %s245_s15, 8 }
 0x17d   : > { %s6771_s17 = scalar_lea.vmem [#allocation4], %s5830_s16 }
 0x17e   : > { %v449_v16 = vpop.permute.xlu1 %448  ;;  %s5733_s7 = sshll.u32 %s6771_s17, 4  ;;  %s5734_s7 = int_to_ptr.vmem [resolvable:$true] %s5733_s7 }
 0x17f   : > { %451 = vst.msk [vmem:[#allocation3] sm:$0x1] %vm6397_vm7, %v449_v16 }
 0x184   : > { %670 = vperm.xlu2 %6015, %v571_v23   ;;  %645 = vperm.xlu0 %6016, %v566_v24   ;;  %v10160_v23 = vmov 683565275  }
 0x186   : > { %v481_v27 = vpop.permute.xlu2 %480 }
 0x18c   : > { %660 = vperm.xlu0 %6016, %v569_v25   ;;  %v10155_v25 = vmov 2475754826  }
 0x18e   : > { %v467_v26 = vpop.permute.xlu0 %466 }
 0x18f   : > { %469 = vst.msk [vmem:[#allocation3 + $0x1] sm:$0x1] %vm6301_vm4, %v467_v26 }
 0x190   : > { %483 = vst.msk [vmem:[#allocation3 + $0x1] sm:$0x1] %vm6321_vm9, %v481_v27 }
 0x196   : > { %v474_v28 = vpop.permute.xlu1 %473 }
 0x197   : > { %476 = vst.msk [vmem:[#allocation2 + $0x1] sm:$0x1] %vm6321_vm9, %v474_v28 }
 0x19e   : > { %v502_v30 = vpop.permute.xlu2 %501 }
 0x1a6   : > { %v488_v29 = vpop.permute.xlu0 %487 }
 0x1a7   : > { %490 = vst.msk [vmem:[#allocation2 + $0x1] sm:$0x1] %vm6325_vm10, %v488_v29  ;;  %v10157_v29 = vmov 2131351028  }
 0x1a8   : > { %504 = vst.msk [vmem:[#allocation2 + $0x1] sm:$0x1] %vm6347_vm13, %v502_v30 }
 0x1ae   : > { %v495_v31 = vpop.permute.xlu1 %494 }
 0x1af   : > { %497 = vst.msk [vmem:[#allocation3 + $0x1] sm:$0x1] %vm6325_vm10, %v495_v31 }
 0x1be   : > { %v509_v32 = vpop.permute.xlu0 %508 }
 0x1bf   : > { %511 = vst.msk [vmem:[#allocation3 + $0x1] sm:$0x1] %vm6347_vm13, %v509_v32  ;;  %v10151_v32 = vmov 2102212464  }
 0x1c6   : > { %v516_v33 = vpop.permute.xlu0 %515  ;;  %v537_v34 = vpop.permute.xlu2 %536 }
 0x1c7   : > { %518 = vst.msk [vmem:[#allocation2 + $0x1] sm:$0x1] %vm6357_vm0, %v516_v33 }
 0x1ce   : > { %v523_v38 = vpop.permute.xlu1 %522  ;;  %v544_v45 = vpop.permute.xlu2 %543 }
 0x1cf   : > { %525 = vst.msk [vmem:[#allocation3 + $0x1] sm:$0x1] %vm6357_vm0, %v523_v38  ;;  %v10148_v38 = vmov 920167782  }
 0x1d0   : > { %539 = vst.msk [vmem:[#allocation3 + $0x1] sm:$0x1] %vm6369_vm3, %v537_v34 }
 0x1d6   : > { %v530_v41 = vpop.permute.xlu1 %529 }
 0x1d7   : > { %532 = vst.msk [vmem:[#allocation2 + $0x1] sm:$0x1] %vm6369_vm3, %v530_v41 }
 0x1d8   : > { %546 = vst.msk [vmem:[#allocation2 + $0x1] sm:$0x1] %vm6397_vm7, %v544_v45 }
 0x1df   : > { %v554_v46 = vld [vmem:[#allocation2] sm:$0x3] }
 0x1e0   : > { %v6442_v47 = vperm.slane %v554_v46, 0  ;;  %v6444_v49 = vperm.slane %v554_v46, 1  ;;  %v10146_v46 = vmov 1326507024  }
 0x1e2   : > { %v617_v51 = vmul.f32 %v6280_v36, %v6442_v47  ;;  %v618_v52 = vmul.f32 %v6280_v36, %v6444_v49  ;;  %v619_v53 = vmul.f32 %v6278_v35, %v6442_v47  ;;  %v6476_v15 = vmul.f32 %v6278_v35, %v6444_v49 }
 0x1e4   : > { %v6453_v54 = vadd.f32 %v6311_v50, %v617_v51  ;;  %v6456_v55 = vadd.f32 %v6311_v50, %v618_v52  ;;  %v6459_v56 = vadd.f32 %v6307_v48, %v619_v53 }
 0x1e6   : > { %v689_v57 = vand.u32 2147483647, %v6453_v54  ;;  %v692_v58 = vand.u32 2139095040, %v6453_v54  ;;  %v844_v59 = vand.u32 2147483647, %v6456_v55  ;;  %v847_v60 = vand.u32 2139095040, %v6456_v55 }
 0x1e7   : > { %v1002_v1 = vand.u32 2139095040, %v6459_v56 }
 0x1e8   : > { %v693_v61 = vshrl.u32 %v692_v58, 23  ;;  %v696_v62 = vand.u32 8388607, %v689_v57  ;;  %v848_v63 = vshrl.u32 %v847_v60, 23  ;;  %v851_v0 = vand.u32 8388607, %v844_v59 }
 0x1e9   : > { %v1003_v9 = vshrl.u32 %v1002_v1, 23 }
 0x1ea   : > { %v5837_v2 = vadd.s32 4294967169, %v693_v61  ;;  %v697_v3 = vor.u32 8388608, %v696_v62  ;;  %v5840_v5 = vadd.s32 4294967169, %v848_v63  ;;  %v852_v6 = vor.u32 8388608, %v851_v0 }
 0x1eb   : > { %v6478_v17 = vadd.s32 4294967169, %v1003_v9 }
 0x1ec   : > { %v699_v7 = vadd.s32 1, %v5837_v2  ;;  %v854_v8 = vadd.s32 1, %v5840_v5  ;;  %v6470_v10 = vshll.u32 %v697_v3, 8  ;;  %v6472_v12 = vshll.u32 %v852_v6, 8 }
 0x1ee   : > { %vm700_vm4 = vcmp.gt.s32.totalorder %v699_v7, 0  ;;  %vm855_vm8 = vcmp.gt.s32.totalorder %v854_v8, 0  ;;  %v6481_v20 = vand.u32 65535, %v6470_v10  ;;  %v6484_v21 = vshrl.u32 %v6470_v10, 16 }
 0x1ef   : > { %v701_v11 = vsel %vm700_vm4, %v699_v7, 0  ;;  %v856_v14 = vsel %vm855_vm8, %v854_v8, 0  ;;  %v6493_v27 = vand.u32 65535, %v6472_v12 }
 0x1f0   : > { %v703_v13 = vand.u32 31, %v701_v11  ;;  %v6486_v22 = vand.u32 31, %v856_v14  ;;  %v6488_v16 = vshrl.u32 %v701_v11, 5 }
 0x1f2   : > { %v704_v18 = vsub.s32 32, %v703_v13  ;;  %v706_v24 = vshll.u32 %v10160_v23, %v703_v13  ;;  %v709_v26 = vshll.u32 %v10155_v25, %v703_v13  ;;  %v712_v31 = vshll.u32 %v10157_v29, %v703_v13 }
 0x1f3   : > { %v715_v34 = vshll.u32 %v10151_v32, %v703_v13  ;;  %v718_v45 = vshll.u32 %v10148_v38, %v703_v13  ;;  %v6504_v60 = vsub.s32 32, %v6486_v22  ;;  %vm721_vm9 = vcmp.lt.s32.totalorder %v6488_v16, 1 }
 0x1f4   : > { %v707_v28 = vshrl.u32 %v10155_v25, %v704_v18  ;;  %v710_v30 = vshrl.u32 %v10157_v29, %v704_v18  ;;  %v713_v33 = vshrl.u32 %v10151_v32, %v704_v18  ;;  %v716_v41 = vshrl.u32 %v10148_v38, %v704_v18 }
 0x1f5   : > { %v719_v51 = vshrl.u32 %v10146_v46, %v704_v18  ;;  %vm722_vm10 = vcmp.lt.s32.totalorder %v6488_v16, 2  ;;  %v705_v63 = vshrl.u32 %v10160_v23, %v704_v18  ;;  %vm724_vm11 = vcmp.lt.s32.totalorder %v6488_v16, 4 }
 0x1f6   : > { %v708_v52 = vor.u32 %v707_v28, %v706_v24  ;;  %v711_v53 = vor.u32 %v710_v30, %v709_v26  ;;  %v714_v58 = vor.u32 %v713_v33, %v712_v31  ;;  %v717_v61 = vor.u32 %v716_v41, %v715_v34 }
 0x1f7   : > { %v720_v62 = vor.u32 %v719_v51, %v718_v45  ;;  %vm723_vm12 = vcmp.lt.s32.totalorder %v6488_v16, 3  ;;  %v861_v5 = vshll.u32 %v10160_v23, %v6486_v22  ;;  %v862_v9 = vshrl.u32 %v10155_v25, %v6504_v60 }
 0x1f8   : > { %v729_v0 = vsel %vm721_vm9, %v708_v52, %v711_v53  ;;  %v733_v1 = vsel %vm721_vm9, %v711_v53, %v714_v58  ;;  %v730_v2 = vsel %vm724_vm11, %v717_v61, 920167782  ;;  %v726_v6 = vsel %vm724_vm11, %v714_v58, 2102212464 }
 0x1f9   : > { %v734_v3 = vsel %vm724_vm11, %v720_v62, 1326507024  ;;  %v731_v7 = vsel %vm723_vm12, %v714_v58, %v730_v2  ;;  %v864_v18 = vshll.u32 %v10155_v25, %v6486_v22  ;;  %v865_v24 = vshrl.u32 %v10157_v29, %v6504_v60 }
 0x1fa   : > { %v735_v8 = vsel %vm723_vm12, %v717_v61, %v734_v3  ;;  %v732_v11 = vsel %vm722_vm10, %v729_v0, %v731_v7  ;;  %v725_v33 = vsel %vm721_vm9, %v705_v63, %v708_v52  ;;  %v727_v34 = vsel %vm723_vm12, %v711_v53, %v726_v6 }
 0x1fb   : > { %v736_v13 = vsel %vm722_vm10, %v733_v1, %v735_v8  ;;  %v762_v30 = vand.u32 65535, %v732_v11  ;;  %v763_v31 = vshrl.u32 %v732_v11, 16  ;;  %v6535_v41 = vshrl.u32 %v856_v14, 5 }
 0x1fc   : > { %v740_v26 = vand.u32 65535, %v736_v13  ;;  %v741_v28 = vshrl.u32 %v736_v13, 16  ;;  %v6537_v45 = vor.u32 %v862_v9, %v861_v5  ;;  %v6541_v61 = vor.u32 %v865_v24, %v864_v18 }
 0x1fd   : > { %v868_v62 = vshrl.u32 %v10151_v32, %v6504_v60  ;;  %v765_v52 = vmul.u32 %v763_v31, %v6481_v20  ;;  %v766_v63 = vmul.u32 %v762_v30, %v6484_v21  ;;  %v867_v14 = vshll.u32 %v10157_v29, %v6486_v22 }
 0x1fe   : > { %v743_v51 = vmul.u32 %v741_v28, %v6481_v20  ;;  %v744_v58 = vmul.u32 %v740_v26, %v6484_v21  ;;  %v742_v0 = vmul.u32 %v740_v26, %v6481_v20  ;;  %v745_v53 = vmul.u32 %v741_v28, %v6484_v21 }
 0x1ff   : > { %v764_v2 = vmul.u32 %v762_v30, %v6481_v20  ;;  %v767_v3 = vmul.u32 %v763_v31, %v6484_v21  ;;  %v768_v8 = vshll.u32 %v765_v52, 16  ;;  %v770_v11 = vshll.u32 %v766_v63, 16 }
 0x200   : > { %v746_v1 = vshll.u32 %v743_v51, 16  ;;  %v747_v5 = vshrl.u32 %v743_v51, 16  ;;  %v748_v6 = vshll.u32 %v744_v58, 16  ;;  %v749_v7 = vshrl.u32 %v744_v58, 16 }
 0x201   : > { %v869_v13 = vor.u32 %v868_v62, %v867_v14  ;;  %vm772_vm14 = vc.u32 %v764_v2, %v768_v8  ;;  %v774_v24 = vadd.s32 %v768_v8, %v764_v2  ;;  %v871_v26 = vshrl.u32 %v10148_v38, %v6504_v60 }
 0x202   : > { %vm750_vm13 = vc.u32 %v742_v0, %v746_v1  ;;  %v752_v9 = vadd.s32 %v746_v1, %v742_v0  ;;  %v773_v20 = vsel %vm772_vm14, 1, %v10163_v4  ;;  %v870_v21 = vshll.u32 %v10151_v32, %v6486_v22 }
 0x203   : > { %v751_v18 = vsel %vm750_vm13, 1, %v10163_v4  ;;  %v775_v31 = vadd.s32 %v773_v20, %v767_v3  ;;  %vm776_vm0 = vc.u32 %v774_v24, %v770_v11  ;;  %v873_v51 = vshll.u32 %v10148_v38, %v6486_v22 }
 0x204   : > { %v753_v28 = vadd.s32 %v751_v18, %v745_v53  ;;  %vm754_vm15 = vc.u32 %v752_v9, %v748_v6  ;;  %v777_v62 = vsel %vm776_vm0, 1, %v10163_v4  ;;  %v872_v0 = vor.u32 %v871_v26, %v870_v21 }
 0x205   : > { %v755_v30 = vsel %vm754_vm15, 1, %v10163_v4  ;;  %v874_v14 = vshrl.u32 %v10146_v46, %v6504_v60  ;;  %v769_v53 = vshrl.u32 %v765_v52, 16  ;;  %v771_v1 = vshrl.u32 %v766_v63, 16 }
 0x206   : > { %v757_v58 = vadd.s32 %v755_v30, %v753_v28  ;;  %v6565_v2 = vadd.s32 %v774_v24, %v770_v11  ;;  %v779_v6 = vadd.s32 %v777_v62, %v775_v31  ;;  %vm876_vm1 = vcmp.lt.s32.totalorder %v6535_v41, 1 }
 0x207   : > { %v875_v9 = vor.u32 %v874_v14, %v873_v51  ;;  %vm879_vm2 = vcmp.lt.s32.totalorder %v6535_v41, 4  ;;  %vm878_vm3 = vcmp.lt.s32.totalorder %v6535_v41, 3  ;;  %v884_v22 = vsel %vm876_vm1, %v6537_v45, %v6541_v61 }
 0x208   : > { %v758_v8 = vadd.s32 %v757_v58, %v747_v5  ;;  %v780_v3 = vadd.s32 %v779_v6, %v769_v53  ;;  %v885_v52 = vsel %vm879_vm2, %v872_v0, 920167782  ;;  %vm877_vm5 = vcmp.lt.s32.totalorder %v6535_v41, 2 }
 0x209   : > { %v886_v5 = vsel %vm878_vm3, %v869_v13, %v885_v52  ;;  %v888_v11 = vsel %vm876_vm1, %v6541_v61, %v869_v13  ;;  %v728_v18 = vsel %vm722_vm10, %v725_v33, %v727_v34  ;;  %v894_v20 = vshrl.u32 %v6472_v12, 16 }
 0x20a   : > { %v6576_v63 = vadd.s32 %v758_v8, %v749_v7  ;;  %v781_v24 = vadd.s32 %v780_v3, %v771_v1  ;;  %v887_v26 = vsel %vm877_vm5, %v884_v22, %v886_v5  ;;  %v889_v7 = vsel %vm879_vm2, %v875_v9, 1326507024 }
 0x20b   : > { %v890_v28 = vsel %vm878_vm3, %v872_v0, %v889_v7  ;;  %v917_v21 = vand.u32 65535, %v887_v26  ;;  %v918_v33 = vshrl.u32 %v887_v26, 16  ;;  %v1009_v34 = vadd.s32 1, %v6478_v17 }
 0x20c   : > { %vm784_vm6 = vc.u32 %v6576_v63, %v6565_v2  ;;  %v785_v30 = vadd.s32 1, %v781_v24  ;;  %v891_v16 = vsel %vm877_vm5, %v888_v11, %v890_v28  ;;  %v782_v31 = vmul.u32 %v6470_v10, %v728_v18 }
 0x20d   : > { %v895_v51 = vand.u32 65535, %v891_v16  ;;  %v896_v58 = vshrl.u32 %v891_v16, 16  ;;  %v999_v62 = vand.u32 2147483647, %v6459_v56  ;;  %v860_v0 = vshrl.u32 %v10160_v23, %v6504_v60 }
 0x20e   : > { %v786_v14 = vsel %vm784_vm6, %v785_v30, %v781_v24  ;;  %v920_v53 = vmul.u32 %v918_v33, %v6493_v27  ;;  %v921_v1 = vmul.u32 %v917_v21, %v894_v20  ;;  %v881_v8 = vsel %vm879_vm2, %v869_v13, 2102212464 }
 0x20f   : > { %v787_v6 = vadd.s32 %v786_v14, %v782_v31  ;;  %v898_v9 = vmul.u32 %v896_v58, %v6493_v27  ;;  %v899_v17 = vmul.u32 %v895_v51, %v894_v20  ;;  %v919_v10 = vmul.u32 %v917_v21, %v6493_v27 }
 0x210   : > { %v922_v3 = vmul.u32 %v918_v33, %v894_v20  ;;  %v923_v22 = vshll.u32 %v920_v53, 16  ;;  %vm1010_vm4 = vcmp.gt.s32.totalorder %v1009_v34, 0  ;;  %v897_v5 = vmul.u32 %v895_v51, %v6493_v27 }
 0x211   : > { %v788_v52 = vadd.s32 536870912, %v787_v6  ;;  %v900_v11 = vmul.u32 %v896_v58, %v894_v20  ;;  %v901_v60 = vshll.u32 %v898_v9, 16  ;;  %v903_v18 = vshll.u32 %v899_v17, 16 }
 0x212   : > { %v925_v24 = vshll.u32 %v921_v1, 16  ;;  %vm927_vm8 = vc.u32 %v919_v10, %v923_v22  ;;  %v929_v26 = vadd.s32 %v923_v22, %v919_v10  ;;  %v1006_v16 = vand.u32 8388607, %v999_v62 }
 0x213   : > { %v789_v7 = vshrl.u32 %v788_v52, 30  ;;  %vm905_vm9 = vc.u32 %v897_v5, %v901_v60  ;;  %v907_v13 = vadd.s32 %v901_v60, %v897_v5  ;;  %v928_v28 = vsel %vm927_vm8, 1, %v10163_v4 }
 0x214   : > { %v906_v30 = vsel %vm905_vm9, 1, %v10163_v4  ;;  %v930_v21 = vadd.s32 %v928_v28, %v922_v3  ;;  %vm931_vm10 = vc.u32 %v929_v26, %v925_v24  ;;  %v880_v27 = vsel %vm876_vm1, %v860_v0, %v6537_v45 }
 0x215   : > { %v790_v33 = vshll.u32 %v789_v7, 30  ;;  %v908_v20 = vadd.s32 %v906_v30, %v900_v11  ;;  %vm909_vm11 = vc.u32 %v907_v13, %v903_v18  ;;  %v882_v31 = vsel %vm878_vm3, %v6541_v61, %v881_v8 }
 0x216   : > { %v910_v51 = vsel %vm909_vm11, 1, %v10163_v4  ;;  %v932_v58 = vsel %vm931_vm10, 1, %v10163_v4  ;;  %v1011_v14 = vsel %vm1010_vm4, %v1009_v34, 0  ;;  %v902_v3 = vshrl.u32 %v898_v9, 16 }
 0x217   : > { %v791_v10 = vsub.s32 %v787_v6, %v790_v33  ;;  %v912_v22 = vadd.s32 %v910_v51, %v908_v20  ;;  %v934_v52 = vadd.s32 %v932_v58, %v930_v21  ;;  %v904_v5 = vshrl.u32 %v899_v17, 16 }
 0x218   : > { %v924_v60 = vshrl.u32 %v920_v53, 16  ;;  %v1007_v28 = vor.u32 8388608, %v1006_v16  ;;  %v1013_v45 = vand.u32 31, %v1011_v14  ;;  %v813_v11 = vsub.s32 4, %v789_v7 }
 0x219   : > { %vm792_vm12 = vcmp.lt.s32.totalorder %v791_v10, 0  ;;  %v793_v0 = vsub.s32 0, %v791_v10  ;;  %v913_v18 = vadd.s32 %v912_v22, %v902_v3  ;;  %v883_v61 = vsel %vm877_vm5, %v880_v27, %v882_v31 }
 0x21a   : > { %v926_v8 = vshrl.u32 %v921_v1, 16  ;;  %v935_v13 = vadd.s32 %v934_v52, %v924_v60  ;;  %v6623_v30 = vsub.s32 32, %v1013_v45  ;;  %vm6627_vm13 = vcmp.le.f32.partialorder %v689_v57, 0.7853982 }
 0x21b   : > { %vm691_vm14 = vcmp.lt.s32.totalorder %v6453_v54, 0  ;;  %v794_v53 = vsel %vm792_vm12, %v793_v0, %v791_v10  ;;  %v6632_v6 = vadd.s32 %v913_v18, %v904_v5  ;;  %v783_v9 = vadd.s32 %v6565_v2, %v6576_v63 }
 0x21c   : > { %v795_v41 = vclz %v794_v53  ;;  %v6636_v17 = vadd.s32 %v929_v26, %v925_v24  ;;  %v936_v1 = vadd.s32 %v935_v13, %v926_v8  ;;  %v814_v21 = vsel %vm691_vm14, %v813_v11, %v789_v7 }
 0x21d   : > { %v937_v57 = vmul.u32 %v6472_v12, %v883_v61  ;;  %v6641_v16 = vshrl.u32 %v1011_v14, 5  ;;  %v6643_v33 = vshll.u32 %v1007_v28, 8  ;;  %v1017_v2 = vshrl.u32 %v10155_v25, %v6623_v30 }
 0x21e   : > { %v5838_v27 = vadd.s32 4294967294, %v795_v41  ;;  %vm939_vm15 = vc.u32 %v6632_v6, %v6636_v17  ;;  %v940_v20 = vadd.s32 1, %v936_v1  ;;  %v1016_v63 = vshll.u32 %v10160_v23, %v1013_v45 }
 0x21f   : > { %v1020_v24 = vshrl.u32 %v10157_v29, %v6623_v30  ;;  %v1023_v12 = vshrl.u32 %v10151_v32, %v6623_v30  ;;  %v1026_v26 = vshrl.u32 %v10148_v38, %v6623_v30  ;;  %v1019_v31 = vshll.u32 %v10155_v25, %v1013_v45 }
 0x220   : > { %vm5839_vm0 = vcmp.lt.s32.totalorder %v5838_v27, 0  ;;  %v941_v7 = vsel %vm939_vm15, %v940_v20, %v936_v1  ;;  %v1025_v51 = vshll.u32 %v10151_v32, %v1013_v45  ;;  %v1022_v3 = vshll.u32 %v10157_v29, %v1013_v45 }
 0x221   : > { %v798_v58 = vsel %vm5839_vm0, 0, %v5838_v27  ;;  %v942_v14 = vadd.s32 %v941_v7, %v937_v57  ;;  %v1029_v22 = vshrl.u32 %v10146_v46, %v6623_v30  ;;  %v1018_v60 = vor.u32 %v1017_v2, %v1016_v63 }
 0x222   : > { %v799_v52 = vsub.s32 32, %v798_v58  ;;  %v803_v5 = vsub.s32 4294967266, %v798_v58  ;;  %v1027_v28 = vor.u32 %v1026_v26, %v1025_v51  ;;  %v1021_v11 = vor.u32 %v1020_v24, %v1019_v31 }
 0x223   : > { %v943_v0 = vadd.s32 536870912, %v942_v14  ;;  %v1024_v18 = vor.u32 %v1023_v12, %v1022_v3  ;;  %v1028_v61 = vshll.u32 %v10148_v38, %v1013_v45  ;;  %v800_v8 = vshll.u32 %v791_v10, %v798_v58 }
 0x224   : > { %v801_v13 = vshrl.u32 %v783_v9, %v799_v52  ;;  %v804_v53 = vadd.s32 127, %v803_v5  ;;  %v816_v41 = vsel %vm6627_vm13, 0, %v814_v21  ;;  %vm1031_vm1 = vcmp.lt.s32.totalorder %v6641_v16, 1 }
 0x225   : > { %v6664_v1 = vshrl.u32 %v943_v0, 30  ;;  %v1030_v57 = vor.u32 %v1029_v22, %v1028_v61  ;;  %vm1034_vm2 = vcmp.lt.s32.totalorder %v6641_v16, 4  ;;  %vm1033_vm3 = vcmp.lt.s32.totalorder %v6641_v16, 3 }
 0x226   : > { %v802_v27 = vor.u32 %v801_v13, %v800_v8  ;;  %v805_v20 = vshll.u32 %v804_v53, 23  ;;  %v1040_v45 = vsel %vm1034_vm2, %v1027_v28, 920167782  ;;  %v833_v10 = vadd.s32 3, %v816_v41 }
 0x227   : > { %v945_v9 = vshll.u32 %v6664_v1, 30  ;;  %v1039_v21 = vsel %vm1031_vm1, %v1018_v60, %v1021_v11  ;;  %v1041_v2 = vsel %vm1033_vm3, %v1024_v18, %v1040_v45  ;;  %v6678_v63 = vadd.f32 %v6307_v48, %v6476_v15 }
 0x228   : > { %v806_v24 = vor.u32 4788187, %v805_v20  ;;  %v1043_v12 = vsel %vm1031_vm1, %v1021_v11, %v1024_v18  ;;  %vm1032_vm5 = vcmp.lt.s32.totalorder %v6641_v16, 2  ;;  %v1044_v7 = vsel %vm1034_vm2, %v1030_v57, 1326507024 }
 0x229   : > { %v6682_v26 = vsub.s32 %v942_v14, %v945_v9  ;;  %v1048_v31 = vand.u32 65535, %v6643_v33  ;;  %v809_v58 = vcvt.s32.f32 %v802_v27  ;;  %v1042_v3 = vsel %vm1032_vm5, %v1039_v21, %v1041_v2 }
 0x22a   : > { %v807_v51 = vand.u32 2147483647, %v806_v24  ;;  %v1045_v15 = vsel %vm1033_vm3, %v1027_v28, %v1044_v7  ;;  %v6692_v22 = vand.u32 3, %v833_v10  ;;  %v1036_v0 = vsel %vm1034_vm2, %v1024_v18, 2102212464 }
 0x22b   : > { %vm947_vm6 = vcmp.lt.s32.totalorder %v6682_v26, 0  ;;  %v948_v14 = vsub.s32 0, %v6682_v26  ;;  %v1046_v52 = vsel %vm1032_vm5, %v1043_v12, %v1045_v15  ;;  %v1015_v28 = vshrl.u32 %v10160_v23, %v6623_v30 }
 0x22c   : > { %v810_v5 = vmul.f32 %v809_v58, %v807_v51  ;;  %v1050_v61 = vand.u32 65535, %v1046_v52  ;;  %v1051_v8 = vshrl.u32 %v1046_v52, 16  ;;  %v1049_v53 = vshrl.u32 %v6643_v33, 16 }
 0x22d   : > { %v949_v13 = vsel %vm947_vm6, %v948_v14, %v6682_v26  ;;  %v1072_v41 = vand.u32 65535, %v1042_v3  ;;  %v938_v27 = vadd.s32 %v6636_v17, %v6632_v6  ;;  %v1035_v10 = vsel %vm1031_vm1, %v1015_v28, %v1018_v60 }
 0x22e   : > { %v811_v57 = vxor.u32 2147483648, %v810_v5  ;;  %v950_v20 = vclz %v949_v13  ;;  %v1053_v45 = vmul.u32 %v1051_v8, %v1048_v31  ;;  %v1037_v18 = vsel %vm1033_vm3, %v1021_v11, %v1036_v0 }
 0x22f   : > { %v6710_v9 = vmul.u32 %v1050_v61, %v1049_v53  ;;  %v1073_v21 = vshrl.u32 %v1042_v3, 16  ;;  %v1052_v24 = vmul.u32 %v1050_v61, %v1048_v31  ;;  %v968_v17 = vsub.s32 4, %v6664_v1 }
 0x230   : > { %v812_v30 = vsel %vm691_vm14, %v811_v57, %v810_v5  ;;  %v5841_v2 = vadd.s32 4294967294, %v950_v20  ;;  %v1056_v12 = vshll.u32 %v1053_v45, 16  ;;  %v1055_v60 = vmul.u32 %v1051_v8, %v1049_v53 }
 0x231   : > { %v6717_v6 = vsel %vm6627_vm13, %v6453_v54, %v812_v30  ;;  %v1074_v7 = vmul.u32 %v1072_v41, %v1048_v31  ;;  %v1058_v3 = vshll.u32 %v6710_v9, 16  ;;  %v1075_v14 = vmul.u32 %v1073_v21, %v1048_v31 }
 0x232   : > { %v817_v11 = vmul.f32 %v6717_v6, %v6717_v6  ;;  %vm5842_vm4 = vcmp.lt.s32.totalorder %v5841_v2, 0  ;;  %vm1060_vm8 = vc.u32 %v1052_v24, %v1056_v12  ;;  %v1062_v51 = vadd.s32 %v1056_v12, %v1052_v24 }
 0x233   : > { %v953_v58 = vsel %vm5842_vm4, 0, %v5841_v2  ;;  %v1061_v15 = vsel %vm1060_vm8, 1, %v10163_v4  ;;  %v1076_v0 = vmul.u32 %v1072_v41, %v1049_v53  ;;  %vm846_vm9 = vcmp.lt.s32.totalorder %v6456_v55, 0 }
 0x234   : > { %v818_v52 = vmul.f32 -0.001358992, %v817_v11  ;;  %v825_v34 = vmul.f32 -0.00019511016, %v817_v11  ;;  %v954_v5 = vsub.s32 32, %v953_v58  ;;  %v958_v61 = vsub.s32 4294967266, %v953_v58 }
 0x235   : > { %v1063_v8 = vadd.s32 %v1061_v15, %v1055_v60  ;;  %vm1064_vm10 = vc.u32 %v1062_v51, %v1058_v3  ;;  %v1078_v13 = vshll.u32 %v1075_v14, 16  ;;  %v955_v2 = vshll.u32 %v6682_v26, %v953_v58 }
 0x236   : > { %v819_v28 = vadd.f32 0.041655596, %v818_v52  ;;  %v826_v57 = vadd.f32 0.008332121, %v825_v34  ;;  %v956_v20 = vshrl.u32 %v938_v27, %v954_v5  ;;  %v1065_v30 = vsel %vm1064_vm10, 1, %v10163_v4 }
 0x237   : > { %v959_v24 = vadd.s32 127, %v958_v61  ;;  %v1057_v12 = vshrl.u32 %v1053_v45, 16  ;;  %v1067_v31 = vadd.s32 %v1065_v30, %v1063_v8  ;;  %vm6729_vm11 = vcmp.le.f32.partialorder %v844_v59, 0.7853982 }
 0x238   : > { %v820_v46 = vmul.f32 %v819_v28, %v817_v11  ;;  %v827_v38 = vmul.f32 %v826_v57, %v817_v11  ;;  %v1077_v60 = vmul.u32 %v1073_v21, %v1049_v53  ;;  %v1080_v51 = vshll.u32 %v1076_v0, 16 }
 0x239   : > { %v957_v3 = vor.u32 %v956_v20, %v955_v2  ;;  %v960_v15 = vshll.u32 %v959_v24, 23  ;;  %vm1082_vm12 = vc.u32 %v1074_v7, %v1078_v13  ;;  %v1084_v27 = vadd.s32 %v1078_v13, %v1074_v7 }
 0x23a   : > { %v821_v52 = vadd.f32 -0.4999988, %v820_v46  ;;  %v828_v34 = vadd.f32 -0.16666654, %v827_v38  ;;  %v1068_v26 = vadd.s32 %v1067_v31, %v1057_v12  ;;  %v1083_v45 = vsel %vm1082_vm12, 1, %v10163_v4 }
 0x23b   : > { %vm836_vm13 = vcmp.eq.s32.totalorder %v6692_v22, 0  ;;  %v961_v58 = vor.u32 4788187, %v960_v15  ;;  %v1038_v59 = vsel %vm1032_vm5, %v1035_v10, %v1037_v18  ;;  %v1085_v5 = vadd.s32 %v1083_v45, %v1077_v60 }
 0x23c   : > { %vm1086_vm14 = vc.u32 %v1084_v27, %v1080_v51  ;;  %v822_v53 = vmul.f32 %v821_v52, %v817_v11  ;;  %v829_v21 = vmul.f32 %v828_v34, %v817_v11  ;;  %vm835_vm15 = vcmp.lt.s32.totalorder %v6692_v22, 2 }
 0x23d   : > { %v1059_v7 = vshrl.u32 %v6710_v9, 16  ;;  %v1087_v38 = vsel %vm1086_vm14, 1, %v10163_v4  ;;  %vm832_vm0 = vweird.f32 %v6453_v54  ;;  %v962_v46 = vand.u32 2147483647, %v961_v58 }
 0x23e   : > { %v964_v61 = vcvt.s32.f32 %v957_v3  ;;  %v1079_v8 = vshrl.u32 %v1075_v14, 16  ;;  %v1089_v13 = vadd.s32 %v1087_v38, %v1085_v5  ;;  %v823_v16 = vadd.f32 1.0, %v822_v53  ;;  %v6769_v38 = vpop.permute.xlu2 %655 }
 0x23f   : > { %v830_v10 = vadd.f32 1.0, %v829_v21  ;;  %v969_v18 = vsel %vm846_vm9, %v968_v17, %v6664_v1  ;;  %v1069_v11 = vadd.s32 %v1068_v26, %v1059_v7  ;;  %v1081_v57 = vshrl.u32 %v1076_v0, 16 }
 0x240   : > { %v965_v28 = vmul.f32 %v964_v61, %v962_v46  ;;  %v1090_v9 = vadd.s32 %v1089_v13, %v1079_v8  ;;  %v1154_v20 = vand.u32 2147483647, %v6678_v63  ;;  %v840_v2 = vxor.u32 2147483648, %v823_v16 }
 0x241   : > { %v831_v30 = vmul.f32 %v830_v10, %v6717_v6  ;;  %v1088_v24 = vadd.s32 %v1084_v27, %v1080_v51  ;;  %v1157_v14 = vand.u32 2139095040, %v6678_v63  ;;  %vm839_vm1 = vcmp.eq.s32.totalorder %v6692_v22, 2 }
 0x242   : > { %v966_v12 = vxor.u32 2147483648, %v965_v28  ;;  %v971_v1 = vsel %vm6729_vm11, 0, %v969_v18  ;;  %v1091_v17 = vadd.s32 %v1090_v9, %v1081_v57  ;;  %v1161_v60 = vand.u32 8388607, %v1154_v20 }
 0x243   : > { %v837_v31 = vxor.u32 2147483648, %v831_v30  ;;  %vm1094_vm2 = vc.u32 %v1069_v11, %v1088_v24  ;;  %v1158_v0 = vshrl.u32 %v1157_v14, 23  ;;  %v1092_v51 = vmul.u32 %v6643_v33, %v1038_v59 }
 0x244   : > { %v967_v6 = vsel %vm846_vm9, %v966_v12, %v965_v28  ;;  %v1095_v3 = vadd.s32 1, %v1091_v17  ;;  %v625_v15 = vmul.f32 %v6285_v39, %v6442_v47  ;;  %v841_v52 = vsel %vm839_vm1, %v840_v2, %v831_v30 }
 0x245   : > { %v838_v27 = vsel %vm836_vm13, %v823_v16, %v837_v31  ;;  %v970_v34 = vsel %vm6729_vm11, %v6456_v55, %v967_v6  ;;  %v5846_v26 = vadd.s32 4294967169, %v1158_v0  ;;  %v988_v5 = vadd.s32 3, %v971_v1 }
 0x246   : > { %v842_v45 = vsel %vm835_vm15, %v838_v27, %v841_v52  ;;  %v972_v58 = vmul.f32 %v970_v34, %v970_v34  ;;  %v1096_v53 = vsel %vm1094_vm2, %v1095_v3, %v1091_v17  ;;  %v1162_v21 = vor.u32 8388608, %v1161_v60 }
 0x247   : > { %v843_v33 = vsel %vm832_vm0, nan, %v842_v45  ;;  %v1097_v59 = vadd.s32 %v1096_v53, %v1092_v51  ;;  %v1164_v7 = vadd.s32 1, %v5846_v26  ;;  %v6775_v22 = vadd.f32 %v6769_v38, %v625_v15 }
 0x248   : > { %v973_v46 = vmul.f32 -0.001358992, %v972_v58  ;;  %v980_v61 = vmul.f32 -0.00019511016, %v972_v58  ;;  %3169 = vst [vmem:[%s6771_s17] sm:$0xff] %v843_v33  ;;  %v989_v16 = vand.u32 3, %v988_v5  ;;  %v6777_v28 = vshll.u32 %v1162_v21, 8 }
 0x249   : > { %v1098_v41 = vadd.s32 536870912, %v1097_v59  ;;  %vm1165_vm3 = vcmp.gt.s32.totalorder %v1164_v7, 0  ;;  %v1932_v30 = vand.u32 2139095040, %v6775_v22  ;;  %vm1001_vm5 = vcmp.lt.s32.totalorder %v6459_v56, 0 }
 0x24a   : > { %v974_v8 = vadd.f32 0.041655596, %v973_v46  ;;  %v981_v13 = vadd.f32 0.008332121, %v980_v61  ;;  %v1166_v54 = vsel %vm1165_vm3, %v1164_v7, 0  ;;  %vm991_vm4 = vcmp.eq.s32.totalorder %v989_v16, 0 }
 0x24b   : > { %v1099_v10 = vshrl.u32 %v1098_v41, 30  ;;  %v1168_v18 = vand.u32 31, %v1166_v54  ;;  %vm6783_vm6 = vcmp.le.f32.partialorder %v999_v62, 0.7853982  ;;  %vm994_vm8 = vcmp.eq.s32.totalorder %v989_v16, 2 }
 0x24c   : > { %v975_v57 = vmul.f32 %v974_v8, %v972_v58  ;;  %v982_v9 = vmul.f32 %v981_v13, %v972_v58  ;;  %v1093_v0 = vadd.s32 %v1088_v24, %v1069_v11  ;;  %v6788_v6 = vand.u32 65535, %v6777_v28 }
 0x24d   : > { %v1100_v2 = vshll.u32 %v1099_v10, 30  ;;  %v1123_v14 = vsub.s32 4, %v1099_v10  ;;  %v1169_v12 = vsub.s32 32, %v1168_v18  ;;  %vm990_vm9 = vcmp.lt.s32.totalorder %v989_v16, 2 }
 0x24e   : > { %v976_v1 = vadd.f32 -0.4999988, %v975_v57  ;;  %v983_v17 = vadd.f32 -0.16666654, %v982_v9  ;;  %v6790_v15 = vshrl.u32 %v1166_v54, 5  ;;  %v1933_v27 = vshrl.u32 %v1932_v30, 23 }
 0x24f   : > { %v1101_v60 = vsub.s32 %v1097_v59, %v1100_v2  ;;  %vm987_vm10 = vweird.f32 %v6456_v55  ;;  %v6795_v52 = vsel %vm1001_vm5, %v1123_v14, %v1099_v10  ;;  %v1172_v11 = vshrl.u32 %v10155_v25, %v1169_v12 }
 0x250   : > { %v977_v51 = vmul.f32 %v976_v1, %v972_v58  ;;  %v984_v3 = vmul.f32 %v983_v17, %v972_v58  ;;  %v1175_v45 = vshrl.u32 %v10157_v29, %v1169_v12  ;;  %v1178_v58 = vshrl.u32 %v10151_v32, %v1169_v12 }
 0x251   : > { %vm1102_vm11 = vcmp.lt.s32.totalorder %v1101_v60, 0  ;;  %v1103_v62 = vsub.s32 0, %v1101_v60  ;;  %v1171_v53 = vshll.u32 %v10160_v23, %v1168_v18  ;;  %v1174_v33 = vshll.u32 %v10155_v25, %v1168_v18 }
 0x252   : > { %v978_v24 = vadd.f32 1.0, %v977_v51  ;;  %v985_v26 = vadd.f32 1.0, %v984_v3  ;;  %v10191_v59 = vmov 920167782   ;;  %v1177_v41 = vshll.u32 %v10157_v29, %v1168_v18 }
 0x253   : > { %v1104_v5 = vsel %vm1102_vm11, %v1103_v62, %v1101_v60  ;;  %v1181_v21 = vshrl.u32 %v10191_v59, %v1169_v12  ;;  %v1126_v8 = vsel %vm6783_vm6, 0, %v6795_v52  ;;  %v1170_v13 = vshrl.u32 %v10160_v23, %v1169_v12 }
 0x254   : > { %v986_v7 = vmul.f32 %v985_v26, %v970_v34  ;;  %v995_v46 = vxor.u32 2147483648, %v978_v24  ;;  %v1105_v61 = vclz %v1104_v5  ;;  %v1173_v54 = vor.u32 %v1172_v11, %v1171_v53 }
 0x255   : > { %v1180_v10 = vshll.u32 %v10151_v32, %v1168_v18  ;;  %v1176_v30 = vor.u32 %v1175_v45, %v1174_v33  ;;  %v1179_v2 = vor.u32 %v1178_v58, %v1177_v41  ;;  %v1183_v1 = vshll.u32 %v10191_v59, %v1168_v18 }
 0x256   : > { %v992_v57 = vxor.u32 2147483648, %v986_v7  ;;  %v5844_v9 = vadd.s32 4294967294, %v1105_v61  ;;  %v996_v14 = vsel %vm994_vm8, %v995_v46, %v986_v7  ;;  %v10192_v17 = vmov 1326507024  }
 0x257   : > { %v1182_v34 = vor.u32 %v1181_v21, %v1180_v10  ;;  %v1184_v51 = vshrl.u32 %v10192_v17, %v1169_v12  ;;  %vm1186_vm13 = vcmp.lt.s32.totalorder %v6790_v15, 1  ;;  %vm1187_vm14 = vcmp.lt.s32.totalorder %v6790_v15, 2 }
 0x258   : > { %v993_v3 = vsel %vm991_vm4, %v978_v24, %v992_v57  ;;  %vm5845_vm12 = vcmp.lt.s32.totalorder %v5844_v9, 0  ;;  %vm1189_vm15 = vcmp.lt.s32.totalorder %v6790_v15, 4  ;;  %vm1188_vm0 = vcmp.lt.s32.totalorder %v6790_v15, 3 }
 0x259   : > { %v997_v62 = vsel %vm990_vm9, %v993_v3, %v996_v14  ;;  %v1108_v52 = vsel %vm5845_vm12, 0, %v5844_v9  ;;  %v1185_v11 = vor.u32 %v1184_v51, %v1183_v1  ;;  %v1191_v12 = vsel %vm1189_vm15, %v1179_v2, 2102212464 }
 0x25a   : > { %v998_v26 = vsel %vm987_vm10, nan, %v997_v62  ;;  %v1109_v18 = vsub.s32 32, %v1108_v52  ;;  %v1113_v45 = vsub.s32 4294967266, %v1108_v52  ;;  %v1110_v24 = vshll.u32 %v1101_v60, %v1108_v52 }
 0x25b   : > { %v1194_v58 = vsel %vm1186_vm13, %v1173_v54, %v1176_v30  ;;  %v1195_v16 = vsel %vm1189_vm15, %v1182_v34, 920167782  ;;  %3170 = vst [vmem:[%s6771_s17 + $0x8] sm:$0xff] %v998_v26  ;;  %v1198_v55 = vsel %vm1186_vm13, %v1176_v30, %v1179_v2  ;;  %v1190_v21 = vsel %vm1186_vm13, %v1170_v13, %v1173_v54 }
 0x25c   : > { %v1111_v5 = vshrl.u32 %v1093_v0, %v1109_v18  ;;  %v1114_v53 = vadd.s32 127, %v1113_v45  ;;  %v1196_v33 = vsel %vm1188_vm0, %v1179_v2, %v1195_v16  ;;  %v1192_v7 = vsel %vm1188_vm0, %v1176_v30, %v1191_v12 }
 0x25d   : > { %v1197_v60 = vsel %vm1187_vm14, %v1194_v58, %v1196_v33  ;;  %v1199_v46 = vsel %vm1189_vm15, %v1185_v11, 1326507024  ;;  %v1204_v9 = vshrl.u32 %v6777_v28, 16  ;;  %v5861_v14 = vadd.s32 4294967169, %v1933_v27 }
 0x25e   : > { %v1112_v61 = vor.u32 %v1111_v5, %v1110_v24  ;;  %v1115_v41 = vshll.u32 %v1114_v53, 23  ;;  %v1200_v10 = vsel %vm1188_vm0, %v1182_v34, %v1199_v46  ;;  %v1227_v57 = vand.u32 65535, %v1197_v60 }
 0x25f   : > { %v1201_v0 = vsel %vm1187_vm14, %v1198_v55, %v1200_v10  ;;  %v1228_v2 = vshrl.u32 %v1197_v60, 16  ;;  %v1929_v30 = vand.u32 2147483647, %v6775_v22  ;;  %v1143_v51 = vadd.s32 3, %v1126_v8 }
 0x260   : > { %v1116_v1 = vor.u32 4788187, %v1115_v41  ;;  %v1205_v13 = vand.u32 65535, %v1201_v0  ;;  %v1206_v54 = vshrl.u32 %v1201_v0, 16  ;;  %v6841_v3 = vsel %vm1187_vm14, %v1190_v21, %v1192_v7 }
 0x261   : > { %v1230_v34 = vmul.u32 %v1228_v2, %v6788_v6  ;;  %v1231_v62 = vmul.u32 %v1227_v57, %v1204_v9  ;;  %v1119_v11 = vcvt.s32.f32 %v1112_v61  ;;  %v1229_v27 = vmul.u32 %v1227_v57, %v6788_v6 }
 0x262   : > { %v1117_v52 = vand.u32 2147483647, %v1116_v1  ;;  %v1208_v26 = vmul.u32 %v1206_v54, %v6788_v6  ;;  %v1209_v18 = vmul.u32 %v1205_v13, %v1204_v9  ;;  %v1232_v45 = vmul.u32 %v1228_v2, %v1204_v9 }
 0x263   : > { %v1233_v12 = vshll.u32 %v1230_v34, 16  ;;  %v1939_v24 = vadd.s32 1, %v5861_v14  ;;  %v1207_v8 = vmul.u32 %v1205_v13, %v6788_v6  ;;  %v1210_v16 = vmul.u32 %v1206_v54, %v1204_v9 }
 0x264   : > { %v1120_v58 = vmul.f32 %v1119_v11, %v1117_v52  ;;  %v1211_v15 = vshll.u32 %v1208_v26, 16  ;;  %v1213_v5 = vshll.u32 %v1209_v18, 16  ;;  %v1235_v53 = vshll.u32 %v1231_v62, 16 }
 0x265   : > { %vm1237_vm1 = vc.u32 %v1229_v27, %v1233_v12  ;;  %v1239_v33 = vadd.s32 %v1233_v12, %v1229_v27  ;;  %v1234_v46 = vshrl.u32 %v1230_v34, 16  ;;  %vm1940_vm8 = vcmp.gt.s32.totalorder %v1939_v24, 0 }
 0x266   : > { %v1121_v55 = vxor.u32 2147483648, %v1120_v58  ;;  %vm1215_vm2 = vc.u32 %v1207_v8, %v1211_v15  ;;  %v1217_v21 = vadd.s32 %v1211_v15, %v1207_v8  ;;  %v1238_v7 = vsel %vm1237_vm1, 1, %v10163_v4 }
 0x267   : > { %v1216_v60 = vsel %vm1215_vm2, 1, %v10163_v4  ;;  %v1240_v61 = vadd.s32 %v1238_v7, %v1232_v45  ;;  %vm1241_vm3 = vc.u32 %v1239_v33, %v1235_v53  ;;  %v1212_v14 = vshrl.u32 %v1208_v26, 16 }
 0x268   : > { %v1122_v41 = vsel %vm1001_vm5, %v1121_v55, %v1120_v58  ;;  %v1218_v6 = vadd.s32 %v1216_v60, %v1210_v16  ;;  %vm1219_vm4 = vc.u32 %v1217_v21, %v1213_v5  ;;  %v1242_v10 = vsel %vm1241_vm3, 1, %v10163_v4 }
 0x269   : > { %v1125_v57 = vsel %vm6783_vm6, %v6459_v56, %v1122_v41  ;;  %v1220_v0 = vsel %vm1219_vm4, 1, %v10163_v4  ;;  %v1244_v9 = vadd.s32 %v1242_v10, %v1240_v61  ;;  %v1941_v13 = vsel %vm1940_vm8, %v1939_v24, 0 }
 0x26a   : > { %v1127_v2 = vmul.f32 %v1125_v57, %v1125_v57  ;;  %v1222_v1 = vadd.s32 %v1220_v0, %v1218_v6  ;;  %v1236_v54 = vshrl.u32 %v1231_v62, 16  ;;  %v1936_v52 = vand.u32 8388607, %v1929_v30 }
 0x26b   : > { %v1245_v34 = vadd.s32 %v1244_v9, %v1234_v46  ;;  %v1943_v11 = vand.u32 31, %v1941_v13  ;;  %v1214_v12 = vshrl.u32 %v1209_v18, 16  ;;  %v6858_v31 = vand.u32 3, %v1143_v51 }
 0x26c   : > { %v1128_v27 = vmul.f32 -0.001358992, %v1127_v2  ;;  %v1135_v45 = vmul.f32 -0.00019511016, %v1127_v2  ;;  %v1223_v58 = vadd.s32 %v1222_v1, %v1212_v14  ;;  %v1247_v16 = vmul.u32 %v6777_v28, %v6841_v3 }
 0x26d   : > { %v1246_v8 = vadd.s32 %v1245_v34, %v1236_v54  ;;  %v6862_v15 = vsub.s32 32, %v1943_v11  ;;  %v6866_v5 = vadd.s32 %v1239_v33, %v1235_v53  ;;  %v6868_v21 = vshrl.u32 %v1941_v13, 5 }
 0x26e   : > { %v1129_v26 = vadd.f32 0.041655596, %v1128_v27  ;;  %v1136_v24 = vadd.f32 0.008332121, %v1135_v45  ;;  %v6864_v62 = vadd.s32 %v1223_v58, %v1214_v12  ;;  %v1946_v18 = vshll.u32 %v10160_v23, %v1943_v11 }
 0x26f   : > { %v1250_v55 = vadd.s32 1, %v1246_v8  ;;  %v1947_v51 = vshrl.u32 %v10155_v25, %v6862_v15  ;;  %v1950_v28 = vshrl.u32 %v10157_v29, %v6862_v15  ;;  %v1949_v53 = vshll.u32 %v10155_v25, %v1943_v11 }
 0x270   : > { %v1130_v7 = vmul.f32 %v1129_v26, %v1127_v2  ;;  %v1137_v60 = vmul.f32 %v1136_v24, %v1127_v2  ;;  %vm1249_vm5 = vc.u32 %v6864_v62, %v6866_v5  ;;  %v1952_v33 = vshll.u32 %v10157_v29, %v1943_v11 }
 0x271   : > { %v1251_v3 = vsel %vm1249_vm5, %v1250_v55, %v1246_v8  ;;  %v1953_v46 = vshrl.u32 %v10151_v32, %v6862_v15  ;;  %v1948_v10 = vor.u32 %v1947_v51, %v1946_v18  ;;  %v1955_v0 = vshll.u32 %v10151_v32, %v1943_v11 }
 0x272   : > { %v1131_v61 = vadd.f32 -0.4999988, %v1130_v7  ;;  %v1138_v41 = vadd.f32 -0.16666654, %v1137_v60  ;;  %v1252_v6 = vadd.s32 %v1251_v3, %v1247_v16  ;;  %v1956_v9 = vshrl.u32 %v10191_v59, %v6862_v15 }
 0x273   : > { %v1958_v14 = vshll.u32 %v10191_v59, %v1943_v11  ;;  %v1959_v1 = vshrl.u32 %v10192_v17, %v6862_v15  ;;  %v6887_v27 = vor.u32 %v1950_v28, %v1949_v53  ;;  %vm1142_vm6 = vweird.f32 %v6459_v56 }
 0x274   : > { %v1132_v13 = vmul.f32 %v1131_v61, %v1127_v2  ;;  %v1139_v54 = vmul.f32 %v1138_v41, %v1127_v2  ;;  %v1253_v34 = vadd.s32 536870912, %v1252_v6  ;;  %v1937_v45 = vor.u32 8388608, %v1936_v52 }
 0x275   : > { %v1954_v12 = vor.u32 %v1953_v46, %v1952_v33  ;;  %v1957_v58 = vor.u32 %v1956_v9, %v1955_v0  ;;  %v1960_v8 = vor.u32 %v1959_v1, %v1958_v14  ;;  %vm1964_vm9 = vcmp.lt.s32.totalorder %v6868_v21, 4 }
 0x276   : > { %v1133_v16 = vadd.f32 1.0, %v1132_v13  ;;  %v1140_v26 = vadd.f32 1.0, %v1139_v54  ;;  %v6890_v24 = vshrl.u32 %v1253_v34, 30  ;;  %v626_v11 = vmul.f32 %v6285_v39, %v6444_v49 }
 0x277   : > { %vm1961_vm10 = vcmp.lt.s32.totalorder %v6868_v21, 1  ;;  %vm1963_vm11 = vcmp.lt.s32.totalorder %v6868_v21, 3  ;;  %v1970_v2 = vsel %vm1964_vm9, %v1957_v58, 920167782  ;;  %vm1145_vm12 = vcmp.lt.s32.totalorder %v6858_v31, 2 }
 0x278   : > { %v1141_v52 = vmul.f32 %v1140_v26, %v1125_v57  ;;  %v1150_v55 = vxor.u32 2147483648, %v1133_v16  ;;  %v1255_v18 = vshll.u32 %v6890_v24, 30  ;;  %v1969_v51 = vsel %vm1961_vm10, %v1948_v10, %v6887_v27 }
 0x279   : > { %v1971_v7 = vsel %vm1963_vm11, %v1954_v12, %v1970_v2  ;;  %v1974_v60 = vsel %vm1964_vm9, %v1960_v8, 1326507024  ;;  %v6908_v28 = vshll.u32 %v1937_v45, 8  ;;  %vm1962_vm13 = vcmp.lt.s32.totalorder %v6868_v21, 2 }
 0x27a   : > { %v1147_v3 = vxor.u32 2147483648, %v1141_v52  ;;  %v1256_v53 = vsub.s32 %v1252_v6, %v1255_v18  ;;  %v1973_v57 = vsel %vm1961_vm10, %v6887_v27, %v1954_v12  ;;  %vm1146_vm14 = vcmp.eq.s32.totalorder %v6858_v31, 0 }
 0x27b   : > { %vm1149_vm15 = vcmp.eq.s32.totalorder %v6858_v31, 2  ;;  %v1972_v33 = vsel %vm1962_vm13, %v1969_v51, %v1971_v7  ;;  %v1975_v46 = vsel %vm1963_vm11, %v1957_v58, %v1974_v60  ;;  %v1945_v9 = vshrl.u32 %v10160_v23, %v6862_v15 }
 0x27c   : > { %v1148_v61 = vsel %vm1146_vm14, %v1133_v16, %v1147_v3  ;;  %v1151_v41 = vsel %vm1149_vm15, %v1150_v55, %v1141_v52  ;;  %vm1257_vm0 = vcmp.lt.s32.totalorder %v1256_v53, 0  ;;  %v1258_v6 = vsub.s32 0, %v1256_v53 }
 0x27d   : > { %v1152_v0 = vsel %vm1145_vm12, %v1148_v61, %v1151_v41  ;;  %v1976_v14 = vsel %vm1962_vm13, %v1973_v57, %v1975_v46  ;;  %v1978_v1 = vand.u32 65535, %v6908_v28  ;;  %v2002_v45 = vand.u32 65535, %v1972_v33 }
 0x27e   : > { %v1153_v13 = vsel %vm1142_vm6, nan, %v1152_v0  ;;  %v1259_v54 = vsel %vm1257_vm0, %v1258_v6, %v1256_v53  ;;  %v1980_v34 = vand.u32 65535, %v1976_v14  ;;  %v1979_v8 = vshrl.u32 %v6908_v28, 16 }
 0x27f   : > { %v1260_v58 = vclz %v1259_v54  ;;  %3171 = vst [vmem:[%s6771_s17 + $0x10] sm:$0xff] %v1153_v13  ;;  %v1981_v31 = vshrl.u32 %v1976_v14, 16  ;;  %v2003_v16 = vshrl.u32 %v1972_v33, 16  ;;  %v1248_v15 = vadd.s32 %v6866_v5, %v6864_v62 }
 0x280   : > { %v6934_v26 = vadd.f32 %v6769_v38, %v626_v11  ;;  %v1965_v56 = vsel %vm1961_vm10, %v1945_v9, %v1948_v10  ;;  %v1984_v55 = vmul.u32 %v1980_v34, %v1979_v8  ;;  %vm1156_vm1 = vcmp.lt.s32.totalorder %v6678_v63, 0 }
 0x281   : > { %v5847_v2 = vadd.s32 4294967294, %v1260_v58  ;;  %v1983_v52 = vmul.u32 %v1981_v31, %v1978_v1  ;;  %v1278_v18 = vsub.s32 4, %v6890_v24  ;;  %v1966_v51 = vsel %vm1964_vm9, %v1954_v12, 2102212464 }
 0x282   : > { %v2005_v7 = vmul.u32 %v2003_v16, %v1978_v1  ;;  %v2006_v60 = vmul.u32 %v2002_v45, %v1979_v8  ;;  %v1982_v62 = vmul.u32 %v1980_v34, %v1978_v1  ;;  %v2004_v11 = vmul.u32 %v2002_v45, %v1978_v1 }
 0x283   : > { %vm5848_vm2 = vcmp.lt.s32.totalorder %v5847_v2, 0  ;;  %v1986_v5 = vshll.u32 %v1983_v52, 16  ;;  %v1985_v57 = vmul.u32 %v1981_v31, %v1979_v8  ;;  %v2007_v33 = vmul.u32 %v2003_v16, %v1979_v8 }
 0x284   : > { %v1263_v3 = vsel %vm5848_vm2, 0, %v5847_v2  ;;  %v2008_v46 = vshll.u32 %v2005_v7, 16  ;;  %v1988_v41 = vshll.u32 %v1984_v55, 16  ;;  %v2010_v14 = vshll.u32 %v2006_v60, 16 }
 0x285   : > { %v1264_v10 = vsub.s32 32, %v1263_v3  ;;  %v1268_v61 = vsub.s32 4294967266, %v1263_v3  ;;  %vm1990_vm3 = vc.u32 %v1982_v62, %v1986_v5  ;;  %v1265_v6 = vshll.u32 %v1256_v53, %v1263_v3 }
 0x286   : > { %v1991_v0 = vsel %vm1990_vm3, 1, %v10163_v4  ;;  %v1992_v9 = vadd.s32 %v1986_v5, %v1982_v62  ;;  %vm2012_vm4 = vc.u32 %v2004_v11, %v2008_v46  ;;  %v2014_v34 = vadd.s32 %v2008_v46, %v2004_v11 }
 0x287   : > { %v1266_v12 = vshrl.u32 %v1248_v15, %v1264_v10  ;;  %v1269_v13 = vadd.s32 127, %v1268_v61  ;;  %v1993_v54 = vadd.s32 %v1991_v0, %v1985_v57  ;;  %v2013_v1 = vsel %vm2012_vm4, 1, %v10163_v4 }
 0x288   : > { %vm1994_vm8 = vc.u32 %v1992_v9, %v1988_v41  ;;  %v10150_v45 = vand.u32 2147483647, %v6934_v26  ;;  %v2015_v16 = vadd.s32 %v2013_v1, %v2007_v33  ;;  %v1967_v53 = vsel %vm1963_vm11, %v6887_v27, %v1966_v51  ;;  %v6968_v1 = vpop.permute.xlu1 %650 }
 0x289   : > { %v1267_v58 = vor.u32 %v1266_v12, %v1265_v6  ;;  %v1270_v8 = vshll.u32 %v1269_v13, 23  ;;  %v1995_v31 = vsel %vm1994_vm8, 1, %v10163_v4  ;;  %v1987_v2 = vshrl.u32 %v1983_v52, 16 }
 0x28a   : > { %v1997_v15 = vadd.s32 %v1995_v31, %v1993_v54  ;;  %vm2016_vm5 = vc.u32 %v2014_v34, %v2010_v14  ;;  %v1279_v5 = vsel %vm1156_vm1, %v1278_v18, %v6890_v24  ;;  %v1989_v11 = vshrl.u32 %v1984_v55, 16 }
 0x28b   : > { %v1271_v62 = vor.u32 4788187, %v1270_v8  ;;  %v2017_v3 = vsel %vm2016_vm5, 1, %v10163_v4  ;;  %v2009_v46 = vshrl.u32 %v2005_v7, 16  ;;  %v2087_v33 = vand.u32 2139095040, %v6934_v26 }
 0x28c   : > { %v1998_v57 = vadd.s32 %v1997_v15, %v1987_v2  ;;  %v2019_v10 = vadd.s32 %v2017_v3, %v2015_v16  ;;  %v1274_v41 = vcvt.s32.f32 %v1267_v58  ;;  %v2011_v6 = vshrl.u32 %v2006_v60, 16 }
 0x28d   : > { %v1272_v61 = vand.u32 2147483647, %v1271_v62  ;;  %v2091_v27 = vand.u32 8388607, %v10150_v45  ;;  %v2088_v0 = vshrl.u32 %v2087_v33, 23  ;;  %v623_v24 = vmul.f32 %v6287_v40, %v6442_v47 }
 0x28e   : > { %v1999_v52 = vadd.s32 %v1998_v57, %v1989_v11  ;;  %v2020_v51 = vadd.s32 %v2019_v10, %v2009_v46  ;;  %v2018_v18 = vadd.s32 %v2014_v34, %v2010_v14  ;;  %vm6960_vm6 = vcmp.le.f32.partialorder %v1154_v20, 0.7853982 }
 0x28f   : > { %v1275_v55 = vmul.f32 %v1274_v41, %v1272_v61  ;;  %v1968_v60 = vsel %vm1962_vm13, %v1965_v56, %v1967_v53  ;;  %v5864_v12 = vadd.s32 4294967169, %v2088_v0  ;;  %v1281_v54 = vsel %vm6960_vm6, 0, %v1279_v5 }
 0x290   : > { %v2021_v9 = vadd.s32 %v2020_v51, %v2011_v6  ;;  %vm2024_vm9 = vc.u32 %v1999_v52, %v2018_v18  ;;  %v2092_v14 = vor.u32 8388608, %v2091_v27  ;;  %v6971_v20 = vadd.f32 %v6968_v1, %v623_v24 }
 0x291   : > { %v1276_v13 = vxor.u32 2147483648, %v1275_v55  ;;  %v2094_v34 = vadd.s32 1, %v5864_v12  ;;  %v2022_v21 = vmul.u32 %v6908_v28, %v1968_v60  ;;  %v1298_v53 = vadd.s32 3, %v1281_v54 }
 0x292   : > { %v2025_v58 = vadd.s32 1, %v2021_v9  ;;  %v6979_v5 = vshll.u32 %v2092_v14, 8  ;;  %v1622_v11 = vand.u32 2139095040, %v6971_v20  ;;  %v6986_v6 = vadd.s32 %v2018_v18, %v1999_v52 }
 0x293   : > { %v1277_v8 = vsel %vm1156_vm1, %v1276_v13, %v1275_v55  ;;  %vm2095_vm10 = vcmp.gt.s32.totalorder %v2094_v34, 0  ;;  %v6984_v61 = vand.u32 3, %v1298_v53  ;;  %v10153_v51 = vand.u32 2147483647, %v6971_v20 }
 0x294   : > { %v1280_v56 = vsel %vm6960_vm6, %v6678_v63, %v1277_v8  ;;  %v2026_v31 = vsel %vm2024_vm9, %v2025_v58, %v2021_v9  ;;  %v2096_v15 = vsel %vm2095_vm10, %v2094_v34, 0  ;;  %v6989_v27 = vand.u32 65535, %v6979_v5 }
 0x295   : > { %v1282_v16 = vmul.f32 %v1280_v56, %v1280_v56  ;;  %v2027_v2 = vadd.s32 %v2026_v31, %v2022_v21  ;;  %v2098_v62 = vand.u32 31, %v2096_v15  ;;  %v1623_v0 = vshrl.u32 %v1622_v11, 23 }
 0x296   : > { %vm1931_vm11 = vcmp.lt.s32.totalorder %v6775_v22, 0  ;;  %v6993_v60 = vshrl.u32 %v2096_v15, 5  ;;  %vm1304_vm12 = vcmp.eq.s32.totalorder %v6984_v61, 2  ;;  %vm1301_vm13 = vcmp.eq.s32.totalorder %v6984_v61, 0 }
 0x297   : > { %v1283_v3 = vmul.f32 -0.001358992, %v1282_v16  ;;  %v1290_v57 = vmul.f32 -0.00019511016, %v1282_v16  ;;  %v2028_v46 = vadd.s32 536870912, %v2027_v2  ;;  %v6982_v10 = vsub.s32 32, %v2098_v62 }
 0x298   : > { %v2101_v9 = vshll.u32 %v10160_v23, %v2098_v62  ;;  %v2104_v14 = vshll.u32 %v10155_v25, %v2098_v62  ;;  %v2107_v34 = vshll.u32 %v10157_v29, %v2098_v62  ;;  %v2110_v21 = vshll.u32 %v10151_v32, %v2098_v62 }
 0x299   : > { %v1284_v28 = vadd.f32 0.041655596, %v1283_v3  ;;  %v1291_v33 = vadd.f32 0.008332121, %v1290_v57  ;;  %v2029_v41 = vshrl.u32 %v2028_v46, 30  ;;  %v2102_v12 = vshrl.u32 %v10155_v25, %v6982_v10 }
 0x29a   : > { %v2105_v52 = vshrl.u32 %v10157_v29, %v6982_v10  ;;  %v2111_v18 = vshrl.u32 %v10191_v59, %v6982_v10  ;;  %v2108_v8 = vshrl.u32 %v10151_v32, %v6982_v10  ;;  %v2114_v31 = vshrl.u32 %v10192_v17, %v6982_v10 }
 0x29b   : > { %v1285_v24 = vmul.f32 %v1284_v28, %v1282_v16  ;;  %v1292_v55 = vmul.f32 %v1291_v33, %v1282_v16  ;;  %v2030_v7 = vshll.u32 %v2029_v41, 30  ;;  %vm1300_vm14 = vcmp.lt.s32.totalorder %v6984_v61, 2 }
 0x29c   : > { %vm1297_vm0 = vweird.f32 %v6678_v63  ;;  %v2053_v11 = vsub.s32 4, %v2029_v41  ;;  %v2103_v3 = vor.u32 %v2102_v12, %v2101_v9  ;;  %v2106_v57 = vor.u32 %v2105_v52, %v2104_v14 }
 0x29d   : > { %v1286_v13 = vadd.f32 -0.4999988, %v1285_v24  ;;  %v1293_v54 = vadd.f32 -0.16666654, %v1292_v55  ;;  %v7003_v58 = vsub.s32 %v2027_v2, %v2030_v7  ;;  %v2112_v46 = vor.u32 %v2111_v18, %v2110_v21 }
 0x29e   : > { %v2113_v55 = vshll.u32 %v10191_v59, %v2098_v62  ;;  %vm7024_vm1 = vcmp.le.f32.partialorder %v1929_v30, 0.7853982  ;;  %vm2116_vm2 = vcmp.lt.s32.totalorder %v6993_v60, 1  ;;  %v7031_v62 = vsel %vm1931_vm11, %v2053_v11, %v2029_v41 }
 0x29f   : > { %v1287_v53 = vmul.f32 %v1286_v13, %v1282_v16  ;;  %v1294_v15 = vmul.f32 %v1293_v54, %v1282_v16  ;;  %vm2032_vm15 = vcmp.lt.s32.totalorder %v7003_v58, 0  ;;  %v2033_v2 = vsub.s32 0, %v7003_v58 }
 0x2a0   : > { %v2109_v16 = vor.u32 %v2108_v8, %v2107_v34  ;;  %v2134_v13 = vshrl.u32 %v6979_v5, 16  ;;  %v7020_v54 = vadd.s32 4294967169, %v1623_v0  ;;  %v2115_v12 = vor.u32 %v2114_v31, %v2113_v55 }
 0x2a1   : > { %v1288_v28 = vadd.f32 1.0, %v1287_v53  ;;  %v1295_v33 = vadd.f32 1.0, %v1294_v15  ;;  %v2034_v24 = vsel %vm2032_vm15, %v2033_v2, %v7003_v58  ;;  %vm2119_vm3 = vcmp.lt.s32.totalorder %v6993_v60, 4 }
 0x2a2   : > { %v2035_v7 = vclz %v2034_v24  ;;  %vm2117_vm4 = vcmp.lt.s32.totalorder %v6993_v60, 2  ;;  %vm2118_vm8 = vcmp.lt.s32.totalorder %v6993_v60, 3  ;;  %v2125_v30 = vsel %vm2119_vm3, %v2112_v46, 920167782 }
 0x2a3   : > { %v1296_v45 = vmul.f32 %v1295_v33, %v1280_v56  ;;  %v1305_v32 = vxor.u32 2147483648, %v1288_v28  ;;  %v2124_v56 = vsel %vm2116_vm2, %v2103_v3, %v2106_v57  ;;  %v2126_v41 = vsel %vm2118_vm8, %v2109_v16, %v2125_v30 }
 0x2a4   : > { %v5862_v52 = vadd.s32 4294967294, %v2035_v7  ;;  %v2128_v14 = vsel %vm2116_vm2, %v2106_v57, %v2109_v16  ;;  %v2127_v21 = vsel %vm2117_vm4, %v2124_v56, %v2126_v41  ;;  %v2129_v31 = vsel %vm2119_vm3, %v2115_v12, 1326507024 }
 0x2a5   : > { %v1302_v0 = vxor.u32 2147483648, %v1296_v45  ;;  %v1306_v18 = vsel %vm1304_vm12, %v1305_v32, %v1296_v45  ;;  %v2121_v15 = vsel %vm2119_vm3, %v2109_v16, 2102212464  ;;  %v2130_v11 = vsel %vm2118_vm8, %v2112_v46, %v2129_v31 }
 0x2a6   : > { %vm5863_vm5 = vcmp.lt.s32.totalorder %v5862_v52, 0  ;;  %v2158_v33 = vshrl.u32 %v2127_v21, 16  ;;  %v2131_v7 = vsel %vm2117_vm4, %v2128_v14, %v2130_v11  ;;  %v2100_v16 = vshrl.u32 %v10160_v23, %v6982_v10 }
 0x2a7   : > { %v1303_v34 = vsel %vm1301_vm13, %v1288_v28, %v1302_v0  ;;  %v2038_v8 = vsel %vm5863_vm5, 0, %v5862_v52  ;;  %v2157_v28 = vand.u32 65535, %v2127_v21  ;;  %v2135_v12 = vand.u32 65535, %v2131_v7 }
 0x2a8   : > { %v1307_v32 = vsel %vm1300_vm14, %v1303_v34, %v1306_v18  ;;  %v2039_v45 = vsub.s32 32, %v2038_v8  ;;  %v2043_v53 = vsub.s32 4294967266, %v2038_v8  ;;  %v2040_v24 = vshll.u32 %v7003_v58, %v2038_v8 }
 0x2a9   : > { %v1308_v2 = vsel %vm1297_vm0, nan, %v1307_v32  ;;  %v2136_v63 = vshrl.u32 %v2131_v7, 16  ;;  %v2160_v52 = vmul.u32 %v2158_v33, %v6989_v27  ;;  %v2056_v0 = vsel %vm7024_vm1, 0, %v7031_v62 }
 0x2aa   : > { %3172 = vst [vmem:[%s6771_s17 + $0x18] sm:$0xff] %v1308_v2  ;;  %v2041_v55 = vshrl.u32 %v6986_v6, %v2039_v45  ;;  %v2044_v61 = vadd.s32 127, %v2043_v53  ;;  %v2161_v58 = vmul.u32 %v2157_v28, %v2134_v13  ;;  %v2120_v6 = vsel %vm2116_vm2, %v2100_v16, %v2103_v3 }
 0x2ab   : > { %v2122_v30 = vsel %vm2118_vm8, %v2106_v57, %v2121_v15  ;;  %v2138_v18 = vmul.u32 %v2136_v63, %v6989_v27  ;;  %v2139_v10 = vmul.u32 %v2135_v12, %v2134_v13  ;;  %v2159_v14 = vmul.u32 %v2157_v28, %v6989_v27 }
 0x2ac   : > { %v2042_v56 = vor.u32 %v2041_v55, %v2040_v24  ;;  %v2045_v46 = vshll.u32 %v2044_v61, 23  ;;  %v2162_v34 = vmul.u32 %v2158_v33, %v2134_v13  ;;  %v2163_v8 = vshll.u32 %v2160_v52, 16 }
 0x2ad   : > { %v2137_v31 = vmul.u32 %v2135_v12, %v6989_v27  ;;  %v2140_v32 = vmul.u32 %v2136_v63, %v2134_v13  ;;  %v2141_v62 = vshll.u32 %v2138_v18, 16  ;;  %v2143_v53 = vshll.u32 %v2139_v10, 16 }
 0x2ae   : > { %v2046_v41 = vor.u32 4788187, %v2045_v46  ;;  %v2049_v21 = vcvt.s32.f32 %v2042_v56  ;;  %v2165_v2 = vshll.u32 %v2161_v58, 16  ;;  %vm2167_vm6 = vc.u32 %v2159_v14, %v2163_v8 }
 0x2af   : > { %vm2145_vm9 = vc.u32 %v2137_v31, %v2141_v62  ;;  %v2147_v3 = vadd.s32 %v2141_v62, %v2137_v31  ;;  %v2168_v57 = vsel %vm2167_vm6, 1, %v10163_v4  ;;  %v2169_v15 = vadd.s32 %v2163_v8, %v2159_v14 }
 0x2b0   : > { %v2047_v45 = vand.u32 2147483647, %v2046_v41  ;;  %v2146_v24 = vsel %vm2145_vm9, 1, %v10163_v4  ;;  %v2170_v28 = vadd.s32 %v2168_v57, %v2162_v34  ;;  %v1629_v33 = vadd.s32 1, %v7020_v54 }
 0x2b1   : > { %v2148_v55 = vadd.s32 %v2146_v24, %v2140_v32  ;;  %vm2149_vm10 = vc.u32 %v2147_v3, %v2143_v53  ;;  %v2164_v27 = vshrl.u32 %v2160_v52, 16  ;;  %vm2171_vm12 = vc.u32 %v2169_v15, %v2165_v2 }
 0x2b2   : > { %v2050_v11 = vmul.f32 %v2049_v21, %v2047_v45  ;;  %v2150_v61 = vsel %vm2149_vm10, 1, %v10163_v4  ;;  %v2172_v7 = vsel %vm2171_vm12, 1, %v10163_v4  ;;  %vm1630_vm13 = vcmp.gt.s32.totalorder %v1629_v33, 0 }
 0x2b3   : > { %v2142_v16 = vshrl.u32 %v2138_v18, 16  ;;  %v2152_v12 = vadd.s32 %v2150_v61, %v2148_v55  ;;  %v2174_v63 = vadd.s32 %v2172_v7, %v2170_v28  ;;  %v1631_v56 = vsel %vm1630_vm13, %v1629_v33, 0 }
 0x2b4   : > { %v2051_v13 = vxor.u32 2147483648, %v2050_v11  ;;  %v2123_v54 = vsel %vm2117_vm4, %v2120_v6, %v2122_v30  ;;  %v2144_v41 = vshrl.u32 %v2139_v10, 16  ;;  %v1633_v14 = vand.u32 31, %v1631_v56 }
 0x2b5   : > { %v2153_v34 = vadd.s32 %v2152_v12, %v2142_v16  ;;  %v2166_v8 = vshrl.u32 %v2161_v58, 16  ;;  %v2175_v21 = vadd.s32 %v2174_v63, %v2164_v27  ;;  %v1626_v18 = vand.u32 8388607, %v10153_v51 }
 0x2b6   : > { %v2052_v46 = vsel %vm1931_vm11, %v2051_v13, %v2050_v11  ;;  %v7092_v32 = vsub.s32 32, %v1633_v14  ;;  %v2073_v62 = vadd.s32 3, %v2056_v0  ;;  %v7096_v60 = vadd.s32 %v2169_v15, %v2165_v2 }
 0x2b7   : > { %v2055_v52 = vsel %vm7024_vm1, %v6775_v22, %v2052_v46  ;;  %v7094_v45 = vadd.s32 %v2153_v34, %v2144_v41  ;;  %v2176_v6 = vadd.s32 %v2175_v21, %v2166_v8  ;;  %v2177_v9 = vmul.u32 %v6979_v5, %v2123_v54 }
 0x2b8   : > { %v2057_v31 = vmul.f32 %v2055_v52, %v2055_v52  ;;  %v7099_v53 = vshrl.u32 %v1631_v56, 5  ;;  %v1636_v3 = vshll.u32 %v10160_v23, %v1633_v14  ;;  %v1640_v0 = vshrl.u32 %v10157_v29, %v7092_v32 }
 0x2b9   : > { %vm2179_vm11 = vc.u32 %v7094_v45, %v7096_v60  ;;  %v2180_v58 = vadd.s32 1, %v2176_v6  ;;  %v1639_v2 = vshll.u32 %v10155_v25, %v1633_v14  ;;  %v10197_v15 = vmov 2102212464  }
 0x2ba   : > { %v2058_v30 = vmul.f32 -0.001358992, %v2057_v31  ;;  %v2065_v10 = vmul.f32 -0.00019511016, %v2057_v31  ;;  %v1643_v24 = vshrl.u32 %v10197_v15, %v7092_v32  ;;  %v1637_v5 = vshrl.u32 %v10155_v25, %v7092_v32 }
 0x2bb   : > { %v2181_v28 = vsel %vm2179_vm11, %v2180_v58, %v2176_v6  ;;  %v1645_v33 = vshll.u32 %v10197_v15, %v1633_v14  ;;  %v1646_v55 = vshrl.u32 %v10191_v59, %v7092_v32  ;;  %v1642_v7 = vshll.u32 %v10157_v29, %v1633_v14 }
 0x2bc   : > { %v2059_v57 = vadd.f32 0.041655596, %v2058_v30  ;;  %v2066_v11 = vadd.f32 0.008332121, %v2065_v10  ;;  %v2182_v61 = vadd.s32 %v2181_v28, %v2177_v9  ;;  %v7115_v16 = vor.u32 %v1640_v0, %v1639_v2 }
 0x2bd   : > { %v1647_v12 = vor.u32 %v1646_v55, %v1645_v33  ;;  %v1648_v63 = vshll.u32 %v10191_v59, %v1633_v14  ;;  %v1649_v56 = vshrl.u32 %v10192_v17, %v7092_v32  ;;  %v1644_v34 = vor.u32 %v1643_v24, %v1642_v7 }
 0x2be   : > { %v2060_v27 = vmul.f32 %v2059_v57, %v2057_v31  ;;  %v2067_v13 = vmul.f32 %v2066_v11, %v2057_v31  ;;  %v2183_v41 = vadd.s32 536870912, %v2182_v61  ;;  %v2074_v8 = vand.u32 3, %v2073_v62 }
 0x2bf   : > { %v1627_v21 = vor.u32 8388608, %v1626_v18  ;;  %v7120_v6 = vor.u32 %v1637_v5, %v1636_v3  ;;  %v1650_v30 = vor.u32 %v1649_v56, %v1648_v63  ;;  %vm1654_vm14 = vcmp.lt.s32.totalorder %v7099_v53, 4 }
 0x2c0   : > { %v2061_v46 = vadd.f32 -0.4999988, %v2060_v27  ;;  %v2068_v54 = vadd.f32 -0.16666654, %v2067_v13  ;;  %v7122_v58 = vshrl.u32 %v2183_v41, 30  ;;  %vm2072_vm15 = vweird.f32 %v6775_v22 }
 0x2c1   : > { %vm1651_vm0 = vcmp.lt.s32.totalorder %v7099_v53, 1  ;;  %vm1653_vm1 = vcmp.lt.s32.totalorder %v7099_v53, 3  ;;  %v1660_v14 = vsel %vm1654_vm14, %v1647_v12, 920167782  ;;  %v1664_v18 = vsel %vm1654_vm14, %v1650_v30, 1326507024 }
 0x2c2   : > { %v2062_v10 = vmul.f32 %v2061_v46, %v2057_v31  ;;  %v2069_v9 = vmul.f32 %v2068_v54, %v2057_v31  ;;  %v2185_v31 = vshll.u32 %v7122_v58, 30  ;;  %v1663_v0 = vsel %vm1651_vm0, %v7115_v16, %v1644_v34 }
 0x2c3   : > { %v1659_v57 = vsel %vm1651_vm0, %v7120_v6, %v7115_v16  ;;  %v1661_v11 = vsel %vm1653_vm1, %v1644_v34, %v1660_v14  ;;  %v1665_v2 = vsel %vm1653_vm1, %v1647_v12, %v1664_v18  ;;  %v7144_v24 = vshll.u32 %v1627_v21, 8 }
 0x2c4   : > { %v2063_v62 = vadd.f32 1.0, %v2062_v10  ;;  %v2070_v3 = vadd.f32 1.0, %v2069_v9  ;;  %v2186_v33 = vsub.s32 %v2182_v61, %v2185_v31  ;;  %vm1652_vm2 = vcmp.lt.s32.totalorder %v7099_v53, 2 }
 0x2c5   : > { %vm2075_vm3 = vcmp.lt.s32.totalorder %v2074_v8, 2  ;;  %vm2076_vm4 = vcmp.eq.s32.totalorder %v2074_v8, 0  ;;  %v624_v55 = vmul.f32 %v6287_v40, %v6444_v49  ;;  %v1666_v27 = vsel %vm1652_vm2, %v1663_v0, %v1665_v2 }
 0x2c6   : > { %v2071_v28 = vmul.f32 %v2070_v3, %v2055_v52  ;;  %v2080_v5 = vxor.u32 2147483648, %v2063_v62  ;;  %vm2187_vm8 = vcmp.lt.s32.totalorder %v2186_v33, 0  ;;  %v2188_v7 = vsub.s32 0, %v2186_v33 }
 0x2c7   : > { %v1662_v12 = vsel %vm1652_vm2, %v1659_v57, %v1661_v11  ;;  %vm2079_vm5 = vcmp.eq.s32.totalorder %v2074_v8, 2  ;;  %v1668_v52 = vand.u32 65535, %v7144_v24  ;;  %v1670_v61 = vand.u32 65535, %v1666_v27 }
 0x2c8   : > { %v2077_v13 = vxor.u32 2147483648, %v2071_v28  ;;  %v1671_v63 = vshrl.u32 %v1666_v27, 16  ;;  %v2081_v46 = vsel %vm2079_vm5, %v2080_v5, %v2071_v28  ;;  %v2189_v54 = vsel %vm2187_vm8, %v2188_v7, %v2186_v33 }
 0x2c9   : > { %v1669_v41 = vshrl.u32 %v7144_v24, 16  ;;  %v2190_v30 = vclz %v2189_v54  ;;  %v7157_v10 = vadd.f32 %v6968_v1, %v624_v55  ;;  %v1693_v9 = vshrl.u32 %v1662_v12, 16 }
 0x2ca   : > { %v2078_v56 = vsel %vm2076_vm4, %v2063_v62, %v2077_v13  ;;  %v1673_v18 = vmul.u32 %v1671_v63, %v1668_v52  ;;  %v1692_v31 = vand.u32 65535, %v1662_v12  ;;  %v2178_v62 = vadd.s32 %v7096_v60, %v7094_v45 }
 0x2cb   : > { %v2082_v21 = vsel %vm2075_vm3, %v2078_v56, %v2081_v46  ;;  %v1674_v3 = vmul.u32 %v1670_v61, %v1669_v41  ;;  %v5865_v0 = vadd.s32 4294967294, %v2190_v30  ;;  %v1635_v8 = vshrl.u32 %v10160_v23, %v7092_v32 }
 0x2cc   : > { %v2083_v14 = vsel %vm2072_vm15, nan, %v2082_v21  ;;  %v1656_v57 = vsel %vm1654_vm14, %v1644_v34, 2102212464  ;;  %v2208_v11 = vsub.s32 4, %v7122_v58  ;;  %v1672_v2 = vmul.u32 %v1670_v61, %v1668_v52 }
 0x2cd   : > { %3177 = vst [vmem:[%s6771_s17 + $0x40] sm:$0xff] %v2083_v14  ;;  %v1675_v28 = vmul.u32 %v1671_v63, %v1669_v41  ;;  %v1676_v22 = vshll.u32 %v1673_v18, 16  ;;  %vm2086_vm6 = vcmp.lt.s32.totalorder %v6934_v26, 0  ;;  %vm5866_vm9 = vcmp.lt.s32.totalorder %v5865_v0, 0 }
 0x2ce   : > { %v1677_v5 = vshrl.u32 %v1673_v18, 16  ;;  %v1678_v55 = vshll.u32 %v1674_v3, 16  ;;  %v1695_v27 = vmul.u32 %v1693_v9, %v1668_v52  ;;  %v2193_v45 = vsel %vm5866_vm9, 0, %v5865_v0 }
 0x2cf   : > { %vm1680_vm10 = vc.u32 %v1672_v2, %v1676_v22  ;;  %v1682_v60 = vadd.s32 %v1676_v22, %v1672_v2  ;;  %v1696_v13 = vmul.u32 %v1692_v31, %v1669_v41  ;;  %v2194_v7 = vsub.s32 32, %v2193_v45 }
 0x2d0   : > { %v2198_v32 = vsub.s32 4294967266, %v2193_v45  ;;  %v1681_v12 = vsel %vm1680_vm10, 1, %v10163_v4  ;;  %v1694_v34 = vmul.u32 %v1692_v31, %v1668_v52  ;;  %v1697_v61 = vmul.u32 %v1693_v9, %v1669_v41 }
 0x2d1   : > { %v1683_v56 = vadd.s32 %v1681_v12, %v1675_v28  ;;  %vm1684_vm12 = vc.u32 %v1682_v60, %v1678_v55  ;;  %v1698_v63 = vshll.u32 %v1695_v27, 16  ;;  %v2195_v46 = vshll.u32 %v2186_v33, %v2193_v45 }
 0x2d2   : > { %v2196_v54 = vshrl.u32 %v2178_v62, %v2194_v7  ;;  %v2199_v21 = vadd.s32 127, %v2198_v32  ;;  %v1685_v30 = vsel %vm1684_vm12, 1, %v10163_v4  ;;  %v1700_v18 = vshll.u32 %v1696_v13, 16 }
 0x2d3   : > { %v1687_v14 = vadd.s32 %v1685_v30, %v1683_v56  ;;  %vm1702_vm13 = vc.u32 %v1694_v34, %v1698_v63  ;;  %v1704_v0 = vadd.s32 %v1698_v63, %v1694_v34  ;;  %v1655_v51 = vsel %vm1651_vm0, %v1635_v8, %v7120_v6 }
 0x2d4   : > { %v2197_v2 = vor.u32 %v2196_v54, %v2195_v46  ;;  %v2200_v22 = vshll.u32 %v2199_v21, 23  ;;  %v1703_v52 = vsel %vm1702_vm13, 1, %v10163_v4  ;;  %v10154_v33 = vand.u32 2147483647, %v7157_v10  ;;  %v7199_v21 = vpop.permute.xlu2 %670 }
 0x2d5   : > { %v1688_v31 = vadd.s32 %v1687_v14, %v1677_v5  ;;  %v1705_v41 = vadd.s32 %v1703_v52, %v1697_v61  ;;  %vm1706_vm11 = vc.u32 %v1704_v0, %v1700_v18  ;;  %v1657_v62 = vsel %vm1653_vm1, %v7115_v16, %v1656_v57 }
 0x2d6   : > { %v2201_v9 = vor.u32 4788187, %v2200_v22  ;;  %v1679_v28 = vshrl.u32 %v1674_v3, 16  ;;  %v1707_v55 = vsel %vm1706_vm11, 1, %v10163_v4  ;;  %v2209_v45 = vsel %vm2086_vm6, %v2208_v11, %v7122_v58 }
 0x2d7   : > { %v1699_v6 = vshrl.u32 %v1695_v27, 16  ;;  %v1709_v8 = vadd.s32 %v1707_v55, %v1705_v41  ;;  %v1777_v5 = vand.u32 2139095040, %v7157_v10  ;;  %v2204_v7 = vcvt.s32.f32 %v2197_v2 }
 0x2d8   : > { %v2202_v60 = vand.u32 2147483647, %v2201_v9  ;;  %v1689_v32 = vadd.s32 %v1688_v31, %v1679_v28  ;;  %v1701_v12 = vshrl.u32 %v1696_v13, 16  ;;  %v1781_v16 = vand.u32 8388607, %v10154_v33 }
 0x2d9   : > { %v1710_v34 = vadd.s32 %v1709_v8, %v1699_v6  ;;  %v1778_v56 = vshrl.u32 %v1777_v5, 23  ;;  %v631_v3 = vmul.f32 %v6291_v42, %v6442_v47  ;;  %v1708_v61 = vadd.s32 %v1704_v0, %v1700_v18 }
 0x2da   : > { %v2205_v57 = vmul.f32 %v2204_v7, %v2202_v60  ;;  %v10198_v58 = vand.u32 2147483647, %v6934_v26  ;;  %v1658_v27 = vsel %vm1652_vm2, %v1655_v51, %v1657_v62  ;;  %v1782_v14 = vor.u32 8388608, %v1781_v16 }
 0x2db   : > { %v1711_v13 = vadd.s32 %v1710_v34, %v1701_v12  ;;  %v5858_v63 = vadd.s32 4294967169, %v1778_v56  ;;  %vm1714_vm15 = vc.u32 %v1689_v32, %v1708_v61  ;;  %v7202_v0 = vadd.f32 %v7199_v21, %v631_v3 }
 0x2dc   : > { %vm7191_vm14 = vcmp.le.f32.partialorder %v10198_v58, 0.7853982  ;;  %v2206_v46 = vxor.u32 2147483648, %v2205_v57  ;;  %v1712_v51 = vmul.u32 %v7144_v24, %v1658_v27  ;;  %v7210_v28 = vshll.u32 %v1782_v14, 8 }
 0x2dd   : > { %v2211_v54 = vsel %vm7191_vm14, 0, %v2209_v45  ;;  %v1715_v30 = vadd.s32 1, %v1711_v13  ;;  %v1784_v18 = vadd.s32 1, %v5858_v63  ;;  %v2862_v55 = vand.u32 2139095040, %v7202_v0 }
 0x2de   : > { %v2207_v2 = vsel %vm2086_vm6, %v2206_v46, %v2205_v57  ;;  %v2228_v31 = vadd.s32 3, %v2211_v54  ;;  %v7217_v34 = vadd.s32 %v1708_v61, %v1689_v32  ;;  %v7220_v56 = vand.u32 65535, %v7210_v28 }
 0x2df   : > { %v2210_v53 = vsel %vm7191_vm14, %v6934_v26, %v2207_v2  ;;  %v1716_v22 = vsel %vm1714_vm15, %v1715_v30, %v1711_v13  ;;  %vm1785_vm0 = vcmp.gt.s32.totalorder %v1784_v18, 0  ;;  %v10159_v16 = vand.u32 2147483647, %v7202_v0 }
 0x2e0   : > { %v2212_v52 = vmul.f32 %v2210_v53, %v2210_v53  ;;  %v1717_v41 = vadd.s32 %v1716_v22, %v1712_v51  ;;  %v1786_v9 = vsel %vm1785_vm0, %v1784_v18, 0  ;;  %v7215_v7 = vand.u32 3, %v2228_v31 }
 0x2e1   : > { %v1788_v62 = vand.u32 31, %v1786_v9  ;;  %v2863_v3 = vshrl.u32 %v2862_v55, 23  ;;  %vm1621_vm1 = vcmp.lt.s32.totalorder %v6971_v20, 0  ;;  %v7224_v27 = vshrl.u32 %v1786_v9, 5 }
 0x2e2   : > { %v2213_v45 = vmul.f32 -0.001358992, %v2212_v52  ;;  %v2220_v6 = vmul.f32 -0.00019511016, %v2212_v52  ;;  %v1718_v8 = vadd.s32 536870912, %v1717_v41  ;;  %vm2234_vm2 = vcmp.eq.s32.totalorder %v7215_v7, 2 }
 0x2e3   : > { %v7213_v5 = vsub.s32 32, %v1788_v62  ;;  %v1791_v13 = vshll.u32 %v10160_v23, %v1788_v62  ;;  %v1794_v14 = vshll.u32 %v10155_v25, %v1788_v62  ;;  %vm2231_vm3 = vcmp.eq.s32.totalorder %v7215_v7, 0 }
 0x2e4   : > { %v2214_v24 = vadd.f32 0.041655596, %v2213_v45  ;;  %v2221_v60 = vadd.f32 0.008332121, %v2220_v6  ;;  %v1719_v12 = vshrl.u32 %v1718_v8, 30  ;;  %v1797_v18 = vshll.u32 %v10157_v29, %v1788_v62 }
 0x2e5   : > { %v1792_v63 = vshrl.u32 %v10155_v25, %v7213_v5  ;;  %v1795_v32 = vshrl.u32 %v10157_v29, %v7213_v5  ;;  %v1801_v61 = vshrl.u32 %v10191_v59, %v7213_v5  ;;  %v1798_v2 = vshrl.u32 %v10197_v15, %v7213_v5 }
 0x2e6   : > { %v2215_v57 = vmul.f32 %v2214_v24, %v2212_v52  ;;  %v2222_v58 = vmul.f32 %v2221_v60, %v2212_v52  ;;  %v1720_v11 = vshll.u32 %v1719_v12, 30  ;;  %v1800_v51 = vshll.u32 %v10197_v15, %v1788_v62 }
 0x2e7   : > { %v1804_v22 = vshrl.u32 %v10192_v17, %v7213_v5  ;;  %vm2230_vm4 = vcmp.lt.s32.totalorder %v7215_v7, 2  ;;  %vm2227_vm5 = vweird.f32 %v6934_v26  ;;  %v1743_v55 = vsub.s32 4, %v1719_v12 }
 0x2e8   : > { %v2216_v46 = vadd.f32 -0.4999988, %v2215_v57  ;;  %v2223_v54 = vadd.f32 -0.16666654, %v2222_v58  ;;  %v7234_v30 = vsub.s32 %v1717_v41, %v1720_v11  ;;  %v1793_v45 = vor.u32 %v1792_v63, %v1791_v13 }
 0x2e9   : > { %v1796_v6 = vor.u32 %v1795_v32, %v1794_v14  ;;  %v1802_v8 = vor.u32 %v1801_v61, %v1800_v51  ;;  %v1803_v58 = vshll.u32 %v10191_v59, %v1788_v62  ;;  %v10201_v29 = vand.u32 2147483647, %v6971_v20 }
 0x2ea   : > { %v2217_v31 = vmul.f32 %v2216_v46, %v2212_v52  ;;  %v2224_v9 = vmul.f32 %v2223_v54, %v2212_v52  ;;  %vm1722_vm8 = vcmp.lt.s32.totalorder %v7234_v30, 0  ;;  %v1723_v41 = vsub.s32 0, %v7234_v30 }
 0x2eb   : > { %v1799_v52 = vor.u32 %v1798_v2, %v1797_v18  ;;  %v1824_v46 = vshrl.u32 %v7210_v28, 16  ;;  %v7251_v54 = vadd.s32 4294967169, %v2863_v3  ;;  %vm7255_vm6 = vcmp.le.f32.partialorder %v10201_v29, 0.7853982 }
 0x2ec   : > { %v2218_v24 = vadd.f32 1.0, %v2217_v31  ;;  %v2225_v60 = vadd.f32 1.0, %v2224_v9  ;;  %v1724_v57 = vsel %vm1722_vm8, %v1723_v41, %v7234_v30  ;;  %v1805_v63 = vor.u32 %v1804_v22, %v1803_v58 }
 0x2ed   : > { %v1725_v11 = vclz %v1724_v57  ;;  %vm1806_vm9 = vcmp.lt.s32.totalorder %v7224_v27, 1  ;;  %v7262_v62 = vsel %vm1621_vm1, %v1743_v55, %v1719_v12  ;;  %vm1809_vm10 = vcmp.lt.s32.totalorder %v7224_v27, 4 }
 0x2ee   : > { %v2226_v33 = vmul.f32 %v2225_v60, %v2210_v53  ;;  %v2235_v25 = vxor.u32 2147483648, %v2218_v24  ;;  %v1814_v53 = vsel %vm1806_vm9, %v1793_v45, %v1796_v6  ;;  %vm1807_vm12 = vcmp.lt.s32.totalorder %v7224_v27, 2 }
 0x2ef   : > { %v5856_v32 = vadd.s32 4294967294, %v1725_v11  ;;  %vm1808_vm13 = vcmp.lt.s32.totalorder %v7224_v27, 3  ;;  %v1815_v29 = vsel %vm1809_vm10, %v1802_v8, 920167782  ;;  %v1818_v14 = vsel %vm1806_vm9, %v1796_v6, %v1799_v52 }
 0x2f0   : > { %v2232_v3 = vxor.u32 2147483648, %v2226_v33  ;;  %v2236_v61 = vsel %vm2234_vm2, %v2235_v25, %v2226_v33  ;;  %v1816_v12 = vsel %vm1808_vm13, %v1799_v52, %v1815_v29  ;;  %v1819_v22 = vsel %vm1809_vm10, %v1805_v63, 1326507024 }
 0x2f1   : > { %vm5857_vm11 = vcmp.lt.s32.totalorder %v5856_v32, 0  ;;  %v1817_v51 = vsel %vm1807_vm12, %v1814_v53, %v1816_v12  ;;  %v1811_v9 = vsel %vm1809_vm10, %v1799_v52, 2102212464  ;;  %v1820_v55 = vsel %vm1808_vm13, %v1802_v8, %v1819_v22 }
 0x2f2   : > { %v2233_v18 = vsel %vm2231_vm3, %v2218_v24, %v2232_v3  ;;  %v1728_v2 = vsel %vm5857_vm11, 0, %v5856_v32  ;;  %v1847_v24 = vand.u32 65535, %v1817_v51  ;;  %v1848_v60 = vshrl.u32 %v1817_v51, 16 }
 0x2f3   : > { %v2237_v25 = vsel %vm2230_vm4, %v2233_v18, %v2236_v61  ;;  %v1729_v33 = vsub.s32 32, %v1728_v2  ;;  %v1733_v31 = vsub.s32 4294967266, %v1728_v2  ;;  %v1730_v57 = vshll.u32 %v7234_v30, %v1728_v2 }
 0x2f4   : > { %v2238_v41 = vsel %vm2227_vm5, nan, %v2237_v25  ;;  %v1821_v11 = vsel %vm1807_vm12, %v1818_v14, %v1820_v55  ;;  %v1790_v52 = vshrl.u32 %v10160_v23, %v7213_v5  ;;  %v1850_v32 = vmul.u32 %v1848_v60, %v7220_v56 }
 0x2f5   : > { %3178 = vst [vmem:[%s6771_s17 + $0x48] sm:$0xff] %v2238_v41  ;;  %v1731_v58 = vshrl.u32 %v7217_v34, %v1729_v33  ;;  %v1734_v7 = vadd.s32 127, %v1733_v31  ;;  %v1825_v63 = vand.u32 65535, %v1821_v11  ;;  %v1826_v26 = vshrl.u32 %v1821_v11, 16 }
 0x2f6   : > { %v1746_v3 = vsel %vm7255_vm6, 0, %v7262_v62  ;;  %v1851_v30 = vmul.u32 %v1847_v24, %v1824_v46  ;;  %v1810_v34 = vsel %vm1806_vm9, %v1790_v52, %v1793_v45  ;;  %v1812_v29 = vsel %vm1808_vm13, %v1796_v6, %v1811_v9 }
 0x2f7   : > { %v1732_v53 = vor.u32 %v1731_v58, %v1730_v57  ;;  %v1735_v8 = vshll.u32 %v1734_v7, 23  ;;  %v1828_v61 = vmul.u32 %v1826_v26, %v7220_v56  ;;  %v1829_v5 = vmul.u32 %v1825_v63, %v1824_v46 }
 0x2f8   : > { %v1849_v14 = vmul.u32 %v1847_v24, %v7220_v56  ;;  %v1852_v18 = vmul.u32 %v1848_v60, %v1824_v46  ;;  %v1853_v2 = vshll.u32 %v1850_v32, 16  ;;  %v1827_v22 = vmul.u32 %v1825_v63, %v7220_v56 }
 0x2f9   : > { %v1736_v12 = vor.u32 4788187, %v1735_v8  ;;  %v1739_v51 = vcvt.s32.f32 %v1732_v53  ;;  %v1830_v25 = vmul.u32 %v1826_v26, %v1824_v46  ;;  %v1831_v62 = vshll.u32 %v1828_v61, 16 }
 0x2fa   : > { %v1833_v31 = vshll.u32 %v1829_v5, 16  ;;  %v1855_v41 = vshll.u32 %v1851_v30, 16  ;;  %vm1857_vm14 = vc.u32 %v1849_v14, %v1853_v2  ;;  %v1859_v9 = vadd.s32 %v1853_v2, %v1849_v14 }
 0x2fb   : > { %v1737_v33 = vand.u32 2147483647, %v1736_v12  ;;  %vm1835_vm15 = vc.u32 %v1827_v22, %v1831_v62  ;;  %v1837_v45 = vadd.s32 %v1831_v62, %v1827_v22  ;;  %v1858_v6 = vsel %vm1857_vm14, 1, %v10163_v4 }
 0x2fc   : > { %v1836_v57 = vsel %vm1835_vm15, 1, %v10163_v4  ;;  %v1860_v24 = vadd.s32 %v1858_v6, %v1852_v18  ;;  %v2869_v60 = vadd.s32 1, %v7251_v54  ;;  %v1854_v56 = vshrl.u32 %v1850_v32, 16 }
 0x2fd   : > { %v1740_v55 = vmul.f32 %v1739_v51, %v1737_v33  ;;  %v1838_v58 = vadd.s32 %v1836_v57, %v1830_v25  ;;  %vm1839_vm0 = vc.u32 %v1837_v45, %v1833_v31  ;;  %vm1861_vm2 = vc.u32 %v1859_v9, %v1855_v41 }
 0x2fe   : > { %v1840_v7 = vsel %vm1839_vm0, 1, %v10163_v4  ;;  %v1862_v11 = vsel %vm1861_vm2, 1, %v10163_v4  ;;  %vm2870_vm3 = vcmp.gt.s32.totalorder %v2869_v60, 0  ;;  %v1832_v52 = vshrl.u32 %v1828_v61, 16 }
 0x2ff   : > { %v1741_v46 = vxor.u32 2147483648, %v1740_v55  ;;  %v1842_v63 = vadd.s32 %v1840_v7, %v1838_v58  ;;  %v1864_v26 = vadd.s32 %v1862_v11, %v1860_v24  ;;  %v2871_v53 = vsel %vm2870_vm3, %v2869_v60, 0 }
 0x300   : > { %v1813_v54 = vsel %vm1807_vm12, %v1810_v34, %v1812_v29  ;;  %v1834_v12 = vshrl.u32 %v1829_v5, 16  ;;  %v2873_v14 = vand.u32 31, %v2871_v53  ;;  %v1856_v2 = vshrl.u32 %v1851_v30, 16 }
 0x301   : > { %v1742_v8 = vsel %vm1621_vm1, %v1741_v46, %v1740_v55  ;;  %v1843_v18 = vadd.s32 %v1842_v63, %v1832_v52  ;;  %v1865_v51 = vadd.s32 %v1864_v26, %v1854_v56  ;;  %v2866_v61 = vand.u32 8388607, %v10159_v16 }
 0x302   : > { %v1745_v32 = vsel %vm7255_vm6, %v6971_v20, %v1742_v8  ;;  %v7323_v25 = vsub.s32 32, %v2873_v14  ;;  %v1763_v62 = vadd.s32 3, %v1746_v3  ;;  %v7327_v27 = vadd.s32 %v1859_v9, %v1855_v41 }
 0x303   : > { %v1747_v22 = vmul.f32 %v1745_v32, %v1745_v32  ;;  %v7325_v33 = vadd.s32 %v1843_v18, %v1834_v12  ;;  %v1866_v34 = vadd.s32 %v1865_v51, %v1856_v2  ;;  %v1867_v13 = vmul.u32 %v7210_v28, %v1813_v54 }
 0x304   : > { %v7330_v31 = vshrl.u32 %v2871_v53, 5  ;;  %v2876_v45 = vshll.u32 %v10160_v23, %v2873_v14  ;;  %v10204_v6 = vmov 2131351028   ;;  %v10205_v41 = vmov 2475754826  }
 0x305   : > { %v1748_v29 = vmul.f32 -0.001358992, %v1747_v22  ;;  %v1755_v5 = vmul.f32 -0.00019511016, %v1747_v22  ;;  %vm1869_vm1 = vc.u32 %v7325_v33, %v7327_v27  ;;  %v1870_v30 = vadd.s32 1, %v1866_v34 }
 0x306   : > { %v2880_v3 = vshrl.u32 %v10204_v6, %v7323_v25  ;;  %v2879_v9 = vshll.u32 %v10205_v41, %v2873_v14  ;;  %v2883_v24 = vshrl.u32 %v10197_v15, %v7323_v25  ;;  %v2877_v28 = vshrl.u32 %v10205_v41, %v7323_v25 }
 0x307   : > { %v1749_v55 = vadd.f32 0.041655596, %v1748_v29  ;;  %v1756_v57 = vadd.f32 0.008332121, %v1755_v5  ;;  %v1871_v60 = vsel %vm1869_vm1, %v1870_v30, %v1866_v34  ;;  %v2885_v58 = vshll.u32 %v10197_v15, %v2873_v14 }
 0x308   : > { %v2886_v56 = vshrl.u32 %v10191_v59, %v7323_v25  ;;  %v1872_v11 = vadd.s32 %v1871_v60, %v1867_v13  ;;  %v2882_v52 = vshll.u32 %v10204_v6, %v2873_v14  ;;  %v7346_v63 = vor.u32 %v2880_v3, %v2879_v9 }
 0x309   : > { %v1750_v46 = vmul.f32 %v1749_v55, %v1747_v22  ;;  %v1757_v7 = vmul.f32 %v1756_v57, %v1747_v22  ;;  %v2888_v53 = vshll.u32 %v10191_v59, %v2873_v14  ;;  %v2889_v8 = vshrl.u32 %v10192_v17, %v7323_v25 }
 0x30a   : > { %v2887_v26 = vor.u32 %v2886_v56, %v2885_v58  ;;  %v1873_v18 = vadd.s32 536870912, %v1872_v11  ;;  %v2884_v2 = vor.u32 %v2883_v24, %v2882_v52  ;;  %v1764_v51 = vand.u32 3, %v1763_v62 }
 0x30b   : > { %v1751_v54 = vadd.f32 -0.4999988, %v1750_v46  ;;  %v1758_v12 = vadd.f32 -0.16666654, %v1757_v7  ;;  %v2867_v34 = vor.u32 8388608, %v2866_v61  ;;  %v7351_v29 = vor.u32 %v2877_v28, %v2876_v45 }
 0x30c   : > { %v2890_v5 = vor.u32 %v2889_v8, %v2888_v53  ;;  %v7353_v55 = vshrl.u32 %v1873_v18, 30  ;;  %vm2894_vm4 = vcmp.lt.s32.totalorder %v7330_v31, 4  ;;  %vm2891_vm8 = vcmp.lt.s32.totalorder %v7330_v31, 1 }
 0x30d   : > { %v1752_v13 = vmul.f32 %v1751_v54, %v1747_v22  ;;  %v1759_v30 = vmul.f32 %v1758_v12, %v1747_v22  ;;  %vm2893_vm5 = vcmp.lt.s32.totalorder %v7330_v31, 3  ;;  %v2900_v14 = vsel %vm2894_vm4, %v2887_v26, 920167782 }
 0x30e   : > { %v2904_v62 = vsel %vm2894_vm4, %v2890_v5, 1326507024  ;;  %v1875_v3 = vshll.u32 %v7353_v55, 30  ;;  %v2903_v22 = vsel %vm2891_vm8, %v7346_v63, %v2884_v2  ;;  %v2899_v57 = vsel %vm2891_vm8, %v7351_v29, %v7346_v63 }
 0x30f   : > { %v1753_v61 = vadd.f32 1.0, %v1752_v13  ;;  %v1760_v45 = vadd.f32 1.0, %v1759_v30  ;;  %v2901_v9 = vsel %vm2893_vm5, %v2884_v2, %v2900_v14  ;;  %v2905_v24 = vsel %vm2893_vm5, %v2887_v26, %v2904_v62 }
 0x310   : > { %v7374_v60 = vshll.u32 %v2867_v34, 8  ;;  %v1876_v56 = vsub.s32 %v1872_v11, %v1875_v3  ;;  %vm2892_vm6 = vcmp.lt.s32.totalorder %v7330_v31, 2  ;;  %vm1765_vm9 = vcmp.lt.s32.totalorder %v1764_v51, 2 }
 0x311   : > { %v1761_v28 = vmul.f32 %v1760_v45, %v1745_v32  ;;  %v1770_v58 = vxor.u32 2147483648, %v1753_v61  ;;  %vm1766_vm10 = vcmp.eq.s32.totalorder %v1764_v51, 0  ;;  %v632_v46 = vmul.f32 %v6291_v42, %v6444_v49 }
 0x312   : > { %v2906_v7 = vsel %vm2892_vm6, %v2903_v22, %v2905_v24  ;;  %vm1877_vm12 = vcmp.lt.s32.totalorder %v1876_v56, 0  ;;  %v1878_v53 = vsub.s32 0, %v1876_v56  ;;  %v2902_v26 = vsel %vm2892_vm6, %v2899_v57, %v2901_v9 }
 0x313   : > { %v1767_v52 = vxor.u32 2147483648, %v1761_v28  ;;  %vm1769_vm13 = vcmp.eq.s32.totalorder %v1764_v51, 2  ;;  %v2908_v32 = vand.u32 65535, %v7374_v60  ;;  %v2910_v11 = vand.u32 65535, %v2906_v7 }
 0x314   : > { %v2911_v8 = vshrl.u32 %v2906_v7, 16  ;;  %v1771_v12 = vsel %vm1769_vm13, %v1770_v58, %v1761_v28  ;;  %v1879_v18 = vsel %vm1877_vm12, %v1878_v53, %v1876_v56  ;;  %v2909_v34 = vshrl.u32 %v7374_v60, 16 }
 0x315   : > { %v1768_v54 = vsel %vm1766_vm10, %v1753_v61, %v1767_v52  ;;  %vm1762_vm11 = vweird.f32 %v6971_v20  ;;  %v1880_v13 = vclz %v1879_v18  ;;  %v2933_v30 = vshrl.u32 %v2902_v26, 16 }
 0x316   : > { %v1772_v5 = vsel %vm1765_vm9, %v1768_v54, %v1771_v12  ;;  %v2913_v62 = vmul.u32 %v2911_v8, %v2908_v32  ;;  %v2914_v45 = vmul.u32 %v2910_v11, %v2909_v34  ;;  %v2932_v3 = vand.u32 65535, %v2902_v26 }
 0x317   : > { %v1773_v14 = vsel %vm1762_vm11, nan, %v1772_v5  ;;  %v1868_v22 = vadd.s32 %v7327_v27, %v7325_v33  ;;  %v5859_v57 = vadd.s32 4294967294, %v1880_v13  ;;  %v7391_v61 = vadd.f32 %v7199_v21, %v632_v46 }
 0x318   : > { %3175 = vst [vmem:[%s6771_s17 + $0x30] sm:$0xff] %v1773_v14  ;;  %v2875_v9 = vshrl.u32 %v10160_v23, %v7323_v25  ;;  %v2896_v20 = vsel %vm2894_vm4, %v2884_v2, 2102212464  ;;  %v2912_v51 = vmul.u32 %v2910_v11, %v2908_v32  ;;  %v2915_v24 = vmul.u32 %v2911_v8, %v2909_v34 }
 0x319   : > { %v2916_v28 = vshll.u32 %v2913_v62, 16  ;;  %vm5860_vm14 = vcmp.lt.s32.totalorder %v5859_v57, 0  ;;  %v2917_v58 = vshrl.u32 %v2913_v62, 16  ;;  %v2918_v7 = vshll.u32 %v2914_v45, 16 }
 0x31a   : > { %v2935_v52 = vmul.u32 %v2933_v30, %v2908_v32  ;;  %vm1776_vm15 = vcmp.lt.s32.totalorder %v7157_v10, 0  ;;  %v1883_v33 = vsel %vm5860_vm14, 0, %v5859_v57  ;;  %v2936_v46 = vmul.u32 %v2932_v3, %v2909_v34 }
 0x31b   : > { %vm2920_vm0 = vc.u32 %v2912_v51, %v2916_v28  ;;  %v2922_v27 = vadd.s32 %v2916_v28, %v2912_v51  ;;  %v1884_v53 = vsub.s32 32, %v1883_v33  ;;  %v1888_v26 = vsub.s32 4294967266, %v1883_v33 }
 0x31c   : > { %v2921_v25 = vsel %vm2920_vm0, 1, %v10163_v4  ;;  %v2934_v54 = vmul.u32 %v2932_v3, %v2908_v32  ;;  %v2937_v2 = vmul.u32 %v2933_v30, %v2909_v34  ;;  %v2938_v11 = vshll.u32 %v2935_v52, 16 }
 0x31d   : > { %v2923_v12 = vadd.s32 %v2921_v25, %v2915_v24  ;;  %vm2924_vm2 = vc.u32 %v2922_v27, %v2918_v7  ;;  %v1885_v8 = vshll.u32 %v1876_v56, %v1883_v33  ;;  %v1886_v18 = vshrl.u32 %v1868_v22, %v1884_v53 }
 0x31e   : > { %v1889_v5 = vadd.s32 127, %v1888_v26  ;;  %v2925_v13 = vsel %vm2924_vm2, 1, %v10163_v4  ;;  %v2940_v62 = vshll.u32 %v2936_v46, 16  ;;  %vm2942_vm3 = vc.u32 %v2934_v54, %v2938_v11 }
 0x31f   : > { %v2927_v14 = vadd.s32 %v2925_v13, %v2923_v12  ;;  %v2944_v57 = vadd.s32 %v2938_v11, %v2934_v54  ;;  %v1887_v51 = vor.u32 %v1886_v18, %v1885_v8  ;;  %v1898_v16 = vsub.s32 4, %v7353_v55 }
 0x320   : > { %v1890_v28 = vshll.u32 %v1889_v5, 23  ;;  %v2943_v23 = vsel %vm2942_vm3, 1, %v10163_v4  ;;  %v10162_v34 = vand.u32 2147483647, %v7391_v61  ;;  %v2895_v30 = vsel %vm2891_vm8, %v2875_v9, %v7351_v29 }
 0x321   : > { %v2928_v32 = vadd.s32 %v2927_v14, %v2917_v58  ;;  %v2945_v3 = vadd.s32 %v2943_v23, %v2937_v2  ;;  %vm2946_vm1 = vc.u32 %v2944_v57, %v2940_v62  ;;  %v2919_v22 = vshrl.u32 %v2914_v45, 16  ;;  %v7422_v2 = vpop.permute.xlu1 %665 }
 0x322   : > { %v1891_v56 = vor.u32 4788187, %v1890_v28  ;;  %v2947_v24 = vsel %vm2946_vm1, 1, %v10163_v4  ;;  %v2897_v7 = vsel %vm2893_vm5, %v7346_v63, %v2896_v20  ;;  %v2939_v33 = vshrl.u32 %v2935_v52, 16 }
 0x323   : > { %v2949_v27 = vadd.s32 %v2947_v24, %v2945_v3  ;;  %v3017_v58 = vand.u32 2139095040, %v7391_v61  ;;  %v1894_v53 = vcvt.s32.f32 %v1887_v51  ;;  %v1899_v26 = vsel %vm1776_vm15, %v1898_v16, %v7353_v55 }
 0x324   : > { %v1892_v23 = vand.u32 2147483647, %v1891_v56  ;;  %v2929_v25 = vadd.s32 %v2928_v32, %v2919_v22  ;;  %v2941_v54 = vshrl.u32 %v2936_v46, 16  ;;  %v3021_v9 = vand.u32 8388607, %v10162_v34 }
 0x325   : > { %v2950_v29 = vadd.s32 %v2949_v27, %v2939_v33  ;;  %v3018_v45 = vshrl.u32 %v3017_v58, 23  ;;  %v10206_v12 = vand.u32 2147483647, %v7157_v10  ;;  %v2948_v52 = vadd.s32 %v2944_v57, %v2940_v62 }
 0x326   : > { %v1895_v20 = vmul.f32 %v1894_v53, %v1892_v23  ;;  %v2898_v16 = vsel %vm2892_vm6, %v2895_v30, %v2897_v7  ;;  %v629_v11 = vmul.f32 %v6293_v43, %v6442_v47  ;;  %v3022_v13 = vor.u32 8388608, %v3021_v9 }
 0x327   : > { %vm7418_vm4 = vcmp.le.f32.partialorder %v10206_v12, 0.7853982  ;;  %v2951_v55 = vadd.s32 %v2950_v29, %v2941_v54  ;;  %v5882_v46 = vadd.s32 4294967169, %v3018_v45  ;;  %vm2954_vm8 = vc.u32 %v2929_v25, %v2948_v52 }
 0x328   : > { %v1896_v8 = vxor.u32 2147483648, %v1895_v20  ;;  %v1901_v18 = vsel %vm7418_vm4, 0, %v1899_v26  ;;  %v7431_v62 = vadd.f32 %v7422_v2, %v629_v11  ;;  %v2952_v57 = vmul.u32 %v7374_v60, %v2898_v16 }
 0x329   : > { %v2955_v5 = vadd.s32 1, %v2951_v55  ;;  %v3024_v14 = vadd.s32 1, %v5882_v46  ;;  %v1918_v3 = vadd.s32 3, %v1901_v18  ;;  %v7439_v24 = vshll.u32 %v3022_v13, 8 }
 0x32a   : > { %v1897_v31 = vsel %vm1776_vm15, %v1896_v8, %v1895_v20  ;;  %v2552_v7 = vand.u32 2139095040, %v7431_v62  ;;  %v7446_v29 = vadd.s32 %v2948_v52, %v2929_v25  ;;  %vm2861_vm6 = vcmp.lt.s32.totalorder %v7202_v0, 0 }
 0x32b   : > { %v1900_v51 = vsel %vm7418_vm4, %v7157_v10, %v1897_v31  ;;  %v2956_v28 = vsel %vm2954_vm8, %v2955_v5, %v2951_v55  ;;  %vm3025_vm5 = vcmp.gt.s32.totalorder %v3024_v14, 0  ;;  %v7444_v26 = vand.u32 3, %v1918_v3 }
 0x32c   : > { %v1902_v32 = vmul.f32 %v1900_v51, %v1900_v51  ;;  %v2957_v56 = vadd.s32 %v2956_v28, %v2952_v57  ;;  %v3026_v30 = vsel %vm3025_vm5, %v3024_v14, 0  ;;  %v7449_v45 = vand.u32 65535, %v7439_v24 }
 0x32d   : > { %v3028_v22 = vand.u32 31, %v3026_v30  ;;  %v2553_v12 = vshrl.u32 %v2552_v7, 23  ;;  %v7453_v55 = vshrl.u32 %v3026_v30, 5  ;;  %v10209_v46 = vmov 683565275  }
 0x32e   : > { %v1903_v33 = vmul.f32 -0.001358992, %v1902_v32  ;;  %v1910_v27 = vmul.f32 -0.00019511016, %v1902_v32  ;;  %v2958_v58 = vadd.s32 536870912, %v2957_v56  ;;  %vm1924_vm9 = vcmp.eq.s32.totalorder %v7444_v26, 2 }
 0x32f   : > { %v7442_v23 = vsub.s32 32, %v3028_v22  ;;  %v3031_v11 = vshll.u32 %v10209_v46, %v3028_v22  ;;  %v3034_v14 = vshll.u32 %v10205_v41, %v3028_v22  ;;  %vm1921_vm10 = vcmp.eq.s32.totalorder %v7444_v26, 0 }
 0x330   : > { %v1904_v60 = vadd.f32 0.041655596, %v1903_v33  ;;  %v1911_v53 = vadd.f32 0.008332121, %v1910_v27  ;;  %v2959_v54 = vshrl.u32 %v2958_v58, 30  ;;  %v3037_v31 = vshll.u32 %v10204_v6, %v3028_v22 }
 0x331   : > { %v3032_v8 = vshrl.u32 %v10205_v41, %v7442_v23  ;;  %v3035_v25 = vshrl.u32 %v10204_v6, %v7442_v23  ;;  %v3041_v52 = vshrl.u32 %v10191_v59, %v7442_v23  ;;  %v3038_v57 = vshrl.u32 %v10197_v15, %v7442_v23 }
 0x332   : > { %v1905_v63 = vmul.f32 %v1904_v60, %v1902_v32  ;;  %v1912_v20 = vmul.f32 %v1911_v53, %v1902_v32  ;;  %v2960_v16 = vshll.u32 %v2959_v54, 30  ;;  %v3040_v28 = vshll.u32 %v10197_v15, %v3028_v22 }
 0x333   : > { %v3044_v3 = vshrl.u32 %v10192_v17, %v7442_v23  ;;  %vm1920_vm12 = vcmp.lt.s32.totalorder %v7444_v26, 2  ;;  %vm1917_vm11 = vweird.f32 %v7157_v10  ;;  %v2983_v33 = vsub.s32 4, %v2959_v54 }
 0x334   : > { %v1906_v18 = vadd.f32 -0.4999988, %v1905_v63  ;;  %v1913_v5 = vadd.f32 -0.16666654, %v1912_v20  ;;  %v7463_v13 = vsub.s32 %v2957_v56, %v2960_v16  ;;  %v3033_v27 = vor.u32 %v3032_v8, %v3031_v11 }
 0x335   : > { %v3036_v58 = vor.u32 %v3035_v25, %v3034_v14  ;;  %v3042_v60 = vor.u32 %v3041_v52, %v3040_v28  ;;  %v3043_v16 = vshll.u32 %v10191_v59, %v3028_v22  ;;  %v7480_v34 = vadd.s32 4294967169, %v2553_v12 }
 0x336   : > { %v1907_v30 = vmul.f32 %v1906_v18, %v1902_v32  ;;  %v1914_v7 = vmul.f32 %v1913_v5, %v1902_v32  ;;  %vm2962_vm13 = vcmp.lt.s32.totalorder %v7463_v13, 0  ;;  %v2963_v56 = vsub.s32 0, %v7463_v13 }
 0x337   : > { %v3039_v32 = vor.u32 %v3038_v57, %v3037_v31  ;;  %v3064_v5 = vshrl.u32 %v7439_v24, 16  ;;  %v10210_v44 = vand.u32 2147483647, %v7202_v0  ;;  %v3045_v8 = vor.u32 %v3044_v3, %v3043_v16 }
 0x338   : > { %v1908_v53 = vadd.f32 1.0, %v1907_v30  ;;  %v1915_v63 = vadd.f32 1.0, %v1914_v7  ;;  %v2964_v20 = vsel %vm2962_vm13, %v2963_v56, %v7463_v13  ;;  %vm3046_vm15 = vcmp.lt.s32.totalorder %v7453_v55, 1 }
 0x339   : > { %v2965_v18 = vclz %v2964_v20  ;;  %vm7484_vm14 = vcmp.le.f32.partialorder %v10210_v44, 0.7853982  ;;  %v7491_v22 = vsel %vm2861_vm6, %v2983_v33, %v2959_v54  ;;  %vm3049_vm0 = vcmp.lt.s32.totalorder %v7453_v55, 4 }
 0x33a   : > { %v1916_v9 = vmul.f32 %v1915_v63, %v1900_v51  ;;  %v1925_v4 = vxor.u32 2147483648, %v1908_v53  ;;  %v3054_v51 = vsel %vm3046_vm15, %v3033_v27, %v3036_v58  ;;  %vm3047_vm2 = vcmp.lt.s32.totalorder %v7453_v55, 2 }
 0x33b   : > { %v5880_v25 = vadd.s32 4294967294, %v2965_v18  ;;  %vm3048_vm3 = vcmp.lt.s32.totalorder %v7453_v55, 3  ;;  %v3055_v44 = vsel %vm3049_vm0, %v3042_v60, 920167782  ;;  %v3058_v14 = vsel %vm3046_vm15, %v3036_v58, %v3039_v32 }
 0x33c   : > { %v1922_v12 = vxor.u32 2147483648, %v1916_v9  ;;  %v1926_v52 = vsel %vm1924_vm9, %v1925_v4, %v1916_v9  ;;  %v3056_v54 = vsel %vm3048_vm3, %v3039_v32, %v3055_v44  ;;  %v3059_v3 = vsel %vm3049_vm0, %v3045_v8, 1326507024 }
 0x33d   : > { %vm5881_vm1 = vcmp.lt.s32.totalorder %v5880_v25, 0  ;;  %v3057_v28 = vsel %vm3047_vm2, %v3054_v51, %v3056_v54  ;;  %v3051_v7 = vsel %vm3049_vm0, %v3039_v32, 2102212464  ;;  %v3060_v33 = vsel %vm3048_vm3, %v3042_v60, %v3059_v3 }
 0x33e   : > { %v1923_v31 = vsel %vm1921_vm10, %v1908_v53, %v1922_v12  ;;  %v2968_v57 = vsel %vm5881_vm1, 0, %v5880_v25  ;;  %v3087_v53 = vand.u32 65535, %v3057_v28  ;;  %v3088_v63 = vshrl.u32 %v3057_v28, 16 }
 0x33f   : > { %v1927_v4 = vsel %vm1920_vm12, %v1923_v31, %v1926_v52  ;;  %v2969_v9 = vsub.s32 32, %v2968_v57  ;;  %v2973_v30 = vsub.s32 4294967266, %v2968_v57  ;;  %v2970_v20 = vshll.u32 %v7463_v13, %v2968_v57 }
 0x340   : > { %v1928_v56 = vsel %vm1917_vm11, nan, %v1927_v4  ;;  %v3061_v18 = vsel %vm3047_vm2, %v3058_v14, %v3060_v33  ;;  %v3030_v32 = vshrl.u32 %v10209_v46, %v7442_v23  ;;  %v3090_v25 = vmul.u32 %v3088_v63, %v7449_v45 }
 0x341   : > { %3176 = vst [vmem:[%s6771_s17 + $0x38] sm:$0xff] %v1928_v56  ;;  %v2971_v16 = vshrl.u32 %v7446_v29, %v2969_v9  ;;  %v2974_v26 = vadd.s32 127, %v2973_v30  ;;  %v3065_v8 = vand.u32 65535, %v3061_v18  ;;  %v3066_v10 = vshrl.u32 %v3061_v18, 16 }
 0x342   : > { %v2986_v12 = vsel %vm7484_vm14, 0, %v7491_v22  ;;  %v3091_v13 = vmul.u32 %v3087_v53, %v3064_v5  ;;  %v3050_v29 = vsel %vm3046_vm15, %v3030_v32, %v3033_v27  ;;  %v3052_v44 = vsel %vm3048_vm3, %v3036_v58, %v3051_v7 }
 0x343   : > { %v2972_v51 = vor.u32 %v2971_v16, %v2970_v20  ;;  %v2975_v60 = vshll.u32 %v2974_v26, 23  ;;  %v3068_v52 = vmul.u32 %v3066_v10, %v7449_v45  ;;  %v3069_v23 = vmul.u32 %v3065_v8, %v3064_v5 }
 0x344   : > { %v3089_v14 = vmul.u32 %v3087_v53, %v7449_v45  ;;  %v3092_v31 = vmul.u32 %v3088_v63, %v3064_v5  ;;  %v3093_v57 = vshll.u32 %v3090_v25, 16  ;;  %v3067_v3 = vmul.u32 %v3065_v8, %v7449_v45 }
 0x345   : > { %v2976_v54 = vor.u32 4788187, %v2975_v60  ;;  %v2979_v28 = vcvt.s32.f32 %v2972_v51  ;;  %v3070_v4 = vmul.u32 %v3066_v10, %v3064_v5  ;;  %v3071_v22 = vshll.u32 %v3068_v52, 16 }
 0x346   : > { %v3073_v30 = vshll.u32 %v3069_v23, 16  ;;  %v3095_v56 = vshll.u32 %v3091_v13, 16  ;;  %vm3097_vm4 = vc.u32 %v3089_v14, %v3093_v57  ;;  %v10213_v58 = vmov 0  }
 0x347   : > { %v2977_v9 = vand.u32 2147483647, %v2976_v54  ;;  %vm3075_vm8 = vc.u32 %v3067_v3, %v3071_v22  ;;  %v3077_v27 = vadd.s32 %v3071_v22, %v3067_v3  ;;  %v3098_v7 = vsel %vm3097_vm4, 1, %v10213_v58 }
 0x348   : > { %v3099_v33 = vadd.s32 %v3093_v57, %v3089_v14  ;;  %v3076_v16 = vsel %vm3075_vm8, 1, %v10213_v58  ;;  %v3100_v53 = vadd.s32 %v3098_v7, %v3092_v31  ;;  %v2559_v63 = vadd.s32 1, %v7480_v34 }
 0x349   : > { %v2980_v20 = vmul.f32 %v2979_v28, %v2977_v9  ;;  %v3078_v26 = vadd.s32 %v3076_v16, %v3070_v4  ;;  %vm3079_vm5 = vc.u32 %v3077_v27, %v3073_v30  ;;  %v3094_v45 = vshrl.u32 %v3090_v25, 16 }
 0x34a   : > { %vm3101_vm9 = vc.u32 %v3099_v33, %v3095_v56  ;;  %v3080_v18 = vsel %vm3079_vm5, 1, %v10213_v58  ;;  %vm2560_vm10 = vcmp.gt.s32.totalorder %v2559_v63, 0  ;;  %v3072_v8 = vshrl.u32 %v3068_v52, 16 }
 0x34b   : > { %v2981_v5 = vxor.u32 2147483648, %v2980_v20  ;;  %v3102_v32 = vsel %vm3101_vm9, 1, %v10213_v58  ;;  %v3082_v10 = vadd.s32 %v3080_v18, %v3078_v26  ;;  %v2561_v60 = vsel %vm2560_vm10, %v2559_v63, 0 }
 0x34c   : > { %v3104_v51 = vadd.s32 %v3102_v32, %v3100_v53  ;;  %v3053_v34 = vsel %vm3047_vm2, %v3050_v29, %v3052_v44  ;;  %v3074_v14 = vshrl.u32 %v3069_v23, 16  ;;  %v2563_v31 = vand.u32 31, %v2561_v60 }
 0x34d   : > { %v2982_v54 = vsel %vm2861_vm6, %v2981_v5, %v2980_v20  ;;  %v3083_v57 = vadd.s32 %v3082_v10, %v3072_v8  ;;  %v3096_v28 = vshrl.u32 %v3091_v13, 16  ;;  %v10214_v52 = vand.u32 2147483647, %v7431_v62 }
 0x34e   : > { %v2985_v25 = vsel %vm7484_vm14, %v7202_v0, %v2982_v54  ;;  %v3105_v3 = vadd.s32 %v3104_v51, %v3094_v45  ;;  %v7552_v9 = vsub.s32 32, %v2563_v31  ;;  %v3003_v30 = vadd.s32 3, %v2986_v12 }
 0x34f   : > { %v2987_v4 = vmul.f32 %v2985_v25, %v2985_v25  ;;  %v2556_v22 = vand.u32 8388607, %v10214_v52  ;;  %v7554_v27 = vadd.s32 %v3083_v57, %v3074_v14  ;;  %v7556_v55 = vadd.s32 %v3099_v33, %v3095_v56 }
 0x350   : > { %v3106_v29 = vadd.s32 %v3105_v3, %v3096_v28  ;;  %v3107_v11 = vmul.u32 %v7439_v24, %v3053_v34  ;;  %v7559_v7 = vshrl.u32 %v2561_v60, 5  ;;  %v2566_v20 = vshll.u32 %v10209_v46, %v2563_v31 }
 0x351   : > { %v2988_v44 = vmul.f32 -0.001358992, %v2987_v4  ;;  %v2995_v23 = vmul.f32 -0.00019511016, %v2987_v4  ;;  %vm3109_vm6 = vc.u32 %v7554_v27, %v7556_v55  ;;  %v2570_v12 = vshrl.u32 %v10204_v6, %v7552_v9 }
 0x352   : > { %v3110_v13 = vadd.s32 1, %v3106_v29  ;;  %v2569_v56 = vshll.u32 %v10205_v41, %v2563_v31  ;;  %v2573_v33 = vshrl.u32 %v10197_v15, %v7552_v9  ;;  %v2567_v24 = vshrl.u32 %v10205_v41, %v7552_v9 }
 0x353   : > { %v2989_v16 = vadd.f32 0.041655596, %v2988_v44  ;;  %v2996_v53 = vadd.f32 0.008332121, %v2995_v23  ;;  %v2575_v26 = vshll.u32 %v10197_v15, %v2563_v31  ;;  %v2576_v45 = vshrl.u32 %v10191_v59, %v7552_v9 }
 0x354   : > { %v3111_v63 = vsel %vm3109_vm6, %v3110_v13, %v3106_v29  ;;  %v2572_v8 = vshll.u32 %v10204_v6, %v2563_v31  ;;  %v7575_v10 = vor.u32 %v2570_v12, %v2569_v56  ;;  %v2578_v60 = vshll.u32 %v10191_v59, %v2563_v31 }
 0x355   : > { %v2990_v5 = vmul.f32 %v2989_v16, %v2987_v4  ;;  %v2997_v18 = vmul.f32 %v2996_v53, %v2987_v4  ;;  %v3112_v32 = vadd.s32 %v3111_v63, %v3107_v11  ;;  %v2577_v51 = vor.u32 %v2576_v45, %v2575_v26 }
 0x356   : > { %v2579_v54 = vshrl.u32 %v10192_v17, %v7552_v9  ;;  %v7580_v28 = vor.u32 %v2573_v33, %v2572_v8  ;;  %v3004_v3 = vand.u32 3, %v3003_v30  ;;  %v2557_v52 = vor.u32 8388608, %v2556_v22 }
 0x357   : > { %v2991_v34 = vadd.f32 -0.4999988, %v2990_v5  ;;  %v2998_v14 = vadd.f32 -0.16666654, %v2997_v18  ;;  %v3113_v57 = vadd.s32 536870912, %v3112_v32  ;;  %v7582_v29 = vor.u32 %v2567_v24, %v2566_v20 }
 0x358   : > { %v2580_v44 = vor.u32 %v2579_v54, %v2578_v60  ;;  %vm2584_vm12 = vcmp.lt.s32.totalorder %v7559_v7, 4  ;;  %vm2581_vm13 = vcmp.lt.s32.totalorder %v7559_v7, 1  ;;  %vm2583_vm11 = vcmp.lt.s32.totalorder %v7559_v7, 3 }
 0x359   : > { %v2992_v23 = vmul.f32 %v2991_v34, %v2987_v4  ;;  %v2999_v11 = vmul.f32 %v2998_v14, %v2987_v4  ;;  %v7584_v13 = vshrl.u32 %v3113_v57, 30  ;;  %v2590_v31 = vsel %vm2584_vm12, %v2577_v51, 920167782 }
 0x35a   : > { %v2594_v30 = vsel %vm2584_vm12, %v2580_v44, 1326507024  ;;  %v2593_v4 = vsel %vm2581_vm13, %v7575_v10, %v7580_v28  ;;  %v2589_v16 = vsel %vm2581_vm13, %v7582_v29, %v7575_v10  ;;  %v2591_v53 = vsel %vm2583_vm11, %v7580_v28, %v2590_v31 }
 0x35b   : > { %v2993_v22 = vadd.f32 1.0, %v2992_v23  ;;  %v3000_v20 = vadd.f32 1.0, %v2999_v11  ;;  %v3115_v12 = vshll.u32 %v7584_v13, 30  ;;  %v2595_v56 = vsel %vm2583_vm11, %v2577_v51, %v2594_v30  ;;  %v551_v51 = vpop.permute.xlu0 %550 }
 0x35c   : > { %v7607_v33 = vshll.u32 %v2557_v52, 8  ;;  %vm2582_vm14 = vcmp.lt.s32.totalorder %v7559_v7, 2  ;;  %vm3002_vm15 = vweird.f32 %v7202_v0  ;;  %vm3005_vm0 = vcmp.lt.s32.totalorder %v3004_v3, 2  ;;  %553 = vst.msk [vmem:[#allocation3 + $0x1] sm:$0x1] %vm6397_vm7, %v551_v51 }
 0x35d   : > { %v3001_v63 = vmul.f32 %v3000_v20, %v2985_v25  ;;  %v3010_v24 = vxor.u32 2147483648, %v2993_v22  ;;  %v3116_v26 = vsub.s32 %v3112_v32, %v3115_v12  ;;  %vm3006_vm2 = vcmp.eq.s32.totalorder %v3004_v3, 0 }
 0x35e   : > { %v2596_v45 = vsel %vm2582_vm14, %v2593_v4, %v2595_v56  ;;  %v2592_v8 = vsel %vm2582_vm14, %v2589_v16, %v2591_v53  ;;  %vm3009_vm1 = vcmp.eq.s32.totalorder %v3004_v3, 2  ;;  %v2598_v25 = vand.u32 65535, %v7607_v33 }
 0x35f   : > { %v3007_v5 = vxor.u32 2147483648, %v3001_v63  ;;  %vm3117_vm3 = vcmp.lt.s32.totalorder %v3116_v26, 0  ;;  %v3118_v18 = vsub.s32 0, %v3116_v26  ;;  %v2600_v32 = vand.u32 65535, %v2596_v45 }
 0x360   : > { %v2601_v60 = vshrl.u32 %v2596_v45, 16  ;;  %v3011_v34 = vsel %vm3009_vm1, %v3010_v24, %v3001_v63  ;;  %v2599_v57 = vshrl.u32 %v7607_v33, 16  ;;  %v630_v23 = vmul.f32 %v6293_v43, %v6444_v49 }
 0x361   : > { %v3008_v54 = vsel %vm3006_vm2, %v2993_v22, %v3007_v5  ;;  %v3119_v14 = vsel %vm3117_vm3, %v3118_v18, %v3116_v26  ;;  %v2623_v11 = vshrl.u32 %v2592_v8, 16  ;;  %v2622_v12 = vand.u32 65535, %v2592_v8 }
 0x362   : > { %v3012_v52 = vsel %vm3005_vm0, %v3008_v54, %v3011_v34  ;;  %v3120_v44 = vclz %v3119_v14  ;;  %v2603_v30 = vmul.u32 %v2601_v60, %v2598_v25  ;;  %v2604_v20 = vmul.u32 %v2600_v32, %v2599_v57 }
 0x363   : > { %v3013_v31 = vsel %vm3002_vm15, nan, %v3012_v52  ;;  %v7626_v22 = vadd.f32 %v7422_v2, %v630_v23  ;;  %v3108_v3 = vadd.s32 %v7556_v55, %v7554_v27  ;;  %v2602_v4 = vmul.u32 %v2600_v32, %v2598_v25 }
 0x364   : > { %v5883_v19 = vadd.s32 4294967294, %v3120_v44  ;;  %3183 = vst [vmem:[%s6771_s17 + $0x70] sm:$0xff] %v3013_v31  ;;  %v2605_v16 = vmul.u32 %v2601_v60, %v2599_v57  ;;  %v2606_v53 = vshll.u32 %v2603_v30, 16  ;;  %v2607_v56 = vshrl.u32 %v2603_v30, 16 }
 0x365   : > { %v2608_v63 = vshll.u32 %v2604_v20, 16  ;;  %v2625_v24 = vmul.u32 %v2623_v11, %v2598_v25  ;;  %v2626_v5 = vmul.u32 %v2622_v12, %v2599_v57  ;;  %v2624_v54 = vmul.u32 %v2622_v12, %v2598_v25 }
 0x366   : > { %vm5884_vm7 = vcmp.lt.s32.totalorder %v5883_v19, 0  ;;  %vm2610_vm4 = vc.u32 %v2602_v4, %v2606_v53  ;;  %v2612_v45 = vadd.s32 %v2606_v53, %v2602_v4  ;;  %v2627_v14 = vmul.u32 %v2623_v11, %v2599_v57 }
 0x367   : > { %v3123_v0 = vsel %vm5884_vm7, 0, %v5883_v19  ;;  %v2611_v51 = vsel %vm2610_vm4, 1, %v10213_v58  ;;  %v2628_v27 = vshll.u32 %v2625_v24, 16  ;;  %v2630_v23 = vshll.u32 %v2626_v5, 16 }
 0x368   : > { %v3124_v18 = vsub.s32 32, %v3123_v0  ;;  %v3128_v8 = vsub.s32 4294967266, %v3123_v0  ;;  %v2613_v34 = vadd.s32 %v2611_v51, %v2605_v16  ;;  %vm2614_vm8 = vc.u32 %v2612_v45, %v2608_v63 }
 0x369   : > { %v3125_v55 = vshll.u32 %v3116_v26, %v3123_v0  ;;  %v2615_v52 = vsel %vm2614_vm8, 1, %v10213_v58  ;;  %vm2632_vm5 = vc.u32 %v2624_v54, %v2628_v27  ;;  %v2634_v31 = vadd.s32 %v2628_v27, %v2624_v54 }
 0x36a   : > { %v3126_v32 = vshrl.u32 %v3108_v3, %v3124_v18  ;;  %v3129_v60 = vadd.s32 127, %v3128_v8  ;;  %v2617_v44 = vadd.s32 %v2615_v52, %v2613_v34  ;;  %v2565_v4 = vshrl.u32 %v10209_v46, %v7552_v9 }
 0x36b   : > { %v2633_v25 = vsel %vm2632_vm5, 1, %v10213_v58  ;;  %v2586_v57 = vsel %vm2584_vm12, %v7580_v28, 2102212464  ;;  %vm2636_vm9 = vc.u32 %v2634_v31, %v2630_v23  ;;  %v3138_v3 = vsub.s32 4, %v7584_v13 }
 0x36c   : > { %v3127_v30 = vor.u32 %v3126_v32, %v3125_v55  ;;  %v3130_v19 = vshll.u32 %v3129_v60, 23  ;;  %v2618_v26 = vadd.s32 %v2617_v44, %v2607_v56  ;;  %v2635_v11 = vadd.s32 %v2633_v25, %v2627_v14 }
 0x36d   : > { %v2609_v16 = vshrl.u32 %v2604_v20, 16  ;;  %v2637_v53 = vsel %vm2636_vm9, 1, %v10213_v58  ;;  %v2585_v63 = vsel %vm2581_vm13, %v2565_v4, %v7582_v29  ;;  %v2629_v9 = vshrl.u32 %v2625_v24, 16 }
 0x36e   : > { %v3131_v12 = vor.u32 4788187, %v3130_v19  ;;  %v2639_v0 = vadd.s32 %v2637_v53, %v2635_v11  ;;  %v2707_v45 = vand.u32 2139095040, %v7626_v22  ;;  %v3134_v8 = vcvt.s32.f32 %v3127_v30  ;;  %v7668_v11 = vld [vmem:[#allocation3] sm:$0x3] }
 0x36f   : > { %v2587_v28 = vsel %vm2583_vm11, %v7575_v10, %v2586_v57  ;;  %v7647_v56 = vadd.s32 %v2618_v26, %v2609_v16  ;;  %vm3016_vm10 = vcmp.lt.s32.totalorder %v7391_v61, 0  ;;  %v2631_v20 = vshrl.u32 %v2626_v5, 16 }
 0x370   : > { %v3132_v18 = vand.u32 2147483647, %v3131_v12  ;;  %v2640_v51 = vadd.s32 %v2639_v0, %v2629_v9  ;;  %v2708_v54 = vshrl.u32 %v2707_v45, 23  ;;  %v3139_v29 = vsel %vm3016_vm10, %v3138_v3, %v7584_v13 }
 0x371   : > { %v7653_v24 = vadd.s32 %v2634_v31, %v2630_v23  ;;  %v2704_v14 = vand.u32 2147483647, %v7626_v22  ;;  %v2588_v27 = vsel %vm2582_vm14, %v2585_v63, %v2587_v28  ;;  %v10215_v32 = vand.u32 2147483647, %v7391_v61 }
 0x372   : > { %v3135_v34 = vmul.f32 %v3134_v8, %v3132_v18  ;;  %v2641_v10 = vadd.s32 %v2640_v51, %v2631_v20  ;;  %v5876_v55 = vadd.s32 4294967169, %v2708_v54  ;;  %v2642_v23 = vmul.u32 %v7607_v33, %v2588_v27 }
 0x373   : > { %vm3015_vm6 = vcmp.le.f32.partialorder %v10215_v32, 0.7853982  ;;  %vm2644_vm12 = vc.u32 %v7647_v56, %v7653_v24  ;;  %v2711_v7 = vand.u32 8388607, %v2704_v14  ;;  %v7675_v18 = vperm.slane %v7668_v11, 0 }
 0x374   : > { %v3136_v5 = vxor.u32 2147483648, %v3135_v34  ;;  %v3141_v60 = vsel %vm3015_vm6, 0, %v3139_v29  ;;  %v2645_v52 = vadd.s32 1, %v2641_v10  ;;  %v2714_v44 = vadd.s32 1, %v5876_v55 }
 0x375   : > { %v3158_v4 = vadd.s32 3, %v3141_v60  ;;  %v2712_v53 = vor.u32 8388608, %v2711_v7  ;;  %vm3157_vm2 = vweird.f32 %v7391_v61  ;;  %vm2551_vm5 = vcmp.lt.s32.totalorder %v7431_v62, 0 }
 0x376   : > { %v3137_v13 = vsel %vm3016_vm10, %v3136_v5, %v3135_v34  ;;  %v2646_v30 = vsel %vm2644_vm12, %v2645_v52, %v2641_v10  ;;  %vm2715_vm13 = vcmp.gt.s32.totalorder %v2714_v44, 0 }
 0x377   : > { %v3140_v31 = vsel %vm3015_vm6, %v7391_v61, %v3137_v13  ;;  %v2647_v25 = vadd.s32 %v2646_v30, %v2642_v23  ;;  %v2716_v57 = vsel %vm2715_vm13, %v2714_v44, 0  ;;  %v3159_v0 = vand.u32 3, %v3158_v4 }
 0x378   : > { %v3142_v19 = vmul.f32 %v3140_v31, %v3140_v31  ;;  %v2718_v26 = vand.u32 31, %v2716_v57  ;;  %v7678_v51 = vshll.u32 %v2712_v53, 8  ;;  %v7680_v54 = vshrl.u32 %v2716_v57, 5 }
 0x379   : > { %v2648_v16 = vadd.s32 536870912, %v2647_v25  ;;  %vm3164_vm11 = vcmp.eq.s32.totalorder %v3159_v0, 2  ;;  %vm3161_vm14 = vcmp.eq.s32.totalorder %v3159_v0, 0  ;;  %vm3160_vm15 = vcmp.lt.s32.totalorder %v3159_v0, 2 }
 0x37a   : > { %v3143_v12 = vmul.f32 -0.001358992, %v3142_v19  ;;  %v3150_v3 = vmul.f32 -0.00019511016, %v3142_v19  ;;  %v7670_v63 = vsub.s32 32, %v2718_v26  ;;  %v2721_v5 = vshll.u32 %v10209_v46, %v2718_v26 }
 0x37b   : > { %v7672_v45 = vshrl.u32 %v2648_v16, 30  ;;  %v2724_v60 = vshll.u32 %v10205_v41, %v2718_v26  ;;  %v2730_v44 = vshll.u32 %v10197_v15, %v2718_v26  ;;  %v2727_v57 = vshll.u32 %v10204_v6, %v2718_v26 }
 0x37c   : > { %v3144_v33 = vadd.f32 0.041655596, %v3143_v12  ;;  %v3151_v9 = vadd.f32 0.008332121, %v3150_v3  ;;  %v2722_v34 = vshrl.u32 %v10205_v41, %v7670_v63  ;;  %v2725_v29 = vshrl.u32 %v10204_v6, %v7670_v63 }
 0x37d   : > { %v2650_v20 = vshll.u32 %v7672_v45, 30  ;;  %v2731_v27 = vshrl.u32 %v10191_v59, %v7670_v63  ;;  %v2728_v52 = vshrl.u32 %v10197_v15, %v7670_v63  ;;  %v2734_v13 = vshrl.u32 %v10192_v17, %v7670_v63 }
 0x37e   : > { %v3145_v8 = vmul.f32 %v3144_v33, %v3142_v19  ;;  %v3152_v28 = vmul.f32 %v3151_v9, %v3142_v19  ;;  %v7700_v4 = vor.u32 %v2722_v34, %v2721_v5  ;;  %v2643_v33 = vadd.s32 %v7653_v24, %v7647_v56 }
 0x37f   : > { %v7688_v32 = vsub.s32 %v2647_v25, %v2650_v20  ;;  %v7702_v25 = vor.u32 %v2725_v29, %v2724_v60  ;;  %v2732_v12 = vor.u32 %v2731_v27, %v2730_v44  ;;  %vm2736_vm3 = vcmp.lt.s32.totalorder %v7680_v54, 1 }
 0x380   : > { %v3146_v10 = vadd.f32 -0.4999988, %v3145_v8  ;;  %v3153_v55 = vadd.f32 -0.16666654, %v3152_v28  ;;  %v2729_v8 = vor.u32 %v2728_v52, %v2727_v57  ;;  %v3190_v28 = vmul.f32 %v7675_v18, %v6280_v36 }
 0x381   : > { %vm2652_vm0 = vcmp.lt.s32.totalorder %v7688_v32, 0  ;;  %v2653_v30 = vsub.s32 0, %v7688_v32  ;;  %vm2739_vm1 = vcmp.lt.s32.totalorder %v7680_v54, 4  ;;  %v2753_v56 = vand.u32 65535, %v7678_v51 }
 0x382   : > { %v3147_v23 = vmul.f32 %v3146_v10, %v3142_v19  ;;  %v3154_v7 = vmul.f32 %v3153_v55, %v3142_v19  ;;  %v2733_v19 = vshll.u32 %v10191_v59, %v2718_v26  ;;  %v2744_v26 = vsel %vm2736_vm3, %v7700_v4, %v7702_v25 }
 0x383   : > { %v2654_v53 = vsel %vm2652_vm0, %v2653_v30, %v7688_v32  ;;  %vm2737_vm7 = vcmp.lt.s32.totalorder %v7680_v54, 2  ;;  %vm2738_vm4 = vcmp.lt.s32.totalorder %v7680_v54, 3  ;;  %v2748_v5 = vsel %vm2736_vm3, %v7702_v25, %v2729_v8 }
 0x384   : > { %v3148_v3 = vadd.f32 1.0, %v3147_v23  ;;  %v3155_v16 = vadd.f32 1.0, %v3154_v7  ;;  %v2655_v9 = vclz %v2654_v53  ;;  %v2735_v29 = vor.u32 %v2734_v13, %v2733_v19 }
 0x385   : > { %v2754_v57 = vshrl.u32 %v7678_v51, 16  ;;  %v7745_v61 = vadd.f32 %v3190_v28, %v6311_v50 }
 0x386   : > { %v3156_v20 = vmul.f32 %v3155_v16, %v3140_v31  ;;  %v3165_v34 = vxor.u32 2147483648, %v3148_v3  ;;  %v5874_v27 = vadd.s32 4294967294, %v2655_v9  ;;  %v2745_v31 = vsel %vm2739_vm1, %v2732_v12, 920167782 }
 0x387   : > { %v2746_v55 = vsel %vm2738_vm4, %v2729_v8, %v2745_v31  ;;  %v2749_v13 = vsel %vm2739_vm1, %v2735_v29, 1326507024 }
 0x388   : > { %v3162_v24 = vxor.u32 2147483648, %v3156_v20  ;;  %v3166_v10 = vsel %vm3164_vm11, %v3165_v34, %v3156_v20  ;;  %vm5875_vm8 = vcmp.lt.s32.totalorder %v5874_v27, 0  ;;  %v2747_v44 = vsel %vm2737_vm7, %v2744_v26, %v2746_v55 }
 0x389   : > { %v2658_v52 = vsel %vm5875_vm8, 0, %v5874_v27  ;;  %v2777_v53 = vand.u32 65535, %v2747_v44  ;;  %v2778_v19 = vshrl.u32 %v2747_v44, 16  ;;  %v2673_v55 = vsub.s32 4, %v7672_v45 }
 0x38a   : > { %v3163_v60 = vsel %vm3161_vm14, %v3148_v3, %v3162_v24  ;;  %v2659_v7 = vsub.s32 32, %v2658_v52  ;;  %v2663_v30 = vsub.s32 4294967266, %v2658_v52  ;;  %v2750_v3 = vsel %vm2738_vm4, %v2732_v12, %v2749_v13 }
 0x38b   : > { %v3167_v23 = vsel %vm3160_vm15, %v3163_v60, %v3166_v10  ;;  %v2660_v9 = vshll.u32 %v7688_v32, %v2658_v52  ;;  %v2751_v34 = vsel %vm2737_vm7, %v2748_v5, %v2750_v3  ;;  %v2780_v26 = vmul.u32 %v2778_v19, %v2753_v56 }
 0x38c   : > { %v3168_v16 = vsel %vm3157_vm2, nan, %v3167_v23  ;;  %v2661_v20 = vshrl.u32 %v2643_v33, %v2659_v7  ;;  %v2664_v0 = vadd.s32 127, %v2663_v30  ;;  %v2755_v29 = vand.u32 65535, %v2751_v34 }
 0x38d   : > { %3184 = vst [vmem:[%s6771_s17 + $0x78] sm:$0xff] %v3168_v16  ;;  %v2756_v27 = vshrl.u32 %v2751_v34, 16  ;;  %v2720_v12 = vshrl.u32 %v10209_v46, %v7670_v63  ;;  %v2781_v10 = vmul.u32 %v2777_v53, %v2754_v57  ;;  %v2741_v32 = vsel %vm2739_vm1, %v2729_v8, 2102212464 }
 0x38e   : > { %v2662_v24 = vor.u32 %v2661_v20, %v2660_v9  ;;  %v2665_v31 = vshll.u32 %v2664_v0, 23  ;;  %v2759_v60 = vmul.u32 %v2755_v29, %v2754_v57  ;;  %v2779_v52 = vmul.u32 %v2777_v53, %v2753_v56 }
 0x38f   : > { %v2758_v33 = vmul.u32 %v2756_v27, %v2753_v56  ;;  %v2782_v44 = vmul.u32 %v2778_v19, %v2754_v57  ;;  %v2783_v13 = vshll.u32 %v2780_v26, 16  ;;  %v2757_v28 = vmul.u32 %v2755_v29, %v2753_v56 }
 0x390   : > { %v2666_v5 = vor.u32 4788187, %v2665_v31  ;;  %v2669_v23 = vcvt.s32.f32 %v2662_v24  ;;  %v2760_v7 = vmul.u32 %v2756_v27, %v2754_v57  ;;  %v2763_v3 = vshll.u32 %v2759_v60, 16 }
 0x391   : > { %v2761_v30 = vshll.u32 %v2758_v33, 16  ;;  %v2785_v9 = vshll.u32 %v2781_v10, 16  ;;  %vm2787_vm9 = vc.u32 %v2779_v52, %v2783_v13  ;;  %v2789_v0 = vadd.s32 %v2783_v13, %v2779_v52 }
 0x392   : > { %v2667_v16 = vand.u32 2147483647, %v2666_v5  ;;  %v2788_v20 = vsel %vm2787_vm9, 1, %v10213_v58  ;;  %v2674_v53 = vsel %vm2551_vm5, %v2673_v55, %v7672_v45  ;;  %v2740_v56 = vsel %vm2736_vm3, %v2720_v12, %v7700_v4 }
 0x393   : > { %vm2765_vm10 = vc.u32 %v2757_v28, %v2761_v30  ;;  %v2767_v63 = vadd.s32 %v2761_v30, %v2757_v28  ;;  %v2790_v34 = vadd.s32 %v2788_v20, %v2782_v44  ;;  %vm2791_vm12 = vc.u32 %v2789_v0, %v2785_v9 }
 0x394   : > { %v2670_v8 = vmul.f32 %v2669_v23, %v2667_v16  ;;  %v2766_v19 = vsel %vm2765_vm10, 1, %v10213_v58  ;;  %v2742_v27 = vsel %vm2738_vm4, %v7702_v25, %v2741_v32  ;;  %v2792_v31 = vsel %vm2791_vm12, 1, %v10213_v58 }
 0x395   : > { %v2768_v57 = vadd.s32 %v2766_v19, %v2760_v7  ;;  %vm2769_vm6 = vc.u32 %v2767_v63, %v2763_v3  ;;  %v2762_v45 = vshrl.u32 %v2758_v33, 16  ;;  %v2784_v5 = vshrl.u32 %v2780_v26, 16 }
 0x396   : > { %v2671_v29 = vxor.u32 2147483648, %v2670_v8  ;;  %v2770_v24 = vsel %vm2769_vm6, 1, %v10213_v58  ;;  %v2794_v52 = vadd.s32 %v2792_v31, %v2790_v34  ;;  %v10216_v44 = vand.u32 2147483647, %v7431_v62 }
 0x397   : > { %v2772_v55 = vadd.s32 %v2770_v24, %v2768_v57  ;;  %v2764_v13 = vshrl.u32 %v2759_v60, 16  ;;  %v7774_v25 = vperm.slane %v7668_v11, 1  ;;  %v2786_v26 = vshrl.u32 %v2781_v10, 16 }
 0x398   : > { %vm7767_vm13 = vcmp.le.f32.partialorder %v10216_v44, 0.7853982  ;;  %v2672_v12 = vsel %vm2551_vm5, %v2671_v29, %v2670_v8  ;;  %v2795_v23 = vadd.s32 %v2794_v52, %v2784_v5  ;;  %v2743_v30 = vsel %vm2737_vm7, %v2740_v56, %v2742_v27 }
 0x399   : > { %v2675_v32 = vsel %vm7767_vm13, %v7431_v62, %v2672_v12  ;;  %v2773_v33 = vadd.s32 %v2772_v55, %v2762_v45  ;;  %v2676_v28 = vsel %vm7767_vm13, 0, %v2674_v53  ;;  %v7783_v16 = vadd.s32 %v2789_v0, %v2785_v9 }
 0x39a   : > { %v2677_v7 = vmul.f32 %v2675_v32, %v2675_v32  ;;  %v2796_v11 = vadd.s32 %v2795_v23, %v2786_v26  ;;  %v3222_v3 = vand.u32 2147483647, %v7745_v61  ;;  %v3225_v63 = vand.u32 2139095040, %v7745_v61 }
 0x39b   : > { %v7785_v60 = vadd.s32 %v2773_v33, %v2764_v13  ;;  %v2693_v10 = vadd.s32 3, %v2676_v28  ;;  %v2797_v9 = vmul.u32 %v7678_v51, %v2743_v30  ;;  %v3191_v56 = vmul.f32 %v7774_v25, %v6280_v36 }
 0x39c   : > { %v2678_v20 = vmul.f32 -0.001358992, %v2677_v7  ;;  %v2685_v8 = vmul.f32 -0.00019511016, %v2677_v7  ;;  %v2800_v53 = vadd.s32 1, %v2796_v11  ;;  %v3226_v19 = vshrl.u32 %v3225_v63, 23 }
 0x39d   : > { %vm2799_vm11 = vc.u32 %v7785_v60, %v7783_v16  ;;  %v3229_v29 = vand.u32 8388607, %v3222_v3  ;;  %v2694_v45 = vand.u32 3, %v2693_v10  ;;  %v7797_v4 = vadd.f32 %v3191_v56, %v6311_v50 }
 0x39e   : > { %v2679_v34 = vadd.f32 0.041655596, %v2678_v20  ;;  %v2686_v54 = vadd.f32 0.008332121, %v2685_v8  ;;  %v2801_v0 = vsel %vm2799_vm11, %v2800_v53, %v2796_v11  ;;  %v5885_v57 = vadd.s32 4294967169, %v3226_v19 }
 0x39f   : > { %v2802_v31 = vadd.s32 %v2801_v0, %v2797_v9  ;;  %v3230_v51 = vor.u32 8388608, %v3229_v29  ;;  %vm2692_vm15 = vweird.f32 %v7431_v62  ;;  %vm2695_vm0 = vcmp.lt.s32.totalorder %v2694_v45, 2 }
 0x3a0   : > { %v2680_v27 = vmul.f32 %v2679_v34, %v2677_v7  ;;  %v2687_v24 = vmul.f32 %v2686_v54, %v2677_v7  ;;  %v3232_v55 = vadd.s32 1, %v5885_v57  ;;  %vm2696_vm2 = vcmp.eq.s32.totalorder %v2694_v45, 0 }
 0x3a1   : > { %v2803_v44 = vadd.s32 536870912, %v2802_v31  ;;  %vm2706_vm3 = vcmp.lt.s32.totalorder %v7626_v22, 0  ;;  %vm2699_vm1 = vcmp.eq.s32.totalorder %v2694_v45, 2  ;;  %v3377_v63 = vand.u32 2147483647, %v7797_v4 }
 0x3a2   : > { %v2681_v5 = vadd.f32 -0.4999988, %v2680_v27  ;;  %v2688_v52 = vadd.f32 -0.16666654, %v2687_v24  ;;  %vm3233_vm14 = vcmp.gt.s32.totalorder %v3232_v55, 0  ;;  %v3380_v20 = vand.u32 2139095040, %v7797_v4 }
 0x3a3   : > { %v2804_v36 = vshrl.u32 %v2803_v44, 30  ;;  %v3234_v33 = vsel %vm3233_vm14, %v3232_v55, 0  ;;  %vm7805_vm7 = vcmp.le.f32.partialorder %v2704_v14, 0.7853982  ;;  %v7809_v19 = vshll.u32 %v3230_v51, 8 }
 0x3a4   : > { %v2682_v12 = vmul.f32 %v2681_v5, %v2677_v7  ;;  %v2689_v13 = vmul.f32 %v2688_v52, %v2677_v7  ;;  %v3236_v26 = vand.u32 31, %v3234_v33  ;;  %v7811_v34 = vshrl.u32 %v3234_v33, 5 }
 0x3a5   : > { %v2805_v30 = vshll.u32 %v2804_v36, 30  ;;  %v2828_v11 = vsub.s32 4, %v2804_v36  ;;  %v7835_v45 = vand.u32 8388607, %v3377_v63  ;;  %v3272_v62 = vshrl.u32 %v7809_v19, 16 }
 0x3a6   : > { %v2683_v23 = vadd.f32 1.0, %v2682_v12  ;;  %v2690_v28 = vadd.f32 1.0, %v2689_v13  ;;  %v3237_v50 = vsub.s32 32, %v3236_v26  ;;  %v3239_v54 = vshll.u32 %v10209_v46, %v3236_v26 }
 0x3a7   : > { %v2806_v53 = vsub.s32 %v2802_v31, %v2805_v30  ;;  %v3242_v57 = vshll.u32 %v10205_v41, %v3236_v26  ;;  %v2829_v29 = vsel %vm2706_vm3, %v2828_v11, %v2804_v36  ;;  %v3245_v27 = vshll.u32 %v10204_v6, %v3236_v26 }
 0x3a8   : > { %v2691_v7 = vmul.f32 %v2690_v28, %v2675_v32  ;;  %v2700_v8 = vxor.u32 2147483648, %v2683_v23  ;;  %v3240_v9 = vshrl.u32 %v10205_v41, %v3237_v50  ;;  %v3243_v0 = vshrl.u32 %v10204_v6, %v3237_v50 }
 0x3a9   : > { %vm2807_vm4 = vcmp.lt.s32.totalorder %v2806_v53, 0  ;;  %v2808_v32 = vsub.s32 0, %v2806_v53  ;;  %v3246_v24 = vshrl.u32 %v10197_v15, %v3237_v50  ;;  %v3248_v5 = vshll.u32 %v10197_v15, %v3236_v26 }
 0x3aa   : > { %v2697_v56 = vxor.u32 2147483648, %v2691_v7  ;;  %v2701_v14 = vsel %vm2699_vm1, %v2700_v8, %v2691_v7  ;;  %v3249_v52 = vshrl.u32 %v10191_v59, %v3237_v50  ;;  %v3241_v12 = vor.u32 %v3240_v9, %v3239_v54 }
 0x3ab   : > { %v2809_v55 = vsel %vm2807_vm4, %v2808_v32, %v2806_v53  ;;  %v3244_v13 = vor.u32 %v3243_v0, %v3242_v57  ;;  %v3251_v28 = vshll.u32 %v10191_v59, %v3236_v26  ;;  %v3252_v30 = vshrl.u32 %v10192_v17, %v3237_v50 }
 0x3ac   : > { %v2698_v31 = vsel %vm2696_vm2, %v2683_v23, %v2697_v56  ;;  %v2810_v51 = vclz %v2809_v55  ;;  %v3250_v33 = vor.u32 %v3249_v52, %v3248_v5  ;;  %v2798_v23 = vadd.s32 %v7783_v16, %v7785_v60 }
 0x3ad   : > { %v2702_v44 = vsel %vm2695_vm0, %v2698_v31, %v2701_v14  ;;  %v3247_v7 = vor.u32 %v3246_v24, %v3245_v27  ;;  %v3253_v8 = vor.u32 %v3252_v30, %v3251_v28  ;;  %v3271_v54 = vand.u32 65535, %v7809_v19 }
 0x3ae   : > { %v2703_v36 = vsel %vm2692_vm15, nan, %v2702_v44  ;;  %v5877_v11 = vadd.s32 4294967294, %v2810_v51  ;;  %v3381_v9 = vshrl.u32 %v3380_v20, 23  ;;  %v2831_v26 = vsel %vm7805_vm7, 0, %v2829_v29 }
 0x3af   : > { %3181 = vst [vmem:[%s6771_s17 + $0x60] sm:$0xff] %v2703_v36  ;;  %vm3254_vm5 = vcmp.lt.s32.totalorder %v7811_v34, 1  ;;  %vm3257_vm9 = vcmp.lt.s32.totalorder %v7811_v34, 4  ;;  %v3238_v60 = vshrl.u32 %v10209_v46, %v3237_v50  ;;  %vm3256_vm10 = vcmp.lt.s32.totalorder %v7811_v34, 3 }
 0x3b0   : > { %vm5878_vm8 = vcmp.lt.s32.totalorder %v5877_v11, 0  ;;  %v3262_v0 = vsel %vm3254_vm5, %v3241_v12, %v3244_v13  ;;  %v3263_v56 = vsel %vm3257_vm9, %v3250_v33, 920167782  ;;  %v3266_v20 = vsel %vm3254_vm5, %v3244_v13, %v3247_v7 }
 0x3b1   : > { %v2813_v16 = vsel %vm5878_vm8, 0, %v5877_v11  ;;  %vm3255_vm6 = vcmp.lt.s32.totalorder %v7811_v34, 2  ;;  %v3264_v29 = vsel %vm3256_vm10, %v3247_v7, %v3263_v56  ;;  %v3267_v50 = vsel %vm3257_vm9, %v3253_v8, 1326507024 }
 0x3b2   : > { %v2814_v32 = vsub.s32 32, %v2813_v16  ;;  %v2818_v57 = vsub.s32 4294967266, %v2813_v16  ;;  %v2815_v14 = vshll.u32 %v2806_v53, %v2813_v16  ;;  %v3265_v31 = vsel %vm3255_vm6, %v3262_v0, %v3264_v29 }
 0x3b3   : > { %v3268_v55 = vsel %vm3256_vm10, %v3250_v33, %v3267_v50  ;;  %v3259_v5 = vsel %vm3257_vm9, %v3247_v7, 2102212464  ;;  %v3295_v52 = vand.u32 65535, %v3265_v31  ;;  %v3296_v44 = vshrl.u32 %v3265_v31, 16 }
 0x3b4   : > { %v2816_v27 = vshrl.u32 %v2798_v23, %v2814_v32  ;;  %v2819_v24 = vadd.s32 127, %v2818_v57  ;;  %v3269_v53 = vsel %vm3255_vm6, %v3266_v20, %v3268_v55  ;;  %v7864_v23 = vadd.s32 3, %v2831_v26 }
 0x3b5   : > { %v3273_v28 = vand.u32 65535, %v3269_v53  ;;  %v3274_v30 = vshrl.u32 %v3269_v53, 16  ;;  %v3258_v11 = vsel %vm3254_vm5, %v3238_v60, %v3241_v12  ;;  %v3298_v8 = vmul.u32 %v3296_v44, %v3271_v54 }
 0x3b6   : > { %v2817_v51 = vor.u32 %v2816_v27, %v2815_v14  ;;  %v2820_v36 = vshll.u32 %v2819_v24, 23  ;;  %v3299_v16 = vmul.u32 %v3295_v52, %v3272_v62  ;;  %v3260_v7 = vsel %vm3256_vm10, %v3244_v13, %v3259_v5 }
 0x3b7   : > { %v3276_v0 = vmul.u32 %v3274_v30, %v3271_v54  ;;  %v5888_v56 = vadd.s32 4294967169, %v3381_v9  ;;  %v3277_v32 = vmul.u32 %v3273_v28, %v3272_v62  ;;  %v3297_v57 = vmul.u32 %v3295_v52, %v3271_v54 }
 0x3b8   : > { %v2821_v33 = vor.u32 4788187, %v2820_v36  ;;  %v3300_v20 = vmul.u32 %v3296_v44, %v3272_v62  ;;  %v3301_v14 = vshll.u32 %v3298_v8, 16  ;;  %v2824_v50 = vcvt.s32.f32 %v2817_v51 }
 0x3b9   : > { %v3275_v27 = vmul.u32 %v3273_v28, %v3271_v54  ;;  %v3279_v26 = vshll.u32 %v3276_v0, 16  ;;  %v3278_v24 = vmul.u32 %v3274_v30, %v3272_v62  ;;  %v3281_v31 = vshll.u32 %v3277_v32, 16 }
 0x3ba   : > { %v2822_v29 = vand.u32 2147483647, %v2821_v33  ;;  %v3303_v55 = vshll.u32 %v3299_v16, 16  ;;  %vm3305_vm12 = vc.u32 %v3297_v57, %v3301_v14  ;;  %v3307_v9 = vadd.s32 %v3301_v14, %v3297_v57 }
 0x3bb   : > { %vm3283_vm13 = vc.u32 %v3275_v27, %v3279_v26  ;;  %v3285_v60 = vadd.s32 %v3279_v26, %v3275_v27  ;;  %v3306_v53 = vsel %vm3305_vm12, 1, %v10213_v58  ;;  %v3387_v52 = vadd.s32 1, %v5888_v56 }
 0x3bc   : > { %v2825_v12 = vmul.f32 %v2824_v50, %v2822_v29  ;;  %v3284_v13 = vsel %vm3283_vm13, 1, %v10213_v58  ;;  %v3308_v5 = vadd.s32 %v3306_v53, %v3300_v20  ;;  %v3261_v51 = vsel %vm3255_vm6, %v3258_v11, %v3260_v7 }
 0x3bd   : > { %v3286_v54 = vadd.s32 %v3284_v13, %v3278_v24  ;;  %vm3287_vm11 = vc.u32 %v3285_v60, %v3281_v31  ;;  %v3280_v62 = vshrl.u32 %v3276_v0, 16  ;;  %vm3309_vm14 = vc.u32 %v3307_v9, %v3303_v55 }
 0x3be   : > { %v2826_v44 = vxor.u32 2147483648, %v2825_v12  ;;  %v3288_v36 = vsel %vm3287_vm11, 1, %v10213_v58  ;;  %vm3388_vm15 = vcmp.gt.s32.totalorder %v3387_v52, 0  ;;  %v3310_v33 = vsel %vm3309_vm14, 1, %v10213_v58 }
 0x3bf   : > { %v3290_v30 = vadd.s32 %v3288_v36, %v3286_v54  ;;  %v3389_v57 = vsel %vm3388_vm15, %v3387_v52, 0  ;;  %v3302_v34 = vshrl.u32 %v3298_v8, 16  ;;  %v3312_v11 = vadd.s32 %v3310_v33, %v3308_v5 }
 0x3c0   : > { %v2827_v28 = vsel %vm2706_vm3, %v2826_v44, %v2825_v12  ;;  %v3391_v7 = vand.u32 31, %v3389_v57  ;;  %v3282_v0 = vshrl.u32 %v3277_v32, 16  ;;  %v3315_v29 = vmul.u32 %v7809_v19, %v3261_v51 }
 0x3c1   : > { %v2830_v56 = vsel %vm7805_vm7, %v7626_v22, %v2827_v28  ;;  %v3291_v14 = vadd.s32 %v3290_v30, %v3280_v62  ;;  %v3304_v50 = vshrl.u32 %v3299_v16, 16  ;;  %v7882_v27 = vadd.s32 %v3307_v9, %v3303_v55 }
 0x3c2   : > { %v2832_v20 = vmul.f32 %v2830_v56, %v2830_v56  ;;  %v3313_v26 = vadd.s32 %v3312_v11, %v3302_v34  ;;  %v7884_v24 = vsub.s32 32, %v3391_v7  ;;  %v7888_v10 = vshrl.u32 %v3389_v57, 5 }
 0x3c3   : > { %v7886_v60 = vadd.s32 %v3291_v14, %v3282_v0  ;;  %v3394_v53 = vshll.u32 %v10209_v46, %v3391_v7  ;;  %v3397_v13 = vshll.u32 %v10205_v41, %v3391_v7  ;;  %v3400_v52 = vshll.u32 %v10204_v6, %v3391_v7 }
 0x3c4   : > { %v2833_v31 = vmul.f32 -0.001358992, %v2832_v20  ;;  %v2840_v12 = vmul.f32 -0.00019511016, %v2832_v20  ;;  %v3314_v8 = vadd.s32 %v3313_v26, %v3304_v50  ;;  %v3395_v32 = vshrl.u32 %v10205_v41, %v7884_v24 }
 0x3c5   : > { %v3398_v19 = vshrl.u32 %v10204_v6, %v7884_v24  ;;  %vm3317_vm0 = vc.u32 %v7886_v60, %v7882_v27  ;;  %v3401_v44 = vshrl.u32 %v10197_v15, %v7884_v24  ;;  %v3403_v62 = vshll.u32 %v10197_v15, %v3391_v7 }
 0x3c6   : > { %v2834_v16 = vadd.f32 0.041655596, %v2833_v31  ;;  %v2841_v55 = vadd.f32 0.008332121, %v2840_v12  ;;  %v3318_v9 = vadd.s32 1, %v3314_v8  ;;  %v7898_v5 = vor.u32 %v3395_v32, %v3394_v53 }
 0x3c7   : > { %v3404_v36 = vshrl.u32 %v10191_v59, %v7884_v24  ;;  %v7906_v30 = vor.u32 %v3398_v19, %v3397_v13  ;;  %v3406_v33 = vshll.u32 %v10191_v59, %v3391_v7  ;;  %v3407_v57 = vshrl.u32 %v10192_v17, %v7884_v24 }
 0x3c8   : > { %v2835_v51 = vmul.f32 %v2834_v16, %v2832_v20  ;;  %v2842_v54 = vmul.f32 %v2841_v55, %v2832_v20  ;;  %v3319_v28 = vsel %vm3317_vm0, %v3318_v9, %v3314_v8  ;;  %v3385_v50 = vor.u32 8388608, %v7835_v45 }
 0x3c9   : > { %v3320_v0 = vadd.s32 %v3319_v28, %v3315_v29  ;;  %v3405_v14 = vor.u32 %v3404_v36, %v3403_v62  ;;  %v3402_v26 = vor.u32 %v3401_v44, %v3400_v52  ;;  %v3408_v31 = vor.u32 %v3407_v57, %v3406_v33 }
 0x3ca   : > { %v2836_v34 = vadd.f32 -0.4999988, %v2835_v51  ;;  %v2843_v11 = vadd.f32 -0.16666654, %v2842_v54  ;;  %vm3412_vm2 = vcmp.lt.s32.totalorder %v7888_v10, 4  ;;  %vm2847_vm3 = vweird.f32 %v7626_v22 }
 0x3cb   : > { %v3321_v32 = vadd.s32 536870912, %v3320_v0  ;;  %v2849_v7 = vand.u32 3, %v7864_v23  ;;  %vm3409_vm1 = vcmp.lt.s32.totalorder %v7888_v10, 1  ;;  %vm3411_vm7 = vcmp.lt.s32.totalorder %v7888_v10, 3 }
 0x3cc   : > { %v2837_v12 = vmul.f32 %v2836_v34, %v2832_v20  ;;  %v2844_v53 = vmul.f32 %v2843_v11, %v2832_v20  ;;  %v3418_v29 = vsel %vm3412_vm2, %v3405_v14, 920167782  ;;  %v3417_v20 = vsel %vm3409_vm1, %v7898_v5, %v7906_v30 }
 0x3cd   : > { %v7919_v19 = vshrl.u32 %v3321_v32, 30  ;;  %vm3410_vm4 = vcmp.lt.s32.totalorder %v7888_v10, 2  ;;  %v3419_v23 = vsel %vm3411_vm7, %v3402_v26, %v3418_v29  ;;  %v3422_v16 = vsel %vm3412_vm2, %v3408_v31, 1326507024 }
 0x3ce   : > { %v2838_v8 = vadd.f32 1.0, %v2837_v12  ;;  %v2845_v45 = vadd.f32 1.0, %v2844_v53  ;;  %v7930_v55 = vshll.u32 %v3385_v50, 8  ;;  %v3421_v44 = vsel %vm3409_vm1, %v7906_v30, %v3402_v26 }
 0x3cf   : > { %v3323_v52 = vshll.u32 %v7919_v19, 30  ;;  %v3192_v51 = vmul.f32 %v7675_v18, %v6278_v35  ;;  %v3193_v54 = vmul.f32 %v7774_v25, %v6278_v35  ;;  %v3420_v62 = vsel %vm3410_vm4, %v3417_v20, %v3419_v23 }
 0x3d0   : > { %v2846_v13 = vmul.f32 %v2845_v45, %v2830_v56  ;;  %v2855_v9 = vxor.u32 2147483648, %v2838_v8  ;;  %v3423_v36 = vsel %vm3411_vm7, %v3405_v14, %v3422_v16  ;;  %vm2850_vm8 = vcmp.lt.s32.totalorder %v2849_v7, 2 }
 0x3d1   : > { %vm2851_vm5 = vcmp.eq.s32.totalorder %v2849_v7, 0  ;;  %v3324_v28 = vsub.s32 %v3320_v0, %v3323_v52  ;;  %vm2854_vm9 = vcmp.eq.s32.totalorder %v2849_v7, 2  ;;  %v3424_v33 = vsel %vm3410_vm4, %v3421_v44, %v3423_v36 }
 0x3d2   : > { %v2852_v56 = vxor.u32 2147483648, %v2846_v13  ;;  %v3426_v57 = vand.u32 65535, %v7930_v55  ;;  %v3451_v34 = vshrl.u32 %v3420_v62, 16  ;;  %v2856_v35 = vsel %vm2854_vm9, %v2855_v9, %v2846_v13 }
 0x3d3   : > { %vm3325_vm10 = vcmp.lt.s32.totalorder %v3324_v28, 0  ;;  %v3326_v50 = vsub.s32 0, %v3324_v28  ;;  %v3427_v12 = vshrl.u32 %v7930_v55, 16  ;;  %v3428_v14 = vand.u32 65535, %v3424_v33 }
 0x3d4   : > { %v2853_v11 = vsel %vm2851_vm5, %v2838_v8, %v2852_v56  ;;  %v3429_v53 = vshrl.u32 %v3424_v33, 16  ;;  %v3450_v7 = vand.u32 65535, %v3420_v62  ;;  %v3453_v29 = vmul.u32 %v3451_v34, %v3426_v57 }
 0x3d5   : > { %v2857_v31 = vsel %vm2850_vm8, %v2853_v11, %v2856_v35  ;;  %v3327_v32 = vsel %vm3325_vm10, %v3326_v50, %v3324_v28  ;;  %v7952_v45 = vadd.f32 %v3192_v51, %v6307_v48  ;;  %v7955_v8 = vadd.f32 %v3193_v54, %v6307_v48 }
 0x3d6   : > { %v2858_v0 = vsel %vm2847_vm3, nan, %v2857_v31  ;;  %v3328_v20 = vclz %v3327_v32  ;;  %v3431_v23 = vmul.u32 %v3429_v53, %v3426_v57  ;;  %v3316_v16 = vadd.s32 %v7882_v27, %v7886_v60 }
 0x3d7   : > { %3182 = vst [vmem:[%s6771_s17 + $0x68] sm:$0xff] %v2858_v0  ;;  %v3393_v13 = vshrl.u32 %v10209_v46, %v7884_v24  ;;  %v3414_v22 = vsel %vm3412_vm2, %v3402_v26, 2102212464  ;;  %v3432_v9 = vmul.u32 %v3428_v14, %v3427_v12  ;;  %v3346_v44 = vsub.s32 4, %v7919_v19 }
 0x3d8   : > { %v5886_v52 = vadd.s32 4294967294, %v3328_v20  ;;  %v3430_v51 = vmul.u32 %v3428_v14, %v3426_v57  ;;  %v3434_v62 = vshll.u32 %v3431_v23, 16  ;;  %v3433_v36 = vmul.u32 %v3429_v53, %v3427_v12 }
 0x3d9   : > { %v3452_v48 = vmul.u32 %v3450_v7, %v3426_v57  ;;  %v3454_v54 = vmul.u32 %v3450_v7, %v3427_v12  ;;  %v3456_v56 = vshll.u32 %v3453_v29, 16  ;;  %v3435_v33 = vshrl.u32 %v3431_v23, 16 }
 0x3da   : > { %vm5887_vm6 = vcmp.lt.s32.totalorder %v5886_v52, 0  ;;  %vm3438_vm12 = vc.u32 %v3430_v51, %v3434_v62  ;;  %v3440_v27 = vadd.s32 %v3434_v62, %v3430_v51  ;;  %vm3224_vm13 = vcmp.lt.s32.totalorder %v7745_v61, 0 }
 0x3db   : > { %v3331_v24 = vsel %vm5887_vm6, 0, %v5886_v52  ;;  %v3436_v60 = vshll.u32 %v3432_v9, 16  ;;  %v3439_v26 = vsel %vm3438_vm12, 1, %v10213_v58  ;;  %v3455_v11 = vmul.u32 %v3451_v34, %v3427_v12 }
 0x3dc   : > { %v3332_v35 = vsub.s32 32, %v3331_v24  ;;  %v3336_v50 = vsub.s32 4294967266, %v3331_v24  ;;  %v3441_v31 = vadd.s32 %v3439_v26, %v3433_v36  ;;  %v3458_v14 = vshll.u32 %v3454_v54, 16 }
 0x3dd   : > { %v3333_v0 = vshll.u32 %v3324_v28, %v3331_v24  ;;  %vm3442_vm11 = vc.u32 %v3440_v27, %v3436_v60  ;;  %vm3460_vm14 = vc.u32 %v3452_v48, %v3456_v56  ;;  %v3462_v57 = vadd.s32 %v3456_v56, %v3452_v48 }
 0x3de   : > { %v3334_v53 = vshrl.u32 %v3316_v16, %v3332_v35  ;;  %v3337_v32 = vadd.s32 127, %v3336_v50  ;;  %v3443_v7 = vsel %vm3442_vm11, 1, %v10213_v58  ;;  %v3461_v20 = vsel %vm3460_vm14, 1, %v10213_v58 }
 0x3df   : > { %v3445_v23 = vadd.s32 %v3443_v7, %v3441_v31  ;;  %v3463_v52 = vadd.s32 %v3461_v20, %v3455_v11  ;;  %vm3464_vm15 = vc.u32 %v3462_v57, %v3458_v14  ;;  %v3532_v51 = vand.u32 2147483647, %v7952_v45 }
 0x3e0   : > { %v3335_v34 = vor.u32 %v3334_v53, %v3333_v0  ;;  %v3338_v12 = vshll.u32 %v3337_v32, 23  ;;  %v3437_v62 = vshrl.u32 %v3432_v9, 16  ;;  %v3465_v36 = vsel %vm3464_vm15, 1, %v10213_v58 }
 0x3e1   : > { %v3446_v28 = vadd.s32 %v3445_v23, %v3435_v33  ;;  %v3457_v27 = vshrl.u32 %v3453_v29, 16  ;;  %v3467_v24 = vadd.s32 %v3465_v36, %v3463_v52  ;;  %v3535_v16 = vand.u32 2139095040, %v7952_v45 }
 0x3e2   : > { %v3339_v48 = vor.u32 4788187, %v3338_v12  ;;  %v3413_v56 = vsel %vm3409_vm1, %v3393_v13, %v7898_v5  ;;  %v3415_v60 = vsel %vm3411_vm7, %v7906_v30, %v3414_v22  ;;  %v3459_v26 = vshrl.u32 %v3454_v54, 16 }
 0x3e3   : > { %v3447_v11 = vadd.s32 %v3446_v28, %v3437_v62  ;;  %v3468_v35 = vadd.s32 %v3467_v24, %v3457_v27  ;;  %v3536_v9 = vshrl.u32 %v3535_v16, 23  ;;  %v3539_v33 = vand.u32 8388607, %v3532_v51 }
 0x3e4   : > { %v3340_v29 = vand.u32 2147483647, %v3339_v48  ;;  %v3342_v50 = vcvt.s32.f32 %v3335_v34  ;;  %v3347_v31 = vsel %vm3224_vm13, %v3346_v44, %v7919_v19  ;;  %v3466_v0 = vadd.s32 %v3462_v57, %v3458_v14 }
 0x3e5   : > { %v3416_v5 = vsel %vm3410_vm4, %v3413_v56, %v3415_v60  ;;  %v3469_v13 = vadd.s32 %v3468_v35, %v3459_v26  ;;  %v5891_v53 = vadd.s32 4294967169, %v3536_v9  ;;  %vm7986_vm0 = vcmp.le.f32.partialorder %v3222_v3, 0.7853982 }
 0x3e6   : > { %v3343_v22 = vmul.f32 %v3342_v50, %v3340_v29  ;;  %vm3472_vm2 = vc.u32 %v3447_v11, %v3466_v0  ;;  %v3349_v54 = vsel %vm7986_vm0, 0, %v3347_v31  ;;  %v3540_v7 = vor.u32 8388608, %v3539_v33 }
 0x3e7   : > { %v3473_v32 = vadd.s32 1, %v3469_v13  ;;  %v3542_v19 = vadd.s32 1, %v5891_v53  ;;  %v3470_v10 = vmul.u32 %v7930_v55, %v3416_v5  ;;  %v3690_v14 = vand.u32 2139095040, %v7955_v8 }
 0x3e8   : > { %v3344_v44 = vxor.u32 2147483648, %v3343_v22  ;;  %v3366_v20 = vadd.s32 3, %v3349_v54  ;;  %v7999_v62 = vshll.u32 %v3540_v7, 8  ;;  %vm3379_vm1 = vcmp.lt.s32.totalorder %v7797_v4, 0 }
 0x3e9   : > { %v3474_v57 = vsel %vm3472_vm2, %v3473_v32, %v3469_v13  ;;  %vm3543_vm3 = vcmp.gt.s32.totalorder %v3542_v19, 0  ;;  %v3691_v55 = vshrl.u32 %v3690_v14, 23  ;;  %v8006_v60 = vadd.s32 %v3466_v0, %v3447_v11 }
 0x3ea   : > { %v3345_v3 = vsel %vm3224_vm13, %v3344_v44, %v3343_v22  ;;  %v3475_v23 = vadd.s32 %v3474_v57, %v3470_v10  ;;  %v3544_v52 = vsel %vm3543_vm3, %v3542_v19, 0  ;;  %v8003_v48 = vand.u32 3, %v3366_v20 }
 0x3eb   : > { %v3348_v34 = vsel %vm7986_vm0, %v7745_v61, %v3345_v3  ;;  %v3546_v12 = vand.u32 31, %v3544_v52  ;;  %v8009_v26 = vand.u32 65535, %v7999_v62  ;;  %v8012_v35 = vshrl.u32 %v7999_v62, 16 }
 0x3ec   : > { %v3350_v36 = vmul.f32 %v3348_v34, %v3348_v34  ;;  %v3476_v28 = vadd.s32 536870912, %v3475_v23  ;;  %v3687_v9 = vand.u32 2147483647, %v7955_v8  ;;  %v5894_v31 = vadd.s32 4294967169, %v3691_v55 }
 0x3ed   : > { %v8001_v27 = vsub.s32 32, %v3546_v12  ;;  %v8015_v5 = vshrl.u32 %v3544_v52, 5  ;;  %v3549_v13 = vshll.u32 %v10209_v46, %v3546_v12  ;;  %vm3372_vm7 = vcmp.eq.s32.totalorder %v8003_v48, 2 }
 0x3ee   : > { %v3351_v24 = vmul.f32 -0.001358992, %v3350_v36  ;;  %v3358_v16 = vmul.f32 -0.00019511016, %v3350_v36  ;;  %v3477_v56 = vshrl.u32 %v3476_v28, 30  ;;  %v3552_v7 = vshll.u32 %v10205_v41, %v3546_v12 }
 0x3ef   : > { %v3550_v11 = vshrl.u32 %v10205_v41, %v8001_v27  ;;  %v3553_v0 = vshrl.u32 %v10204_v6, %v8001_v27  ;;  %v3559_v54 = vshrl.u32 %v10191_v59, %v8001_v27  ;;  %v3556_v19 = vshrl.u32 %v10197_v15, %v8001_v27 }
 0x3f0   : > { %v3352_v33 = vadd.f32 0.041655596, %v3351_v24  ;;  %v3359_v29 = vadd.f32 0.008332121, %v3358_v16  ;;  %v3478_v50 = vshll.u32 %v3477_v56, 30  ;;  %v3501_v32 = vsub.s32 4, %v3477_v56 }
 0x3f1   : > { %v3558_v44 = vshll.u32 %v10197_v15, %v3546_v12  ;;  %vm3369_vm8 = vcmp.eq.s32.totalorder %v8003_v48, 0  ;;  %v3551_v3 = vor.u32 %v3550_v11, %v3549_v13  ;;  %v8034_v20 = vor.u32 %v3553_v0, %v3552_v7 }
 0x3f2   : > { %v3353_v53 = vmul.f32 %v3352_v33, %v3350_v36  ;;  %v3360_v30 = vmul.f32 %v3359_v29, %v3350_v36  ;;  %v8022_v22 = vsub.s32 %v3475_v23, %v3478_v50  ;;  %v3555_v23 = vshll.u32 %v10204_v6, %v3546_v12 }
 0x3f3   : > { %v3562_v52 = vshrl.u32 %v10192_v17, %v8001_v27  ;;  %vm3368_vm5 = vcmp.lt.s32.totalorder %v8003_v48, 2  ;;  %v3560_v16 = vor.u32 %v3559_v54, %v3558_v44  ;;  %vm3365_vm9 = vweird.f32 %v7745_v61 }
 0x3f4   : > { %v3354_v10 = vadd.f32 -0.4999988, %v3353_v53  ;;  %v3361_v14 = vadd.f32 -0.16666654, %v3360_v30  ;;  %vm3480_vm4 = vcmp.lt.s32.totalorder %v8022_v22, 0  ;;  %v3481_v57 = vsub.s32 0, %v8022_v22 }
 0x3f5   : > { %v3557_v29 = vor.u32 %v3556_v19, %v3555_v23  ;;  %v3561_v50 = vshll.u32 %v10191_v59, %v3546_v12  ;;  %v8043_v13 = vadd.s32 1, %v5894_v31  ;;  %v8047_v53 = vsel %vm3379_vm1, %v3501_v32, %v3477_v56 }
 0x3f6   : > { %v3355_v28 = vmul.f32 %v3354_v10, %v3350_v36  ;;  %v3362_v55 = vmul.f32 %v3361_v14, %v3350_v36  ;;  %v3482_v24 = vsel %vm3480_vm4, %v3481_v57, %v8022_v22  ;;  %vm3564_vm10 = vcmp.lt.s32.totalorder %v8015_v5, 1 }
 0x3f7   : > { %v3483_v33 = vclz %v3482_v24  ;;  %vm8052_vm6 = vcmp.le.f32.partialorder %v3377_v63, 0.7853982  ;;  %v3563_v54 = vor.u32 %v3562_v52, %v3561_v50  ;;  %vm3567_vm12 = vcmp.lt.s32.totalorder %v8015_v5, 4 }
 0x3f8   : > { %v3356_v11 = vadd.f32 1.0, %v3355_v28  ;;  %v3363_v0 = vadd.f32 1.0, %v3362_v55  ;;  %v3572_v12 = vsel %vm3564_vm10, %v3551_v3, %v8034_v20  ;;  %vm3566_vm13 = vcmp.lt.s32.totalorder %v8015_v5, 3 }
 0x3f9   : > { %v5889_v30 = vadd.s32 4294967294, %v3483_v33  ;;  %v3573_v56 = vsel %vm3567_vm12, %v3560_v16, 920167782  ;;  %vm3565_vm14 = vcmp.lt.s32.totalorder %v8015_v5, 2  ;;  %v3576_v32 = vsel %vm3564_vm10, %v8034_v20, %v3557_v29 }
 0x3fa   : > { %v3364_v31 = vmul.f32 %v3363_v0, %v3348_v34  ;;  %v3373_v7 = vxor.u32 2147483648, %v3356_v11  ;;  %v3574_v63 = vsel %vm3566_vm13, %v3557_v29, %v3573_v56  ;;  %v3577_v52 = vsel %vm3567_vm12, %v3563_v54, 1326507024 }
 0x3fb   : > { %vm5890_vm11 = vcmp.lt.s32.totalorder %v5889_v30, 0  ;;  %v3575_v10 = vsel %vm3565_vm14, %v3572_v12, %v3574_v63  ;;  %v3578_v55 = vsel %vm3566_vm13, %v3560_v16, %v3577_v52  ;;  %vm3698_vm15 = vcmp.gt.s32.totalorder %v8043_v13, 0 }
 0x3fc   : > { %v3370_v19 = vxor.u32 2147483648, %v3364_v31  ;;  %v3374_v34 = vsel %vm3372_vm7, %v3373_v7, %v3364_v31  ;;  %v3486_v44 = vsel %vm5890_vm11, 0, %v5889_v30  ;;  %v3605_v24 = vand.u32 65535, %v3575_v10 }
 0x3fd   : > { %v3487_v14 = vsub.s32 32, %v3486_v44  ;;  %v3488_v57 = vshll.u32 %v8022_v22, %v3486_v44  ;;  %v3491_v23 = vsub.s32 4294967266, %v3486_v44  ;;  %v3606_v33 = vshrl.u32 %v3575_v10, 16 }
 0x3fe   : > { %v3371_v28 = vsel %vm3369_vm8, %v3356_v11, %v3370_v19  ;;  %v3579_v22 = vsel %vm3565_vm14, %v3576_v32, %v3578_v55  ;;  %v3548_v16 = vshrl.u32 %v10209_v46, %v8001_v27  ;;  %v3504_v56 = vsel %vm8052_vm6, 0, %v8047_v53 }
 0x3ff   : > { %v3375_v50 = vsel %vm3368_vm5, %v3371_v28, %v3374_v34  ;;  %v3489_v0 = vshrl.u32 %v8006_v60, %v3487_v14  ;;  %v3492_v30 = vadd.s32 127, %v3491_v23  ;;  %v3583_v54 = vand.u32 65535, %v3579_v22 }
 0x400   : > { %v3376_v11 = vsel %vm3365_vm9, nan, %v3375_v50  ;;  %v3584_v12 = vshrl.u32 %v3579_v22, 16  ;;  %v3608_v48 = vmul.u32 %v3606_v33, %v8009_v26  ;;  %v3609_v60 = vmul.u32 %v3605_v24, %v8012_v35 }
 0x401   : > { %v3490_v31 = vor.u32 %v3489_v0, %v3488_v57  ;;  %v3493_v7 = vshll.u32 %v3492_v30, 23  ;;  %5702 = vst [vmem:[%s6771_s17 + $0x80] sm:$0xff] %v3376_v11  ;;  %v3568_v61 = vsel %vm3564_vm10, %v3548_v16, %v3551_v3  ;;  %v3587_v27 = vmul.u32 %v3583_v54, %v8012_v35 }
 0x402   : > { %v3586_v63 = vmul.u32 %v3584_v12, %v8009_v26  ;;  %v3569_v19 = vsel %vm3567_vm12, %v3557_v29, 2102212464  ;;  %v3607_v34 = vmul.u32 %v3605_v24, %v8009_v26  ;;  %v3611_v44 = vshll.u32 %v3608_v48, 16 }
 0x403   : > { %v3494_v32 = vor.u32 4788187, %v3493_v7  ;;  %v3497_v10 = vcvt.s32.f32 %v3490_v31  ;;  %v3585_v14 = vmul.u32 %v3583_v54, %v8009_v26  ;;  %v3588_v57 = vmul.u32 %v3584_v12, %v8012_v35 }
 0x404   : > { %v3589_v53 = vshll.u32 %v3586_v63, 16  ;;  %v3591_v52 = vshll.u32 %v3587_v27, 16  ;;  %v3610_v3 = vmul.u32 %v3606_v33, %v8012_v35  ;;  %v3613_v28 = vshll.u32 %v3609_v60, 16 }
 0x405   : > { %v3495_v23 = vand.u32 2147483647, %v3494_v32  ;;  %vm3615_vm2 = vc.u32 %v3607_v34, %v3611_v44  ;;  %v3617_v50 = vadd.s32 %v3611_v44, %v3607_v34  ;;  %v3570_v29 = vsel %vm3566_vm13, %v8034_v20, %v3569_v19 }
 0x406   : > { %vm3593_vm0 = vc.u32 %v3585_v14, %v3589_v53  ;;  %v3595_v55 = vadd.s32 %v3589_v53, %v3585_v14  ;;  %v3616_v26 = vsel %vm3615_vm2, 1, %v10213_v58  ;;  %v3590_v35 = vshrl.u32 %v3586_v63, 16 }
 0x407   : > { %v3498_v0 = vmul.f32 %v3497_v10, %v3495_v23  ;;  %v3594_v24 = vsel %vm3593_vm0, 1, %v10213_v58  ;;  %v3618_v22 = vadd.s32 %v3616_v26, %v3610_v3  ;;  %vm3619_vm7 = vc.u32 %v3617_v50, %v3613_v28 }
 0x408   : > { %v3596_v30 = vadd.s32 %v3594_v24, %v3588_v57  ;;  %vm3597_vm3 = vc.u32 %v3595_v55, %v3591_v52  ;;  %v3620_v16 = vsel %vm3619_vm7, 1, %v10213_v58  ;;  %v3612_v12 = vshrl.u32 %v3608_v48, 16 }
 0x409   : > { %v3499_v11 = vxor.u32 2147483648, %v3498_v0  ;;  %v3598_v33 = vsel %vm3597_vm3, 1, %v10213_v58  ;;  %v3622_v31 = vadd.s32 %v3620_v16, %v3618_v22  ;;  %v3699_v20 = vsel %vm3698_vm15, %v8043_v13, 0 }
 0x40a   : > { %v3600_v54 = vadd.s32 %v3598_v33, %v3596_v30  ;;  %v3571_v32 = vsel %vm3565_vm14, %v3568_v61, %v3570_v29  ;;  %v3592_v19 = vshrl.u32 %v3587_v27, 16  ;;  %v3701_v34 = vand.u32 31, %v3699_v20 }
 0x40b   : > { %v3500_v7 = vsel %vm3379_vm1, %v3499_v11, %v3498_v0  ;;  %v3614_v10 = vshrl.u32 %v3609_v60, 16  ;;  %v3623_v48 = vadd.s32 %v3622_v31, %v3612_v12  ;;  %v3694_v57 = vand.u32 8388607, %v3687_v9 }
 0x40c   : > { %v3503_v63 = vsel %vm8052_vm6, %v7797_v4, %v3500_v7  ;;  %v3601_v44 = vadd.s32 %v3600_v54, %v3590_v35  ;;  %v8125_v13 = vsub.s32 32, %v3701_v34  ;;  %v3521_v53 = vadd.s32 3, %v3504_v56 }
 0x40d   : > { %v3505_v14 = vmul.f32 %v3503_v63, %v3503_v63  ;;  %v8129_v5 = vadd.s32 %v3617_v50, %v3613_v28  ;;  %v3624_v61 = vadd.s32 %v3623_v48, %v3614_v10  ;;  %v3625_v36 = vmul.u32 %v7999_v62, %v3571_v32 }
 0x40e   : > { %v8127_v23 = vadd.s32 %v3601_v44, %v3592_v19  ;;  %v8132_v3 = vshrl.u32 %v3699_v20, 5  ;;  %v3704_v55 = vshll.u32 %v10209_v46, %v3701_v34  ;;  %v3708_v56 = vshrl.u32 %v10204_v6, %v8125_v13 }
 0x40f   : > { %v3506_v27 = vmul.f32 -0.001358992, %v3505_v14  ;;  %v3513_v52 = vmul.f32 -0.00019511016, %v3505_v14  ;;  %v3628_v60 = vadd.s32 1, %v3624_v61  ;;  %v3707_v28 = vshll.u32 %v10205_v41, %v3701_v34 }
 0x410   : > { %vm3627_vm1 = vc.u32 %v8127_v23, %v8129_v5  ;;  %v3711_v50 = vshrl.u32 %v10197_v15, %v8125_v13  ;;  %v3705_v62 = vshrl.u32 %v10205_v41, %v8125_v13  ;;  %v3713_v26 = vshll.u32 %v10197_v15, %v3701_v34 }
 0x411   : > { %v3507_v0 = vadd.f32 0.041655596, %v3506_v27  ;;  %v3514_v29 = vadd.f32 0.008332121, %v3513_v52  ;;  %v3629_v24 = vsel %vm3627_vm1, %v3628_v60, %v3624_v61  ;;  %v3714_v30 = vshrl.u32 %v10191_v59, %v8125_v13 }
 0x412   : > { %v3630_v35 = vadd.s32 %v3629_v24, %v3625_v36  ;;  %v3710_v33 = vshll.u32 %v10204_v6, %v3701_v34  ;;  %v8148_v16 = vor.u32 %v3708_v56, %v3707_v28  ;;  %v3716_v12 = vshll.u32 %v10191_v59, %v3701_v34 }
 0x413   : > { %v3508_v22 = vmul.f32 %v3507_v0, %v3505_v14  ;;  %v3515_v11 = vmul.f32 %v3514_v29, %v3505_v14  ;;  %v3715_v54 = vor.u32 %v3714_v30, %v3713_v26  ;;  %v3717_v31 = vshrl.u32 %v10192_v17, %v8125_v13 }
 0x414   : > { %v3631_v32 = vadd.s32 536870912, %v3630_v35  ;;  %v8153_v19 = vor.u32 %v3711_v50, %v3710_v33  ;;  %v3522_v44 = vand.u32 3, %v3521_v53  ;;  %v3695_v10 = vor.u32 8388608, %v3694_v57 }
 0x415   : > { %v3509_v20 = vadd.f32 -0.4999988, %v3508_v22  ;;  %v3516_v7 = vadd.f32 -0.16666654, %v3515_v11  ;;  %v8155_v48 = vor.u32 %v3705_v62, %v3704_v55  ;;  %v3718_v61 = vor.u32 %v3717_v31, %v3716_v12 }
 0x416   : > { %v8157_v36 = vshrl.u32 %v3631_v32, 30  ;;  %vm3722_vm4 = vcmp.lt.s32.totalorder %v8132_v3, 4  ;;  %vm3719_vm8 = vcmp.lt.s32.totalorder %v8132_v3, 1  ;;  %vm3721_vm5 = vcmp.lt.s32.totalorder %v8132_v3, 3 }
 0x417   : > { %v3510_v27 = vmul.f32 %v3509_v20, %v3505_v14  ;;  %v3517_v52 = vmul.f32 %v3516_v7, %v3505_v14  ;;  %v3728_v34 = vsel %vm3722_vm4, %v3715_v54, 920167782  ;;  %v3732_v53 = vsel %vm3722_vm4, %v3718_v61, 1326507024 }
 0x418   : > { %v3633_v55 = vshll.u32 %v8157_v36, 30  ;;  %v3731_v14 = vsel %vm3719_vm8, %v8148_v16, %v8153_v19  ;;  %v3727_v56 = vsel %vm3719_vm8, %v8155_v48, %v8148_v16  ;;  %v3729_v0 = vsel %vm3721_vm5, %v8153_v19, %v3728_v34 }
 0x419   : > { %v3511_v57 = vadd.f32 1.0, %v3510_v27  ;;  %v3518_v60 = vadd.f32 1.0, %v3517_v52  ;;  %v3733_v29 = vsel %vm3721_vm5, %v3715_v54, %v3732_v53  ;;  %v8180_v28 = vshll.u32 %v3695_v10, 8 }
 0x41a   : > { %v3634_v62 = vsub.s32 %v3630_v35, %v3633_v55  ;;  %vm3720_vm9 = vcmp.lt.s32.totalorder %v8132_v3, 2  ;;  %v3196_v26 = vmul.f32 %v7675_v18, %v6287_v40  ;;  %vm3523_vm10 = vcmp.lt.s32.totalorder %v3522_v44, 2 }
 0x41b   : > { %v3519_v50 = vmul.f32 %v3518_v60, %v3503_v63  ;;  %v3528_v24 = vxor.u32 2147483648, %v3511_v57  ;;  %vm3524_vm6 = vcmp.eq.s32.totalorder %v3522_v44, 0  ;;  %v3734_v30 = vsel %vm3720_vm9, %v3731_v14, %v3733_v29 }
 0x41c   : > { %vm3635_vm12 = vcmp.lt.s32.totalorder %v3634_v62, 0  ;;  %v3636_v11 = vsub.s32 0, %v3634_v62  ;;  %v3730_v33 = vsel %vm3720_vm9, %v3727_v56, %v3729_v0  ;;  %vm3527_vm13 = vcmp.eq.s32.totalorder %v3522_v44, 2 }
 0x41d   : > { %v3525_v22 = vxor.u32 2147483648, %v3519_v50  ;;  %v3736_v63 = vand.u32 65535, %v8180_v28  ;;  %v3738_v35 = vand.u32 65535, %v3734_v30  ;;  %v3739_v54 = vshrl.u32 %v3734_v30, 16 }
 0x41e   : > { %v3529_v31 = vsel %vm3527_vm13, %v3528_v24, %v3519_v50  ;;  %v3637_v20 = vsel %vm3635_vm12, %v3636_v11, %v3634_v62  ;;  %v3737_v7 = vshrl.u32 %v8180_v28, 16  ;;  %vm3520_vm11 = vweird.f32 %v7797_v4 }
 0x41f   : > { %v3526_v12 = vsel %vm3524_vm6, %v3511_v57, %v3525_v22  ;;  %v3638_v10 = vclz %v3637_v20  ;;  %v3761_v61 = vshrl.u32 %v3730_v33, 16  ;;  %v3741_v52 = vmul.u32 %v3739_v54, %v3736_v63 }
 0x420   : > { %v3530_v32 = vsel %vm3523_vm10, %v3526_v12, %v3529_v31  ;;  %v3742_v34 = vmul.u32 %v3738_v35, %v3737_v7  ;;  %v3760_v53 = vand.u32 65535, %v3730_v33  ;;  %v3197_v60 = vmul.f32 %v7774_v25, %v6287_v40 }
 0x421   : > { %v3531_v27 = vsel %vm3520_vm11, nan, %v3530_v32  ;;  %v8196_v57 = vadd.f32 %v3196_v26, %v6968_v1  ;;  %v5892_v55 = vadd.s32 4294967294, %v3638_v10  ;;  %v3703_v14 = vshrl.u32 %v10209_v46, %v8125_v13 }
 0x422   : > { %5703 = vst [vmem:[%s6771_s17 + $0x88] sm:$0xff] %v3531_v27  ;;  %v3626_v4 = vadd.s32 %v8129_v5, %v8127_v23  ;;  %v3740_v44 = vmul.u32 %v3738_v35, %v3736_v63  ;;  %v3743_v56 = vmul.u32 %v3739_v54, %v3737_v7  ;;  %v3744_v0 = vshll.u32 %v3741_v52, 16 }
 0x423   : > { %vm5893_vm14 = vcmp.lt.s32.totalorder %v5892_v55, 0  ;;  %v3745_v29 = vshrl.u32 %v3741_v52, 16  ;;  %v3746_v50 = vshll.u32 %v3742_v34, 16  ;;  %v3763_v24 = vmul.u32 %v3761_v61, %v3736_v63 }
 0x424   : > { %v3641_v30 = vsel %vm5893_vm14, 0, %v5892_v55  ;;  %vm3748_vm15 = vc.u32 %v3740_v44, %v3744_v0  ;;  %v3750_v40 = vadd.s32 %v3744_v0, %v3740_v44  ;;  %v3764_v26 = vmul.u32 %v3760_v53, %v3737_v7 }
 0x425   : > { %v3642_v22 = vsub.s32 32, %v3641_v30  ;;  %v3646_v11 = vsub.s32 4294967266, %v3641_v30  ;;  %v3749_v33 = vsel %vm3748_vm15, 1, %v10213_v58  ;;  %v3762_v13 = vmul.u32 %v3760_v53, %v3736_v63 }
 0x426   : > { %vm3534_vm0 = vcmp.lt.s32.totalorder %v7952_v45, 0  ;;  %v3751_v12 = vadd.s32 %v3749_v33, %v3743_v56  ;;  %vm3752_vm2 = vc.u32 %v3750_v40, %v3746_v50  ;;  %v3765_v23 = vmul.u32 %v3761_v61, %v3737_v7 }
 0x427   : > { %v3766_v5 = vshll.u32 %v3763_v24, 16  ;;  %v3643_v35 = vshll.u32 %v3634_v62, %v3641_v30  ;;  %v3644_v54 = vshrl.u32 %v3626_v4, %v3642_v22  ;;  %v3647_v31 = vadd.s32 127, %v3646_v11 }
 0x428   : > { %v3753_v20 = vsel %vm3752_vm2, 1, %v10213_v58  ;;  %v3768_v10 = vshll.u32 %v3764_v26, 16  ;;  %v3724_v63 = vsel %vm3722_vm4, %v8153_v19, 2102212464  ;;  %v4152_v62 = vand.u32 2147483647, %v8196_v57 }
 0x429   : > { %v3755_v32 = vadd.s32 %v3753_v20, %v3751_v12  ;;  %vm3770_vm3 = vc.u32 %v3762_v13, %v3766_v5  ;;  %v3772_v27 = vadd.s32 %v3766_v5, %v3762_v13  ;;  %v3645_v52 = vor.u32 %v3644_v54, %v3643_v35 }
 0x42a   : > { %v3648_v55 = vshll.u32 %v3647_v31, 23  ;;  %v3771_v53 = vsel %vm3770_vm3, 1, %v10213_v58  ;;  %v3656_v4 = vsub.s32 4, %v8157_v36  ;;  %v3747_v56 = vshrl.u32 %v3742_v34, 16 }
 0x42b   : > { %v3756_v44 = vadd.s32 %v3755_v32, %v3745_v29  ;;  %v3773_v7 = vadd.s32 %v3771_v53, %v3765_v23  ;;  %vm3774_vm7 = vc.u32 %v3772_v27, %v3768_v10  ;;  %v3723_v50 = vsel %vm3719_vm8, %v3703_v14, %v8155_v48 }
 0x42c   : > { %v3649_v61 = vor.u32 4788187, %v3648_v55  ;;  %v3775_v0 = vsel %vm3774_vm7, 1, %v10213_v58  ;;  %v3767_v30 = vshrl.u32 %v3763_v24, 16  ;;  %v4155_v19 = vand.u32 2139095040, %v8196_v57 }
 0x42d   : > { %v3777_v40 = vadd.s32 %v3775_v0, %v3773_v7  ;;  %v3652_v29 = vcvt.s32.f32 %v3645_v52  ;;  %v3725_v11 = vsel %vm3721_vm5, %v8148_v16, %v3724_v63  ;;  %v3757_v33 = vadd.s32 %v3756_v44, %v3747_v56 }
 0x42e   : > { %v3650_v22 = vand.u32 2147483647, %v3649_v61  ;;  %v3769_v13 = vshrl.u32 %v3764_v26, 16  ;;  %v4156_v34 = vshrl.u32 %v4155_v19, 23  ;;  %v4159_v23 = vand.u32 8388607, %v4152_v62 }
 0x42f   : > { %v3778_v12 = vadd.s32 %v3777_v40, %v3767_v30  ;;  %v8223_v5 = vadd.f32 %v3197_v60, %v6968_v1  ;;  %v3657_v14 = vsel %vm3534_vm0, %v3656_v4, %v8157_v36  ;;  %v3776_v24 = vadd.s32 %v3772_v27, %v3768_v10 }
 0x430   : > { %v3653_v48 = vmul.f32 %v3652_v29, %v3650_v22  ;;  %v3726_v35 = vsel %vm3720_vm9, %v3723_v50, %v3725_v11  ;;  %v5903_v54 = vadd.s32 4294967169, %v4156_v34  ;;  %vm3533_vm1 = vcmp.le.f32.partialorder %v3532_v51, 0.7853982 }
 0x431   : > { %v3779_v16 = vadd.s32 %v3778_v12, %v3769_v13  ;;  %vm3782_vm4 = vc.u32 %v3757_v33, %v3776_v24  ;;  %v3659_v31 = vsel %vm3533_vm1, 0, %v3657_v14  ;;  %v4160_v1 = vor.u32 8388608, %v4159_v23 }
 0x432   : > { %v3654_v26 = vxor.u32 2147483648, %v3653_v48  ;;  %v4162_v60 = vadd.s32 1, %v5903_v54  ;;  %v3780_v36 = vmul.u32 %v8180_v28, %v3726_v35  ;;  %v4310_v10 = vand.u32 2139095040, %v8223_v5 }
 0x433   : > { %v3783_v20 = vadd.s32 1, %v3779_v16  ;;  %v3676_v55 = vadd.s32 3, %v3659_v31  ;;  %v8237_v44 = vshll.u32 %v4160_v1, 8  ;;  %v4307_v7 = vand.u32 2147483647, %v8223_v5 }
 0x434   : > { %v3655_v32 = vsel %vm3534_vm0, %v3654_v26, %v3653_v48  ;;  %vm4163_vm8 = vcmp.gt.s32.totalorder %v4162_v60, 0  ;;  %v4311_v0 = vshrl.u32 %v4310_v10, 23  ;;  %v8248_v22 = vmul.f32 %v7675_v18, %v6285_v39 }
 0x435   : > { %v3658_v3 = vsel %vm3533_vm1, %v7952_v45, %v3655_v32  ;;  %v3784_v27 = vsel %vm3782_vm4, %v3783_v20, %v3779_v16  ;;  %v4164_v63 = vsel %vm4163_vm8, %v4162_v60, 0  ;;  %v8242_v40 = vand.u32 3, %v3676_v55 }
 0x436   : > { %v3660_v52 = vmul.f32 %v3658_v3, %v3658_v3  ;;  %v3785_v51 = vadd.s32 %v3784_v27, %v3780_v36  ;;  %v4166_v53 = vand.u32 31, %v4164_v63  ;;  %v8250_v29 = vadd.s32 %v3776_v24, %v3757_v33 }
 0x437   : > { %v8253_v11 = vand.u32 65535, %v8237_v44  ;;  %v8257_v13 = vand.u32 8388607, %v4307_v7  ;;  %v5906_v48 = vadd.s32 4294967169, %v4311_v0  ;;  %v8260_v14 = vshrl.u32 %v4164_v63, 5 }
 0x438   : > { %v3661_v61 = vmul.f32 -0.001358992, %v3660_v52  ;;  %v3668_v4 = vmul.f32 -0.00019511016, %v3660_v52  ;;  %v3786_v56 = vadd.s32 536870912, %v3785_v51  ;;  %v8240_v28 = vsub.s32 32, %v4166_v53 }
 0x439   : > { %vm3682_vm5 = vcmp.eq.s32.totalorder %v8242_v40, 2  ;;  %v4169_v31 = vshll.u32 %v10209_v46, %v4166_v53  ;;  %vm3679_vm9 = vcmp.eq.s32.totalorder %v8242_v40, 0  ;;  %v4172_v20 = vshll.u32 %v10205_v41, %v4166_v53 }
 0x43a   : > { %v3662_v50 = vadd.f32 0.041655596, %v3661_v61  ;;  %v3669_v30 = vadd.f32 0.008332121, %v3668_v4  ;;  %v8244_v19 = vshrl.u32 %v3786_v56, 30  ;;  %v4170_v35 = vshrl.u32 %v10205_v41, %v8240_v28 }
 0x43b   : > { %v4173_v33 = vshrl.u32 %v10204_v6, %v8240_v28  ;;  %v4179_v24 = vshrl.u32 %v10191_v59, %v8240_v28  ;;  %v4176_v1 = vshrl.u32 %v10197_v15, %v8240_v28  ;;  %v4178_v60 = vshll.u32 %v10197_v15, %v4166_v53 }
 0x43c   : > { %v3663_v12 = vmul.f32 %v3662_v50, %v3660_v52  ;;  %v3670_v34 = vmul.f32 %v3669_v30, %v3660_v52  ;;  %v3788_v23 = vshll.u32 %v8244_v19, 30  ;;  %v4182_v32 = vshrl.u32 %v10192_v17, %v8240_v28 }
 0x43d   : > { %vm3678_vm10 = vcmp.lt.s32.totalorder %v8242_v40, 2  ;;  %vm3675_vm12 = vweird.f32 %v7952_v45  ;;  %v4171_v55 = vor.u32 %v4170_v35, %v4169_v31  ;;  %v4175_v63 = vshll.u32 %v10204_v6, %v4166_v53 }
 0x43e   : > { %v3664_v16 = vadd.f32 -0.4999988, %v3663_v12  ;;  %v3671_v54 = vadd.f32 -0.16666654, %v3670_v34  ;;  %v8269_v26 = vsub.s32 %v3785_v51, %v3788_v23  ;;  %v4174_v51 = vor.u32 %v4173_v33, %v4172_v20 }
 0x43f   : > { %v4180_v61 = vor.u32 %v4179_v24, %v4178_v60  ;;  %v4181_v50 = vshll.u32 %v10191_v59, %v4166_v53  ;;  %v4177_v30 = vor.u32 %v4176_v1, %v4175_v63  ;;  %v4202_v12 = vshrl.u32 %v8237_v44, 16 }
 0x440   : > { %v3665_v36 = vmul.f32 %v3664_v16, %v3660_v52  ;;  %v3672_v10 = vmul.f32 %v3671_v54, %v3660_v52  ;;  %vm3790_vm6 = vcmp.lt.s32.totalorder %v8269_v26, 0  ;;  %v3791_v27 = vsub.s32 0, %v8269_v26 }
 0x441   : > { %v8287_v34 = vadd.s32 1, %v5906_v48  ;;  %vm3689_vm13 = vcmp.lt.s32.totalorder %v7955_v8, 0  ;;  %v4183_v35 = vor.u32 %v4182_v32, %v4181_v50  ;;  %vm4184_vm11 = vcmp.lt.s32.totalorder %v8260_v14, 1 }
 0x442   : > { %v3666_v4 = vadd.f32 1.0, %v3665_v36  ;;  %v3673_v56 = vadd.f32 1.0, %v3672_v10  ;;  %v3792_v0 = vsel %vm3790_vm6, %v3791_v27, %v8269_v26  ;;  %v3811_v24 = vsub.s32 4, %v8244_v19 }
 0x443   : > { %v3793_v52 = vclz %v3792_v0  ;;  %vm4187_vm14 = vcmp.lt.s32.totalorder %v8260_v14, 4  ;;  %v4192_v53 = vsel %vm4184_vm11, %v4171_v55, %v4174_v51  ;;  %vm4185_vm15 = vcmp.lt.s32.totalorder %v8260_v14, 2 }
 0x444   : > { %v3674_v23 = vmul.f32 %v3673_v56, %v3658_v3  ;;  %v3683_v16 = vxor.u32 2147483648, %v3666_v4  ;;  %vm4186_vm0 = vcmp.lt.s32.totalorder %v8260_v14, 3  ;;  %v4193_v3 = vsel %vm4187_vm14, %v4180_v61, 920167782 }
 0x445   : > { %v5895_v33 = vadd.s32 4294967294, %v3793_v52  ;;  %v4194_v31 = vsel %vm4186_vm0, %v4177_v30, %v4193_v3  ;;  %v4196_v20 = vsel %vm4184_vm11, %v4174_v51, %v4177_v30  ;;  %v4197_v36 = vsel %vm4187_vm14, %v4183_v35, 1326507024 }
 0x446   : > { %v3680_v54 = vxor.u32 2147483648, %v3674_v23  ;;  %v3684_v48 = vsel %vm3682_vm5, %v3683_v16, %v3674_v23  ;;  %v4195_v32 = vsel %vm4185_vm15, %v4192_v53, %v4194_v31  ;;  %vm4318_vm3 = vcmp.gt.s32.totalorder %v8287_v34, 0 }
 0x447   : > { %vm5896_vm2 = vcmp.lt.s32.totalorder %v5895_v33, 0  ;;  %v4189_v56 = vsel %vm4187_vm14, %v4177_v30, 2102212464  ;;  %v4198_v0 = vsel %vm4186_vm0, %v4180_v61, %v4197_v36  ;;  %v4225_v50 = vand.u32 65535, %v4195_v32 }
 0x448   : > { %v3681_v1 = vsel %vm3679_vm9, %v3666_v4, %v3680_v54  ;;  %v3796_v60 = vsel %vm5896_vm2, 0, %v5895_v33  ;;  %v4226_v52 = vshrl.u32 %v4195_v32, 16  ;;  %v4199_v40 = vsel %vm4185_vm15, %v4196_v20, %v4198_v0 }
 0x449   : > { %v3685_v10 = vsel %vm3678_vm10, %v3681_v1, %v3684_v48  ;;  %v3797_v27 = vsub.s32 32, %v3796_v60  ;;  %v3801_v63 = vsub.s32 4294967266, %v3796_v60  ;;  %v3798_v23 = vshll.u32 %v8269_v26, %v3796_v60 }
 0x44a   : > { %v3686_v4 = vsel %vm3675_vm12, nan, %v3685_v10  ;;  %v4168_v30 = vshrl.u32 %v10209_v46, %v8240_v28  ;;  %v4203_v33 = vand.u32 65535, %v4199_v40  ;;  %v4204_v45 = vshrl.u32 %v4199_v40, 16 }
 0x44b   : > { %v3799_v16 = vshrl.u32 %v8250_v29, %v3797_v27  ;;  %v3802_v35 = vadd.s32 127, %v3801_v63  ;;  %5704 = vst [vmem:[%s6771_s17 + $0x90] sm:$0xff] %v3686_v4  ;;  %v4228_v53 = vmul.u32 %v4226_v52, %v8253_v11  ;;  %v8331_v26 = vsel %vm3689_vm13, %v3811_v24, %v8244_v19 }
 0x44c   : > { %v4229_v29 = vmul.u32 %v4225_v50, %v4202_v12  ;;  %vm8335_vm7 = vcmp.le.f32.partialorder %v3687_v9, 0.7853982  ;;  %v4188_v28 = vsel %vm4184_vm11, %v4168_v30, %v4171_v55  ;;  %v4190_v48 = vsel %vm4186_vm0, %v4174_v51, %v4189_v56 }
 0x44d   : > { %v3800_v54 = vor.u32 %v3799_v16, %v3798_v23  ;;  %v3803_v61 = vshll.u32 %v3802_v35, 23  ;;  %v4206_v31 = vmul.u32 %v4204_v45, %v8253_v11  ;;  %v4207_v20 = vmul.u32 %v4203_v33, %v4202_v12 }
 0x44e   : > { %v4227_v19 = vmul.u32 %v4225_v50, %v8253_v11  ;;  %v4230_v24 = vmul.u32 %v4226_v52, %v4202_v12  ;;  %v4231_v60 = vshll.u32 %v4228_v53, 16  ;;  %v4205_v9 = vmul.u32 %v4203_v33, %v8253_v11 }
 0x44f   : > { %v3804_v1 = vor.u32 4788187, %v3803_v61  ;;  %v3807_v32 = vcvt.s32.f32 %v3800_v54  ;;  %v4208_v36 = vmul.u32 %v4204_v45, %v4202_v12  ;;  %v4209_v10 = vshll.u32 %v4206_v31, 16 }
 0x450   : > { %v4211_v63 = vshll.u32 %v4207_v20, 16  ;;  %v4233_v4 = vshll.u32 %v4229_v29, 16  ;;  %vm4235_vm1 = vc.u32 %v4227_v19, %v4231_v60  ;;  %v4237_v56 = vadd.s32 %v4231_v60, %v4227_v19 }
 0x451   : > { %v3805_v27 = vand.u32 2147483647, %v3804_v1  ;;  %vm4213_vm4 = vc.u32 %v4205_v9, %v4209_v10  ;;  %v4215_v55 = vadd.s32 %v4209_v10, %v4205_v9  ;;  %v4236_v51 = vsel %vm4235_vm1, 1, %v10213_v58 }
 0x452   : > { %v4214_v23 = vsel %vm4213_vm4, 1, %v10213_v58  ;;  %v4238_v50 = vadd.s32 %v4236_v51, %v4230_v24  ;;  %v4319_v52 = vsel %vm4318_vm3, %v8287_v34, 0  ;;  %v4191_v11 = vsel %vm4185_vm15, %v4188_v28, %v4190_v48 }
 0x453   : > { %v3808_v0 = vmul.f32 %v3807_v32, %v3805_v27  ;;  %v4216_v12 = vadd.s32 %v4214_v23, %v4208_v36  ;;  %vm4217_vm8 = vc.u32 %v4215_v55, %v4211_v63  ;;  %vm4239_vm5 = vc.u32 %v4237_v56, %v4233_v4 }
 0x454   : > { %v4218_v35 = vsel %vm4217_vm8, 1, %v10213_v58  ;;  %v4232_v40 = vshrl.u32 %v4228_v53, 16  ;;  %v4240_v30 = vsel %vm4239_vm5, 1, %v10213_v58  ;;  %v4210_v33 = vshrl.u32 %v4206_v31, 16 }
 0x455   : > { %v3809_v16 = vxor.u32 2147483648, %v3808_v0  ;;  %v4220_v45 = vadd.s32 %v4218_v35, %v4216_v12  ;;  %v4242_v54 = vadd.s32 %v4240_v30, %v4238_v50  ;;  %v4321_v61 = vand.u32 31, %v4319_v52 }
 0x456   : > { %v3814_v14 = vsel %vm8335_vm7, 0, %v8331_v26  ;;  %v4212_v34 = vshrl.u32 %v4207_v20, 16  ;;  %v4234_v28 = vshrl.u32 %v4229_v29, 16  ;;  %v8365_v60 = vadd.s32 %v4237_v56, %v4233_v4 }
 0x457   : > { %v3810_v1 = vsel %vm3689_vm13, %v3809_v16, %v3808_v0  ;;  %v4221_v53 = vadd.s32 %v4220_v45, %v4210_v33  ;;  %v4243_v19 = vadd.s32 %v4242_v54, %v4232_v40  ;;  %v8363_v24 = vsub.s32 32, %v4321_v61 }
 0x458   : > { %v3813_v48 = vsel %vm8335_vm7, %v7955_v8, %v3810_v1  ;;  %v4245_v32 = vmul.u32 %v8237_v44, %v4191_v11  ;;  %v8368_v9 = vshrl.u32 %v4319_v52, 5  ;;  %v4324_v29 = vshll.u32 %v10209_v46, %v4321_v61 }
 0x459   : > { %v3815_v31 = vmul.f32 %v3813_v48, %v3813_v48  ;;  %v8370_v36 = vadd.s32 %v4221_v53, %v4212_v34  ;;  %v4244_v26 = vadd.s32 %v4243_v19, %v4234_v28  ;;  %v4325_v3 = vshrl.u32 %v10205_v41, %v8363_v24 }
 0x45a   : > { %v4327_v27 = vshll.u32 %v10205_v41, %v4321_v61  ;;  %v4328_v63 = vshrl.u32 %v10204_v6, %v8363_v24  ;;  %v4330_v4 = vshll.u32 %v10204_v6, %v4321_v61  ;;  %v4331_v55 = vshrl.u32 %v10197_v15, %v8363_v24 }
 0x45b   : > { %v3816_v20 = vmul.f32 -0.001358992, %v3815_v31  ;;  %v3823_v10 = vmul.f32 -0.00019511016, %v3815_v31  ;;  %vm4247_vm9 = vc.u32 %v8370_v36, %v8365_v60  ;;  %v4248_v44 = vadd.s32 1, %v4244_v26 }
 0x45c   : > { %v8383_v0 = vor.u32 %v4325_v3, %v4324_v29  ;;  %v8385_v23 = vor.u32 %v4328_v63, %v4327_v27  ;;  %v4333_v52 = vshll.u32 %v10197_v15, %v4321_v61  ;;  %v4334_v11 = vshrl.u32 %v10191_v59, %v8363_v24 }
 0x45d   : > { %v3817_v51 = vadd.f32 0.041655596, %v3816_v20  ;;  %v3824_v56 = vadd.f32 0.008332121, %v3823_v10  ;;  %v4249_v50 = vsel %vm4247_vm9, %v4248_v44, %v4244_v26  ;;  %v4336_v12 = vshll.u32 %v10191_v59, %v4321_v61 }
 0x45e   : > { %v4250_v40 = vadd.s32 %v4249_v50, %v4245_v32  ;;  %v4337_v30 = vshrl.u32 %v10192_v17, %v8363_v24  ;;  %v3831_v33 = vadd.s32 3, %v3814_v14  ;;  %v8393_v45 = vor.u32 %v4331_v55, %v4330_v4 }
 0x45f   : > { %v3818_v16 = vmul.f32 %v3817_v51, %v3815_v31  ;;  %v3825_v35 = vmul.f32 %v3824_v56, %v3815_v31  ;;  %v4335_v54 = vor.u32 %v4334_v11, %v4333_v52  ;;  %vm4342_vm10 = vcmp.lt.s32.totalorder %v8368_v9, 4 }
 0x460   : > { %v4251_v28 = vadd.s32 536870912, %v4250_v40  ;;  %v4338_v53 = vor.u32 %v4337_v30, %v4336_v12  ;;  %v4315_v19 = vor.u32 8388608, %v8257_v13  ;;  %vm4339_vm6 = vcmp.lt.s32.totalorder %v8368_v9, 1 }
 0x461   : > { %v3819_v1 = vadd.f32 -0.4999988, %v3818_v16  ;;  %v3826_v34 = vadd.f32 -0.16666654, %v3825_v35  ;;  %vm4341_vm12 = vcmp.lt.s32.totalorder %v8368_v9, 3  ;;  %v4347_v29 = vsel %vm4339_vm6, %v8383_v0, %v8385_v23 }
 0x462   : > { %v4348_v61 = vsel %vm4342_vm10, %v4335_v54, 920167782  ;;  %v8401_v26 = vshrl.u32 %v4251_v28, 30  ;;  %v3832_v3 = vand.u32 3, %v3831_v33  ;;  %vm4340_vm13 = vcmp.lt.s32.totalorder %v8368_v9, 2 }
 0x463   : > { %v3820_v32 = vmul.f32 %v3819_v1, %v3815_v31  ;;  %v3827_v14 = vmul.f32 %v3826_v34, %v3815_v31  ;;  %v4349_v13 = vsel %vm4341_vm12, %v8393_v45, %v4348_v61  ;;  %v4352_v20 = vsel %vm4342_vm10, %v4338_v53, 1326507024 }
 0x464   : > { %v4253_v31 = vshll.u32 %v8401_v26, 30  ;;  %v4351_v63 = vsel %vm4339_vm6, %v8385_v23, %v8393_v45  ;;  %v3199_v44 = vmul.f32 %v7774_v25, %v6285_v39  ;;  %v4350_v4 = vsel %vm4340_vm13, %v4347_v29, %v4349_v13 }
 0x465   : > { %v3821_v10 = vadd.f32 1.0, %v3820_v32  ;;  %v3828_v27 = vadd.f32 1.0, %v3827_v14  ;;  %v4353_v55 = vsel %vm4341_vm12, %v4335_v54, %v4352_v20  ;;  %v8424_v51 = vshll.u32 %v4315_v19, 8 }
 0x466   : > { %v8428_v56 = vadd.f32 %v8248_v22, %v6769_v38  ;;  %v4254_v11 = vsub.s32 %v4250_v40, %v4253_v31  ;;  %vm3833_vm11 = vcmp.lt.s32.totalorder %v3832_v3, 2  ;;  %vm3834_vm14 = vcmp.eq.s32.totalorder %v3832_v3, 0 }
 0x467   : > { %v3829_v50 = vmul.f32 %v3828_v27, %v3813_v48  ;;  %v3838_v52 = vxor.u32 2147483648, %v3821_v10  ;;  %v4354_v39 = vsel %vm4340_vm13, %v4351_v63, %v4353_v55  ;;  %v4381_v12 = vshrl.u32 %v4350_v4, 16 }
 0x468   : > { %vm3837_vm15 = vcmp.eq.s32.totalorder %v3832_v3, 2  ;;  %vm4255_vm0 = vcmp.lt.s32.totalorder %v4254_v11, 0  ;;  %v4256_v35 = vsub.s32 0, %v4254_v11  ;;  %v4356_v30 = vand.u32 65535, %v8424_v51 }
 0x469   : > { %v3835_v16 = vxor.u32 2147483648, %v3829_v50  ;;  %v4357_v33 = vshrl.u32 %v8424_v51, 16  ;;  %v4358_v54 = vand.u32 65535, %v4354_v39  ;;  %v4359_v22 = vshrl.u32 %v4354_v39, 16 }
 0x46a   : > { %v3839_v48 = vsel %vm3837_vm15, %v3838_v52, %v3829_v50  ;;  %v4257_v40 = vsel %vm4255_vm0, %v4256_v35, %v4254_v11  ;;  %v4380_v34 = vand.u32 65535, %v4350_v4  ;;  %vm3830_vm2 = vweird.f32 %v7955_v8 }
 0x46b   : > { %v3836_v1 = vsel %vm3834_vm14, %v3821_v10, %v3835_v16  ;;  %v4258_v53 = vclz %v4257_v40  ;;  %v8436_v19 = vmul.u32 %v4381_v12, %v4356_v30  ;;  %v8439_v61 = vadd.f32 %v3199_v44, %v6769_v38 }
 0x46c   : > { %v3840_v28 = vsel %vm3833_vm11, %v3836_v1, %v3839_v48  ;;  %v4361_v14 = vmul.u32 %v4359_v22, %v4356_v30  ;;  %v4362_v29 = vmul.u32 %v4358_v54, %v4357_v33  ;;  %vm4154_vm3 = vcmp.lt.s32.totalorder %v8196_v57, 0 }
 0x46d   : > { %v3841_v32 = vsel %vm3830_vm2, nan, %v3840_v28  ;;  %v4246_v13 = vadd.s32 %v8365_v60, %v8370_v36  ;;  %v5904_v20 = vadd.s32 4294967294, %v4258_v53  ;;  %v4276_v10 = vsub.s32 4, %v8401_v26 }
 0x46e   : > { %v4323_v8 = vshrl.u32 %v10209_v46, %v8363_v24  ;;  %5705 = vst [vmem:[%s6771_s17 + $0x98] sm:$0xff] %v3841_v32  ;;  %v4360_v3 = vmul.u32 %v4358_v54, %v4356_v30  ;;  %v4364_v27 = vshll.u32 %v4361_v14, 16  ;;  %v4382_v31 = vmul.u32 %v4380_v34, %v4356_v30 }
 0x46f   : > { %v4384_v38 = vmul.u32 %v4380_v34, %v4357_v33  ;;  %vm5905_vm7 = vcmp.lt.s32.totalorder %v5904_v20, 0  ;;  %v4363_v63 = vmul.u32 %v4359_v22, %v4357_v33  ;;  %v4365_v44 = vshrl.u32 %v4361_v14, 16 }
 0x470   : > { %v4386_v4 = vshll.u32 %v8436_v19, 16  ;;  %v4261_v55 = vsel %vm5905_vm7, 0, %v5904_v20  ;;  %v4366_v50 = vshll.u32 %v4362_v29, 16  ;;  %vm4368_vm1 = vc.u32 %v4360_v3, %v4364_v27 }
 0x471   : > { %v4370_v60 = vadd.s32 %v4364_v27, %v4360_v3  ;;  %vm8451_vm4 = vcmp.le.f32.partialorder %v4152_v62, 0.7853982  ;;  %v4262_v24 = vsub.s32 32, %v4261_v55  ;;  %v4266_v52 = vsub.s32 4294967266, %v4261_v55 }
 0x472   : > { %v4369_v39 = vsel %vm4368_vm1, 1, %v10213_v58  ;;  %v4385_v16 = vmul.u32 %v4381_v12, %v4357_v33  ;;  %v4263_v35 = vshll.u32 %v4254_v11, %v4261_v55  ;;  %vm4390_vm5 = vc.u32 %v4382_v31, %v4386_v4 }
 0x473   : > { %v4371_v30 = vadd.s32 %v4369_v39, %v4363_v63  ;;  %vm4372_vm8 = vc.u32 %v4370_v60, %v4366_v50  ;;  %v4264_v54 = vshrl.u32 %v4246_v13, %v4262_v24  ;;  %v4267_v22 = vadd.s32 127, %v4266_v52 }
 0x474   : > { %v4373_v1 = vsel %vm4372_vm8, 1, %v10213_v58  ;;  %v4391_v48 = vsel %vm4390_vm5, 1, %v10213_v58  ;;  %v4388_v62 = vshll.u32 %v4384_v38, 16  ;;  %v4392_v34 = vadd.s32 %v4386_v4, %v4382_v31 }
 0x475   : > { %v4375_v40 = vadd.s32 %v4373_v1, %v4371_v30  ;;  %v4393_v28 = vadd.s32 %v4391_v48, %v4385_v16  ;;  %v4265_v53 = vor.u32 %v4264_v54, %v4263_v35  ;;  %v4268_v32 = vshll.u32 %v4267_v22, 23 }
 0x476   : > { %v4344_v12 = vsel %vm4342_vm10, %v8393_v45, 2102212464  ;;  %v4465_v11 = vand.u32 2139095040, %v8428_v56  ;;  %v4277_v33 = vsel %vm4154_vm3, %v4276_v10, %v8401_v26  ;;  %vm4394_vm9 = vc.u32 %v4392_v34, %v4388_v62 }
 0x477   : > { %v4376_v14 = vadd.s32 %v4375_v40, %v4365_v44  ;;  %v4462_v13 = vand.u32 2147483647, %v8428_v56  ;;  %v4269_v20 = vor.u32 4788187, %v4268_v32  ;;  %v4367_v3 = vshrl.u32 %v4362_v29, 16 }
 0x478   : > { %v4395_v27 = vsel %vm4394_vm9, 1, %v10213_v58  ;;  %v4466_v31 = vshrl.u32 %v4465_v11, 23  ;;  %v4343_v63 = vsel %vm4339_vm6, %v4323_v8, %v8383_v0  ;;  %v4345_v45 = vsel %vm4341_vm12, %v8385_v23, %v4344_v12 }
 0x479   : > { %v4387_v4 = vshrl.u32 %v8436_v19, 16  ;;  %v4397_v26 = vadd.s32 %v4395_v27, %v4393_v28  ;;  %v4270_v10 = vand.u32 2147483647, %v4269_v20  ;;  %v4272_v44 = vcvt.s32.f32 %v4265_v53 }
 0x47a   : > { %v4377_v55 = vadd.s32 %v4376_v14, %v4367_v3  ;;  %v5909_v50 = vadd.s32 4294967169, %v4466_v31  ;;  %v4279_v29 = vsel %vm8451_vm4, 0, %v4277_v33  ;;  %v4389_v60 = vshrl.u32 %v4384_v38, 16 }
 0x47b   : > { %v4398_v24 = vadd.s32 %v4397_v26, %v4387_v4  ;;  %v4469_v52 = vand.u32 8388607, %v4462_v13  ;;  %v4273_v0 = vmul.f32 %v4272_v44, %v4270_v10  ;;  %v4396_v8 = vadd.s32 %v4392_v34, %v4388_v62 }
 0x47c   : > { %v4472_v39 = vadd.s32 1, %v5909_v50  ;;  %v4346_v23 = vsel %vm4340_vm13, %v4343_v63, %v4345_v45  ;;  %v4296_v35 = vadd.s32 3, %v4279_v29  ;;  %v4617_v38 = vand.u32 2147483647, %v8439_v61 }
 0x47d   : > { %v4399_v19 = vadd.s32 %v4398_v24, %v4389_v60  ;;  %v4274_v16 = vxor.u32 2147483648, %v4273_v0  ;;  %vm4402_vm10 = vc.u32 %v4377_v55, %v4396_v8  ;;  %v4470_v54 = vor.u32 8388608, %v4469_v52 }
 0x47e   : > { %vm4473_vm6 = vcmp.gt.s32.totalorder %v4472_v39, 0  ;;  %v4400_v48 = vmul.u32 %v8424_v51, %v4346_v23  ;;  %v4620_v62 = vand.u32 2139095040, %v8439_v61  ;;  %v8492_v28 = vmul.f32 %v7675_v18, %v6293_v43 }
 0x47f   : > { %v4403_v30 = vadd.s32 1, %v4399_v19  ;;  %v4474_v22 = vsel %vm4473_vm6, %v4472_v39, 0  ;;  %v4275_v1 = vsel %vm4154_vm3, %v4274_v16, %v4273_v0  ;;  %v8498_v51 = vand.u32 3, %v4296_v35 }
 0x480   : > { %v4476_v40 = vand.u32 31, %v4474_v22  ;;  %v8488_v9 = vsel %vm8451_vm4, %v8196_v57, %v4275_v1  ;;  %v8500_v11 = vadd.s32 %v4396_v8, %v4377_v55  ;;  %v8502_v33 = vshll.u32 %v4470_v54, 8 }
 0x481   : > { %v4404_v34 = vsel %vm4402_vm10, %v4403_v30, %v4399_v19  ;;  %v4280_v53 = vmul.f32 %v8488_v9, %v8488_v9  ;;  %v8506_v36 = vand.u32 8388607, %v4617_v38  ;;  %v4621_v27 = vshrl.u32 %v4620_v62, 23 }
 0x482   : > { %v4405_v32 = vadd.s32 %v4404_v34, %v4400_v48  ;;  %v8496_v12 = vsub.s32 32, %v4476_v40  ;;  %v8508_v31 = vshrl.u32 %v4474_v22, 5  ;;  %vm4309_vm12 = vcmp.lt.s32.totalorder %v8223_v5, 0 }
 0x483   : > { %v4281_v14 = vmul.f32 -0.001358992, %v4280_v53  ;;  %v4288_v20 = vmul.f32 -0.00019511016, %v4280_v53  ;;  %v4479_v50 = vshll.u32 %v10209_v46, %v4476_v40  ;;  %v4482_v29 = vshll.u32 %v10205_v41, %v4476_v40 }
 0x484   : > { %v4406_v3 = vadd.s32 536870912, %v4405_v32  ;;  %v4480_v63 = vshrl.u32 %v10205_v41, %v8496_v12  ;;  %v4483_v45 = vshrl.u32 %v10204_v6, %v8496_v12  ;;  %v4489_v4 = vshrl.u32 %v10191_v59, %v8496_v12 }
 0x485   : > { %v4282_v26 = vadd.f32 0.041655596, %v4281_v14  ;;  %v4289_v10 = vadd.f32 0.008332121, %v4288_v20  ;;  %v4486_v55 = vshrl.u32 %v10197_v15, %v8496_v12  ;;  %v4488_v60 = vshll.u32 %v10197_v15, %v4476_v40 }
 0x486   : > { %v4407_v44 = vshrl.u32 %v4406_v3, 30  ;;  %v4492_v24 = vshrl.u32 %v10192_v17, %v8496_v12  ;;  %v4485_v39 = vshll.u32 %v10204_v6, %v4476_v40  ;;  %vm8527_vm13 = vcmp.le.f32.partialorder %v4307_v7, 0.7853982 }
 0x487   : > { %v4283_v52 = vmul.f32 %v4282_v26, %v4280_v53  ;;  %v4290_v0 = vmul.f32 %v4289_v10, %v4280_v53  ;;  %v4481_v19 = vor.u32 %v4480_v63, %v4479_v50  ;;  %v8531_v16 = vor.u32 %v4483_v45, %v4482_v29 }
 0x488   : > { %v4408_v8 = vshll.u32 %v4407_v44, 30  ;;  %v4490_v35 = vor.u32 %v4489_v4, %v4488_v60  ;;  %v4491_v30 = vshll.u32 %v10191_v59, %v4476_v40  ;;  %vm4302_vm11 = vcmp.eq.s32.totalorder %v8498_v51, 2 }
 0x489   : > { %v4284_v54 = vadd.f32 -0.4999988, %v4283_v52  ;;  %v4291_v22 = vadd.f32 -0.16666654, %v4290_v0  ;;  %v4487_v48 = vor.u32 %v4486_v55, %v4485_v39  ;;  %vm4299_vm14 = vcmp.eq.s32.totalorder %v8498_v51, 0 }
 0x48a   : > { %v8535_v1 = vsub.s32 %v4405_v32, %v4408_v8  ;;  %v4431_v62 = vsub.s32 4, %v4407_v44  ;;  %v4493_v7 = vor.u32 %v4492_v24, %v4491_v30  ;;  %vm4494_vm15 = vcmp.lt.s32.totalorder %v8508_v31, 1 }
 0x48b   : > { %vm4497_vm0 = vcmp.lt.s32.totalorder %v8508_v31, 4  ;;  %v4285_v34 = vmul.f32 %v4284_v54, %v4280_v53  ;;  %v4292_v14 = vmul.f32 %v4291_v22, %v4280_v53  ;;  %vm4298_vm2 = vcmp.lt.s32.totalorder %v8498_v51, 2 }
 0x48c   : > { %vm4410_vm3 = vcmp.lt.s32.totalorder %v8535_v1, 0  ;;  %v4411_v40 = vsub.s32 0, %v8535_v1  ;;  %vm4295_vm7 = vweird.f32 %v8196_v57  ;;  %vm4495_vm1 = vcmp.lt.s32.totalorder %v8508_v31, 2 }
 0x48d   : > { %v4502_v32 = vsel %vm4494_vm15, %v4481_v19, %v8531_v16  ;;  %v4503_v20 = vsel %vm4497_vm0, %v4490_v35, 920167782  ;;  %v4511_v3 = vand.u32 65535, %v8502_v33  ;;  %v4286_v53 = vadd.f32 1.0, %v4285_v34 }
 0x48e   : > { %v4293_v63 = vadd.f32 1.0, %v4292_v14  ;;  %v4412_v45 = vsel %vm4410_vm3, %v4411_v40, %v8535_v1  ;;  %vm4496_vm4 = vcmp.lt.s32.totalorder %v8508_v31, 3  ;;  %v8555_v26 = vsel %vm4309_vm12, %v4431_v62, %v4407_v44 }
 0x48f   : > { %v4413_v4 = vclz %v4412_v45  ;;  %v4504_v10 = vsel %vm4496_vm4, %v4487_v48, %v4503_v20  ;;  %v4506_v55 = vsel %vm4494_vm15, %v8531_v16, %v4487_v48  ;;  %v4303_v29 = vxor.u32 2147483648, %v4286_v53 }
 0x490   : > { %v4294_v50 = vmul.f32 %v4293_v63, %v8488_v9  ;;  %v4505_v60 = vsel %vm4495_vm1, %v4502_v32, %v4504_v10  ;;  %v4507_v24 = vsel %vm4497_vm0, %v4493_v7, 1326507024  ;;  %v4478_v44 = vshrl.u32 %v10209_v46, %v8496_v12 }
 0x491   : > { %v5907_v52 = vadd.s32 4294967294, %v4413_v4  ;;  %v4512_v0 = vshrl.u32 %v8502_v33, 16  ;;  %v5912_v8 = vadd.s32 4294967169, %v4621_v27  ;;  %v4434_v30 = vsel %vm8527_vm13, 0, %v8555_v26 }
 0x492   : > { %v4300_v39 = vxor.u32 2147483648, %v4294_v50  ;;  %v4499_v9 = vsel %vm4497_vm0, %v4487_v48, 2102212464  ;;  %v4508_v54 = vsel %vm4496_vm4, %v4490_v35, %v4507_v24  ;;  %v4304_v22 = vsel %vm4302_vm11, %v4303_v29, %v4294_v50 }
 0x493   : > { %vm5908_vm8 = vcmp.lt.s32.totalorder %v5907_v52, 0  ;;  %v4509_v12 = vsel %vm4495_vm1, %v4506_v55, %v4508_v54  ;;  %v4535_v62 = vand.u32 65535, %v4505_v60  ;;  %v4536_v32 = vshrl.u32 %v4505_v60, 16 }
 0x494   : > { %v4301_v27 = vsel %vm4299_vm14, %v4286_v53, %v4300_v39  ;;  %v4416_v7 = vsel %vm5908_vm8, 0, %v5907_v52  ;;  %v4513_v34 = vand.u32 65535, %v4509_v12  ;;  %v4514_v14 = vshrl.u32 %v4509_v12, 16 }
 0x495   : > { %v4305_v48 = vsel %vm4298_vm2, %v4301_v27, %v4304_v22  ;;  %v4417_v40 = vsub.s32 32, %v4416_v7  ;;  %v4421_v35 = vsub.s32 4294967266, %v4416_v7  ;;  %v4498_v63 = vsel %vm4494_vm15, %v4478_v44, %v4481_v19 }
 0x496   : > { %v4306_v20 = vsel %vm4295_vm7, nan, %v4305_v48  ;;  %v4516_v45 = vmul.u32 %v4514_v14, %v4511_v3  ;;  %v4517_v4 = vmul.u32 %v4513_v34, %v4512_v0  ;;  %v4418_v53 = vshll.u32 %v8535_v1, %v4416_v7 }
 0x497   : > { %v4419_v10 = vshrl.u32 %v8500_v11, %v4417_v40  ;;  %v4422_v55 = vadd.s32 127, %v4421_v35  ;;  %v4500_v51 = vsel %vm4496_vm4, %v8531_v16, %v4499_v9  ;;  %5708 = vst [vmem:[%s6771_s17 + $0xb0] sm:$0xff] %v4306_v20  ;;  %v4515_v50 = vmul.u32 %v4513_v34, %v4511_v3 }
 0x498   : > { %v4518_v29 = vmul.u32 %v4514_v14, %v4512_v0  ;;  %v4519_v60 = vshll.u32 %v4516_v45, 16  ;;  %v4537_v57 = vmul.u32 %v4535_v62, %v4511_v3  ;;  %v4538_v39 = vmul.u32 %v4536_v32, %v4511_v3 }
 0x499   : > { %v4420_v24 = vor.u32 %v4419_v10, %v4418_v53  ;;  %v4423_v52 = vshll.u32 %v4422_v55, 23  ;;  %v4539_v19 = vmul.u32 %v4535_v62, %v4512_v0  ;;  %v4521_v44 = vshll.u32 %v4517_v4, 16 }
 0x49a   : > { %vm4523_vm5 = vc.u32 %v4515_v50, %v4519_v60  ;;  %v4525_v54 = vadd.s32 %v4519_v60, %v4515_v50  ;;  %v4627_v1 = vadd.s32 1, %v5912_v8  ;;  %v4520_v11 = vshrl.u32 %v4516_v45, 16 }
 0x49b   : > { %v4424_v22 = vor.u32 4788187, %v4423_v52  ;;  %v4524_v12 = vsel %vm4523_vm5, 1, %v10213_v58  ;;  %v4541_v27 = vshll.u32 %v4538_v39, 16  ;;  %v4427_v7 = vcvt.s32.f32 %v4420_v24 }
 0x49c   : > { %v4526_v16 = vadd.s32 %v4524_v12, %v4518_v29  ;;  %vm4527_vm9 = vc.u32 %v4525_v54, %v4521_v44  ;;  %v4540_v9 = vmul.u32 %v4536_v32, %v4512_v0  ;;  %v4543_v48 = vshll.u32 %v4539_v19, 16 }
 0x49d   : > { %v4425_v34 = vand.u32 2147483647, %v4424_v22  ;;  %v4528_v14 = vsel %vm4527_vm9, 1, %v10213_v58  ;;  %vm4545_vm10 = vc.u32 %v4537_v57, %v4541_v27  ;;  %v4547_v40 = vadd.s32 %v4541_v27, %v4537_v57 }
 0x49e   : > { %v4530_v3 = vadd.s32 %v4528_v14, %v4526_v16  ;;  %v4546_v62 = vsel %vm4545_vm10, 1, %v10213_v58  ;;  %vm4628_vm6 = vcmp.gt.s32.totalorder %v4627_v1, 0  ;;  %v4501_v35 = vsel %vm4495_vm1, %v4498_v63, %v4500_v51 }
 0x49f   : > { %v4428_v8 = vmul.f32 %v4427_v7, %v4425_v34  ;;  %v4548_v20 = vadd.s32 %v4546_v62, %v4540_v9  ;;  %v4629_v45 = vsel %vm4628_vm6, %v4627_v1, 0  ;;  %v4522_v53 = vshrl.u32 %v4517_v4, 16 }
 0x4a0   : > { %v4531_v10 = vadd.s32 %v4530_v3, %v4520_v11  ;;  %vm4549_vm11 = vc.u32 %v4547_v40, %v4543_v48  ;;  %v8600_v0 = vshrl.u32 %v4629_v45, 5  ;;  %v4625_v50 = vor.u32 8388608, %v8506_v36 }
 0x4a1   : > { %v4429_v32 = vxor.u32 2147483648, %v4428_v8  ;;  %v4550_v55 = vsel %vm4549_vm11, 1, %v10213_v58  ;;  %v4631_v29 = vand.u32 31, %v4629_v45  ;;  %v4451_v60 = vadd.s32 3, %v4434_v30 }
 0x4a2   : > { %v8608_v31 = vadd.s32 %v4531_v10, %v4522_v53  ;;  %v4542_v63 = vshrl.u32 %v4538_v39, 16  ;;  %v4552_v51 = vadd.s32 %v4550_v55, %v4548_v20  ;;  %v4544_v57 = vshrl.u32 %v4539_v19, 16 }
 0x4a3   : > { %v4430_v4 = vsel %vm4309_vm12, %v4429_v32, %v4428_v8  ;;  %v4555_v24 = vmul.u32 %v8502_v33, %v4501_v35  ;;  %v8613_v52 = vsub.s32 32, %v4631_v29  ;;  %v8618_v44 = vadd.s32 %v4547_v40, %v4543_v48 }
 0x4a4   : > { %v4433_v36 = vsel %vm8527_vm13, %v8223_v5, %v4430_v4  ;;  %v4553_v26 = vadd.s32 %v4552_v51, %v4542_v63  ;;  %vm4649_vm14 = vcmp.lt.s32.totalorder %v8600_v0, 1  ;;  %v4634_v39 = vshll.u32 %v10209_v46, %v4631_v29 }
 0x4a5   : > { %v4435_v30 = vmul.f32 %v4433_v36, %v4433_v36  ;;  %v4635_v54 = vshrl.u32 %v10205_v41, %v8613_v52  ;;  %v4638_v33 = vshrl.u32 %v10204_v6, %v8613_v52  ;;  %vm4557_vm12 = vc.u32 %v8608_v31, %v8618_v44 }
 0x4a6   : > { %v4554_v19 = vadd.s32 %v4553_v26, %v4544_v57  ;;  %v4637_v23 = vshll.u32 %v10205_v41, %v4631_v29  ;;  %v4641_v1 = vshrl.u32 %v10197_v15, %v8613_v52  ;;  %v4640_v12 = vshll.u32 %v10204_v6, %v4631_v29 }
 0x4a7   : > { %v4436_v22 = vmul.f32 -0.001358992, %v4435_v30  ;;  %v4443_v11 = vmul.f32 -0.00019511016, %v4435_v30  ;;  %v4643_v27 = vshll.u32 %v10197_v15, %v4631_v29  ;;  %v8633_v16 = vor.u32 %v4635_v54, %v4634_v39 }
 0x4a8   : > { %v4558_v7 = vadd.s32 1, %v4554_v19  ;;  %v8635_v9 = vor.u32 %v4638_v33, %v4637_v23  ;;  %v4644_v34 = vshrl.u32 %v10191_v59, %v8613_v52  ;;  %v4646_v3 = vshll.u32 %v10191_v59, %v4631_v29 }
 0x4a9   : > { %v4437_v14 = vadd.f32 0.041655596, %v4436_v22  ;;  %v4444_v48 = vadd.f32 0.008332121, %v4443_v11  ;;  %v4647_v62 = vshrl.u32 %v10192_v17, %v8613_v52  ;;  %v4642_v8 = vor.u32 %v4641_v1, %v4640_v12 }
 0x4aa   : > { %v4559_v40 = vsel %vm4557_vm12, %v4558_v7, %v4554_v19  ;;  %v4645_v35 = vor.u32 %v4644_v34, %v4643_v27  ;;  %vm4652_vm13 = vcmp.lt.s32.totalorder %v8600_v0, 4  ;;  %v4452_v32 = vand.u32 3, %v4451_v60 }
 0x4ab   : > { %v4438_v20 = vmul.f32 %v4437_v14, %v4435_v30  ;;  %v4445_v45 = vmul.f32 %v4444_v48, %v4435_v30  ;;  %v4560_v53 = vadd.s32 %v4559_v40, %v4555_v24  ;;  %v4648_v10 = vor.u32 %v4647_v62, %v4646_v3 }
 0x4ac   : > { %v4657_v55 = vsel %vm4649_vm14, %v8633_v16, %v8635_v9  ;;  %v4658_v29 = vsel %vm4652_vm13, %v4645_v35, 920167782  ;;  %v8649_v63 = vshll.u32 %v4625_v50, 8  ;;  %vm4651_vm15 = vcmp.lt.s32.totalorder %v8600_v0, 3 }
 0x4ad   : > { %v4439_v51 = vadd.f32 -0.4999988, %v4438_v20  ;;  %v4446_v4 = vadd.f32 -0.16666654, %v4445_v45  ;;  %v4561_v57 = vadd.s32 536870912, %v4560_v53  ;;  %vm4650_vm0 = vcmp.lt.s32.totalorder %v8600_v0, 2 }
 0x4ae   : > { %v4659_v60 = vsel %vm4651_vm15, %v4642_v8, %v4658_v29  ;;  %v4661_v24 = vsel %vm4649_vm14, %v8635_v9, %v4642_v8  ;;  %v4662_v26 = vsel %vm4652_vm13, %v4648_v10, 1326507024  ;;  %v8668_v1 = vmul.f32 %v7774_v25, %v6293_v43 }
 0x4af   : > { %v4440_v39 = vmul.f32 %v4439_v51, %v4435_v30  ;;  %v4447_v50 = vmul.f32 %v4446_v4, %v4435_v30  ;;  %v8660_v54 = vshrl.u32 %v4561_v57, 30  ;;  %v4660_v33 = vsel %vm4650_vm0, %v4657_v55, %v4659_v60 }
 0x4b0   : > { %v4663_v19 = vsel %vm4651_vm15, %v4645_v35, %v4662_v26  ;;  %v4691_v23 = vshrl.u32 %v4660_v33, 16  ;;  %v8673_v30 = vadd.f32 %v8492_v28, %v7422_v2  ;;  %vm4450_vm2 = vweird.f32 %v8223_v5 }
 0x4b1   : > { %v4441_v22 = vadd.f32 1.0, %v4440_v39  ;;  %v4448_v11 = vadd.f32 1.0, %v4447_v50  ;;  %v4563_v12 = vshll.u32 %v8660_v54, 30  ;;  %v4664_v27 = vsel %vm4650_vm0, %v4661_v24, %v4663_v19 }
 0x4b2   : > { %v4666_v7 = vand.u32 65535, %v8649_v63  ;;  %vm4453_vm3 = vcmp.lt.s32.totalorder %v4452_v32, 2  ;;  %vm4454_vm7 = vcmp.eq.s32.totalorder %v4452_v32, 0  ;;  %v4668_v48 = vand.u32 65535, %v4664_v27 }
 0x4b3   : > { %v4449_v34 = vmul.f32 %v4448_v11, %v4433_v36  ;;  %v4458_v14 = vxor.u32 2147483648, %v4441_v22  ;;  %v4564_v43 = vsub.s32 %v4560_v53, %v4563_v12  ;;  %v4669_v3 = vshrl.u32 %v4664_v27, 16 }
 0x4b4   : > { %v8679_v62 = vmul.u32 %v4691_v23, %v4666_v7  ;;  %v4667_v35 = vshrl.u32 %v8649_v63, 16  ;;  %vm4457_vm4 = vcmp.eq.s32.totalorder %v4452_v32, 2  ;;  %v4633_v20 = vshrl.u32 %v10209_v46, %v8613_v52 }
 0x4b5   : > { %v4455_v40 = vxor.u32 2147483648, %v4449_v34  ;;  %vm4565_vm1 = vcmp.lt.s32.totalorder %v4564_v43, 0  ;;  %v4566_v28 = vsub.s32 0, %v4564_v43  ;;  %v4671_v45 = vmul.u32 %v4669_v3, %v4666_v7 }
 0x4b6   : > { %v4690_v10 = vand.u32 65535, %v4660_v33  ;;  %v4459_v55 = vsel %vm4457_vm4, %v4458_v14, %v4449_v34  ;;  %v4672_v29 = vmul.u32 %v4668_v48, %v4667_v35  ;;  %v4696_v60 = vshll.u32 %v8679_v62, 16 }
 0x4b7   : > { %v4456_v36 = vsel %vm4454_vm7, %v4441_v22, %v4455_v40  ;;  %v4567_v53 = vsel %vm4565_vm1, %v4566_v28, %v4564_v43  ;;  %v4674_v57 = vshll.u32 %v4671_v45, 16  ;;  %v4556_v26 = vadd.s32 %v8618_v44, %v8608_v31 }
 0x4b8   : > { %v4460_v51 = vsel %vm4453_vm3, %v4456_v36, %v4459_v55  ;;  %v4568_v4 = vclz %v4567_v53  ;;  %v4653_v52 = vsel %vm4649_vm14, %v4633_v20, %v8633_v16  ;;  %v4670_v39 = vmul.u32 %v4668_v48, %v4666_v7 }
 0x4b9   : > { %v4461_v24 = vsel %vm4450_vm2, nan, %v4460_v51  ;;  %v4654_v32 = vsel %vm4652_vm13, %v4642_v8, 2102212464  ;;  %v4692_v33 = vmul.u32 %v4690_v10, %v4666_v7  ;;  %v4694_v19 = vmul.u32 %v4690_v10, %v4667_v35 }
 0x4ba   : > { %v5910_v50 = vadd.s32 4294967294, %v4568_v4  ;;  %5709 = vst [vmem:[%s6771_s17 + $0xb8] sm:$0xff] %v4461_v24  ;;  %vm4464_vm8 = vcmp.lt.s32.totalorder %v8428_v56, 0  ;;  %v4673_v22 = vmul.u32 %v4669_v3, %v4667_v35  ;;  %v4676_v5 = vshll.u32 %v4672_v29, 16 }
 0x4bb   : > { %vm4678_vm5 = vc.u32 %v4670_v39, %v4674_v57  ;;  %v4680_v11 = vadd.s32 %v4674_v57, %v4670_v39  ;;  %v4695_v44 = vmul.u32 %v4691_v23, %v4667_v35  ;;  %vm4700_vm10 = vc.u32 %v4692_v33, %v4696_v60 }
 0x4bc   : > { %vm5911_vm9 = vcmp.lt.s32.totalorder %v5910_v50, 0  ;;  %v4679_v31 = vsel %vm4678_vm5, 1, %v10213_v58  ;;  %v4701_v27 = vsel %vm4700_vm10, 1, %v10213_v58  ;;  %v4675_v34 = vshrl.u32 %v4671_v45, 16 }
 0x4bd   : > { %v4571_v16 = vsel %vm5911_vm9, 0, %v5910_v50  ;;  %v4681_v12 = vadd.s32 %v4679_v31, %v4673_v22  ;;  %vm4682_vm6 = vc.u32 %v4680_v11, %v4676_v5  ;;  %v4698_v3 = vshll.u32 %v4694_v19, 16 }
 0x4be   : > { %v4572_v8 = vsub.s32 32, %v4571_v16  ;;  %v4576_v7 = vsub.s32 4294967266, %v4571_v16  ;;  %v4683_v14 = vsel %vm4682_vm6, 1, %v10213_v58  ;;  %v4702_v40 = vadd.s32 %v4696_v60, %v4692_v33 }
 0x4bf   : > { %v4685_v48 = vadd.s32 %v4683_v14, %v4681_v12  ;;  %v4703_v28 = vadd.s32 %v4701_v27, %v4695_v44  ;;  %v4573_v20 = vshll.u32 %v4564_v43, %v4571_v16  ;;  %v4586_v23 = vsub.s32 4, %v8660_v54 }
 0x4c0   : > { %v4574_v10 = vshrl.u32 %v4556_v26, %v4572_v8  ;;  %v4577_v36 = vadd.s32 127, %v4576_v7  ;;  %v4655_v35 = vsel %vm4651_vm15, %v8635_v9, %v4654_v32  ;;  %vm4704_vm11 = vc.u32 %v4702_v40, %v4698_v3 }
 0x4c1   : > { %v4686_v55 = vadd.s32 %v4685_v48, %v4675_v34  ;;  %v5085_v53 = vand.u32 2139095040, %v8673_v30  ;;  %v4677_v4 = vshrl.u32 %v4672_v29, 16  ;;  %v4705_v57 = vsel %vm4704_vm11, 1, %v10213_v58 }
 0x4c2   : > { %v4575_v45 = vor.u32 %v4574_v10, %v4573_v20  ;;  %v4578_v51 = vshll.u32 %v4577_v36, 23  ;;  %v4697_v60 = vshrl.u32 %v8679_v62, 16  ;;  %v4707_v43 = vadd.s32 %v4705_v57, %v4703_v28 }
 0x4c3   : > { %v5082_v24 = vand.u32 2147483647, %v8673_v30  ;;  %v5086_v26 = vshrl.u32 %v5085_v53, 23  ;;  %v8710_v39 = vadd.f32 %v8668_v1, %v7422_v2  ;;  %v4587_v50 = vsel %vm4464_vm8, %v4586_v23, %v8660_v54 }
 0x4c4   : > { %v4579_v9 = vor.u32 4788187, %v4578_v51  ;;  %v4687_v32 = vadd.s32 %v4686_v55, %v4677_v4  ;;  %vm8717_vm14 = vcmp.le.f32.partialorder %v4462_v13, 0.7853982  ;;  %v4699_v62 = vshrl.u32 %v4694_v19, 16 }
 0x4c5   : > { %v4708_v33 = vadd.s32 %v4707_v43, %v4697_v60  ;;  %v5921_v22 = vadd.s32 4294967169, %v5086_v26  ;;  %v4582_v11 = vcvt.s32.f32 %v4575_v45  ;;  %v4656_v2 = vsel %vm4650_vm0, %v4653_v52, %v4655_v35 }
 0x4c6   : > { %v4580_v5 = vand.u32 2147483647, %v4579_v9  ;;  %v4706_v1 = vadd.s32 %v4702_v40, %v4698_v3  ;;  %v4589_v31 = vsel %vm8717_vm14, 0, %v4587_v50  ;;  %v5089_v44 = vand.u32 8388607, %v5082_v24 }
 0x4c7   : > { %v4709_v54 = vadd.s32 %v4708_v33, %v4699_v62  ;;  %v5092_v13 = vadd.s32 1, %v5921_v22  ;;  %v4606_v27 = vadd.s32 3, %v4589_v31  ;;  %v4710_v8 = vmul.u32 %v8649_v63, %v4656_v2 }
 0x4c8   : > { %v4583_v16 = vmul.f32 %v4582_v11, %v4580_v5  ;;  %vm4712_vm12 = vc.u32 %v4687_v32, %v4706_v1  ;;  %v5090_v52 = vor.u32 8388608, %v5089_v44  ;;  %v5237_v14 = vand.u32 2147483647, %v8710_v39 }
 0x4c9   : > { %v4713_v12 = vadd.s32 1, %v4709_v54  ;;  %vm5093_vm13 = vcmp.gt.s32.totalorder %v5092_v13, 0  ;;  %v8740_v20 = vand.u32 3, %v4606_v27  ;;  %v8742_v36 = vadd.s32 %v4706_v1, %v4687_v32 }
 0x4ca   : > { %v4584_v19 = vxor.u32 2147483648, %v4583_v16  ;;  %v5094_v7 = vsel %vm5093_vm13, %v5092_v13, 0  ;;  %v8744_v23 = vshll.u32 %v5090_v52, 8  ;;  %v5240_v35 = vand.u32 2139095040, %v8710_v39 }
 0x4cb   : > { %v4714_v0 = vsel %vm4712_vm12, %v4713_v12, %v4709_v54  ;;  %v5096_v34 = vand.u32 31, %v5094_v7  ;;  %v8749_v55 = vand.u32 8388607, %v5237_v14  ;;  %v8755_v57 = vshrl.u32 %v5094_v7, 5 }
 0x4cc   : > { %v4585_v48 = vsel %vm4464_vm8, %v4584_v19, %v4583_v16  ;;  %v4715_v3 = vadd.s32 %v4714_v0, %v4710_v8  ;;  %vm4619_vm15 = vcmp.lt.s32.totalorder %v8439_v61, 0  ;;  %vm4609_vm2 = vcmp.eq.s32.totalorder %v8740_v20, 0 }
 0x4cd   : > { %v8734_v40 = vsel %vm8717_vm14, %v8428_v56, %v4585_v48  ;;  %v8736_v28 = vsub.s32 32, %v5096_v34  ;;  %v5099_v29 = vshll.u32 %v10209_v46, %v5096_v34  ;;  %v5102_v62 = vshll.u32 %v10205_v41, %v5096_v34 }
 0x4ce   : > { %v4590_v63 = vmul.f32 %v8734_v40, %v8734_v40  ;;  %v4716_v10 = vadd.s32 536870912, %v4715_v3  ;;  %v5105_v33 = vshll.u32 %v10204_v6, %v5096_v34  ;;  %v5108_v22 = vshll.u32 %v10197_v15, %v5096_v34 }
 0x4cf   : > { %v5100_v4 = vshrl.u32 %v10205_v41, %v8736_v28  ;;  %v5103_v60 = vshrl.u32 %v10204_v6, %v8736_v28  ;;  %v5106_v43 = vshrl.u32 %v10197_v15, %v8736_v28  ;;  %v5109_v26 = vshrl.u32 %v10191_v59, %v8736_v28 }
 0x4d0   : > { %v4591_v53 = vmul.f32 -0.001358992, %v4590_v63  ;;  %v4598_v45 = vmul.f32 -0.00019511016, %v4590_v63  ;;  %v8751_v51 = vshrl.u32 %v4716_v10, 30  ;;  %v5112_v5 = vshrl.u32 %v10192_v17, %v8736_v28 }
 0x4d1   : > { %v8772_v31 = vor.u32 %v5100_v4, %v5099_v29  ;;  %v8775_v54 = vor.u32 %v5103_v60, %v5102_v62  ;;  %v8777_v44 = vor.u32 %v5106_v43, %v5105_v33  ;;  %v5110_v13 = vor.u32 %v5109_v26, %v5108_v22 }
 0x4d2   : > { %v4592_v9 = vadd.f32 0.041655596, %v4591_v53  ;;  %v4599_v50 = vadd.f32 0.008332121, %v4598_v45  ;;  %v4718_v32 = vshll.u32 %v8751_v51, 30  ;;  %v5111_v16 = vshll.u32 %v10191_v59, %v5096_v34 }
 0x4d3   : > { %vm4612_vm3 = vcmp.eq.s32.totalorder %v8740_v20, 2  ;;  %vm5114_vm7 = vcmp.lt.s32.totalorder %v8755_v57, 1  ;;  %v5131_v7 = vand.u32 65535, %v8744_v23  ;;  %v5241_v0 = vshrl.u32 %v5240_v35, 23 }
 0x4d4   : > { %v4593_v11 = vmul.f32 %v4592_v9, %v4590_v63  ;;  %v4600_v2 = vmul.f32 %v4599_v50, %v4590_v63  ;;  %v8770_v1 = vsub.s32 %v4715_v3, %v4718_v32  ;;  %v5113_v8 = vor.u32 %v5112_v5, %v5111_v16 }
 0x4d5   : > { %vm4608_vm1 = vcmp.lt.s32.totalorder %v8740_v20, 2  ;;  %vm5117_vm4 = vcmp.lt.s32.totalorder %v8755_v57, 4  ;;  %vm4605_vm8 = vweird.f32 %v8428_v56  ;;  %vm5116_vm5 = vcmp.lt.s32.totalorder %v8755_v57, 3 }
 0x4d6   : > { %v4594_v12 = vadd.f32 -0.4999988, %v4593_v11  ;;  %v4601_v19 = vadd.f32 -0.16666654, %v4600_v2  ;;  %vm4720_vm0 = vcmp.lt.s32.totalorder %v8770_v1, 0  ;;  %v4721_v27 = vsub.s32 0, %v8770_v1 }
 0x4d7   : > { %v5122_v10 = vsel %vm5114_vm7, %v8772_v31, %v8775_v54  ;;  %v5123_v35 = vsel %vm5117_vm4, %v5110_v13, 920167782  ;;  %vm8799_vm9 = vcmp.le.f32.partialorder %v4617_v38, 0.7853982  ;;  %v4741_v4 = vsub.s32 4, %v8751_v51 }
 0x4d8   : > { %v4595_v52 = vmul.f32 %v4594_v12, %v4590_v63  ;;  %v4602_v48 = vmul.f32 %v4601_v19, %v4590_v63  ;;  %v4722_v34 = vsel %vm4720_vm0, %v4721_v27, %v8770_v1  ;;  %v5124_v60 = vsel %vm5116_vm5, %v8777_v44, %v5123_v35 }
 0x4d9   : > { %v4723_v3 = vclz %v4722_v34  ;;  %vm5115_vm10 = vcmp.lt.s32.totalorder %v8755_v57, 2  ;;  %v5126_v26 = vsel %vm5114_vm7, %v8775_v54, %v8777_v44  ;;  %v5132_v9 = vshrl.u32 %v8744_v23, 16 }
 0x4da   : > { %v4596_v63 = vadd.f32 1.0, %v4595_v52  ;;  %v4603_v53 = vadd.f32 1.0, %v4602_v48  ;;  %v5125_v32 = vsel %vm5115_vm10, %v5122_v10, %v5124_v60  ;;  %v5127_v29 = vsel %vm5117_vm4, %v5113_v8, 1326507024 }
 0x4db   : > { %v5913_v43 = vadd.s32 4294967294, %v4723_v3  ;;  %v5128_v62 = vsel %vm5116_vm5, %v5110_v13, %v5127_v29  ;;  %v5156_v33 = vshrl.u32 %v5125_v32, 16  ;;  %v5924_v22 = vadd.s32 4294967169, %v5241_v0 }
 0x4dc   : > { %v4604_v38 = vmul.f32 %v4603_v53, %v8734_v40  ;;  %v4613_v50 = vxor.u32 2147483648, %v4596_v63  ;;  %v8823_v2 = vsel %vm4619_vm15, %v4741_v4, %v8751_v51  ;;  %v5129_v40 = vsel %vm5115_vm10, %v5126_v26, %v5128_v62 }
 0x4dd   : > { %vm5914_vm6 = vcmp.lt.s32.totalorder %v5913_v43, 0  ;;  %v5133_v19 = vand.u32 65535, %v5129_v40  ;;  %v5155_v27 = vand.u32 65535, %v5125_v32  ;;  %v5134_v52 = vshrl.u32 %v5129_v40, 16 }
 0x4de   : > { %v4610_v5 = vxor.u32 2147483648, %v4604_v38  ;;  %v4726_v11 = vsel %vm5914_vm6, 0, %v5913_v43  ;;  %v4614_v13 = vsel %vm4612_vm3, %v4613_v50, %v4604_v38  ;;  %v5158_v3 = vmul.u32 %v5156_v33, %v5131_v7 }
 0x4df   : > { %v4727_v16 = vsub.s32 32, %v4726_v11  ;;  %v4731_v12 = vsub.s32 4294967266, %v4726_v11  ;;  %v4728_v0 = vshll.u32 %v8770_v1, %v4726_v11  ;;  %v5098_v35 = vshrl.u32 %v10209_v46, %v8736_v28 }
 0x4e0   : > { %v4611_v8 = vsel %vm4609_vm2, %v4596_v63, %v4610_v5  ;;  %v5136_v63 = vmul.u32 %v5134_v52, %v5131_v7  ;;  %v5137_v53 = vmul.u32 %v5133_v19, %v5132_v9  ;;  %v4744_v1 = vsel %vm8799_vm9, 0, %v8823_v2 }
 0x4e1   : > { %v4615_v51 = vsel %vm4608_vm1, %v4611_v8, %v4614_v13  ;;  %v4729_v48 = vshrl.u32 %v8742_v36, %v4727_v16  ;;  %v4732_v34 = vadd.s32 127, %v4731_v12  ;;  %v5159_v20 = vmul.u32 %v5155_v27, %v5132_v9 }
 0x4e2   : > { %v4616_v10 = vsel %vm4605_vm8, nan, %v4615_v51  ;;  %v5135_v43 = vmul.u32 %v5133_v19, %v5131_v7  ;;  %v5138_v36 = vmul.u32 %v5134_v52, %v5132_v9  ;;  %v5139_v26 = vshll.u32 %v5136_v63, 16 }
 0x4e3   : > { %v4730_v4 = vor.u32 %v4729_v48, %v4728_v0  ;;  %v4733_v60 = vshll.u32 %v4732_v34, 23  ;;  %5710 = vst [vmem:[%s6771_s17 + $0xc0] sm:$0xff] %v4616_v10  ;;  %v5157_v38 = vmul.u32 %v5155_v27, %v5131_v7  ;;  %v5141_v56 = vshll.u32 %v5137_v53, 16 }
 0x4e4   : > { %v5160_v32 = vmul.u32 %v5156_v33, %v5132_v9  ;;  %v5161_v29 = vshll.u32 %v5158_v3, 16  ;;  %vm5143_vm11 = vc.u32 %v5135_v43, %v5139_v26  ;;  %v5145_v28 = vadd.s32 %v5139_v26, %v5135_v43 }
 0x4e5   : > { %v4734_v50 = vor.u32 4788187, %v4733_v60  ;;  %v4737_v62 = vcvt.s32.f32 %v4730_v4  ;;  %v5163_v5 = vshll.u32 %v5159_v20, 16  ;;  %v5144_v40 = vsel %vm5143_vm11, 1, %v10213_v58 }
 0x4e6   : > { %vm5165_vm14 = vc.u32 %v5157_v38, %v5161_v29  ;;  %v5167_v16 = vadd.s32 %v5161_v29, %v5157_v38  ;;  %v5119_v2 = vsel %vm5117_vm4, %v8777_v44, 2102212464  ;;  %v5146_v12 = vadd.s32 %v5144_v40, %v5138_v36 }
 0x4e7   : > { %v4735_v11 = vand.u32 2147483647, %v4734_v50  ;;  %vm5147_vm12 = vc.u32 %v5145_v28, %v5141_v56  ;;  %v5166_v7 = vsel %vm5165_vm14, 1, %v10213_v58  ;;  %v5140_v27 = vshrl.u32 %v5136_v63, 16 }
 0x4e8   : > { %v5148_v9 = vsel %vm5147_vm12, 1, %v10213_v58  ;;  %v5168_v33 = vadd.s32 %v5166_v7, %v5160_v32  ;;  %vm5169_vm13 = vc.u32 %v5167_v16, %v5163_v5  ;;  %v5247_v0 = vadd.s32 1, %v5924_v22 }
 0x4e9   : > { %v4738_v19 = vmul.f32 %v4737_v62, %v4735_v11  ;;  %v5150_v8 = vadd.s32 %v5148_v9, %v5146_v12  ;;  %v5170_v13 = vsel %vm5169_vm13, 1, %v10213_v58  ;;  %v5118_v51 = vsel %vm5114_vm7, %v5098_v35, %v8772_v31 }
 0x4ea   : > { %v5162_v44 = vshrl.u32 %v5158_v3, 16  ;;  %v5172_v48 = vadd.s32 %v5170_v13, %v5168_v33  ;;  %v5120_v34 = vsel %vm5116_vm5, %v8775_v54, %v5119_v2  ;;  %v5142_v10 = vshrl.u32 %v5137_v53, 16 }
 0x4eb   : > { %v4739_v52 = vxor.u32 2147483648, %v4738_v19  ;;  %v5151_v4 = vadd.s32 %v5150_v8, %v5140_v27  ;;  %vm5248_vm0 = vcmp.gt.s32.totalorder %v5247_v0, 0  ;;  %v5164_v60 = vshrl.u32 %v5159_v20, 16 }
 0x4ec   : > { %v5173_v43 = vadd.s32 %v5172_v48, %v5162_v44  ;;  %v5249_v22 = vsel %vm5248_vm0, %v5247_v0, 0  ;;  %v8863_v3 = vadd.s32 %v5167_v16, %v5163_v5  ;;  %v3204_v54 = vmul.f32 %v7675_v18, %v6291_v42 }
 0x4ed   : > { %v4740_v63 = vsel %vm4619_vm15, %v4739_v52, %v4738_v19  ;;  %v8861_v31 = vadd.s32 %v5151_v4, %v5142_v10  ;;  %v5251_v35 = vand.u32 31, %v5249_v22  ;;  %v5121_v26 = vsel %vm5115_vm10, %v5118_v51, %v5120_v34 }
 0x4ee   : > { %v4743_v36 = vsel %vm8799_vm9, %v8439_v61, %v4740_v63  ;;  %v5174_v38 = vadd.s32 %v5173_v43, %v5164_v60  ;;  %v8871_v20 = vmul.f32 %v7774_v25, %v6291_v42  ;;  %v5245_v45 = vor.u32 8388608, %v8749_v55 }
 0x4ef   : > { %v4745_v53 = vmul.f32 %v4743_v36, %v4743_v36  ;;  %vm5177_vm15 = vc.u32 %v8861_v31, %v8863_v3  ;;  %v8876_v50 = vsub.s32 32, %v5251_v35  ;;  %v4761_v29 = vadd.s32 3, %v4744_v1 }
 0x4f0   : > { %v5178_v62 = vadd.s32 1, %v5174_v38  ;;  %v5175_v28 = vmul.u32 %v8744_v23, %v5121_v26  ;;  %v8879_v57 = vshrl.u32 %v5249_v22, 5  ;;  %v5254_v55 = vshll.u32 %v10209_v46, %v5251_v35 }
 0x4f1   : > { %v4746_v56 = vmul.f32 -0.001358992, %v4745_v53  ;;  %v4753_v32 = vmul.f32 -0.00019511016, %v4745_v53  ;;  %v5255_v5 = vshrl.u32 %v10205_v41, %v8876_v50  ;;  %v5258_v42 = vshrl.u32 %v10204_v6, %v8876_v50 }
 0x4f2   : > { %v5179_v16 = vsel %vm5177_vm15, %v5178_v62, %v5174_v38  ;;  %v5257_v12 = vshll.u32 %v10205_v41, %v5251_v35  ;;  %v5260_v1 = vshll.u32 %v10204_v6, %v5251_v35  ;;  %v5261_v23 = vshrl.u32 %v10197_v15, %v8876_v50 }
 0x4f3   : > { %v4747_v11 = vadd.f32 0.041655596, %v4746_v56  ;;  %v4754_v40 = vadd.f32 0.008332121, %v4753_v32  ;;  %v5180_v2 = vadd.s32 %v5179_v16, %v5175_v28  ;;  %v5263_v9 = vshll.u32 %v10197_v15, %v5251_v35 }
 0x4f4   : > { %v5264_v33 = vshrl.u32 %v10191_v59, %v8876_v50  ;;  %v5256_v8 = vor.u32 %v5255_v5, %v5254_v55  ;;  %v8893_v13 = vor.u32 %v5258_v42, %v5257_v12  ;;  %v5267_v0 = vshrl.u32 %v10192_v17, %v8876_v50 }
 0x4f5   : > { %v4748_v7 = vmul.f32 %v4747_v11, %v4745_v53  ;;  %v4755_v19 = vmul.f32 %v4754_v40, %v4745_v53  ;;  %v5181_v27 = vadd.s32 536870912, %v5180_v2  ;;  %v8898_v52 = vadd.f32 %v3204_v54, %v7199_v21 }
 0x4f6   : > { %v5265_v48 = vor.u32 %v5264_v33, %v5263_v9  ;;  %v4762_v34 = vand.u32 3, %v4761_v29  ;;  %v5262_v4 = vor.u32 %v5261_v23, %v5260_v1  ;;  %v5266_v63 = vshll.u32 %v10191_v59, %v5251_v35 }
 0x4f7   : > { %v4749_v51 = vadd.f32 -0.4999988, %v4748_v7  ;;  %v4756_v44 = vadd.f32 -0.16666654, %v4755_v19  ;;  %v8900_v10 = vshrl.u32 %v5181_v27, 30  ;;  %vm5269_vm2 = vcmp.lt.s32.totalorder %v8879_v57, 1 }
 0x4f8   : > { %v8904_v22 = vshll.u32 %v5245_v45, 8  ;;  %vm4760_vm3 = vweird.f32 %v8439_v61  ;;  %v5268_v26 = vor.u32 %v5267_v0, %v5266_v63  ;;  %vm5272_vm7 = vcmp.lt.s32.totalorder %v8879_v57, 4 }
 0x4f9   : > { %v4750_v60 = vmul.f32 %v4749_v51, %v4745_v53  ;;  %v4757_v43 = vmul.f32 %v4756_v44, %v4745_v53  ;;  %v5183_v54 = vshll.u32 %v8900_v10, 30  ;;  %v5277_v38 = vsel %vm5269_vm2, %v5256_v8, %v8893_v13 }
 0x4fa   : > { %vm5271_vm1 = vcmp.lt.s32.totalorder %v8879_v57, 3  ;;  %v5278_v35 = vsel %vm5272_vm7, %v5265_v48, 920167782  ;;  %vm4763_vm4 = vcmp.lt.s32.totalorder %v4762_v34, 2  ;;  %vm5270_vm8 = vcmp.lt.s32.totalorder %v8879_v57, 2 }
 0x4fb   : > { %v4751_v56 = vadd.f32 1.0, %v4750_v60  ;;  %v4758_v32 = vadd.f32 1.0, %v4757_v43  ;;  %v5184_v53 = vsub.s32 %v5180_v2, %v5183_v54  ;;  %v5279_v45 = vsel %vm5271_vm1, %v5262_v4, %v5278_v35 }
 0x4fc   : > { %v5280_v28 = vsel %vm5270_vm8, %v5277_v38, %v5279_v45  ;;  %v5281_v5 = vsel %vm5269_vm2, %v8893_v13, %v5262_v4  ;;  %vm4764_vm5 = vcmp.eq.s32.totalorder %v4762_v34, 0  ;;  %v5282_v11 = vsel %vm5272_vm7, %v5268_v26, 1326507024 }
 0x4fd   : > { %v4759_v29 = vmul.f32 %v4758_v32, %v4743_v36  ;;  %v4768_v62 = vxor.u32 2147483648, %v4751_v56  ;;  %vm5185_vm9 = vcmp.lt.s32.totalorder %v5184_v53, 0  ;;  %v5186_v42 = vsub.s32 0, %v5184_v53 }
 0x4fe   : > { %vm4767_vm10 = vcmp.eq.s32.totalorder %v4762_v34, 2  ;;  %v5283_v16 = vsel %vm5271_vm1, %v5265_v48, %v5282_v11  ;;  %v5286_v36 = vand.u32 65535, %v8904_v22  ;;  %v5311_v1 = vshrl.u32 %v5280_v28, 16 }
 0x4ff   : > { %v4765_v40 = vxor.u32 2147483648, %v4759_v29  ;;  %v4769_v55 = vsel %vm4767_vm10, %v4768_v62, %v4759_v29  ;;  %v5187_v2 = vsel %vm5185_vm9, %v5186_v42, %v5184_v53  ;;  %v5284_v12 = vsel %vm5270_vm8, %v5281_v5, %v5283_v16 }
 0x500   : > { %v5188_v7 = vclz %v5187_v2  ;;  %v5288_v19 = vand.u32 65535, %v5284_v12  ;;  %v5289_v9 = vshrl.u32 %v5284_v12, 16  ;;  %v5253_v27 = vshrl.u32 %v10209_v46, %v8876_v50 }
 0x501   : > { %v4766_v23 = vsel %vm4764_vm5, %v4751_v56, %v4765_v40  ;;  %v5287_v0 = vshrl.u32 %v8904_v22, 16  ;;  %v5310_v51 = vand.u32 65535, %v5280_v28  ;;  %v5392_v60 = vand.u32 2147483647, %v8898_v52 }
 0x502   : > { %v4770_v33 = vsel %vm4763_vm4, %v4766_v23, %v4769_v55  ;;  %v5922_v48 = vadd.s32 4294967294, %v5188_v7  ;;  %v5291_v63 = vmul.u32 %v5289_v9, %v5286_v36  ;;  %v5176_v43 = vadd.s32 %v8863_v3, %v8861_v31 }
 0x503   : > { %v4771_v44 = vsel %vm4760_vm3, nan, %v4770_v33  ;;  %v5273_v34 = vsel %vm5269_vm2, %v5253_v27, %v5256_v8  ;;  %v5292_v54 = vmul.u32 %v5288_v19, %v5287_v0  ;;  %v5313_v26 = vmul.u32 %v5311_v1, %v5286_v36 }
 0x504   : > { %5711 = vst [vmem:[%s6771_s17 + $0xc8] sm:$0xff] %v4771_v44  ;;  %vm5923_vm6 = vcmp.lt.s32.totalorder %v5922_v48, 0  ;;  %v5274_v50 = vsel %vm5272_vm7, %v5262_v4, 2102212464  ;;  %v5290_v38 = vmul.u32 %v5288_v19, %v5286_v36  ;;  %v5294_v61 = vshll.u32 %v5291_v63, 16 }
 0x505   : > { %v5191_v56 = vsel %vm5923_vm6, 0, %v5922_v48  ;;  %v5293_v32 = vmul.u32 %v5289_v9, %v5287_v0  ;;  %v5312_v35 = vmul.u32 %v5310_v51, %v5286_v36  ;;  %v5314_v45 = vmul.u32 %v5310_v51, %v5287_v0 }
 0x506   : > { %v5192_v29 = vsub.s32 32, %v5191_v56  ;;  %v5196_v62 = vsub.s32 4294967266, %v5191_v56  ;;  %v5296_v28 = vshll.u32 %v5292_v54, 16  ;;  %vm5298_vm11 = vc.u32 %v5290_v38, %v5294_v61 }
 0x507   : > { %vm5084_vm14 = vcmp.lt.s32.totalorder %v8673_v30, 0  ;;  %v5299_v31 = vsel %vm5298_vm11, 1, %v10213_v58  ;;  %v5300_v3 = vadd.s32 %v5294_v61, %v5290_v38  ;;  %v5315_v8 = vmul.u32 %v5311_v1, %v5287_v0 }
 0x508   : > { %v5316_v5 = vshll.u32 %v5313_v26, 16  ;;  %v5193_v42 = vshll.u32 %v5184_v53, %v5191_v56  ;;  %v5194_v11 = vshrl.u32 %v5176_v43, %v5192_v29  ;;  %v5197_v4 = vadd.s32 127, %v5196_v62 }
 0x509   : > { %v5301_v40 = vadd.s32 %v5299_v31, %v5293_v32  ;;  %vm5302_vm12 = vc.u32 %v5300_v3, %v5296_v28  ;;  %v5318_v16 = vshll.u32 %v5314_v45, 16  ;;  %v5295_v7 = vshrl.u32 %v5291_v63, 16 }
 0x50a   : > { %vm5320_vm13 = vc.u32 %v5312_v35, %v5316_v5  ;;  %v5322_v36 = vadd.s32 %v5316_v5, %v5312_v35  ;;  %v5195_v55 = vor.u32 %v5194_v11, %v5193_v42  ;;  %v5198_v2 = vshll.u32 %v5197_v4, 23 }
 0x50b   : > { %v5303_v12 = vsel %vm5302_vm12, 1, %v10213_v58  ;;  %v5321_v23 = vsel %vm5320_vm13, 1, %v10213_v58  ;;  %v5206_v53 = vsub.s32 4, %v8900_v10  ;;  %v5297_v33 = vshrl.u32 %v5292_v54, 16 }
 0x50c   : > { %v5305_v19 = vadd.s32 %v5303_v12, %v5301_v40  ;;  %v5323_v9 = vadd.s32 %v5321_v23, %v5315_v8  ;;  %vm5324_vm0 = vc.u32 %v5322_v36, %v5318_v16  ;;  %v5199_v1 = vor.u32 4788187, %v5198_v2 }
 0x50d   : > { %v5325_v27 = vsel %vm5324_vm0, 1, %v10213_v58  ;;  %v5317_v51 = vshrl.u32 %v5313_v26, 16  ;;  %v5395_v48 = vand.u32 2139095040, %v8898_v52  ;;  %v5202_v38 = vcvt.s32.f32 %v5195_v55 }
 0x50e   : > { %v5306_v0 = vadd.s32 %v5305_v19, %v5295_v7  ;;  %v5327_v44 = vadd.s32 %v5325_v27, %v5323_v9  ;;  %v5200_v43 = vand.u32 2147483647, %v5199_v1  ;;  %v5275_v63 = vsel %vm5271_vm1, %v8893_v13, %v5274_v50 }
 0x50f   : > { %v5319_v61 = vshrl.u32 %v5314_v45, 16  ;;  %v5396_v35 = vshrl.u32 %v5395_v48, 23  ;;  %v5399_v54 = vand.u32 8388607, %v5392_v60  ;;  %v8958_v29 = vadd.f32 %v8871_v20, %v7199_v21 }
 0x510   : > { %v5307_v56 = vadd.s32 %v5306_v0, %v5297_v33  ;;  %v5328_v32 = vadd.s32 %v5327_v44, %v5317_v51  ;;  %v5203_v26 = vmul.f32 %v5202_v38, %v5200_v43  ;;  %v5207_v62 = vsel %vm5084_vm14, %v5206_v53, %v8900_v10 }
 0x511   : > { %v5326_v28 = vadd.s32 %v5322_v36, %v5318_v16  ;;  %v5276_v13 = vsel %vm5270_vm8, %v5273_v34, %v5275_v63  ;;  %v5927_v45 = vadd.s32 4294967169, %v5396_v35  ;;  %vm5083_vm15 = vcmp.le.f32.partialorder %v5082_v24, 0.7853982 }
 0x512   : > { %v5329_v50 = vadd.s32 %v5328_v32, %v5319_v61  ;;  %v5204_v31 = vxor.u32 2147483648, %v5203_v26  ;;  %v5209_v3 = vsel %vm5083_vm15, 0, %v5207_v62  ;;  %v5400_v21 = vor.u32 8388608, %v5399_v54 }
 0x513   : > { %vm5332_vm2 = vc.u32 %v5307_v56, %v5326_v28  ;;  %v5402_v20 = vadd.s32 1, %v5927_v45  ;;  %v5330_v10 = vmul.u32 %v8904_v22, %v5276_v13  ;;  %v5550_v42 = vand.u32 2139095040, %v8958_v29 }
 0x514   : > { %v5333_v8 = vadd.s32 1, %v5329_v50  ;;  %v5205_v5 = vsel %vm5084_vm14, %v5204_v31, %v5203_v26  ;;  %v5226_v4 = vadd.s32 3, %v5209_v3  ;;  %v8972_v36 = vshll.u32 %v5400_v21, 8 }
 0x515   : > { %v5208_v57 = vsel %vm5083_vm15, %v8673_v30, %v5205_v5  ;;  %vm5403_vm3 = vcmp.gt.s32.totalorder %v5402_v20, 0  ;;  %v5547_v55 = vand.u32 2147483647, %v8958_v29  ;;  %v5551_v7 = vshrl.u32 %v5550_v42, 23 }
 0x516   : > { %v5334_v34 = vsel %vm5332_vm2, %v5333_v8, %v5329_v50  ;;  %v5210_v11 = vmul.f32 %v5208_v57, %v5208_v57  ;;  %v5404_v40 = vsel %vm5403_vm3, %v5402_v20, 0  ;;  %v8977_v1 = vand.u32 3, %v5226_v4 }
 0x517   : > { %v5335_v24 = vadd.s32 %v5334_v34, %v5330_v10  ;;  %v5406_v16 = vand.u32 31, %v5404_v40  ;;  %v8981_v33 = vadd.s32 %v5326_v28, %v5307_v56  ;;  %v8984_v27 = vand.u32 65535, %v8972_v36 }
 0x518   : > { %v5211_v2 = vmul.f32 -0.001358992, %v5210_v11  ;;  %v5218_v12 = vmul.f32 -0.00019511016, %v5210_v11  ;;  %v8988_v0 = vand.u32 8388607, %v5547_v55  ;;  %vm5225_vm5 = vweird.f32 %v8673_v30 }
 0x519   : > { %v5336_v23 = vadd.s32 536870912, %v5335_v24  ;;  %v8975_v22 = vsub.s32 32, %v5406_v16  ;;  %v5930_v43 = vadd.s32 4294967169, %v5551_v7  ;;  %v8991_v38 = vshrl.u32 %v5404_v40, 5 }
 0x51a   : > { %v5212_v19 = vadd.f32 0.041655596, %v5211_v2  ;;  %v5219_v9 = vadd.f32 0.008332121, %v5218_v12  ;;  %vm5232_vm7 = vcmp.eq.s32.totalorder %v8977_v1, 2  ;;  %v5409_v26 = vshll.u32 %v10209_v46, %v5406_v16 }
 0x51b   : > { %v8979_v53 = vshrl.u32 %v5336_v23, 30  ;;  %v5410_v63 = vshrl.u32 %v10205_v41, %v8975_v22  ;;  %v5413_v61 = vshrl.u32 %v10204_v6, %v8975_v22  ;;  %v5419_v56 = vshrl.u32 %v10191_v59, %v8975_v22 }
 0x51c   : > { %v5213_v51 = vmul.f32 %v5212_v19, %v5210_v11  ;;  %v5220_v44 = vmul.f32 %v5219_v9, %v5210_v11  ;;  %vm5229_vm1 = vcmp.eq.s32.totalorder %v8977_v1, 0  ;;  %v5412_v62 = vshll.u32 %v10205_v41, %v5406_v16 }
 0x51d   : > { %v5338_v48 = vshll.u32 %v8979_v53, 30  ;;  %v5416_v28 = vshrl.u32 %v10197_v15, %v8975_v22  ;;  %v5418_v13 = vshll.u32 %v10197_v15, %v5406_v16  ;;  %v5422_v50 = vshrl.u32 %v10192_v17, %v8975_v22 }
 0x51e   : > { %v5214_v32 = vadd.f32 -0.4999988, %v5213_v51  ;;  %v5221_v35 = vadd.f32 -0.16666654, %v5220_v44  ;;  %vm5228_vm4 = vcmp.lt.s32.totalorder %v8977_v1, 2  ;;  %v5411_v8 = vor.u32 %v5410_v63, %v5409_v26 }
 0x51f   : > { %v9000_v54 = vsub.s32 %v5335_v24, %v5338_v48  ;;  %v5414_v21 = vor.u32 %v5413_v61, %v5412_v62  ;;  %v5415_v20 = vshll.u32 %v10204_v6, %v5406_v16  ;;  %v5420_v5 = vor.u32 %v5419_v56, %v5418_v13 }
 0x520   : > { %v5215_v45 = vmul.f32 %v5214_v32, %v5210_v11  ;;  %v5222_v31 = vmul.f32 %v5221_v35, %v5210_v11  ;;  %v5421_v4 = vshll.u32 %v10191_v59, %v5406_v16  ;;  %v5442_v40 = vshrl.u32 %v8972_v36, 16 }
 0x521   : > { %vm5340_vm8 = vcmp.lt.s32.totalorder %v9000_v54, 0  ;;  %v5341_v3 = vsub.s32 0, %v9000_v54  ;;  %v5417_v24 = vor.u32 %v5416_v28, %v5415_v20  ;;  %v9018_v2 = vadd.s32 1, %v5930_v43 }
 0x522   : > { %v5216_v10 = vadd.f32 1.0, %v5215_v45  ;;  %v5223_v42 = vadd.f32 1.0, %v5222_v31  ;;  %vm5239_vm9 = vcmp.lt.s32.totalorder %v8710_v39, 0  ;;  %v5423_v7 = vor.u32 %v5422_v50, %v5421_v4 }
 0x523   : > { %v5342_v34 = vsel %vm5340_vm8, %v5341_v3, %v9000_v54  ;;  %vm5424_vm10 = vcmp.lt.s32.totalorder %v8991_v38, 1  ;;  %v5361_v9 = vsub.s32 4, %v8979_v53  ;;  %vm5427_vm6 = vcmp.lt.s32.totalorder %v8991_v38, 4 }
 0x524   : > { %v5343_v11 = vclz %v5342_v34  ;;  %v5224_v12 = vmul.f32 %v5223_v42, %v5208_v57  ;;  %v5233_v23 = vxor.u32 2147483648, %v5216_v10  ;;  %v5432_v16 = vsel %vm5424_vm10, %v5411_v8, %v5414_v21 }
 0x525   : > { %vm5425_vm11 = vcmp.lt.s32.totalorder %v8991_v38, 2  ;;  %vm5426_vm14 = vcmp.lt.s32.totalorder %v8991_v38, 3  ;;  %v5433_v57 = vsel %vm5427_vm6, %v5420_v5, 920167782  ;;  %v5436_v43 = vsel %vm5424_vm10, %v5414_v21, %v5417_v24 }
 0x526   : > { %v5925_v19 = vadd.s32 4294967294, %v5343_v11  ;;  %v5230_v51 = vxor.u32 2147483648, %v5224_v12  ;;  %v5234_v44 = vsel %vm5232_vm7, %v5233_v23, %v5224_v12  ;;  %v5434_v48 = vsel %vm5426_vm14, %v5417_v24, %v5433_v57 }
 0x527   : > { %v5435_v56 = vsel %vm5425_vm11, %v5432_v16, %v5434_v48  ;;  %v5437_v32 = vsel %vm5427_vm6, %v5423_v7, 1326507024  ;;  %vm5558_vm13 = vcmp.gt.s32.totalorder %v9018_v2, 0  ;;  %v5429_v28 = vsel %vm5427_vm6, %v5417_v24, 2102212464 }
 0x528   : > { %vm5926_vm12 = vcmp.lt.s32.totalorder %v5925_v19, 0  ;;  %v5231_v63 = vsel %vm5229_vm1, %v5216_v10, %v5230_v51  ;;  %v5438_v50 = vsel %vm5426_vm14, %v5420_v5, %v5437_v32  ;;  %v5465_v45 = vand.u32 65535, %v5435_v56 }
 0x529   : > { %v5346_v61 = vsel %vm5926_vm12, 0, %v5925_v19  ;;  %v5235_v35 = vsel %vm5228_vm4, %v5231_v63, %v5234_v44  ;;  %v5466_v31 = vshrl.u32 %v5435_v56, 16  ;;  %v5439_v1 = vsel %vm5425_vm11, %v5436_v43, %v5438_v50 }
 0x52a   : > { %v5347_v26 = vsub.s32 32, %v5346_v61  ;;  %v5351_v62 = vsub.s32 4294967266, %v5346_v61  ;;  %v5236_v13 = vsel %vm5225_vm5, nan, %v5235_v35  ;;  %v5348_v3 = vshll.u32 %v9000_v54, %v5346_v61 }
 0x52b   : > { %5714 = vst [vmem:[%s6771_s17 + $0xe0] sm:$0xff] %v5236_v13  ;;  %v5408_v42 = vshrl.u32 %v10209_v46, %v8975_v22  ;;  %v5443_v34 = vand.u32 65535, %v5439_v1  ;;  %v5444_v30 = vshrl.u32 %v5439_v1, 16  ;;  %v5468_v4 = vmul.u32 %v5466_v31, %v8984_v27 }
 0x52c   : > { %v5349_v20 = vshrl.u32 %v8981_v33, %v5347_v26  ;;  %v5352_v10 = vadd.s32 127, %v5351_v62  ;;  %v9062_v54 = vsel %vm5239_vm9, %v5361_v9, %v8979_v53  ;;  %v5469_v33 = vmul.u32 %v5465_v45, %v5442_v40 }
 0x52d   : > { %vm9066_vm0 = vcmp.le.f32.partialorder %v5237_v14, 0.7853982  ;;  %v5428_v22 = vsel %vm5424_vm10, %v5408_v42, %v5411_v8  ;;  %v5430_v12 = vsel %vm5426_vm14, %v5414_v21, %v5429_v28  ;;  %v5446_v23 = vmul.u32 %v5444_v30, %v8984_v27 }
 0x52e   : > { %v5350_v11 = vor.u32 %v5349_v20, %v5348_v3  ;;  %v5353_v5 = vshll.u32 %v5352_v10, 23  ;;  %v5447_v7 = vmul.u32 %v5443_v34, %v5442_v40  ;;  %v5467_v53 = vmul.u32 %v5465_v45, %v8984_v27 }
 0x52f   : > { %v5470_v9 = vmul.u32 %v5466_v31, %v5442_v40  ;;  %v5471_v16 = vshll.u32 %v5468_v4, 16  ;;  %v5445_v14 = vmul.u32 %v5443_v34, %v8984_v27  ;;  %v5448_v57 = vmul.u32 %v5444_v30, %v5442_v40 }
 0x530   : > { %v5354_v19 = vor.u32 4788187, %v5353_v5  ;;  %v5357_v51 = vcvt.s32.f32 %v5350_v11  ;;  %v5449_v44 = vshll.u32 %v5446_v23, 16  ;;  %v5451_v43 = vshll.u32 %v5447_v7, 16 }
 0x531   : > { %v5473_v63 = vshll.u32 %v5469_v33, 16  ;;  %vm5475_vm15 = vc.u32 %v5467_v53, %v5471_v16  ;;  %v5477_v61 = vadd.s32 %v5471_v16, %v5467_v53  ;;  %v5559_v26 = vsel %vm5558_vm13, %v9018_v2, 0 }
 0x532   : > { %v5355_v48 = vand.u32 2147483647, %v5354_v19  ;;  %vm5453_vm2 = vc.u32 %v5445_v14, %v5449_v44  ;;  %v5455_v8 = vadd.s32 %v5449_v44, %v5445_v14  ;;  %v5476_v21 = vsel %vm5475_vm15, 1, %v10213_v58 }
 0x533   : > { %v5454_v32 = vsel %vm5453_vm2, 1, %v10213_v58  ;;  %v5478_v35 = vadd.s32 %v5476_v21, %v5470_v9  ;;  %v5431_v27 = vsel %vm5425_vm11, %v5428_v22, %v5430_v12  ;;  %vm5479_vm7 = vc.u32 %v5477_v61, %v5473_v63 }
 0x534   : > { %v5358_v56 = vmul.f32 %v5357_v51, %v5355_v48  ;;  %v5456_v40 = vadd.s32 %v5454_v32, %v5448_v57  ;;  %vm5457_vm3 = vc.u32 %v5455_v8, %v5451_v43  ;;  %v5472_v13 = vshrl.u32 %v5468_v4, 16 }
 0x535   : > { %v5458_v28 = vsel %vm5457_vm3, 1, %v10213_v58  ;;  %v5480_v50 = vsel %vm5479_vm7, 1, %v10213_v58  ;;  %v5450_v45 = vshrl.u32 %v5446_v23, 16  ;;  %v5561_v20 = vand.u32 31, %v5559_v26 }
 0x536   : > { %v5359_v62 = vxor.u32 2147483648, %v5358_v56  ;;  %v5460_v31 = vadd.s32 %v5458_v28, %v5456_v40  ;;  %v5482_v3 = vadd.s32 %v5480_v50, %v5478_v35  ;;  %v5364_v38 = vsel %vm9066_vm0, 0, %v9062_v54 }
 0x537   : > { %v5452_v2 = vshrl.u32 %v5447_v7, 16  ;;  %v5474_v1 = vshrl.u32 %v5469_v33, 16  ;;  %v9094_v4 = vsub.s32 32, %v5561_v20  ;;  %v9096_v5 = vadd.s32 %v5477_v61, %v5473_v63 }
 0x538   : > { %v5360_v10 = vsel %vm5239_vm9, %v5359_v62, %v5358_v56  ;;  %v5461_v34 = vadd.s32 %v5460_v31, %v5450_v45  ;;  %v5483_v30 = vadd.s32 %v5482_v3, %v5472_v13  ;;  %v5485_v22 = vmul.u32 %v8972_v36, %v5431_v27 }
 0x539   : > { %v5363_v42 = vsel %vm9066_vm0, %v8710_v39, %v5360_v10  ;;  %v9099_v12 = vshrl.u32 %v5559_v26, 5  ;;  %v5564_v33 = vshll.u32 %v10209_v46, %v5561_v20  ;;  %v5565_v24 = vshrl.u32 %v10205_v41, %v9094_v4 }
 0x53a   : > { %v5365_v11 = vmul.f32 %v5363_v42, %v5363_v42  ;;  %v9101_v23 = vadd.s32 %v5461_v34, %v5452_v2  ;;  %v5484_v54 = vadd.s32 %v5483_v30, %v5474_v1  ;;  %v5567_v53 = vshll.u32 %v10205_v41, %v5561_v20 }
 0x53b   : > { %v5568_v9 = vshrl.u32 %v10204_v6, %v9094_v4  ;;  %v5570_v16 = vshll.u32 %v10204_v6, %v5561_v20  ;;  %v5571_v51 = vshrl.u32 %v10197_v15, %v9094_v4  ;;  %v9114_v44 = vor.u32 %v5565_v24, %v5564_v33 }
 0x53c   : > { %v5366_v7 = vmul.f32 -0.001358992, %v5365_v11  ;;  %v5373_v19 = vmul.f32 -0.00019511016, %v5365_v11  ;;  %vm5487_vm1 = vc.u32 %v9101_v23, %v9096_v5  ;;  %v5488_v36 = vadd.s32 1, %v5484_v54 }
 0x53d   : > { %v9116_v48 = vor.u32 %v5568_v9, %v5567_v53  ;;  %v5573_v63 = vshll.u32 %v10197_v15, %v5561_v20  ;;  %v5574_v8 = vshrl.u32 %v10191_v59, %v9094_v4  ;;  %v5576_v21 = vshll.u32 %v10191_v59, %v5561_v20 }
 0x53e   : > { %v5367_v14 = vadd.f32 0.041655596, %v5366_v7  ;;  %v5374_v57 = vadd.f32 0.008332121, %v5373_v19  ;;  %v5489_v43 = vsel %vm5487_vm1, %v5488_v36, %v5484_v54  ;;  %v5577_v35 = vshrl.u32 %v10192_v17, %v9094_v4 }
 0x53f   : > { %v5490_v32 = vadd.s32 %v5489_v43, %v5485_v22  ;;  %v5381_v26 = vadd.s32 3, %v5364_v38  ;;  %v5572_v27 = vor.u32 %v5571_v51, %v5570_v16  ;;  %v5575_v40 = vor.u32 %v5574_v8, %v5573_v63 }
 0x540   : > { %v5368_v61 = vmul.f32 %v5367_v14, %v5365_v11  ;;  %v5375_v56 = vmul.f32 %v5374_v57, %v5365_v11  ;;  %vm5582_vm4 = vcmp.lt.s32.totalorder %v9099_v12, 4  ;;  %v5578_v50 = vor.u32 %v5577_v35, %v5576_v21 }
 0x541   : > { %v5491_v13 = vadd.s32 536870912, %v5490_v32  ;;  %v5555_v45 = vor.u32 8388608, %v8988_v0  ;;  %vm5579_vm8 = vcmp.lt.s32.totalorder %v9099_v12, 1  ;;  %vm5581_vm5 = vcmp.lt.s32.totalorder %v9099_v12, 3 }
 0x542   : > { %v5369_v62 = vadd.f32 -0.4999988, %v5368_v61  ;;  %v5376_v28 = vadd.f32 -0.16666654, %v5375_v56  ;;  %v5588_v31 = vsel %vm5582_vm4, %v5575_v40, 920167782  ;;  %v5587_v38 = vsel %vm5579_vm8, %v9114_v44, %v9116_v48 }
 0x543   : > { %v9130_v10 = vshrl.u32 %v5491_v13, 30  ;;  %v5382_v2 = vand.u32 3, %v5381_v26  ;;  %vm5580_vm9 = vcmp.lt.s32.totalorder %v9099_v12, 2  ;;  %v5589_v0 = vsel %vm5581_vm5, %v5572_v27, %v5588_v31 }
 0x544   : > { %v5370_v3 = vmul.f32 %v5369_v62, %v5365_v11  ;;  %v5377_v20 = vmul.f32 %v5376_v28, %v5365_v11  ;;  %v5592_v1 = vsel %vm5582_vm4, %v5578_v50, 1326507024  ;;  %v5591_v22 = vsel %vm5579_vm8, %v9116_v48, %v5572_v27 }
 0x545   : > { %v5493_v11 = vshll.u32 %v9130_v10, 30  ;;  %v5590_v54 = vsel %vm5580_vm9, %v5587_v38, %v5589_v0  ;;  %v5593_v33 = vsel %vm5581_vm5, %v5575_v40, %v5592_v1  ;;  %v9149_v24 = vshll.u32 %v5555_v45, 8 }
 0x546   : > { %v5371_v34 = vadd.f32 1.0, %v5370_v3  ;;  %v5378_v30 = vadd.f32 1.0, %v5377_v20  ;;  %vm5380_vm10 = vweird.f32 %v8710_v39  ;;  %vm5383_vm6 = vcmp.lt.s32.totalorder %v5382_v2, 2 }
 0x547   : > { %v5494_v53 = vsub.s32 %v5490_v32, %v5493_v11  ;;  %vm5384_vm11 = vcmp.eq.s32.totalorder %v5382_v2, 0  ;;  %v5594_v9 = vsel %vm5580_vm9, %v5591_v22, %v5593_v33  ;;  %v5621_v36 = vshrl.u32 %v5590_v54, 16 }
 0x548   : > { %v5379_v7 = vmul.f32 %v5378_v30, %v5363_v42  ;;  %v5388_v19 = vxor.u32 2147483648, %v5371_v34  ;;  %vm5387_vm14 = vcmp.eq.s32.totalorder %v5382_v2, 2  ;;  %v5596_v14 = vand.u32 65535, %v9149_v24 }
 0x549   : > { %vm5495_vm12 = vcmp.lt.s32.totalorder %v5494_v53, 0  ;;  %v5496_v51 = vsub.s32 0, %v5494_v53  ;;  %v5597_v57 = vshrl.u32 %v9149_v24, 16  ;;  %v5598_v43 = vand.u32 65535, %v5594_v9 }
 0x54a   : > { %v5385_v16 = vxor.u32 2147483648, %v5379_v7  ;;  %v5599_v42 = vshrl.u32 %v5594_v9, 16  ;;  %v5389_v8 = vsel %vm5387_vm14, %v5388_v19, %v5379_v7  ;;  %v5620_v61 = vand.u32 65535, %v5590_v54 }
 0x54b   : > { %v5497_v21 = vsel %vm5495_vm12, %v5496_v51, %v5494_v53  ;;  %v5563_v35 = vshrl.u32 %v10209_v46, %v9094_v4  ;;  %v5623_v26 = vmul.u32 %v5621_v36, %v5596_v14  ;;  %v5602_v28 = vmul.u32 %v5598_v43, %v5597_v57 }
 0x54c   : > { %v5386_v63 = vsel %vm5384_vm11, %v5371_v34, %v5385_v16  ;;  %v5498_v32 = vclz %v5497_v21  ;;  %v5601_v62 = vmul.u32 %v5599_v42, %v5596_v14  ;;  %v5486_v13 = vadd.s32 %v9096_v5, %v9101_v23 }
 0x54d   : > { %v5390_v56 = vsel %vm5383_vm6, %v5386_v63, %v5389_v8  ;;  %v5583_v45 = vsel %vm5579_vm8, %v5563_v35, %v9114_v44  ;;  %v5584_v31 = vsel %vm5582_vm4, %v5572_v27, 2102212464  ;;  %v5600_v3 = vmul.u32 %v5598_v43, %v5596_v14  ;;  %v9173_v43 = vpop.permute.xlu0 %645 }
 0x54e   : > { %v5391_v40 = vsel %vm5380_vm10, nan, %v5390_v56  ;;  %v5928_v50 = vadd.s32 4294967294, %v5498_v32  ;;  %v5604_v4 = vshll.u32 %v5601_v62, 16  ;;  %v5622_v20 = vmul.u32 %v5620_v61, %v5596_v14 }
 0x54f   : > { %5715 = vst [vmem:[%s6771_s17 + $0xe8] sm:$0xff] %v5391_v40  ;;  %v5624_v38 = vmul.u32 %v5620_v61, %v5597_v57  ;;  %v5603_v39 = vmul.u32 %v5599_v42, %v5597_v57  ;;  %v5605_v2 = vshrl.u32 %v5601_v62, 16  ;;  %v5626_v0 = vshll.u32 %v5623_v26, 16 }
 0x550   : > { %vm5929_vm13 = vcmp.lt.s32.totalorder %v5928_v50, 0  ;;  %v5606_v34 = vshll.u32 %v5602_v28, 16  ;;  %vm5608_vm0 = vc.u32 %v5600_v3, %v5604_v4  ;;  %v5610_v5 = vadd.s32 %v5604_v4, %v5600_v3 }
 0x551   : > { %v5501_v1 = vsel %vm5929_vm13, 0, %v5928_v50  ;;  %vm5394_vm15 = vcmp.lt.s32.totalorder %v8898_v52, 0  ;;  %v5609_v30 = vsel %vm5608_vm0, 1, %v10213_v58  ;;  %v5625_v27 = vmul.u32 %v5621_v36, %v5597_v57 }
 0x552   : > { %v5502_v23 = vsub.s32 32, %v5501_v1  ;;  %v5506_v44 = vsub.s32 4294967266, %v5501_v1  ;;  %v5503_v11 = vshll.u32 %v5494_v53, %v5501_v1  ;;  %v5611_v22 = vadd.s32 %v5609_v30, %v5603_v39 }
 0x553   : > { %vm5612_vm2 = vc.u32 %v5610_v5, %v5606_v34  ;;  %vm5630_vm3 = vc.u32 %v5622_v20, %v5626_v0  ;;  %v5628_v16 = vshll.u32 %v5624_v38, 16  ;;  %v5632_v51 = vadd.s32 %v5626_v0, %v5622_v20 }
 0x554   : > { %v5504_v54 = vshrl.u32 %v5486_v13, %v5502_v23  ;;  %v5507_v33 = vadd.s32 127, %v5506_v44  ;;  %v5613_v7 = vsel %vm5612_vm2, 1, %v10213_v58  ;;  %v5631_v19 = vsel %vm5630_vm3, 1, %v10213_v58 }
 0x555   : > { %v5615_v9 = vadd.s32 %v5613_v7, %v5611_v22  ;;  %v5633_v14 = vadd.s32 %v5631_v19, %v5625_v27  ;;  %v5585_v53 = vsel %vm5581_vm5, %v9116_v48, %v5584_v31  ;;  %v621_v36 = vmul.f32 %v6282_v37, %v6442_v47 }
 0x556   : > { %v5505_v42 = vor.u32 %v5504_v54, %v5503_v11  ;;  %v5508_v63 = vshll.u32 %v5507_v33, 23  ;;  %v5516_v57 = vsub.s32 4, %v9130_v10  ;;  %vm5634_vm7 = vc.u32 %v5632_v51, %v5628_v16 }
 0x557   : > { %v5616_v8 = vadd.s32 %v5615_v9, %v5605_v2  ;;  %v622_v21 = vmul.f32 %v6282_v37, %v6444_v49  ;;  %v5607_v56 = vshrl.u32 %v5602_v28, 16  ;;  %v5635_v32 = vsel %vm5634_vm7, 1, %v10213_v58 }
 0x558   : > { %v5509_v61 = vor.u32 4788187, %v5508_v63  ;;  %v9185_v35 = vadd.f32 %v9173_v43, %v621_v36  ;;  %v5512_v40 = vcvt.s32.f32 %v5505_v42  ;;  %v5627_v62 = vshrl.u32 %v5623_v26, 16 }
 0x559   : > { %v5637_v48 = vadd.s32 %v5635_v32, %v5633_v14  ;;  %v9188_v13 = vadd.f32 %v9173_v43, %v622_v21  ;;  %v5617_v31 = vadd.s32 %v5616_v8, %v5607_v56  ;;  %v5517_v28 = vsel %vm5394_vm15, %v5516_v57, %v9130_v10 }
 0x55a   : > { %v5510_v50 = vand.u32 2147483647, %v5509_v61  ;;  %v1309_v3 = vand.u32 2147483647, %v9185_v35  ;;  %v1312_v4 = vand.u32 2139095040, %v9185_v35  ;;  %v5629_v20 = vshrl.u32 %v5624_v38, 16 }
 0x55b   : > { %v5638_v39 = vadd.s32 %v5637_v48, %v5627_v62  ;;  %v5636_v0 = vadd.s32 %v5632_v51, %v5628_v16  ;;  %vm5393_vm1 = vcmp.le.f32.partialorder %v5392_v60, 0.7853982  ;;  %v5586_v34 = vsel %vm5580_vm9, %v5583_v45, %v5585_v53 }
 0x55c   : > { %v5513_v2 = vmul.f32 %v5512_v40, %v5510_v50  ;;  %v1313_v1 = vshrl.u32 %v1312_v4, 23  ;;  %v1316_v26 = vand.u32 8388607, %v1309_v3  ;;  %v1467_v23 = vand.u32 2139095040, %v9188_v13 }
 0x55d   : > { %v5639_v5 = vadd.s32 %v5638_v39, %v5629_v20  ;;  %v5519_v30 = vsel %vm5393_vm1, 0, %v5517_v28  ;;  %vm5642_vm4 = vc.u32 %v5617_v31, %v5636_v0  ;;  %v5640_v22 = vmul.u32 %v9149_v24, %v5586_v34 }
 0x55e   : > { %v5514_v44 = vxor.u32 2147483648, %v5513_v2  ;;  %v5849_v10 = vadd.s32 4294967169, %v1313_v1  ;;  %v1317_v27 = vor.u32 8388608, %v1316_v26  ;;  %v5536_v33 = vadd.s32 3, %v5519_v30 }
 0x55f   : > { %v5643_v38 = vadd.s32 1, %v5639_v5  ;;  %v1468_v45 = vshrl.u32 %v1467_v23, 23  ;;  %v9210_v21 = vadd.s32 %v5636_v0, %v5617_v31  ;;  %v1464_v32 = vand.u32 2147483647, %v9188_v13 }
 0x560   : > { %v5515_v11 = vsel %vm5394_vm15, %v5514_v44, %v5513_v2  ;;  %v1319_v54 = vadd.s32 1, %v5849_v10  ;;  %v9206_v16 = vshll.u32 %v1317_v27, 8  ;;  %v9208_v63 = vand.u32 3, %v5536_v33 }
 0x561   : > { %v5518_v60 = vsel %vm5393_vm1, %v8898_v52, %v5515_v11  ;;  %v5644_v12 = vsel %vm5642_vm4, %v5643_v38, %v5639_v5  ;;  %v5852_v36 = vadd.s32 4294967169, %v1468_v45  ;;  %vm5549_vm5 = vcmp.lt.s32.totalorder %v8958_v29, 0 }
 0x562   : > { %v5520_v7 = vmul.f32 %v5518_v60, %v5518_v60  ;;  %v5645_v19 = vadd.s32 %v5644_v12, %v5640_v22  ;;  %vm1320_vm8 = vcmp.gt.s32.totalorder %v1319_v54, 0  ;;  %v9213_v56 = vand.u32 65535, %v9206_v16 }
 0x563   : > { %v1321_v9 = vsel %vm1320_vm8, %v1319_v54, 0  ;;  %v9218_v50 = vshrl.u32 %v9206_v16, 16  ;;  %vm5542_vm9 = vcmp.eq.s32.totalorder %v9208_v63, 2  ;;  %v9225_v20 = vadd.s32 1, %v5852_v36 }
 0x564   : > { %v5521_v51 = vmul.f32 -0.001358992, %v5520_v7  ;;  %v5528_v14 = vmul.f32 -0.00019511016, %v5520_v7  ;;  %v5646_v42 = vadd.s32 536870912, %v5645_v19  ;;  %v1323_v53 = vand.u32 31, %v1321_v9 }
 0x565   : > { %v9221_v4 = vshrl.u32 %v1321_v9, 5  ;;  %vm5539_vm10 = vcmp.eq.s32.totalorder %v9208_v63, 0  ;;  %vm5538_vm6 = vcmp.lt.s32.totalorder %v9208_v63, 2  ;;  %vm5535_vm14 = vweird.f32 %v8898_v52 }
 0x566   : > { %v5522_v24 = vadd.f32 0.041655596, %v5521_v51  ;;  %v5529_v57 = vadd.f32 0.008332121, %v5528_v14  ;;  %v5647_v8 = vshrl.u32 %v5646_v42, 30  ;;  %v1324_v61 = vsub.s32 32, %v1323_v53 }
 0x567   : > { %v1326_v1 = vshll.u32 %v10209_v46, %v1323_v53  ;;  %v1329_v34 = vshll.u32 %v10205_v41, %v1323_v53  ;;  %v1332_v5 = vshll.u32 %v10204_v6, %v1323_v53  ;;  %v1335_v11 = vshll.u32 %v10197_v15, %v1323_v53 }
 0x568   : > { %v5523_v40 = vmul.f32 %v5522_v24, %v5520_v7  ;;  %v5530_v62 = vmul.f32 %v5529_v57, %v5520_v7  ;;  %v5648_v48 = vshll.u32 %v5647_v8, 30  ;;  %v1327_v31 = vshrl.u32 %v10205_v41, %v1324_v61 }
 0x569   : > { %v1330_v28 = vshrl.u32 %v10204_v6, %v1324_v61  ;;  %v5671_v26 = vsub.s32 4, %v5647_v8  ;;  %v1333_v23 = vshrl.u32 %v10197_v15, %v1324_v61  ;;  %v1336_v22 = vshrl.u32 %v10191_v59, %v1324_v61 }
 0x56a   : > { %v5524_v39 = vadd.f32 -0.4999988, %v5523_v40  ;;  %v5531_v2 = vadd.f32 -0.16666654, %v5530_v62  ;;  %v9227_v0 = vsub.s32 %v5645_v19, %v5648_v48  ;;  %v1328_v38 = vor.u32 %v1327_v31, %v1326_v1 }
 0x56b   : > { %v1331_v27 = vor.u32 %v1330_v28, %v1329_v34  ;;  %v1339_v45 = vshrl.u32 %v10192_v17, %v1324_v61  ;;  %vm9244_vm12 = vcmp.le.f32.partialorder %v5547_v55, 0.7853982  ;;  %v1334_v9 = vor.u32 %v1333_v23, %v1332_v5 }
 0x56c   : > { %v5525_v44 = vmul.f32 %v5524_v39, %v5520_v7  ;;  %v5532_v30 = vmul.f32 %v5531_v2, %v5520_v7  ;;  %vm5650_vm11 = vcmp.lt.s32.totalorder %v9227_v0, 0  ;;  %v5651_v10 = vsub.s32 0, %v9227_v0 }
 0x56d   : > { %v1337_v51 = vor.u32 %v1336_v22, %v1335_v11  ;;  %v1338_v14 = vshll.u32 %v10191_v59, %v1323_v53  ;;  %v1325_v24 = vshrl.u32 %v10209_v46, %v1324_v61  ;;  %vm1341_vm13 = vcmp.lt.s32.totalorder %v9221_v4, 1 }
 0x56e   : > { %v5526_v54 = vadd.f32 1.0, %v5525_v44  ;;  %v5533_v33 = vadd.f32 1.0, %v5532_v30  ;;  %v5652_v12 = vsel %vm5650_vm11, %v5651_v10, %v9227_v0  ;;  %v5672_v40 = vsel %vm5549_vm5, %v5671_v26, %v5647_v8 }
 0x56f   : > { %v5653_v19 = vclz %v5652_v12  ;;  %v1340_v62 = vor.u32 %v1339_v45, %v1338_v14  ;;  %vm1342_vm0 = vcmp.lt.s32.totalorder %v9221_v4, 2  ;;  %vm1343_vm15 = vcmp.lt.s32.totalorder %v9221_v4, 3 }
 0x570   : > { %v5534_v42 = vmul.f32 %v5533_v33, %v5518_v60  ;;  %v5543_v36 = vxor.u32 2147483648, %v5526_v54  ;;  %vm1344_vm2 = vcmp.lt.s32.totalorder %v9221_v4, 4  ;;  %v1349_v53 = vsel %vm1341_vm13, %v1328_v38, %v1331_v27 }
 0x571   : > { %v5931_v57 = vadd.s32 4294967294, %v5653_v19  ;;  %v1346_v60 = vsel %vm1344_vm2, %v1334_v9, 2102212464  ;;  %v1350_v8 = vsel %vm1344_vm2, %v1337_v51, 920167782  ;;  %v1345_v28 = vsel %vm1341_vm13, %v1325_v24, %v1328_v38 }
 0x572   : > { %v5540_v55 = vxor.u32 2147483648, %v5534_v42  ;;  %v5544_v48 = vsel %vm5542_vm9, %v5543_v36, %v5534_v42  ;;  %v1351_v39 = vsel %vm1343_vm15, %v1334_v9, %v1350_v8  ;;  %v1347_v34 = vsel %vm1343_vm15, %v1331_v27, %v1346_v60 }
 0x573   : > { %vm5932_vm3 = vcmp.lt.s32.totalorder %v5931_v57, 0  ;;  %v1352_v44 = vsel %vm1342_vm0, %v1349_v53, %v1351_v39  ;;  %v1353_v30 = vsel %vm1341_vm13, %v1331_v27, %v1334_v9  ;;  %v1354_v38 = vsel %vm1344_vm2, %v1340_v62, 1326507024 }
 0x574   : > { %v5541_v61 = vsel %vm5539_vm10, %v5526_v54, %v5540_v55  ;;  %v5656_v31 = vsel %vm5932_vm3, 0, %v5931_v57  ;;  %v1382_v11 = vand.u32 65535, %v1352_v44  ;;  %v5674_v52 = vsel %vm9244_vm12, 0, %v5672_v40 }
 0x575   : > { %v5545_v2 = vsel %vm5538_vm6, %v5541_v61, %v5544_v48  ;;  %v5657_v1 = vsub.s32 32, %v5656_v31  ;;  %v5661_v26 = vsub.s32 4294967266, %v5656_v31  ;;  %v5658_v23 = vshll.u32 %v9227_v0, %v5656_v31 }
 0x576   : > { %v5546_v5 = vsel %vm5535_vm14, nan, %v5545_v2  ;;  %v9289_v0 = vsel %vm1342_vm0, %v1345_v28, %v1347_v34  ;;  %v1355_v22 = vsel %vm1343_vm15, %v1337_v51, %v1354_v38  ;;  %v1383_v54 = vshrl.u32 %v1352_v44, 16 }
 0x577   : > { %v5659_v10 = vshrl.u32 %v9210_v21, %v5657_v1  ;;  %v5662_v63 = vadd.s32 127, %v5661_v26  ;;  %5716 = vst [vmem:[%s6771_s17 + $0xf0] sm:$0xff] %v5546_v5  ;;  %v1356_v21 = vsel %vm1342_vm0, %v1353_v30, %v1355_v22  ;;  %vm1475_vm7 = vcmp.gt.s32.totalorder %v9225_v20, 0 }
 0x578   : > { %v1360_v12 = vand.u32 65535, %v1356_v21  ;;  %v1361_v45 = vshrl.u32 %v1356_v21, 16  ;;  %v1385_v19 = vmul.u32 %v1383_v54, %v9213_v56  ;;  %v1386_v9 = vmul.u32 %v1382_v11, %v9218_v50 }
 0x579   : > { %v5660_v27 = vor.u32 %v5659_v10, %v5658_v23  ;;  %v5663_v33 = vshll.u32 %v5662_v63, 23  ;;  %v9298_v42 = vadd.s32 3, %v5674_v52  ;;  %v1402_v51 = vmul.u32 %v9206_v16, %v9289_v0 }
 0x57a   : > { %v9304_v36 = vand.u32 8388607, %v1464_v32  ;;  %v1363_v4 = vmul.u32 %v1361_v45, %v9213_v56  ;;  %v1364_v24 = vmul.u32 %v1360_v12, %v9218_v50  ;;  %v1384_v57 = vmul.u32 %v1382_v11, %v9213_v56 }
 0x57b   : > { %v5664_v14 = vor.u32 4788187, %v5663_v33  ;;  %v1476_v40 = vsel %vm1475_vm7, %v9225_v20, 0  ;;  %v5667_v55 = vcvt.s32.f32 %v5660_v27  ;;  %v1387_v48 = vmul.u32 %v1383_v54, %v9218_v50 }
 0x57c   : > { %v1388_v60 = vshll.u32 %v1385_v19, 16  ;;  %v1362_v53 = vmul.u32 %v1360_v12, %v9213_v56  ;;  %v1365_v8 = vmul.u32 %v1361_v45, %v9218_v50  ;;  %v1366_v61 = vshll.u32 %v1363_v4, 16 }
 0x57d   : > { %v5665_v62 = vand.u32 2147483647, %v5664_v14  ;;  %v1390_v31 = vshll.u32 %v1386_v9, 16  ;;  %v1368_v39 = vshll.u32 %v1364_v24, 16  ;;  %v1478_v20 = vand.u32 31, %v1476_v40 }
 0x57e   : > { %vm1392_vm1 = vc.u32 %v1384_v57, %v1388_v60  ;;  %v1394_v2 = vadd.s32 %v1388_v60, %v1384_v57  ;;  %vm1370_vm4 = vc.u32 %v1362_v53, %v1366_v61  ;;  %v1372_v1 = vadd.s32 %v1366_v61, %v1362_v53 }
 0x57f   : > { %v5668_v28 = vmul.f32 %v5667_v55, %v5665_v62  ;;  %v1393_v26 = vsel %vm1392_vm1, 1, %v10213_v58  ;;  %v1371_v5 = vsel %vm1370_vm4, 1, %v10213_v58  ;;  %v1389_v56 = vshrl.u32 %v1385_v19, 16 }
 0x580   : > { %v1395_v23 = vadd.s32 %v1393_v26, %v1387_v48  ;;  %vm1396_vm8 = vc.u32 %v1394_v2, %v1390_v31  ;;  %v1373_v44 = vadd.s32 %v1371_v5, %v1365_v8  ;;  %vm1374_vm9 = vc.u32 %v1372_v1, %v1368_v39 }
 0x581   : > { %v5669_v34 = vxor.u32 2147483648, %v5668_v28  ;;  %v1397_v50 = vsel %vm1396_vm8, 1, %v10213_v58  ;;  %v1375_v10 = vsel %vm1374_vm9, 1, %v10213_v58  ;;  %v9319_v38 = vsub.s32 32, %v1478_v20 }
 0x582   : > { %v1399_v63 = vadd.s32 %v1397_v50, %v1395_v23  ;;  %v1367_v52 = vshrl.u32 %v1363_v4, 16  ;;  %v1377_v22 = vadd.s32 %v1375_v10, %v1373_v44  ;;  %v9324_v54 = vshrl.u32 %v1476_v40, 5 }
 0x583   : > { %v5670_v30 = vsel %vm5549_vm5, %v5669_v34, %v5668_v28  ;;  %v1369_v33 = vshrl.u32 %v1364_v24, 16  ;;  %v1391_v21 = vshrl.u32 %v1386_v9, 16  ;;  %v9326_v19 = vadd.s32 %v1394_v2, %v1390_v31 }
 0x584   : > { %v5673_v11 = vsel %vm9244_vm12, %v8958_v29, %v5670_v30  ;;  %v1400_v12 = vadd.s32 %v1399_v63, %v1389_v56  ;;  %v1378_v45 = vadd.s32 %v1377_v22, %v1367_v52  ;;  %v1481_v14 = vshll.u32 %v10209_v46, %v1478_v20 }
 0x585   : > { %v5675_v27 = vmul.f32 %v5673_v11, %v5673_v11  ;;  %v1484_v57 = vshll.u32 %v10205_v41, %v1478_v20  ;;  %v1482_v7 = vshrl.u32 %v10205_v41, %v9319_v38  ;;  %v1485_v24 = vshrl.u32 %v10204_v6, %v9319_v38 }
 0x586   : > { %v1401_v48 = vadd.s32 %v1400_v12, %v1391_v21  ;;  %v9332_v4 = vadd.s32 %v1378_v45, %v1369_v33  ;;  %v1488_v9 = vshrl.u32 %v10197_v15, %v9319_v38  ;;  %v1490_v40 = vshll.u32 %v10197_v15, %v1478_v20 }
 0x587   : > { %v5676_v62 = vmul.f32 -0.001358992, %v5675_v27  ;;  %v5683_v55 = vmul.f32 -0.00019511016, %v5675_v27  ;;  %v1491_v61 = vshrl.u32 %v10191_v59, %v9319_v38  ;;  %v1487_v31 = vshll.u32 %v10204_v6, %v1478_v20 }
 0x588   : > { %v1405_v8 = vadd.s32 1, %v1401_v48  ;;  %vm1404_vm5 = vc.u32 %v9332_v4, %v9326_v19  ;;  %v1493_v28 = vshll.u32 %v10191_v59, %v1478_v20  ;;  %v1494_v39 = vshrl.u32 %v10192_v17, %v9319_v38 }
 0x589   : > { %v5677_v60 = vadd.f32 0.041655596, %v5676_v62  ;;  %v5684_v53 = vadd.f32 0.008332121, %v5683_v55  ;;  %v1492_v34 = vor.u32 %v1491_v61, %v1490_v40  ;;  %v9350_v23 = vor.u32 %v1482_v7, %v1481_v14 }
 0x58a   : > { %v1406_v26 = vsel %vm1404_vm5, %v1405_v8, %v1401_v48  ;;  %v9352_v44 = vor.u32 %v1485_v24, %v1484_v57  ;;  %v9354_v56 = vor.u32 %v1488_v9, %v1487_v31  ;;  %v1495_v20 = vor.u32 %v1494_v39, %v1493_v28 }
 0x58b   : > { %v5678_v2 = vmul.f32 %v5677_v60, %v5675_v27  ;;  %v5685_v1 = vmul.f32 %v5684_v53, %v5675_v27  ;;  %v1407_v5 = vadd.s32 %v1406_v26, %v1402_v51  ;;  %v5692_v10 = vand.u32 3, %v9298_v42 }
 0x58c   : > { %v1472_v52 = vor.u32 8388608, %v9304_v36  ;;  %vm1499_vm10 = vcmp.lt.s32.totalorder %v9324_v54, 4  ;;  %vm1496_vm6 = vcmp.lt.s32.totalorder %v9324_v54, 1  ;;  %vm1498_vm11 = vcmp.lt.s32.totalorder %v9324_v54, 3 }
 0x58d   : > { %v5679_v50 = vadd.f32 -0.4999988, %v5678_v2  ;;  %v5686_v30 = vadd.f32 -0.16666654, %v5685_v1  ;;  %v1408_v63 = vadd.s32 536870912, %v1407_v5  ;;  %v1504_v42 = vsel %vm1496_vm6, %v9350_v23, %v9352_v44 }
 0x58e   : > { %v1505_v16 = vsel %vm1499_vm10, %v1492_v34, 920167782  ;;  %v1508_v51 = vsel %vm1496_vm6, %v9352_v44, %v9354_v56  ;;  %v1509_v12 = vsel %vm1499_vm10, %v1495_v20, 1326507024  ;;  %vm1497_vm14 = vcmp.lt.s32.totalorder %v9324_v54, 2 }
 0x58f   : > { %v5680_v22 = vmul.f32 %v5679_v50, %v5675_v27  ;;  %v5687_v33 = vmul.f32 %v5686_v30, %v5675_v27  ;;  %v9362_v0 = vshrl.u32 %v1408_v63, 30  ;;  %v1506_v21 = vsel %vm1498_vm11, %v9354_v56, %v1505_v16 }
 0x590   : > { %v1510_v14 = vsel %vm1498_vm11, %v1492_v34, %v1509_v12  ;;  %v9382_v57 = vshll.u32 %v1472_v52, 8  ;;  %vm5690_vm12 = vweird.f32 %v8958_v29  ;;  %vm5693_vm13 = vcmp.lt.s32.totalorder %v5692_v10, 2 }
 0x591   : > { %v5681_v36 = vadd.f32 1.0, %v5680_v22  ;;  %v5688_v27 = vadd.f32 1.0, %v5687_v33  ;;  %v1410_v45 = vshll.u32 %v9362_v0, 30  ;;  %v1511_v48 = vsel %vm1497_vm14, %v1508_v51, %v1510_v14 }
 0x592   : > { %vm5694_vm0 = vcmp.eq.s32.totalorder %v5692_v10, 0  ;;  %v1507_v24 = vsel %vm1497_vm14, %v1504_v42, %v1506_v21  ;;  %vm5697_vm15 = vcmp.eq.s32.totalorder %v5692_v10, 2  ;;  %v1514_v40 = vshrl.u32 %v9382_v57, 16 }
 0x593   : > { %v5689_v62 = vmul.f32 %v5688_v27, %v5673_v11  ;;  %v5698_v55 = vxor.u32 2147483648, %v5681_v36  ;;  %v1411_v7 = vsub.s32 %v1407_v5, %v1410_v45  ;;  %v1515_v60 = vand.u32 65535, %v1511_v48 }
 0x594   : > { %v1513_v53 = vand.u32 65535, %v9382_v57  ;;  %v1516_v8 = vshrl.u32 %v1511_v48, 16  ;;  %v1537_v39 = vand.u32 65535, %v1507_v24  ;;  %v1538_v34 = vshrl.u32 %v1507_v24, 16 }
 0x595   : > { %v5695_v9 = vxor.u32 2147483648, %v5689_v62  ;;  %vm1412_vm2 = vcmp.lt.s32.totalorder %v1411_v7, 0  ;;  %v1413_v11 = vsub.s32 0, %v1411_v7  ;;  %v5699_v31 = vsel %vm5697_vm15, %v5698_v55, %v5689_v62 }
 0x596   : > { %v1519_v28 = vmul.u32 %v1515_v60, %v1514_v40  ;;  %v1518_v26 = vmul.u32 %v1516_v8, %v1513_v53  ;;  %v3194_v30 = vmul.f32 %v7675_v18, %v6282_v37  ;;  %v1517_v20 = vmul.u32 %v1515_v60, %v1513_v53 }
 0x597   : > { %v5696_v61 = vsel %vm5694_vm0, %v5681_v36, %v5695_v9  ;;  %v1414_v1 = vsel %vm1412_vm2, %v1413_v11, %v1411_v7  ;;  %v9399_v52 = vmul.f32 %v7774_v25, %v6282_v37  ;;  %v1520_v10 = vmul.u32 %v1516_v8, %v1514_v40 }
 0x598   : > { %v5700_v2 = vsel %vm5693_vm13, %v5696_v61, %v5699_v31  ;;  %v1415_v50 = vclz %v1414_v1  ;;  %v1521_v63 = vshll.u32 %v1518_v26, 16  ;;  %v1523_v33 = vshll.u32 %v1519_v28, 16 }
 0x599   : > { %v5701_v5 = vsel %vm5690_vm12, nan, %v5700_v2  ;;  %v1540_v42 = vmul.u32 %v1538_v34, %v1513_v53  ;;  %v1541_v51 = vmul.u32 %v1537_v39, %v1514_v40  ;;  %v1403_v29 = vadd.s32 %v9326_v19, %v9332_v4 }
 0x59a   : > { %5717 = vst [vmem:[%s6771_s17 + $0xf8] sm:$0xff] %v5701_v5  ;;  %v5850_v22 = vadd.s32 4294967294, %v1415_v50  ;;  %vm1525_vm3 = vc.u32 %v1517_v20, %v1521_v63  ;;  %v1527_v16 = vadd.s32 %v1521_v63, %v1517_v20  ;;  %v1522_v36 = vshrl.u32 %v1518_v26, 16 }
 0x59b   : > { %v1526_v27 = vsel %vm1525_vm3, 1, %v10213_v58  ;;  %v1543_v45 = vshll.u32 %v1540_v42, 16  ;;  %v1539_v55 = vmul.u32 %v1537_v39, %v1513_v53  ;;  %v1542_v9 = vmul.u32 %v1538_v34, %v1514_v40 }
 0x59c   : > { %vm5851_vm7 = vcmp.lt.s32.totalorder %v5850_v22, 0  ;;  %v1528_v12 = vadd.s32 %v1526_v27, %v1520_v10  ;;  %vm1529_vm1 = vc.u32 %v1527_v16, %v1523_v33  ;;  %v1545_v60 = vshll.u32 %v1541_v51, 16 }
 0x59d   : > { %v1418_v21 = vsel %vm5851_vm7, 0, %v5850_v22  ;;  %v1530_v62 = vsel %vm1529_vm1, 1, %v10213_v58  ;;  %vm1547_vm4 = vc.u32 %v1539_v55, %v1543_v45  ;;  %v1549_v19 = vadd.s32 %v1543_v45, %v1539_v55 }
 0x59e   : > { %v1419_v37 = vsub.s32 32, %v1418_v21  ;;  %v1423_v14 = vsub.s32 4294967266, %v1418_v21  ;;  %v1420_v48 = vshll.u32 %v1411_v7, %v1418_v21  ;;  %v1532_v24 = vadd.s32 %v1530_v62, %v1528_v12 }
 0x59f   : > { %v1501_v4 = vsel %vm1499_vm10, %v9354_v56, 2102212464  ;;  %v1548_v31 = vsel %vm1547_vm4, 1, %v10213_v58  ;;  %v9410_v2 = vadd.f32 %v3194_v30, %v9173_v43  ;;  %vm1551_vm8 = vc.u32 %v1549_v19, %v1545_v60 }
 0x5a0   : > { %v1421_v11 = vshrl.u32 %v1403_v29, %v1419_v37  ;;  %v1424_v8 = vadd.s32 127, %v1423_v14  ;;  %v1533_v61 = vadd.s32 %v1532_v24, %v1522_v36  ;;  %v1550_v7 = vadd.s32 %v1548_v31, %v1542_v9 }
 0x5a1   : > { %v1433_v40 = vsub.s32 4, %v9362_v0  ;;  %v1480_v39 = vshrl.u32 %v10209_v46, %v9319_v38  ;;  %v1524_v26 = vshrl.u32 %v1519_v28, 16  ;;  %v1552_v34 = vsel %vm1551_vm8, 1, %v10213_v58 }
 0x5a2   : > { %v1422_v1 = vor.u32 %v1421_v11, %v1420_v48  ;;  %v1425_v53 = vshll.u32 %v1424_v8, 23  ;;  %v1544_v56 = vshrl.u32 %v1540_v42, 16  ;;  %v1554_v50 = vadd.s32 %v1552_v34, %v1550_v7 }
 0x5a3   : > { %v3842_v20 = vand.u32 2147483647, %v9410_v2  ;;  %v1500_v30 = vsel %vm1496_vm6, %v1480_v39, %v9350_v23  ;;  %v1502_v63 = vsel %vm1498_vm11, %v9352_v44, %v1501_v4  ;;  %v1534_v22 = vadd.s32 %v1533_v61, %v1524_v26 }
 0x5a4   : > { %v1426_v5 = vor.u32 4788187, %v1425_v53  ;;  %v3845_v10 = vand.u32 2139095040, %v9410_v2  ;;  %v1429_v28 = vcvt.s32.f32 %v1422_v1  ;;  %v1546_v33 = vshrl.u32 %v1541_v51, 16 }
 0x5a5   : > { %v1555_v16 = vadd.s32 %v1554_v50, %v1544_v56  ;;  %vm1311_vm9 = vcmp.lt.s32.totalorder %v9185_v35, 0  ;;  %v1553_v42 = vadd.s32 %v1549_v19, %v1545_v60  ;;  %v3849_v36 = vand.u32 8388607, %v3842_v20 }
 0x5a6   : > { %v1427_v38 = vand.u32 2147483647, %v1426_v5  ;;  %v3846_v29 = vshrl.u32 %v3845_v10, 23  ;;  %v1434_v23 = vsel %vm1311_vm9, %v1433_v40, %v9362_v0  ;;  %v1503_v44 = vsel %vm1497_vm14, %v1500_v30, %v1502_v63 }
 0x5a7   : > { %v1556_v21 = vadd.s32 %v1555_v16, %v1546_v33  ;;  %vm1559_vm5 = vc.u32 %v1534_v22, %v1553_v42  ;;  %vm1310_vm10 = vcmp.le.f32.partialorder %v1309_v3, 0.7853982  ;;  %v9436_v37 = vadd.f32 %v9399_v52, %v9173_v43 }
 0x5a8   : > { %v1430_v27 = vmul.f32 %v1429_v28, %v1427_v38  ;;  %v5897_v12 = vadd.s32 4294967169, %v3846_v29  ;;  %v1436_v14 = vsel %vm1310_vm10, 0, %v1434_v23  ;;  %v1557_v62 = vmul.u32 %v9382_v57, %v1503_v44 }
 0x5a9   : > { %v1560_v45 = vadd.s32 1, %v1556_v21  ;;  %v3850_v55 = vor.u32 8388608, %v3849_v36  ;;  %v1453_v60 = vadd.s32 3, %v1436_v14  ;;  %v3997_v8 = vand.u32 2147483647, %v9436_v37 }
 0x5aa   : > { %v1431_v51 = vxor.u32 2147483648, %v1430_v27  ;;  %v3852_v0 = vadd.s32 1, %v5897_v12  ;;  %v4000_v57 = vand.u32 2139095040, %v9436_v37  ;;  %v9448_v39 = vadd.s32 %v1553_v42, %v1534_v22 }
 0x5ab   : > { %v1561_v48 = vsel %vm1559_vm5, %v1560_v45, %v1556_v21  ;;  %v9443_v19 = vshll.u32 %v3850_v55, 8  ;;  %v9446_v40 = vand.u32 3, %v1453_v60  ;;  %v9455_v56 = vand.u32 8388607, %v3997_v8 }
 0x5ac   : > { %v1432_v54 = vsel %vm1311_vm9, %v1431_v51, %v1430_v27  ;;  %v1562_v9 = vadd.s32 %v1561_v48, %v1557_v62  ;;  %vm3853_vm6 = vcmp.gt.s32.totalorder %v3852_v0, 0  ;;  %v4001_v5 = vshrl.u32 %v4000_v57, 23 }
 0x5ad   : > { %v1435_v24 = vsel %vm1310_vm10, %v9185_v35, %v1432_v54  ;;  %v3854_v11 = vsel %vm3853_vm6, %v3852_v0, 0  ;;  %v9451_v34 = vand.u32 65535, %v9443_v19  ;;  %vm1466_vm11 = vcmp.lt.s32.totalorder %v9188_v13, 0 }
 0x5ae   : > { %v1437_v3 = vmul.f32 %v1435_v24, %v1435_v24  ;;  %v1563_v43 = vadd.s32 536870912, %v1562_v9  ;;  %v3856_v52 = vand.u32 31, %v3854_v11  ;;  %v9458_v63 = vshrl.u32 %v3854_v11, 5 }
 0x5af   : > { %v9461_v10 = vshrl.u32 %v9443_v19, 16  ;;  %vm1456_vm14 = vcmp.eq.s32.totalorder %v9446_v40, 0  ;;  %vm1459_vm12 = vcmp.eq.s32.totalorder %v9446_v40, 2  ;;  %vm1455_vm0 = vcmp.lt.s32.totalorder %v9446_v40, 2 }
 0x5b0   : > { %v1438_v4 = vmul.f32 -0.001358992, %v1437_v3  ;;  %v1445_v61 = vmul.f32 -0.00019511016, %v1437_v3  ;;  %v1564_v31 = vshrl.u32 %v1563_v43, 30  ;;  %v3857_v1 = vsub.s32 32, %v3856_v52 }
 0x5b1   : > { %v3859_v38 = vshll.u32 %v10209_v46, %v3856_v52  ;;  %v3862_v33 = vshll.u32 %v10205_v41, %v3856_v52  ;;  %v3865_v36 = vshll.u32 %v10204_v6, %v3856_v52  ;;  %v3868_v45 = vshll.u32 %v10197_v15, %v3856_v52 }
 0x5b2   : > { %v1439_v53 = vadd.f32 0.041655596, %v1438_v4  ;;  %v1446_v7 = vadd.f32 0.008332121, %v1445_v61  ;;  %v1565_v26 = vshll.u32 %v1564_v31, 30  ;;  %v3860_v28 = vshrl.u32 %v10205_v41, %v3857_v1 }
 0x5b3   : > { %v3863_v29 = vshrl.u32 %v10204_v6, %v3857_v1  ;;  %v3866_v23 = vshrl.u32 %v10197_v15, %v3857_v1  ;;  %v3869_v44 = vshrl.u32 %v10191_v59, %v3857_v1  ;;  %v1588_v51 = vsub.s32 4, %v1564_v31 }
 0x5b4   : > { %v1440_v50 = vmul.f32 %v1439_v53, %v1437_v3  ;;  %v1447_v30 = vmul.f32 %v1446_v7, %v1437_v3  ;;  %v9463_v22 = vsub.s32 %v1562_v9, %v1565_v26  ;;  %vm1452_vm15 = vweird.f32 %v9185_v35 }
 0x5b5   : > { %v3861_v62 = vor.u32 %v3860_v28, %v3859_v38  ;;  %v3871_v55 = vshll.u32 %v10191_v59, %v3856_v52  ;;  %v3872_v0 = vshrl.u32 %v10192_v17, %v3857_v1  ;;  %v3864_v60 = vor.u32 %v3863_v29, %v3862_v33 }
 0x5b6   : > { %v1441_v16 = vadd.f32 -0.4999988, %v1440_v50  ;;  %v1448_v42 = vadd.f32 -0.16666654, %v1447_v30  ;;  %vm1567_vm13 = vcmp.lt.s32.totalorder %v9463_v22, 0  ;;  %v1568_v27 = vsub.s32 0, %v9463_v22 }
 0x5b7   : > { %v3867_v11 = vor.u32 %v3866_v23, %v3865_v36  ;;  %v3873_v43 = vor.u32 %v3872_v0, %v3871_v55  ;;  %v5900_v57 = vadd.s32 4294967169, %v4001_v5  ;;  %vm9484_vm2 = vcmp.le.f32.partialorder %v1464_v32, 0.7853982 }
 0x5b8   : > { %v1442_v21 = vmul.f32 %v1441_v16, %v1437_v3  ;;  %v1449_v12 = vmul.f32 %v1448_v42, %v1437_v3  ;;  %v1569_v14 = vsel %vm1567_vm13, %v1568_v27, %v9463_v22  ;;  %v3870_v3 = vor.u32 %v3869_v44, %v3868_v45 }
 0x5b9   : > { %v1570_v9 = vclz %v1569_v14  ;;  %v3858_v52 = vshrl.u32 %v10209_v46, %v3857_v1  ;;  %v9491_v26 = vsel %vm1466_vm11, %v1588_v51, %v1564_v31  ;;  %vm3874_vm3 = vcmp.lt.s32.totalorder %v9458_v63, 1 }
 0x5ba   : > { %v1443_v54 = vadd.f32 1.0, %v1442_v21  ;;  %v1450_v48 = vadd.f32 1.0, %v1449_v12  ;;  %vm3875_vm7 = vcmp.lt.s32.totalorder %v9458_v63, 2  ;;  %vm3876_vm1 = vcmp.lt.s32.totalorder %v9458_v63, 3 }
 0x5bb   : > { %v5853_v7 = vadd.s32 4294967294, %v1570_v9  ;;  %vm3877_vm8 = vcmp.lt.s32.totalorder %v9458_v63, 4  ;;  %v3882_v32 = vsel %vm3874_vm3, %v3861_v62, %v3864_v60  ;;  %v3886_v31 = vsel %vm3874_vm3, %v3864_v60, %v3867_v11 }
 0x5bc   : > { %v1451_v4 = vmul.f32 %v1450_v48, %v1435_v24  ;;  %v1460_v61 = vxor.u32 2147483648, %v1443_v54  ;;  %v3883_v1 = vsel %vm3877_vm8, %v3870_v3, 920167782  ;;  %v3887_v50 = vsel %vm3877_vm8, %v3873_v43, 1326507024 }
 0x5bd   : > { %vm5854_vm4 = vcmp.lt.s32.totalorder %v5853_v7, 0  ;;  %v3884_v29 = vsel %vm3876_vm1, %v3867_v11, %v3883_v1  ;;  %v3888_v36 = vsel %vm3876_vm1, %v3870_v3, %v3887_v50  ;;  %v3879_v40 = vsel %vm3877_vm8, %v3867_v11, 2102212464 }
 0x5be   : > { %v1457_v24 = vxor.u32 2147483648, %v1451_v4  ;;  %v1573_v5 = vsel %vm5854_vm4, 0, %v5853_v7  ;;  %v1461_v38 = vsel %vm1459_vm12, %v1460_v61, %v1451_v4  ;;  %v3885_v21 = vsel %vm3875_vm7, %v3882_v32, %v3884_v29 }
 0x5bf   : > { %v1574_v28 = vsub.s32 32, %v1573_v5  ;;  %v1578_v33 = vsub.s32 4294967266, %v1573_v5  ;;  %v1575_v42 = vshll.u32 %v9463_v22, %v1573_v5  ;;  %v3889_v22 = vsel %vm3875_vm7, %v3886_v31, %v3888_v36 }
 0x5c0   : > { %v1458_v30 = vsel %vm1456_vm14, %v1443_v54, %v1457_v24  ;;  %v3915_v12 = vand.u32 65535, %v3885_v21  ;;  %v3916_v51 = vshrl.u32 %v3885_v21, 16  ;;  %v3893_v55 = vand.u32 65535, %v3889_v22 }
 0x5c1   : > { %v1462_v16 = vsel %vm1455_vm0, %v1458_v30, %v1461_v38  ;;  %v1576_v23 = vshrl.u32 %v9448_v39, %v1574_v28  ;;  %v1579_v44 = vadd.s32 127, %v1578_v33  ;;  %v3894_v35 = vshrl.u32 %v3889_v22, 16 }
 0x5c2   : > { %v1463_v27 = vsel %vm1452_vm15, nan, %v1462_v16  ;;  %v1591_v39 = vsel %vm9484_vm2, 0, %v9491_v26  ;;  %v3918_v0 = vmul.u32 %v3916_v51, %v9451_v34  ;;  %v3919_v54 = vmul.u32 %v3915_v12, %v9461_v10 }
 0x5c3   : > { %3173 = vst [vmem:[%s6771_s17 + $0x20] sm:$0xff] %v1463_v27  ;;  %v1577_v45 = vor.u32 %v1576_v23, %v1575_v42  ;;  %v1580_v14 = vshll.u32 %v1579_v44, 23  ;;  %v4007_v48 = vadd.s32 1, %v5900_v57  ;;  %v3878_v11 = vsel %vm3874_vm3, %v3858_v52, %v3861_v62 }
 0x5c4   : > { %v3880_v3 = vsel %vm3876_vm1, %v3864_v60, %v3879_v40  ;;  %v3896_v43 = vmul.u32 %v3894_v35, %v9451_v34  ;;  %v3897_v4 = vmul.u32 %v3893_v55, %v9461_v10  ;;  %v3917_v61 = vmul.u32 %v3915_v12, %v9451_v34 }
 0x5c5   : > { %v1581_v9 = vor.u32 4788187, %v1580_v14  ;;  %v3920_v7 = vmul.u32 %v3916_v51, %v9461_v10  ;;  %v3921_v26 = vshll.u32 %v3918_v0, 16  ;;  %v1584_v32 = vcvt.s32.f32 %v1577_v45 }
 0x5c6   : > { %v3895_v57 = vmul.u32 %v3893_v55, %v9451_v34  ;;  %v3899_v5 = vshll.u32 %v3896_v43, 16  ;;  %v3898_v1 = vmul.u32 %v3894_v35, %v9461_v10  ;;  %v3901_v62 = vshll.u32 %v3897_v4, 16 }
 0x5c7   : > { %v1582_v24 = vand.u32 2147483647, %v1581_v9  ;;  %v3923_v52 = vshll.u32 %v3919_v54, 16  ;;  %vm3925_vm9 = vc.u32 %v3917_v61, %v3921_v26  ;;  %v3927_v38 = vadd.s32 %v3921_v26, %v3917_v61 }
 0x5c8   : > { %vm3903_vm5 = vc.u32 %v3895_v57, %v3899_v5  ;;  %v3905_v31 = vadd.s32 %v3899_v5, %v3895_v57  ;;  %v3926_v50 = vsel %vm3925_vm9, 1, %v10213_v58  ;;  %vm4008_vm10 = vcmp.gt.s32.totalorder %v4007_v48, 0 }
 0x5c9   : > { %v1585_v60 = vmul.f32 %v1584_v32, %v1582_v24  ;;  %v3904_v30 = vsel %vm3903_vm5, 1, %v10213_v58  ;;  %v3928_v28 = vadd.s32 %v3926_v50, %v3920_v7  ;;  %v4009_v34 = vsel %vm4008_vm10, %v4007_v48, 0 }
 0x5ca   : > { %v3906_v16 = vadd.s32 %v3904_v30, %v3898_v1  ;;  %vm3907_vm6 = vc.u32 %v3905_v31, %v3901_v62  ;;  %v3881_v10 = vsel %vm3875_vm7, %v3878_v11, %v3880_v3  ;;  %v3900_v42 = vshrl.u32 %v3896_v43, 16 }
 0x5cb   : > { %v1586_v33 = vxor.u32 2147483648, %v1585_v60  ;;  %v3908_v29 = vsel %vm3907_vm6, 1, %v10213_v58  ;;  %vm3929_vm14 = vc.u32 %v3927_v38, %v3923_v52  ;;  %v4011_v44 = vand.u32 31, %v4009_v34 }
 0x5cc   : > { %v3910_v27 = vadd.s32 %v3908_v29, %v3906_v16  ;;  %v3930_v23 = vsel %vm3929_vm14, 1, %v10213_v58  ;;  %v1608_v40 = vadd.s32 3, %v1591_v39  ;;  %v3922_v22 = vshrl.u32 %v3918_v0, 16 }
 0x5cd   : > { %v1587_v36 = vsel %vm1466_vm11, %v1586_v33, %v1585_v60  ;;  %v3932_v12 = vadd.s32 %v3930_v23, %v3928_v28  ;;  %v3902_v51 = vshrl.u32 %v3897_v4, 16  ;;  %v9552_v14 = vsub.s32 32, %v4011_v44 }
 0x5ce   : > { %v1590_v21 = vsel %vm9484_vm2, %v9188_v13, %v1587_v36  ;;  %v3911_v45 = vadd.s32 %v3910_v27, %v3900_v42  ;;  %v3924_v55 = vshrl.u32 %v3919_v54, 16  ;;  %v9554_v35 = vadd.s32 %v3927_v38, %v3923_v52 }
 0x5cf   : > { %v1592_v63 = vmul.f32 %v1590_v21, %v1590_v21  ;;  %v3933_v48 = vadd.s32 %v3932_v12, %v3922_v22  ;;  %v3935_v9 = vmul.u32 %v9443_v19, %v3881_v10  ;;  %v9559_v53 = vshrl.u32 %v4009_v34, 5 }
 0x5d0   : > { %v9557_v43 = vadd.s32 %v3911_v45, %v3902_v51  ;;  %v4014_v0 = vshll.u32 %v10209_v46, %v4011_v44  ;;  %v4018_v4 = vshrl.u32 %v10204_v6, %v9552_v14  ;;  %v4021_v54 = vshrl.u32 %v10197_v15, %v9552_v14 }
 0x5d1   : > { %v1593_v11 = vmul.f32 -0.001358992, %v1592_v63  ;;  %v1600_v3 = vmul.f32 -0.00019511016, %v1592_v63  ;;  %v3934_v39 = vadd.s32 %v3933_v48, %v3924_v55  ;;  %v4017_v19 = vshll.u32 %v10205_v41, %v4011_v44 }
 0x5d2   : > { %vm3937_vm11 = vc.u32 %v9557_v43, %v9554_v35  ;;  %v4015_v24 = vshrl.u32 %v10205_v41, %v9552_v14  ;;  %v4020_v32 = vshll.u32 %v10204_v6, %v4011_v44  ;;  %v4023_v57 = vshll.u32 %v10197_v15, %v4011_v44 }
 0x5d3   : > { %v1594_v61 = vadd.f32 0.041655596, %v1593_v11  ;;  %v1601_v7 = vadd.f32 0.008332121, %v1600_v3  ;;  %v3938_v26 = vadd.s32 1, %v3934_v39  ;;  %v9573_v62 = vor.u32 %v4018_v4, %v4017_v19 }
 0x5d4   : > { %v4024_v52 = vshrl.u32 %v10191_v59, %v9552_v14  ;;  %v9577_v31 = vor.u32 %v4021_v54, %v4020_v32  ;;  %v4026_v50 = vshll.u32 %v10191_v59, %v4011_v44  ;;  %v4027_v30 = vshrl.u32 %v10192_v17, %v9552_v14 }
 0x5d5   : > { %v1595_v5 = vmul.f32 %v1594_v61, %v1592_v63  ;;  %v1602_v1 = vmul.f32 %v1601_v7, %v1592_v63  ;;  %v3939_v60 = vsel %vm3937_vm11, %v3938_v26, %v3934_v39  ;;  %v1609_v34 = vand.u32 3, %v1608_v40 }
 0x5d6   : > { %v3940_v33 = vadd.s32 %v3939_v60, %v3935_v9  ;;  %v4025_v16 = vor.u32 %v4024_v52, %v4023_v57  ;;  %v4005_v10 = vor.u32 8388608, %v9455_v56  ;;  %v9583_v42 = vor.u32 %v4015_v24, %v4014_v0 }
 0x5d7   : > { %v1596_v38 = vadd.f32 -0.4999988, %v1595_v5  ;;  %v1603_v28 = vadd.f32 -0.16666654, %v1602_v1  ;;  %v4028_v29 = vor.u32 %v4027_v30, %v4026_v50  ;;  %vm4032_vm12 = vcmp.lt.s32.totalorder %v9559_v53, 4 }
 0x5d8   : > { %v3941_v23 = vadd.s32 536870912, %v3940_v33  ;;  %vm4029_vm13 = vcmp.lt.s32.totalorder %v9559_v53, 1  ;;  %vm4031_vm0 = vcmp.lt.s32.totalorder %v9559_v53, 3  ;;  %v4038_v44 = vsel %vm4032_vm12, %v4025_v16, 920167782 }
 0x5d9   : > { %v1597_v36 = vmul.f32 %v1596_v38, %v1592_v63  ;;  %v1604_v27 = vmul.f32 %v1603_v28, %v1592_v63  ;;  %v4042_v40 = vsel %vm4032_vm12, %v4028_v29, 1326507024  ;;  %v4041_v63 = vsel %vm4029_vm13, %v9573_v62, %v9577_v31 }
 0x5da   : > { %v9592_v12 = vshrl.u32 %v3941_v23, 30  ;;  %v4037_v51 = vsel %vm4029_vm13, %v9583_v42, %v9573_v62  ;;  %v4039_v45 = vsel %vm4031_vm0, %v9577_v31, %v4038_v44  ;;  %v4043_v55 = vsel %vm4031_vm0, %v4025_v16, %v4042_v40 }
 0x5db   : > { %v1598_v22 = vadd.f32 1.0, %v1597_v36  ;;  %v1605_v56 = vadd.f32 1.0, %v1604_v27  ;;  %v9607_v48 = vshll.u32 %v4005_v10, 8  ;;  %vm4030_vm15 = vcmp.lt.s32.totalorder %v9559_v53, 2 }
 0x5dc   : > { %v3943_v3 = vshll.u32 %v9592_v12, 30  ;;  %vm1610_vm2 = vcmp.lt.s32.totalorder %v1609_v34, 2  ;;  %vm1611_vm3 = vcmp.eq.s32.totalorder %v1609_v34, 0  ;;  %v4044_v39 = vsel %vm4030_vm15, %v4041_v63, %v4043_v55 }
 0x5dd   : > { %v1606_v9 = vmul.f32 %v1605_v56, %v1590_v21  ;;  %v1615_v11 = vxor.u32 2147483648, %v1598_v22  ;;  %vm1614_vm7 = vcmp.eq.s32.totalorder %v1609_v34, 2  ;;  %v4040_v54 = vsel %vm4030_vm15, %v4037_v51, %v4039_v45 }
 0x5de   : > { %v3944_v4 = vsub.s32 %v3940_v33, %v3943_v3  ;;  %v4046_v61 = vand.u32 65535, %v9607_v48  ;;  %v4047_v21 = vshrl.u32 %v9607_v48, 16  ;;  %v4048_v7 = vand.u32 65535, %v4044_v39 }
 0x5df   : > { %v1612_v0 = vxor.u32 2147483648, %v1606_v9  ;;  %v4049_v19 = vshrl.u32 %v4044_v39, 16  ;;  %v1616_v24 = vsel %vm1614_vm7, %v1615_v11, %v1606_v9  ;;  %vm1607_vm4 = vweird.f32 %v9188_v13 }
 0x5e0   : > { %vm3945_vm1 = vcmp.lt.s32.totalorder %v3944_v4, 0  ;;  %v3946_v32 = vsub.s32 0, %v3944_v4  ;;  %v4052_v1 = vmul.u32 %v4048_v7, %v4047_v21  ;;  %v4070_v50 = vand.u32 65535, %v4040_v54 }
 0x5e1   : > { %v1613_v26 = vsel %vm1611_vm3, %v1598_v22, %v1612_v0  ;;  %v4051_v5 = vmul.u32 %v4049_v19, %v4046_v61  ;;  %v4071_v30 = vshrl.u32 %v4040_v54, 16  ;;  %v4050_v28 = vmul.u32 %v4048_v7, %v4046_v61 }
 0x5e2   : > { %v1617_v57 = vsel %vm1610_vm2, %v1613_v26, %v1616_v24  ;;  %v3947_v60 = vsel %vm3945_vm1, %v3946_v32, %v3944_v4  ;;  %v4053_v16 = vmul.u32 %v4049_v19, %v4047_v21  ;;  %v4056_v29 = vshll.u32 %v4052_v1, 16 }
 0x5e3   : > { %v1618_v52 = vsel %vm1607_vm4, nan, %v1617_v57  ;;  %v3948_v38 = vclz %v3947_v60  ;;  %v4054_v33 = vshll.u32 %v4051_v5, 16  ;;  %v3936_v13 = vadd.s32 %v9554_v35, %v9557_v43  ;;  %v9631_v57 = vpop.permute.xlu0 %660 }
 0x5e4   : > { %3174 = vst [vmem:[%s6771_s17 + $0x28] sm:$0xff] %v1618_v52  ;;  %v4073_v27 = vmul.u32 %v4071_v30, %v4046_v61  ;;  %v4074_v23 = vmul.u32 %v4070_v50, %v4047_v21  ;;  %v4055_v44 = vshrl.u32 %v4051_v5, 16  ;;  %v4072_v63 = vmul.u32 %v4070_v50, %v4046_v61 }
 0x5e5   : > { %v5898_v10 = vadd.s32 4294967294, %v3948_v38  ;;  %vm4058_vm8 = vc.u32 %v4050_v28, %v4054_v33  ;;  %v4060_v36 = vadd.s32 %v4054_v33, %v4050_v28  ;;  %v4075_v11 = vmul.u32 %v4071_v30, %v4047_v21 }
 0x5e6   : > { %v4059_v34 = vsel %vm4058_vm8, 1, %v10213_v58  ;;  %v4076_v51 = vshll.u32 %v4073_v27, 16  ;;  %v4078_v39 = vshll.u32 %v4074_v23, 16  ;;  %v4013_v19 = vshrl.u32 %v10209_v46, %v9552_v14  ;;  %v10241_v14 = vld [vmem:[#allocation7_spill] sm:$0xff] }
 0x5e7   : > { %vm5899_vm9 = vcmp.lt.s32.totalorder %v5898_v10, 0  ;;  %v4061_v40 = vadd.s32 %v4059_v34, %v4053_v16  ;;  %vm4062_vm5 = vc.u32 %v4060_v36, %v4056_v29  ;;  %v4034_v61 = vsel %vm4032_vm12, %v9577_v31, 2102212464 }
 0x5e8   : > { %v3951_v22 = vsel %vm5899_vm9, 0, %v5898_v10  ;;  %v4063_v56 = vsel %vm4062_vm5, 1, %v10213_v58  ;;  %vm4080_vm10 = vc.u32 %v4072_v63, %v4076_v51  ;;  %v4082_v35 = vadd.s32 %v4076_v51, %v4072_v63 }
 0x5e9   : > { %v3952_v45 = vsub.s32 32, %v3951_v22  ;;  %v3956_v55 = vsub.s32 4294967266, %v3951_v22  ;;  %v4065_v9 = vadd.s32 %v4063_v56, %v4061_v40  ;;  %v3953_v3 = vshll.u32 %v3944_v4, %v3951_v22 }
 0x5ea   : > { %v4081_v7 = vsel %vm4080_vm10, 1, %v10213_v58  ;;  %vm4084_vm6 = vc.u32 %v4082_v35, %v4078_v39  ;;  %v4057_v4 = vshrl.u32 %v4052_v1, 16  ;;  %v4033_v5 = vsel %vm4029_vm13, %v4013_v19, %v9583_v42 }
 0x5eb   : > { %v3954_v43 = vshrl.u32 %v3936_v13, %v3952_v45  ;;  %v3957_v0 = vadd.s32 127, %v3956_v55  ;;  %v4066_v54 = vadd.s32 %v4065_v9, %v4055_v44  ;;  %v4083_v26 = vadd.s32 %v4081_v7, %v4075_v11 }
 0x5ec   : > { %v4085_v32 = vsel %vm4084_vm6, 1, %v10213_v58  ;;  %v4077_v52 = vshrl.u32 %v4073_v27, 16  ;;  %v627_v50 = vmul.f32 %v10241_v14, %v6442_v47  ;;  %v4035_v31 = vsel %vm4031_vm0, %v9573_v62, %v4034_v61 }
 0x5ed   : > { %v3955_v24 = vor.u32 %v3954_v43, %v3953_v3  ;;  %v3958_v21 = vshll.u32 %v3957_v0, 23  ;;  %v4087_v60 = vadd.s32 %v4085_v32, %v4083_v26  ;;  %v4067_v38 = vadd.s32 %v4066_v54, %v4057_v4 }
 0x5ee   : > { %v628_v1 = vmul.f32 %v10241_v14, %v6444_v49  ;;  %v3966_v28 = vsub.s32 4, %v9592_v12  ;;  %v4079_v33 = vshrl.u32 %v4074_v23, 16  ;;  %v9645_v42 = vadd.f32 %v9631_v57, %v627_v50 }
 0x5ef   : > { %v3959_v30 = vor.u32 4788187, %v3958_v21  ;;  %v4088_v16 = vadd.s32 %v4087_v60, %v4077_v52  ;;  %v3962_v29 = vcvt.s32.f32 %v3955_v24  ;;  %v4086_v36 = vadd.s32 %v4082_v35, %v4078_v39 }
 0x5f0   : > { %v9648_v47 = vadd.f32 %v9631_v57, %v628_v1  ;;  %v4036_v62 = vsel %vm4030_vm15, %v4033_v5, %v4035_v31  ;;  %v2239_v34 = vand.u32 2147483647, %v9645_v42  ;;  %v2242_v49 = vand.u32 2139095040, %v9645_v42 }
 0x5f1   : > { %v3960_v10 = vand.u32 2147483647, %v3959_v30  ;;  %v4089_v13 = vadd.s32 %v4088_v16, %v4079_v33  ;;  %vm3844_vm14 = vcmp.lt.s32.totalorder %v9410_v2, 0  ;;  %vm4092_vm11 = vc.u32 %v4067_v38, %v4086_v36 }
 0x5f2   : > { %v3967_v23 = vsel %vm3844_vm14, %v3966_v28, %v9592_v12  ;;  %v2243_v40 = vshrl.u32 %v2242_v49, 23  ;;  %v2246_v22 = vand.u32 8388607, %v2239_v34  ;;  %v4090_v53 = vmul.u32 %v9607_v48, %v4036_v62 }
 0x5f3   : > { %v3963_v27 = vmul.f32 %v3962_v29, %v3960_v10  ;;  %v4093_v44 = vadd.s32 1, %v4089_v13  ;;  %v2397_v63 = vand.u32 2139095040, %v9648_v47  ;;  %vm3843_vm12 = vcmp.le.f32.partialorder %v3842_v20, 0.7853982 }
 0x5f4   : > { %v5867_v45 = vadd.s32 4294967169, %v2243_v40  ;;  %v3969_v9 = vsel %vm3843_vm12, 0, %v3967_v23  ;;  %v2247_v3 = vor.u32 8388608, %v2246_v22  ;;  %v2394_v48 = vand.u32 2147483647, %v9648_v47 }
 0x5f5   : > { %v3964_v56 = vxor.u32 2147483648, %v3963_v27  ;;  %v4094_v51 = vsel %vm4092_vm11, %v4093_v44, %v4089_v13  ;;  %v2398_v35 = vshrl.u32 %v2397_v63, 23  ;;  %v3986_v54 = vadd.s32 3, %v3969_v9 }
 0x5f6   : > { %v4095_v11 = vadd.s32 %v4094_v51, %v4090_v53  ;;  %v2249_v39 = vadd.s32 1, %v5867_v45  ;;  %v9664_v24 = vshll.u32 %v2247_v3, 8  ;;  %vm9668_vm0 = vcmp.le.f32.partialorder %v3997_v8, 0.7853982 }
 0x5f7   : > { %v3965_v55 = vsel %vm3844_vm14, %v3964_v56, %v3963_v27  ;;  %v5870_v21 = vadd.s32 4294967169, %v2398_v35  ;;  %vm3999_vm15 = vcmp.lt.s32.totalorder %v9436_v37, 0  ;;  %v3987_v60 = vand.u32 3, %v3986_v54 }
 0x5f8   : > { %v3968_v12 = vsel %vm3843_vm12, %v9410_v2, %v3965_v55  ;;  %v4096_v0 = vadd.s32 536870912, %v4095_v11  ;;  %vm2250_vm13 = vcmp.gt.s32.totalorder %v2249_v39, 0  ;;  %v4091_v50 = vadd.s32 %v4086_v36, %v4067_v38 }
 0x5f9   : > { %v3970_v43 = vmul.f32 %v3968_v12, %v3968_v12  ;;  %v2251_v20 = vsel %vm2250_vm13, %v2249_v39, 0  ;;  %v9677_v16 = vand.u32 8388607, %v2394_v48  ;;  %v9682_v8 = vand.u32 65535, %v9664_v24 }
 0x5fa   : > { %v4097_v61 = vshrl.u32 %v4096_v0, 30  ;;  %v2253_v26 = vand.u32 31, %v2251_v20  ;;  %v9679_v10 = vshrl.u32 %v2251_v20, 5  ;;  %v9685_v29 = vshrl.u32 %v9664_v24, 16 }
 0x5fb   : > { %v3971_v7 = vmul.f32 -0.001358992, %v3970_v43  ;;  %v3978_v19 = vmul.f32 -0.00019511016, %v3970_v43  ;;  %v9687_v62 = vadd.s32 1, %v5870_v21  ;;  %vm3989_vm3 = vcmp.eq.s32.totalorder %v3987_v60, 0 }
 0x5fc   : > { %v4098_v52 = vshll.u32 %v4097_v61, 30  ;;  %v4121_v30 = vsub.s32 4, %v4097_v61  ;;  %v2254_v31 = vsub.s32 32, %v2253_v26  ;;  %vm3992_vm7 = vcmp.eq.s32.totalorder %v3987_v60, 2 }
 0x5fd   : > { %v3972_v4 = vadd.f32 0.041655596, %v3971_v7  ;;  %v3979_v32 = vadd.f32 0.008332121, %v3978_v19  ;;  %v2256_v27 = vshll.u32 %v10209_v46, %v2253_v26  ;;  %v2259_v44 = vshll.u32 %v10205_v41, %v2253_v26 }
 0x5fe   : > { %v9673_v33 = vsub.s32 %v4095_v11, %v4098_v52  ;;  %v4122_v49 = vsel %vm3999_vm15, %v4121_v30, %v4097_v61  ;;  %v2257_v23 = vshrl.u32 %v10205_v41, %v2254_v31  ;;  %vm3988_vm1 = vcmp.lt.s32.totalorder %v3987_v60, 2 }
 0x5ff   : > { %v3973_v1 = vmul.f32 %v3972_v4, %v3970_v43  ;;  %v3980_v28 = vmul.f32 %v3979_v32, %v3970_v43  ;;  %v2260_v53 = vshrl.u32 %v10204_v6, %v2254_v31  ;;  %vm3985_vm4 = vweird.f32 %v9410_v2 }
 0x600   : > { %vm4100_vm2 = vcmp.lt.s32.totalorder %v9673_v33, 0  ;;  %v4101_v13 = vsub.s32 0, %v9673_v33  ;;  %v2262_v51 = vshll.u32 %v10204_v6, %v2253_v26  ;;  %v2263_v45 = vshrl.u32 %v10197_v15, %v2254_v31 }
 0x601   : > { %v3974_v38 = vadd.f32 -0.4999988, %v3973_v1  ;;  %v3981_v36 = vadd.f32 -0.16666654, %v3980_v28  ;;  %v2266_v55 = vshrl.u32 %v10191_v59, %v2254_v31  ;;  %v2265_v3 = vshll.u32 %v10197_v15, %v2253_v26 }
 0x602   : > { %v4102_v56 = vsel %vm4100_vm2, %v4101_v13, %v9673_v33  ;;  %v2269_v39 = vshrl.u32 %v10192_v17, %v2254_v31  ;;  %v2258_v0 = vor.u32 %v2257_v23, %v2256_v27  ;;  %v2268_v54 = vshll.u32 %v10191_v59, %v2253_v26 }
 0x603   : > { %v3975_v40 = vmul.f32 %v3974_v38, %v3970_v43  ;;  %v3982_v22 = vmul.f32 %v3981_v36, %v3970_v43  ;;  %v4103_v63 = vclz %v4102_v56  ;;  %v4124_v43 = vsel %vm9668_vm0, 0, %v4122_v49 }
 0x604   : > { %v2261_v61 = vor.u32 %v2260_v53, %v2259_v44  ;;  %v2267_v20 = vor.u32 %v2266_v55, %v2265_v3  ;;  %v2255_v21 = vshrl.u32 %v10209_v46, %v2254_v31  ;;  %v2264_v4 = vor.u32 %v2263_v45, %v2262_v51 }
 0x605   : > { %v3976_v9 = vadd.f32 1.0, %v3975_v40  ;;  %v3983_v11 = vadd.f32 1.0, %v3982_v22  ;;  %v5901_v35 = vadd.s32 4294967294, %v4103_v63  ;;  %v2270_v32 = vor.u32 %v2269_v39, %v2268_v54 }
 0x606   : > { %vm2271_vm9 = vcmp.lt.s32.totalorder %v9679_v10, 1  ;;  %vm2272_vm5 = vcmp.lt.s32.totalorder %v9679_v10, 2  ;;  %vm2273_vm10 = vcmp.lt.s32.totalorder %v9679_v10, 3  ;;  %vm2274_vm6 = vcmp.lt.s32.totalorder %v9679_v10, 4 }
 0x607   : > { %v3984_v7 = vmul.f32 %v3983_v11, %v3968_v12  ;;  %v3993_v19 = vxor.u32 2147483648, %v3976_v9  ;;  %vm5902_vm8 = vcmp.lt.s32.totalorder %v5901_v35, 0  ;;  %v2279_v31 = vsel %vm2271_vm9, %v2258_v0, %v2261_v61 }
 0x608   : > { %v4106_v30 = vsel %vm5902_vm8, 0, %v5901_v35  ;;  %v2280_v38 = vsel %vm2274_vm6, %v2267_v20, 920167782  ;;  %v2276_v44 = vsel %vm2274_vm6, %v2264_v4, 2102212464  ;;  %v2283_v22 = vsel %vm2271_vm9, %v2261_v61, %v2264_v4 }
 0x609   : > { %v3990_v52 = vxor.u32 2147483648, %v3984_v7  ;;  %v4107_v1 = vsub.s32 32, %v4106_v30  ;;  %v4111_v28 = vsub.s32 4294967266, %v4106_v30  ;;  %v3994_v26 = vsel %vm3992_vm7, %v3993_v19, %v3984_v7 }
 0x60a   : > { %v4108_v13 = vshll.u32 %v9673_v33, %v4106_v30  ;;  %v2281_v40 = vsel %vm2273_vm10, %v2264_v4, %v2280_v38  ;;  %v4141_v2 = vadd.s32 3, %v4124_v43  ;;  %v2275_v55 = vsel %vm2271_vm9, %v2255_v21, %v2258_v0 }
 0x60b   : > { %v3991_v12 = vsel %vm3989_vm3, %v3976_v9, %v3990_v52  ;;  %v4109_v49 = vshrl.u32 %v4091_v50, %v4107_v1  ;;  %v4112_v27 = vadd.s32 127, %v4111_v28  ;;  %v2282_v60 = vsel %vm2272_vm5, %v2279_v31, %v2281_v40 }
 0x60c   : > { %v3995_v36 = vsel %vm3988_vm1, %v3991_v12, %v3994_v26  ;;  %v2284_v50 = vsel %vm2274_vm6, %v2270_v32, 1326507024  ;;  %v2312_v63 = vand.u32 65535, %v2282_v60  ;;  %v2313_v51 = vshrl.u32 %v2282_v60, 16 }
 0x60d   : > { %v3996_v23 = vsel %vm3985_vm4, nan, %v3995_v36  ;;  %v4110_v56 = vor.u32 %v4109_v49, %v4108_v13  ;;  %v4113_v53 = vshll.u32 %v4112_v27, 23  ;;  %v2285_v33 = vsel %vm2273_vm10, %v2267_v20, %v2284_v50 }
 0x60e   : > { %5706 = vst [vmem:[%s6771_s17 + $0xa0] sm:$0xff] %v3996_v23  ;;  %v2277_v9 = vsel %vm2273_vm10, %v2261_v61, %v2276_v44  ;;  %v2286_v11 = vsel %vm2272_vm5, %v2283_v22, %v2285_v33  ;;  %v2315_v35 = vmul.u32 %v2313_v51, %v9682_v8  ;;  %v2402_v43 = vor.u32 8388608, %v9677_v16 }
 0x60f   : > { %v4114_v45 = vor.u32 4788187, %v4113_v53  ;;  %v2290_v3 = vand.u32 65535, %v2286_v11  ;;  %v2291_v39 = vshrl.u32 %v2286_v11, 16  ;;  %v4117_v7 = vcvt.s32.f32 %v4110_v56 }
 0x610   : > { %v2316_v19 = vmul.u32 %v2312_v63, %v9685_v29  ;;  %vm2405_vm14 = vcmp.gt.s32.totalorder %v9687_v62, 0  ;;  %v9745_v20 = vand.u32 3, %v4141_v2  ;;  %v9749_v0 = vsel %vm2272_vm5, %v2275_v55, %v2277_v9 }
 0x611   : > { %v4115_v54 = vand.u32 2147483647, %v4114_v45  ;;  %v2293_v61 = vmul.u32 %v2291_v39, %v9682_v8  ;;  %v2294_v21 = vmul.u32 %v2290_v3, %v9685_v29  ;;  %v2314_v32 = vmul.u32 %v2312_v63, %v9682_v8 }
 0x612   : > { %v2317_v52 = vmul.u32 %v2313_v51, %v9685_v29  ;;  %v2318_v30 = vshll.u32 %v2315_v35, 16  ;;  %v2292_v1 = vmul.u32 %v2290_v3, %v9682_v8  ;;  %v2295_v28 = vmul.u32 %v2291_v39, %v9685_v29 }
 0x613   : > { %v4118_v4 = vmul.f32 %v4117_v7, %v4115_v54  ;;  %v2296_v12 = vshll.u32 %v2293_v61, 16  ;;  %v2406_v26 = vsel %vm2405_vm14, %v9687_v62, 0  ;;  %v2320_v31 = vshll.u32 %v2316_v19, 16 }
 0x614   : > { %vm2322_vm11 = vc.u32 %v2314_v32, %v2318_v30  ;;  %v2324_v38 = vadd.s32 %v2318_v30, %v2314_v32  ;;  %v2298_v36 = vshll.u32 %v2294_v21, 16  ;;  %v2319_v56 = vshrl.u32 %v2315_v35, 16 }
 0x615   : > { %v4119_v10 = vxor.u32 2147483648, %v4118_v4  ;;  %vm2300_vm12 = vc.u32 %v2292_v1, %v2296_v12  ;;  %v2302_v13 = vadd.s32 %v2296_v12, %v2292_v1  ;;  %v2323_v49 = vsel %vm2322_vm11, 1, %v10213_v58 }
 0x616   : > { %v2301_v23 = vsel %vm2300_vm12, 1, %v10213_v58  ;;  %v2325_v8 = vadd.s32 %v2323_v49, %v2317_v52  ;;  %vm2326_vm13 = vc.u32 %v2324_v38, %v2320_v31  ;;  %v2297_v60 = vshrl.u32 %v2293_v61, 16 }
 0x617   : > { %v4120_v27 = vsel %vm3999_vm15, %v4119_v10, %v4118_v4  ;;  %v2303_v62 = vadd.s32 %v2301_v23, %v2295_v28  ;;  %vm2304_vm2 = vc.u32 %v2302_v13, %v2298_v36  ;;  %v2327_v44 = vsel %vm2326_vm13, 1, %v10213_v58 }
 0x618   : > { %v4123_v29 = vsel %vm9668_vm0, %v9436_v37, %v4120_v27  ;;  %v2305_v22 = vsel %vm2304_vm2, 1, %v10213_v58  ;;  %v2329_v53 = vadd.s32 %v2327_v44, %v2325_v8  ;;  %v2332_v2 = vmul.u32 %v9664_v24, %v9749_v0 }
 0x619   : > { %v4125_v40 = vmul.f32 %v4123_v29, %v4123_v29  ;;  %v2307_v50 = vadd.s32 %v2305_v22, %v2303_v62  ;;  %v2408_v33 = vand.u32 31, %v2406_v26  ;;  %v2321_v45 = vshrl.u32 %v2316_v19, 16 }
 0x61a   : > { %v2330_v5 = vadd.s32 %v2329_v53, %v2319_v56  ;;  %v2299_v55 = vshrl.u32 %v2294_v21, 16  ;;  %v9769_v11 = vadd.s32 %v2324_v38, %v2320_v31  ;;  %v9785_v30 = vshrl.u32 %v2406_v26, 5 }
 0x61b   : > { %v4126_v63 = vmul.f32 -0.001358992, %v4125_v40  ;;  %v4133_v51 = vmul.f32 -0.00019511016, %v4125_v40  ;;  %v2308_v9 = vadd.s32 %v2307_v50, %v2297_v60  ;;  %v9771_v3 = vsub.s32 32, %v2408_v33 }
 0x61c   : > { %v2331_v35 = vadd.s32 %v2330_v5, %v2321_v45  ;;  %v2411_v7 = vshll.u32 %v10209_v46, %v2408_v33  ;;  %v2414_v0 = vshll.u32 %v10205_v41, %v2408_v33  ;;  %v2417_v28 = vshll.u32 %v10204_v6, %v2408_v33 }
 0x61d   : > { %v4127_v39 = vadd.f32 0.041655596, %v4126_v63  ;;  %v4134_v54 = vadd.f32 0.008332121, %v4133_v51  ;;  %v9774_v61 = vadd.s32 %v2308_v9, %v2299_v55  ;;  %v2412_v24 = vshrl.u32 %v10205_v41, %v9771_v3 }
 0x61e   : > { %v2415_v19 = vshrl.u32 %v10204_v6, %v9771_v3  ;;  %v2335_v32 = vadd.s32 1, %v2331_v35  ;;  %v2418_v52 = vshrl.u32 %v10197_v15, %v9771_v3  ;;  %v2420_v49 = vshll.u32 %v10197_v15, %v2408_v33 }
 0x61f   : > { %v4128_v21 = vmul.f32 %v4127_v39, %v4125_v40  ;;  %v4135_v4 = vmul.f32 %v4134_v54, %v4125_v40  ;;  %vm2334_vm0 = vc.u32 %v9774_v61, %v9769_v11  ;;  %v9787_v1 = vor.u32 %v2412_v24, %v2411_v7 }
 0x620   : > { %v2336_v31 = vsel %vm2334_vm0, %v2335_v32, %v2331_v35  ;;  %v9790_v38 = vor.u32 %v2415_v19, %v2414_v0  ;;  %v2419_v13 = vor.u32 %v2418_v52, %v2417_v28  ;;  %v2421_v27 = vshrl.u32 %v10191_v59, %v9771_v3 }
 0x621   : > { %v4129_v12 = vadd.f32 -0.4999988, %v4128_v21  ;;  %v4136_v10 = vadd.f32 -0.16666654, %v4135_v4  ;;  %v2337_v36 = vadd.s32 %v2336_v31, %v2332_v2  ;;  %v2423_v26 = vshll.u32 %v10191_v59, %v2408_v33 }
 0x622   : > { %v2424_v62 = vshrl.u32 %v10192_v17, %v9771_v3  ;;  %v2422_v22 = vor.u32 %v2421_v27, %v2420_v49  ;;  %vm2426_vm15 = vcmp.lt.s32.totalorder %v9785_v30, 1  ;;  %vm2427_vm3 = vcmp.lt.s32.totalorder %v9785_v30, 2 }
 0x623   : > { %v4130_v23 = vmul.f32 %v4129_v12, %v4125_v40  ;;  %v4137_v8 = vmul.f32 %v4136_v10, %v4125_v40  ;;  %v2338_v44 = vadd.s32 536870912, %v2337_v36  ;;  %vm2429_vm7 = vcmp.lt.s32.totalorder %v9785_v30, 4 }
 0x624   : > { %v2425_v60 = vor.u32 %v2424_v62, %v2423_v26  ;;  %vm2428_vm1 = vcmp.lt.s32.totalorder %v9785_v30, 3  ;;  %v2434_v40 = vsel %vm2426_vm15, %v9787_v1, %v9790_v38  ;;  %v2435_v2 = vsel %vm2429_vm7, %v2422_v22, 920167782 }
 0x625   : > { %v4131_v56 = vadd.f32 1.0, %v4130_v23  ;;  %v4138_v53 = vadd.f32 1.0, %v4137_v8  ;;  %v9801_v50 = vshrl.u32 %v2338_v44, 30  ;;  %v2436_v51 = vsel %vm2428_vm1, %v2419_v13, %v2435_v2 }
 0x626   : > { %v2438_v45 = vsel %vm2426_vm15, %v9790_v38, %v2419_v13  ;;  %v2437_v55 = vsel %vm2427_vm3, %v2434_v40, %v2436_v51  ;;  %v2439_v9 = vsel %vm2429_vm7, %v2425_v60, 1326507024  ;;  %vm4140_vm4 = vweird.f32 %v9436_v37 }
 0x627   : > { %v4139_v33 = vmul.f32 %v4138_v53, %v4123_v29  ;;  %v4148_v63 = vxor.u32 2147483648, %v4131_v56  ;;  %v2340_v5 = vshll.u32 %v9801_v50, 30  ;;  %v2440_v29 = vsel %vm2428_vm1, %v2422_v22, %v2439_v9 }
 0x628   : > { %v9825_v54 = vshll.u32 %v2402_v43, 8  ;;  %vm4144_vm8 = vcmp.eq.s32.totalorder %v9745_v20, 0  ;;  %vm4147_vm9 = vcmp.eq.s32.totalorder %v9745_v20, 2  ;;  %v2441_v7 = vsel %vm2427_vm3, %v2438_v45, %v2440_v29 }
 0x629   : > { %v4145_v39 = vxor.u32 2147483648, %v4139_v33  ;;  %v2341_v35 = vsub.s32 %v2337_v36, %v2340_v5  ;;  %vm4143_vm5 = vcmp.lt.s32.totalorder %v9745_v20, 2  ;;  %v4149_v0 = vsel %vm4147_vm9, %v4148_v63, %v4139_v33 }
 0x62a   : > { %v2467_v19 = vand.u32 65535, %v2437_v55  ;;  %v2443_v16 = vand.u32 65535, %v9825_v54  ;;  %v2444_v32 = vshrl.u32 %v9825_v54, 16  ;;  %v2445_v52 = vand.u32 65535, %v2441_v7 }
 0x62b   : > { %v4146_v24 = vsel %vm4144_vm8, %v4131_v56, %v4145_v39  ;;  %vm2342_vm10 = vcmp.lt.s32.totalorder %v2341_v35, 0  ;;  %v2343_v4 = vsub.s32 0, %v2341_v35  ;;  %v2446_v28 = vshrl.u32 %v2441_v7, 16 }
 0x62c   : > { %v4150_v21 = vsel %vm4143_vm5, %v4146_v24, %v4149_v0  ;;  %v2410_v20 = vshrl.u32 %v10209_v46, %v9771_v3  ;;  %v2468_v10 = vshrl.u32 %v2437_v55, 16  ;;  %v2449_v49 = vmul.u32 %v2445_v52, %v2444_v32 }
 0x62d   : > { %v4151_v43 = vsel %vm4140_vm4, nan, %v4150_v21  ;;  %v2344_v12 = vsel %vm2342_vm10, %v2343_v4, %v2341_v35  ;;  %v2448_v36 = vmul.u32 %v2446_v28, %v2443_v16  ;;  %v3200_v27 = vmul.f32 %v7675_v18, %v10241_v14 }
 0x62e   : > { %5707 = vst [vmem:[%s6771_s17 + $0xa8] sm:$0xff] %v4151_v43  ;;  %v2345_v31 = vclz %v2344_v12  ;;  %v3201_v37 = vmul.f32 %v7774_v25, %v10241_v14  ;;  %v2333_v23 = vadd.s32 %v9769_v11, %v9774_v61  ;;  %v2430_v8 = vsel %vm2426_vm15, %v2410_v20, %v9787_v1 }
 0x62f   : > { %v2447_v62 = vmul.u32 %v2445_v52, %v2443_v16  ;;  %v2451_v3 = vshll.u32 %v2448_v36, 16  ;;  %v2471_v44 = vmul.u32 %v2467_v19, %v2444_v32  ;;  %v2431_v22 = vsel %vm2429_vm7, %v2419_v13, 2102212464 }
 0x630   : > { %v5868_v26 = vadd.s32 4294967294, %v2345_v31  ;;  %v2450_v56 = vmul.u32 %v2446_v28, %v2444_v32  ;;  %v2469_v53 = vmul.u32 %v2467_v19, %v2443_v16  ;;  %v2470_v18 = vmul.u32 %v2468_v10, %v2443_v16 }
 0x631   : > { %v2453_v60 = vshll.u32 %v2449_v49, 16  ;;  %vm2455_vm14 = vc.u32 %v2447_v62, %v2451_v3  ;;  %v2457_v25 = vadd.s32 %v2451_v3, %v2447_v62  ;;  %v2472_v61 = vmul.u32 %v2468_v10, %v2444_v32 }
 0x632   : > { %vm5869_vm6 = vcmp.lt.s32.totalorder %v5868_v26, 0  ;;  %v2456_v11 = vsel %vm2455_vm14, 1, %v10213_v58  ;;  %v2473_v40 = vshll.u32 %v2470_v18, 16  ;;  %v2475_v63 = vshll.u32 %v2471_v44, 16 }
 0x633   : > { %v2348_v14 = vsel %vm5869_vm6, 0, %v5868_v26  ;;  %v2458_v33 = vadd.s32 %v2456_v11, %v2450_v56  ;;  %vm2459_vm11 = vc.u32 %v2457_v25, %v2453_v60  ;;  %v2452_v39 = vshrl.u32 %v2448_v36, 16 }
 0x634   : > { %v2349_v1 = vsub.s32 32, %v2348_v14  ;;  %v2353_v2 = vsub.s32 4294967266, %v2348_v14  ;;  %v2350_v51 = vshll.u32 %v2341_v35, %v2348_v14  ;;  %vm2477_vm12 = vc.u32 %v2469_v53, %v2473_v40 }
 0x635   : > { %v2479_v13 = vadd.s32 %v2473_v40, %v2469_v53  ;;  %v2460_v55 = vsel %vm2459_vm11, 1, %v10213_v58  ;;  %v2478_v9 = vsel %vm2477_vm12, 1, %v10213_v58  ;;  %v2454_v19 = vshrl.u32 %v2449_v49, 16 }
 0x636   : > { %v2351_v45 = vshrl.u32 %v2333_v23, %v2349_v1  ;;  %v2354_v5 = vadd.s32 127, %v2353_v2  ;;  %v2462_v29 = vadd.s32 %v2460_v55, %v2458_v33  ;;  %v2480_v7 = vadd.s32 %v2478_v9, %v2472_v61 }
 0x637   : > { %vm2481_vm13 = vc.u32 %v2479_v13, %v2475_v63  ;;  %v2474_v35 = vshrl.u32 %v2470_v18, 16  ;;  %v9855_v43 = vadd.f32 %v3200_v27, %v9631_v57  ;;  %v2363_v52 = vsub.s32 4, %v9801_v50 }
 0x638   : > { %v2352_v24 = vor.u32 %v2351_v45, %v2350_v51  ;;  %v2355_v0 = vshll.u32 %v2354_v5, 23  ;;  %v2482_v21 = vsel %vm2481_vm13, 1, %v10213_v58  ;;  %v2463_v4 = vadd.s32 %v2462_v29, %v2452_v39 }
 0x639   : > { %v2484_v16 = vadd.s32 %v2482_v21, %v2480_v7  ;;  %v2432_v28 = vsel %vm2428_vm1, %v9790_v38, %v2431_v22  ;;  %v2476_v12 = vshrl.u32 %v2471_v44, 16  ;;  %v9862_v31 = vadd.f32 %v3201_v37, %v9631_v57 }
 0x63a   : > { %v2356_v32 = vor.u32 4788187, %v2355_v0  ;;  %v2464_v20 = vadd.s32 %v2463_v4, %v2454_v19  ;;  %v4772_v36 = vand.u32 2147483647, %v9855_v43  ;;  %v2359_v23 = vcvt.s32.f32 %v2352_v24 }
 0x63b   : > { %v2485_v10 = vadd.s32 %v2484_v16, %v2474_v35  ;;  %v2483_v26 = vadd.s32 %v2479_v13, %v2475_v63  ;;  %v4775_v27 = vand.u32 2139095040, %v9855_v43  ;;  %v2433_v62 = vsel %vm2427_vm3, %v2430_v8, %v2432_v28 }
 0x63c   : > { %v2357_v49 = vand.u32 2147483647, %v2356_v32  ;;  %vm2241_vm2 = vcmp.lt.s32.totalorder %v9645_v42, 0  ;;  %v4779_v37 = vand.u32 8388607, %v4772_v36  ;;  %v4930_v56 = vand.u32 2139095040, %v9862_v31 }
 0x63d   : > { %v2486_v3 = vadd.s32 %v2485_v10, %v2476_v12  ;;  %vm2489_vm0 = vc.u32 %v2464_v20, %v2483_v26  ;;  %v4776_v44 = vshrl.u32 %v4775_v27, 23  ;;  %v2364_v22 = vsel %vm2241_vm2, %v2363_v52, %v9801_v50 }
 0x63e   : > { %v2360_v38 = vmul.f32 %v2359_v23, %v2357_v49  ;;  %v2487_v18 = vmul.u32 %v9825_v54, %v2433_v62  ;;  %vm2240_vm15 = vcmp.le.f32.partialorder %v2239_v34, 0.7853982  ;;  %v4780_v61 = vor.u32 8388608, %v4779_v37 }
 0x63f   : > { %v2490_v57 = vadd.s32 1, %v2486_v3  ;;  %v5915_v60 = vadd.s32 4294967169, %v4776_v44  ;;  %v2366_v25 = vsel %vm2240_vm15, 0, %v2364_v22  ;;  %v4931_v40 = vshrl.u32 %v4930_v56, 23 }
 0x640   : > { %v2361_v53 = vxor.u32 2147483648, %v2360_v38  ;;  %v2383_v33 = vadd.s32 3, %v2366_v25  ;;  %v9879_v34 = vshll.u32 %v4780_v61, 8  ;;  %v4927_v21 = vand.u32 2147483647, %v9862_v31 }
 0x641   : > { %v2491_v30 = vsel %vm2489_vm0, %v2490_v57, %v2486_v3  ;;  %v4782_v11 = vadd.s32 1, %v5915_v60  ;;  %v5918_v5 = vadd.s32 4294967169, %v4931_v40  ;;  %v2488_v4 = vadd.s32 %v2483_v26, %v2464_v20 }
 0x642   : > { %v2362_v8 = vsel %vm2241_vm2, %v2361_v53, %v2360_v38  ;;  %v2492_v14 = vadd.s32 %v2491_v30, %v2487_v18  ;;  %v9882_v29 = vand.u32 3, %v2383_v33  ;;  %v9888_v35 = vand.u32 65535, %v9879_v34 }
 0x643   : > { %v2365_v50 = vsel %vm2240_vm15, %v9645_v42, %v2362_v8  ;;  %vm4783_vm3 = vcmp.gt.s32.totalorder %v4782_v11, 0  ;;  %v9891_v16 = vshrl.u32 %v9879_v34, 16  ;;  %v9893_v32 = vadd.s32 1, %v5918_v5 }
 0x644   : > { %v2367_v1 = vmul.f32 %v2365_v50, %v2365_v50  ;;  %v2493_v2 = vadd.s32 536870912, %v2492_v14  ;;  %v4784_v63 = vsel %vm4783_vm3, %v4782_v11, 0  ;;  %vm2386_vm1 = vcmp.eq.s32.totalorder %v9882_v29, 0 }
 0x645   : > { %v4786_v45 = vand.u32 31, %v4784_v63  ;;  %vm2389_vm4 = vcmp.eq.s32.totalorder %v9882_v29, 2  ;;  %v9900_v10 = vshrl.u32 %v4784_v63, 5  ;;  %vm2385_vm8 = vcmp.lt.s32.totalorder %v9882_v29, 2 }
 0x646   : > { %v2368_v51 = vmul.f32 -0.001358992, %v2367_v1  ;;  %v2375_v54 = vmul.f32 -0.00019511016, %v2367_v1  ;;  %v9877_v13 = vshrl.u32 %v2493_v2, 30  ;;  %vm2382_vm9 = vweird.f32 %v9645_v42 }
 0x647   : > { %v4787_v7 = vsub.s32 32, %v4786_v45  ;;  %v4789_v49 = vshll.u32 %v10209_v46, %v4786_v45  ;;  %v4792_v44 = vshll.u32 %v10205_v41, %v4786_v45  ;;  %v4798_v53 = vshll.u32 %v10197_v15, %v4786_v45 }
 0x648   : > { %v2369_v55 = vadd.f32 0.041655596, %v2368_v51  ;;  %v2376_v9 = vadd.f32 0.008332121, %v2375_v54  ;;  %v2495_v39 = vshll.u32 %v9877_v13, 30  ;;  %v2518_v20 = vsub.s32 4, %v9877_v13 }
 0x649   : > { %v4790_v23 = vshrl.u32 %v10205_v41, %v4787_v7  ;;  %v4793_v3 = vshrl.u32 %v10204_v6, %v4787_v7  ;;  %v4796_v22 = vshrl.u32 %v10197_v15, %v4787_v7  ;;  %v4799_v57 = vshrl.u32 %v10191_v59, %v4787_v7 }
 0x64a   : > { %v2370_v24 = vmul.f32 %v2369_v55, %v2367_v1  ;;  %v2377_v0 = vmul.f32 %v2376_v9, %v2367_v1  ;;  %v9884_v19 = vsub.s32 %v2492_v14, %v2495_v39  ;;  %v4802_v18 = vshrl.u32 %v10192_v17, %v4787_v7 }
 0x64b   : > { %vm2396_vm5 = vcmp.lt.s32.totalorder %v9648_v47, 0  ;;  %v4791_v30 = vor.u32 %v4790_v23, %v4789_v49  ;;  %v4795_v8 = vshll.u32 %v10204_v6, %v4786_v45  ;;  %v4801_v25 = vshll.u32 %v10191_v59, %v4786_v45 }
 0x64c   : > { %v2371_v52 = vadd.f32 -0.4999988, %v2370_v24  ;;  %v2378_v28 = vadd.f32 -0.16666654, %v2377_v0  ;;  %vm2497_vm7 = vcmp.lt.s32.totalorder %v9884_v19, 0  ;;  %v2498_v12 = vsub.s32 0, %v9884_v19 }
 0x64d   : > { %v4794_v61 = vor.u32 %v4793_v3, %v4792_v44  ;;  %v4800_v40 = vor.u32 %v4799_v57, %v4798_v53  ;;  %v4797_v2 = vor.u32 %v4796_v22, %v4795_v8  ;;  %v4803_v33 = vor.u32 %v4802_v18, %v4801_v25 }
 0x64e   : > { %v2372_v26 = vmul.f32 %v2371_v52, %v2367_v1  ;;  %v2379_v27 = vmul.f32 %v2378_v28, %v2367_v1  ;;  %v2499_v62 = vsel %vm2497_vm7, %v2498_v12, %v9884_v19  ;;  %v4788_v1 = vshrl.u32 %v10209_v46, %v4787_v7 }
 0x64f   : > { %v2500_v38 = vclz %v2499_v62  ;;  %vm4938_vm6 = vcmp.gt.s32.totalorder %v9893_v32, 0  ;;  %vm9920_vm14 = vcmp.le.f32.partialorder %v2394_v48, 0.7853982  ;;  %vm4804_vm11 = vcmp.lt.s32.totalorder %v9900_v10, 1 }
 0x650   : > { %v2373_v37 = vadd.f32 1.0, %v2372_v26  ;;  %v2380_v56 = vadd.f32 1.0, %v2379_v27  ;;  %vm4805_vm12 = vcmp.lt.s32.totalorder %v9900_v10, 2  ;;  %vm4806_vm13 = vcmp.lt.s32.totalorder %v9900_v10, 3 }
 0x651   : > { %v5871_v60 = vadd.s32 4294967294, %v2500_v38  ;;  %vm4807_vm2 = vcmp.lt.s32.totalorder %v9900_v10, 4  ;;  %v4812_v55 = vsel %vm4804_vm11, %v4791_v30, %v4794_v61  ;;  %v4816_v49 = vsel %vm4804_vm11, %v4794_v61, %v4797_v2 }
 0x652   : > { %v2381_v14 = vmul.f32 %v2380_v56, %v2365_v50  ;;  %v2390_v11 = vxor.u32 2147483648, %v2373_v37  ;;  %v4813_v9 = vsel %vm4807_vm2, %v4800_v40, 920167782  ;;  %v4809_v28 = vsel %vm4807_vm2, %v4797_v2, 2102212464 }
 0x653   : > { %vm5872_vm10 = vcmp.lt.s32.totalorder %v5871_v60, 0  ;;  %v4814_v12 = vsel %vm4806_vm13, %v4797_v2, %v4813_v9  ;;  %v2519_v42 = vsel %vm2396_vm5, %v2518_v20, %v9877_v13  ;;  %v4808_v38 = vsel %vm4804_vm11, %v4788_v1, %v4791_v30 }
 0x654   : > { %v2387_v63 = vxor.u32 2147483648, %v2381_v14  ;;  %v2503_v54 = vsel %vm5872_vm10, 0, %v5871_v60  ;;  %v2391_v48 = vsel %vm2389_vm4, %v2390_v11, %v2381_v14  ;;  %v4815_v29 = vsel %vm4805_vm12, %v4812_v55, %v4814_v12 }
 0x655   : > { %v2504_v50 = vsub.s32 32, %v2503_v54  ;;  %v2508_v45 = vsub.s32 4294967266, %v2503_v54  ;;  %v2505_v7 = vshll.u32 %v9884_v19, %v2503_v54  ;;  %v4817_v19 = vsel %vm4807_vm2, %v4803_v33, 1326507024 }
 0x656   : > { %v2388_v5 = vsel %vm2386_vm1, %v2373_v37, %v2387_v63  ;;  %v4845_v27 = vand.u32 65535, %v4815_v29  ;;  %v4846_v62 = vshrl.u32 %v4815_v29, 16  ;;  %v4810_v44 = vsel %vm4806_vm13, %v4794_v61, %v4809_v28 }
 0x657   : > { %v2392_v39 = vsel %vm2385_vm8, %v2388_v5, %v2391_v48  ;;  %v2506_v24 = vshrl.u32 %v2488_v4, %v2504_v50  ;;  %v2509_v0 = vadd.s32 127, %v2508_v45  ;;  %v4818_v4 = vsel %vm4806_vm13, %v4800_v40, %v4817_v19 }
 0x658   : > { %v2393_v52 = vsel %vm2382_vm9, nan, %v2392_v39  ;;  %v4819_v22 = vsel %vm4805_vm12, %v4816_v49, %v4818_v4  ;;  %v4848_v56 = vmul.u32 %v4846_v62, %v9888_v35  ;;  %v9966_v13 = vand.u32 8388607, %v4927_v21 }
 0x659   : > { %v2507_v23 = vor.u32 %v2506_v24, %v2505_v7  ;;  %v2510_v26 = vshll.u32 %v2509_v0, 23  ;;  %3179 = vst [vmem:[%s6771_s17 + $0x50] sm:$0xff] %v2393_v52  ;;  %v4823_v57 = vand.u32 65535, %v4819_v22  ;;  %v4824_v37 = vshrl.u32 %v4819_v22, 16 }
 0x65a   : > { %v2521_v18 = vsel %vm9920_vm14, 0, %v2519_v42  ;;  %v4849_v60 = vmul.u32 %v4845_v27, %v9891_v16  ;;  %v9973_v30 = vsel %vm4805_vm12, %v4808_v38, %v4810_v44  ;;  %v4939_v14 = vsel %vm4938_vm6, %v9893_v32, 0 }
 0x65b   : > { %v2511_v3 = vor.u32 4788187, %v2510_v26  ;;  %v2514_v53 = vcvt.s32.f32 %v2507_v23  ;;  %v4826_v8 = vmul.u32 %v4824_v37, %v9888_v35  ;;  %v4827_v25 = vmul.u32 %v4823_v57, %v9891_v16 }
 0x65c   : > { %v4847_v61 = vmul.u32 %v4845_v27, %v9888_v35  ;;  %v4850_v40 = vmul.u32 %v4846_v62, %v9891_v16  ;;  %v4851_v1 = vshll.u32 %v4848_v56, 16  ;;  %v4825_v2 = vmul.u32 %v4823_v57, %v9888_v35 }
 0x65d   : > { %v2512_v20 = vand.u32 2147483647, %v2511_v3  ;;  %v4828_v10 = vmul.u32 %v4824_v37, %v9891_v16  ;;  %v4829_v33 = vshll.u32 %v4826_v8, 16  ;;  %v4853_v63 = vshll.u32 %v4849_v60, 16 }
 0x65e   : > { %v4831_v50 = vshll.u32 %v4827_v25, 16  ;;  %vm4855_vm0 = vc.u32 %v4847_v61, %v4851_v1  ;;  %v4857_v45 = vadd.s32 %v4851_v1, %v4847_v61  ;;  %v4941_v48 = vand.u32 31, %v4939_v14 }
 0x65f   : > { %v2515_v11 = vmul.f32 %v2514_v53, %v2512_v20  ;;  %vm4833_vm15 = vc.u32 %v4825_v2, %v4829_v33  ;;  %v4835_v5 = vadd.s32 %v4829_v33, %v4825_v2  ;;  %v4856_v32 = vsel %vm4855_vm0, 1, %v10213_v58 }
 0x660   : > { %v4834_v9 = vsel %vm4833_vm15, 1, %v10213_v58  ;;  %v4858_v39 = vadd.s32 %v4856_v32, %v4850_v40  ;;  %vm4859_vm3 = vc.u32 %v4857_v45, %v4853_v63  ;;  %v4852_v52 = vshrl.u32 %v4848_v56, 16 }
 0x661   : > { %v2516_v54 = vxor.u32 2147483648, %v2515_v11  ;;  %v4836_v16 = vadd.s32 %v4834_v9, %v4828_v10  ;;  %vm4837_vm7 = vc.u32 %v4835_v5, %v4831_v50  ;;  %v4860_v7 = vsel %vm4859_vm3, 1, %v10213_v58 }
 0x662   : > { %v4838_v0 = vsel %vm4837_vm7, 1, %v10213_v58  ;;  %v4862_v28 = vadd.s32 %v4860_v7, %v4858_v39  ;;  %v2538_v12 = vadd.s32 3, %v2521_v18  ;;  %v4830_v49 = vshrl.u32 %v4826_v8, 16 }
 0x663   : > { %v2517_v55 = vsel %vm2396_vm5, %v2516_v54, %v2515_v11  ;;  %v4840_v23 = vadd.s32 %v4838_v0, %v4836_v16  ;;  %v9993_v26 = vsub.s32 32, %v4941_v48  ;;  %v4854_v42 = vshrl.u32 %v4849_v60, 16 }
 0x664   : > { %v2520_v35 = vsel %vm9920_vm14, %v9648_v47, %v2517_v55  ;;  %v4863_v4 = vadd.s32 %v4862_v28, %v4852_v52  ;;  %v4832_v51 = vshrl.u32 %v4827_v25, 16  ;;  %v4865_v62 = vmul.u32 %v9879_v34, %v9973_v30 }
 0x665   : > { %v2522_v24 = vmul.f32 %v2520_v35, %v2520_v35  ;;  %v4841_v27 = vadd.s32 %v4840_v23, %v4830_v49  ;;  %v9997_v3 = vshrl.u32 %v4939_v14, 5  ;;  %v9999_v22 = vadd.s32 %v4857_v45, %v4853_v63 }
 0x666   : > { %v4864_v57 = vadd.s32 %v4863_v4, %v4854_v42  ;;  %v4947_v56 = vshll.u32 %v10205_v41, %v4941_v48  ;;  %v4948_v20 = vshrl.u32 %v10204_v6, %v9993_v26  ;;  %v4950_v53 = vshll.u32 %v10204_v6, %v4941_v48 }
 0x667   : > { %v2523_v29 = vmul.f32 -0.001358992, %v2522_v24  ;;  %v2530_v19 = vmul.f32 -0.00019511016, %v2522_v24  ;;  %v10001_v37 = vadd.s32 %v4841_v27, %v4832_v51  ;;  %v4951_v34 = vshrl.u32 %v10197_v15, %v9993_v26 }
 0x668   : > { %v4868_v8 = vadd.s32 1, %v4864_v57  ;;  %v4945_v30 = vshrl.u32 %v10205_v41, %v9993_v26  ;;  %v4953_v25 = vshll.u32 %v10197_v15, %v4941_v48  ;;  %v4954_v14 = vshrl.u32 %v10191_v59, %v9993_v26 }
 0x669   : > { %v2524_v38 = vadd.f32 0.041655596, %v2523_v29  ;;  %v2531_v44 = vadd.f32 0.008332121, %v2530_v19  ;;  %vm4867_vm1 = vc.u32 %v10001_v37, %v9999_v22  ;;  %v4957_v40 = vshrl.u32 %v10192_v17, %v9993_v26 }
 0x66a   : > { %v4869_v6 = vsel %vm4867_vm1, %v4868_v8, %v4864_v57  ;;  %v4944_v2 = vshll.u32 %v10209_v46, %v4941_v48  ;;  %v4955_v10 = vor.u32 %v4954_v14, %v4953_v25  ;;  %v4956_v33 = vshll.u32 %v10191_v59, %v4941_v48 }
 0x66b   : > { %v2525_v18 = vmul.f32 %v2524_v38, %v2522_v24  ;;  %v2532_v60 = vmul.f32 %v2531_v44, %v2522_v24  ;;  %v4870_v1 = vadd.s32 %v4869_v6, %v4865_v62  ;;  %v10020_v41 = vor.u32 %v4948_v20, %v4947_v56 }
 0x66c   : > { %v4952_v15 = vor.u32 %v4951_v34, %v4950_v53  ;;  %v10022_v45 = vor.u32 %v4945_v30, %v4944_v2  ;;  %v4958_v5 = vor.u32 %v4957_v40, %v4956_v33  ;;  %vm4962_vm4 = vcmp.lt.s32.totalorder %v9997_v3, 4 }
 0x66d   : > { %v2526_v11 = vadd.f32 -0.4999988, %v2525_v18  ;;  %v2533_v61 = vadd.f32 -0.16666654, %v2532_v60  ;;  %v4871_v50 = vadd.s32 536870912, %v4870_v1  ;;  %v4935_v17 = vor.u32 8388608, %v9966_v13 }
 0x66e   : > { %v4968_v9 = vsel %vm4962_vm4, %v4955_v10, 920167782  ;;  %vm2537_vm8 = vweird.f32 %v9648_v47  ;;  %v2539_v59 = vand.u32 3, %v2538_v12  ;;  %vm4959_vm9 = vcmp.lt.s32.totalorder %v9997_v3, 1 }
 0x66f   : > { %v2527_v63 = vmul.f32 %v2526_v11, %v2522_v24  ;;  %v2534_v54 = vmul.f32 %v2533_v61, %v2522_v24  ;;  %v10029_v48 = vshrl.u32 %v4871_v50, 30  ;;  %vm4961_vm5 = vcmp.lt.s32.totalorder %v9997_v3, 3 }
 0x670   : > { %v4971_v7 = vsel %vm4959_vm9, %v10020_v41, %v4952_v15  ;;  %v4967_v24 = vsel %vm4959_vm9, %v10022_v45, %v10020_v41  ;;  %v4969_v0 = vsel %vm4961_vm5, %v4952_v15, %v4968_v9  ;;  %vm4960_vm10 = vcmp.lt.s32.totalorder %v9997_v3, 2 }
 0x671   : > { %v2528_v32 = vadd.f32 1.0, %v2527_v63  ;;  %v2535_v55 = vadd.f32 1.0, %v2534_v54  ;;  %v4873_v13 = vshll.u32 %v10029_v48, 30  ;;  %v10048_v12 = vshll.u32 %v4935_v17, 8 }
 0x672   : > { %vm2541_vm6 = vcmp.eq.s32.totalorder %v2539_v59, 0  ;;  %vm2544_vm14 = vcmp.eq.s32.totalorder %v2539_v59, 2  ;;  %vm2540_vm11 = vcmp.lt.s32.totalorder %v2539_v59, 2  ;;  %v4970_v42 = vsel %vm4960_vm10, %v4967_v24, %v4969_v0 }
 0x673   : > { %v2536_v39 = vmul.f32 %v2535_v55, %v2520_v35  ;;  %v2545_v16 = vxor.u32 2147483648, %v2528_v32  ;;  %v4972_v35 = vsel %vm4962_vm4, %v4958_v5, 1326507024  ;;  %v4874_v49 = vsub.s32 %v4870_v1, %v4873_v13 }
 0x674   : > { %v4973_v28 = vsel %vm4961_vm5, %v4955_v10, %v4972_v35  ;;  %v4976_v38 = vand.u32 65535, %v10048_v12  ;;  %v4977_v56 = vshrl.u32 %v10048_v12, 16  ;;  %v5000_v20 = vand.u32 65535, %v4970_v42 }
 0x675   : > { %v2542_v52 = vxor.u32 2147483648, %v2536_v39  ;;  %v4974_v23 = vsel %vm4960_vm10, %v4971_v7, %v4973_v28  ;;  %v2546_v19 = vsel %vm2544_vm14, %v2545_v16, %v2536_v39  ;;  %vm4875_vm12 = vcmp.lt.s32.totalorder %v4874_v49, 0 }
 0x676   : > { %v4876_v51 = vsub.s32 0, %v4874_v49  ;;  %v4978_v27 = vand.u32 65535, %v4974_v23  ;;  %v4979_v44 = vshrl.u32 %v4974_v23, 16  ;;  %v5001_v53 = vshrl.u32 %v4970_v42, 16 }
 0x677   : > { %v2543_v29 = vsel %vm2541_vm6, %v2528_v32, %v2542_v52  ;;  %v4866_v8 = vadd.s32 %v9999_v22, %v10001_v37  ;;  %v4964_v11 = vsel %vm4962_vm4, %v4952_v15, 2102212464  ;;  %v5002_v6 = vmul.u32 %v5000_v20, %v4976_v38 }
 0x678   : > { %v2547_v4 = vsel %vm2540_vm11, %v2543_v29, %v2546_v19  ;;  %v4877_v57 = vsel %vm4875_vm12, %v4876_v51, %v4874_v49  ;;  %v4981_v60 = vmul.u32 %v4979_v44, %v4976_v38  ;;  %v4982_v34 = vmul.u32 %v4978_v27, %v4977_v56 }
 0x679   : > { %v2548_v62 = vsel %vm2537_vm8, nan, %v2547_v4  ;;  %v4878_v18 = vclz %v4877_v57  ;;  %v4980_v25 = vmul.u32 %v4978_v27, %v4976_v38  ;;  %v5003_v47 = vmul.u32 %v5001_v53, %v4976_v38 }
 0x67a   : > { %3180 = vst [vmem:[%s6771_s17 + $0x58] sm:$0xff] %v2548_v62  ;;  %v4984_v14 = vshll.u32 %v4981_v60, 16  ;;  %v4983_v61 = vmul.u32 %v4979_v44, %v4977_v56  ;;  %v5004_v40 = vmul.u32 %v5000_v20, %v4977_v56  ;;  %v4986_v33 = vshll.u32 %v4982_v34, 16 }
 0x67b   : > { %v5916_v30 = vadd.s32 4294967294, %v4878_v18  ;;  %v5006_v2 = vshll.u32 %v5003_v47, 16  ;;  %v5005_v22 = vmul.u32 %v5001_v53, %v4977_v56  ;;  %v4985_v39 = vshrl.u32 %v4981_v60, 16 }
 0x67c   : > { %vm4988_vm2 = vc.u32 %v4980_v25, %v4984_v14  ;;  %v4990_v1 = vadd.s32 %v4984_v14, %v4980_v25  ;;  %v5008_v5 = vshll.u32 %v5004_v40, 16  ;;  %v4943_v0 = vshrl.u32 %v10209_v46, %v9993_v26 }
 0x67d   : > { %vm5917_vm13 = vcmp.lt.s32.totalorder %v5916_v30, 0  ;;  %v4989_v63 = vsel %vm4988_vm2, 1, %v10213_v58  ;;  %vm5010_vm15 = vc.u32 %v5002_v6, %v5006_v2  ;;  %v5012_v15 = vadd.s32 %v5006_v2, %v5002_v6 }
 0x67e   : > { %v4881_v10 = vsel %vm5917_vm13, 0, %v5916_v30  ;;  %v4991_v50 = vadd.s32 %v4989_v63, %v4983_v61  ;;  %vm4992_vm0 = vc.u32 %v4990_v1, %v4986_v33  ;;  %v5011_v59 = vsel %vm5010_vm15, 1, %v10213_v58 }
 0x67f   : > { %v4882_v37 = vsub.s32 32, %v4881_v10  ;;  %v4886_v54 = vsub.s32 4294967266, %v4881_v10  ;;  %v4883_v32 = vshll.u32 %v4874_v49, %v4881_v10  ;;  %v4993_v9 = vsel %vm4992_vm0, 1, %v10213_v58 }
 0x680   : > { %v4995_v16 = vadd.s32 %v4993_v9, %v4991_v50  ;;  %v5013_v7 = vadd.s32 %v5011_v59, %v5005_v22  ;;  %vm5014_vm3 = vc.u32 %v5012_v15, %v5008_v5  ;;  %v4987_v52 = vshrl.u32 %v4982_v34, 16 }
 0x681   : > { %v4884_v55 = vshrl.u32 %v4866_v8, %v4882_v37  ;;  %v4887_v17 = vadd.s32 127, %v4886_v54  ;;  %v5015_v35 = vsel %vm5014_vm3, 1, %v10213_v58  ;;  %v5007_v49 = vshrl.u32 %v5003_v47, 16 }
 0x682   : > { %v4996_v28 = vadd.s32 %v4995_v16, %v4985_v39  ;;  %v5017_v23 = vadd.s32 %v5015_v35, %v5013_v7  ;;  %v4963_v19 = vsel %vm4959_vm9, %v4943_v0, %v10022_v45  ;;  %v4965_v42 = vsel %vm4961_vm5, %v10020_v41, %v4964_v11 }
 0x683   : > { %v4885_v13 = vor.u32 %v4884_v55, %v4883_v32  ;;  %v4888_v24 = vshll.u32 %v4887_v17, 23  ;;  %v5009_v51 = vshrl.u32 %v5004_v40, 16  ;;  %v5016_v26 = vadd.s32 %v5012_v15, %v5008_v5 }
 0x684   : > { %v4997_v4 = vadd.s32 %v4996_v28, %v4987_v52  ;;  %v5018_v27 = vadd.s32 %v5017_v23, %v5007_v49  ;;  %v4966_v58 = vsel %vm4960_vm10, %v4963_v19, %v4965_v42  ;;  %vm4774_vm1 = vcmp.lt.s32.totalorder %v9855_v43, 0 }
 0x685   : > { %v4889_v29 = vor.u32 4788187, %v4888_v24  ;;  %v4892_v46 = vcvt.s32.f32 %v4885_v13  ;;  %v5020_v45 = vmul.u32 %v10048_v12, %v4966_v58  ;;  %v4896_v41 = vsub.s32 4, %v10029_v48 }
 0x686   : > { %v5019_v38 = vadd.s32 %v5018_v27, %v5009_v51  ;;  %vm5022_vm7 = vc.u32 %v4997_v4, %v5016_v26  ;;  %vm10082_vm4 = vcmp.le.f32.partialorder %v4772_v36, 0.7853982  ;;  %v5021_v39 = vadd.s32 %v5016_v26, %v4997_v4 }
 0x687   : > { %v4890_v62 = vand.u32 2147483647, %v4889_v29  ;;  %v4897_v12 = vsel %vm4774_vm1, %v4896_v41, %v10029_v48  ;;  %vm4915_vm6 = vweird.f32 %v9855_v43  ;;  %vm4929_vm11 = vcmp.lt.s32.totalorder %v9862_v31, 0 }
 0x688   : > { %v5023_v57 = vadd.s32 1, %v5019_v38  ;;  %v4899_v47 = vsel %vm10082_vm4, 0, %v4897_v12  ;;  %vm4928_vm12 = vcmp.le.f32.partialorder %v4927_v21, 0.7853982  ;;  %vm5070_vm15 = vweird.f32 %v9862_v31 }
 0x689   : > { %v4893_v44 = vmul.f32 %v4892_v46, %v4890_v62  ;;  %v4916_v2 = vadd.s32 3, %v4899_v47 }
 0x68a   : > { %v5024_v20 = vsel %vm5022_vm7, %v5023_v57, %v5019_v38 }
 0x68b   : > { %v4894_v56 = vxor.u32 2147483648, %v4893_v44  ;;  %v5025_v18 = vadd.s32 %v5024_v20, %v5020_v45  ;;  %v4917_v32 = vand.u32 3, %v4916_v2 }
 0x68d   : > { %v4895_v3 = vsel %vm4774_vm1, %v4894_v56, %v4893_v44  ;;  %v5026_v34 = vadd.s32 536870912, %v5025_v18  ;;  %vm4919_vm5 = vcmp.eq.s32.totalorder %v4917_v32, 0  ;;  %vm4922_vm10 = vcmp.eq.s32.totalorder %v4917_v32, 2 }
 0x68e   : > { %v4898_v60 = vsel %vm10082_vm4, %v9855_v43, %v4895_v3  ;;  %vm4918_vm14 = vcmp.lt.s32.totalorder %v4917_v32, 2 }
 0x68f   : > { %v4900_v8 = vmul.f32 %v4898_v60, %v4898_v60  ;;  %v5027_v14 = vshrl.u32 %v5026_v34, 30 }
 0x691   : > { %v4901_v30 = vmul.f32 -0.001358992, %v4900_v8  ;;  %v4908_v25 = vmul.f32 -0.00019511016, %v4900_v8  ;;  %v5028_v61 = vshll.u32 %v5027_v14, 30  ;;  %v5051_v62 = vsub.s32 4, %v5027_v14 }
 0x693   : > { %v4902_v36 = vadd.f32 0.041655596, %v4901_v30  ;;  %v4909_v11 = vadd.f32 0.008332121, %v4908_v25  ;;  %v5029_v1 = vsub.s32 %v5025_v18, %v5028_v61  ;;  %v5052_v44 = vsel %vm4929_vm11, %v5051_v62, %v5027_v14 }
 0x694   : > { %v5054_v45 = vsel %vm4928_vm12, 0, %v5052_v44 }
 0x695   : > { %v4903_v6 = vmul.f32 %v4902_v36, %v4900_v8  ;;  %v4910_v40 = vmul.f32 %v4909_v11, %v4900_v8  ;;  %vm5030_vm8 = vcmp.lt.s32.totalorder %v5029_v1, 0  ;;  %v5031_v63 = vsub.s32 0, %v5029_v1 }
 0x696   : > { %v5071_v18 = vadd.s32 3, %v5054_v45 }
 0x697   : > { %v4904_v10 = vadd.f32 -0.4999988, %v4903_v6  ;;  %v4911_v33 = vadd.f32 -0.16666654, %v4910_v40  ;;  %v5032_v48 = vsel %vm5030_vm8, %v5031_v63, %v5029_v1 }
 0x698   : > { %v5033_v54 = vclz %v5032_v48  ;;  %v5072_v12 = vand.u32 3, %v5071_v18 }
 0x699   : > { %v4905_v22 = vmul.f32 %v4904_v10, %v4900_v8  ;;  %v4912_v37 = vmul.f32 %v4911_v33, %v4900_v8 }
 0x69a   : > { %v5919_v15 = vadd.s32 4294967294, %v5033_v54  ;;  %vm5074_vm13 = vcmp.eq.s32.totalorder %v5072_v12, 0  ;;  %vm5077_vm2 = vcmp.eq.s32.totalorder %v5072_v12, 2  ;;  %vm5073_vm0 = vcmp.lt.s32.totalorder %v5072_v12, 2 }
 0x69b   : > { %v4906_v50 = vadd.f32 1.0, %v4905_v22  ;;  %v4913_v5 = vadd.f32 1.0, %v4912_v37 }
 0x69c   : > { %vm5920_vm9 = vcmp.lt.s32.totalorder %v5919_v15, 0 }
 0x69d   : > { %v4914_v55 = vmul.f32 %v4913_v5, %v4898_v60  ;;  %v4923_v17 = vxor.u32 2147483648, %v4906_v50  ;;  %v5036_v59 = vsel %vm5920_vm9, 0, %v5919_v15 }
 0x69e   : > { %v5037_v16 = vsub.s32 32, %v5036_v59  ;;  %v5041_v7 = vsub.s32 4294967266, %v5036_v59  ;;  %v5038_v35 = vshll.u32 %v5029_v1, %v5036_v59 }
 0x69f   : > { %v4920_v9 = vxor.u32 2147483648, %v4914_v55  ;;  %v4924_v24 = vsel %vm4922_vm10, %v4923_v17, %v4914_v55 }
 0x6a0   : > { %v5039_v52 = vshrl.u32 %v5021_v39, %v5037_v16  ;;  %v5042_v28 = vadd.s32 127, %v5041_v7 }
 0x6a1   : > { %v4921_v13 = vsel %vm4919_vm5, %v4906_v50, %v4920_v9 }
 0x6a2   : > { %v4925_v0 = vsel %vm4918_vm14, %v4921_v13, %v4924_v24  ;;  %v5040_v23 = vor.u32 %v5039_v52, %v5038_v35  ;;  %v5043_v29 = vshll.u32 %v5042_v28, 23 }
 0x6a3   : > { %v4926_v49 = vsel %vm4915_vm6, nan, %v4925_v0 }
 0x6a4   : > { %5712 = vst [vmem:[%s6771_s17 + $0xd0] sm:$0xff] %v4926_v49  ;;  %v5044_v19 = vor.u32 4788187, %v5043_v29  ;;  %v5047_v51 = vcvt.s32.f32 %v5040_v23 }
 0x6a6   : > { %v5045_v42 = vand.u32 2147483647, %v5044_v19 }
 0x6a8   : > { %v5048_v27 = vmul.f32 %v5047_v51, %v5045_v42 }
 0x6aa   : > { %v5049_v4 = vxor.u32 2147483648, %v5048_v27 }
 0x6ac   : > { %v5050_v43 = vsel %vm4929_vm11, %v5049_v4, %v5048_v27 }
 0x6ad   : > { %v5053_v46 = vsel %vm4928_vm12, %v9862_v31, %v5050_v43 }
 0x6ae   : > { %v5055_v26 = vmul.f32 %v5053_v46, %v5053_v46 }
 0x6b0   : > { %v5056_v58 = vmul.f32 -0.001358992, %v5055_v26  ;;  %v5063_v38 = vmul.f32 -0.00019511016, %v5055_v26 }
 0x6b2   : > { %v5057_v57 = vadd.f32 0.041655596, %v5056_v58  ;;  %v5064_v56 = vadd.f32 0.008332121, %v5063_v38 }
 0x6b4   : > { %v5058_v41 = vmul.f32 %v5057_v57, %v5055_v26  ;;  %v5065_v20 = vmul.f32 %v5064_v56, %v5055_v26 }
 0x6b6   : > { %v5059_v53 = vadd.f32 -0.4999988, %v5058_v41  ;;  %v5066_v3 = vadd.f32 -0.16666654, %v5065_v20 }
 0x6b8   : > { %v5060_v60 = vmul.f32 %v5059_v53, %v5055_v26  ;;  %v5067_v21 = vmul.f32 %v5066_v3, %v5055_v26 }
 0x6ba   : > { %v5061_v8 = vadd.f32 1.0, %v5060_v60  ;;  %v5068_v34 = vadd.f32 1.0, %v5067_v21 }
 0x6bc   : > { %v5069_v30 = vmul.f32 %v5068_v34, %v5053_v46  ;;  %v5078_v25 = vxor.u32 2147483648, %v5061_v8 }
 0x6be   : > { %v5075_v14 = vxor.u32 2147483648, %v5069_v30  ;;  %v5079_v36 = vsel %vm5077_vm2, %v5078_v25, %v5069_v30 }
 0x6c0   : > { %v5076_v47 = vsel %vm5074_vm13, %v5061_v8, %v5075_v14 }
 0x6c1   : > { %v5080_v11 = vsel %vm5073_vm0, %v5076_v47, %v5079_v36 }
 0x6c2   : > { %v5081_v61 = vsel %vm5070_vm15, nan, %v5080_v11 }
 0x6c3   : > { %5713 = vst [vmem:[%s6771_s17 + $0xd8] sm:$0xff] %v5081_v61 }
 0x6c4   : > { %6044 = shalt.err (!%p6041_p5)
}
 0x6c5   : > { %s6111_s15 = smov 256  }
 0x6c6   : > { %5944 = dma.vmem_to_hbm [thread:$0]  (%p6182_p4), %s5734_s7, 4096, %s5736_s8, %s5719_s21, %s6111_s15, %s6111_s15, %s6098_s10  }
 0x6c7 PF: > { %p5950_p6 = scmp.ge.s32.totalorder %s6095_s23, 2  ;;  %s5750_s17 = sand.u32 1, %s6075_s18  }
 0x6c8   : > { %s5751_s25 = scalar_lea.sflag [#allocation5], %s5750_s17 }
 0x6c9   : > { %p5947_p7 = pnand %p5950_p6, %p6189_p8 }
 0x6cb   : > { %p5948_p9 = pneg %p5947_p7 }
 0x6cd   : > { %6070 = dma.done.wait (%p5948_p9), %s5751_s25, 4096  }
 0x6ce   : > { %6072 = vsyncadd (%p5948_p9), %s5751_s25, 4294963200  ;;  %s18_s23 = sadd.s32 1, %s6095_s23   ;;  %s10248_s18 = smov %s6079_s19 }
 0x6cf   : > { %p15_p10 = scmp.ge.s32.totalorder %s18_s23, 4   ;;  %s10249_s19 = smov %s6083_s20 }
 0x6d0   : > { %s10250_s20 = smov %s6195_s6  ;;  %s10251_s21 = smov %s6091_s22 }
 0x6d1   : > { %s10252_s22 = smov %s10254_s26  ;;  %17 = sbr.rel (!%p15_p10) target bundleno = 4 (0x4), region = 106 }
 0x6d6   :  { %5757 = vsyncpa [#allocation5], 1 }
 0x6d7   :  { %5759 = vsyncpa [#allocation5 + $0x1], 1 }

</bundles_post_ra>
